<compile_context>
chip_gen: v7x
topology: tpu7x:2x2x1
jax: 0.10.0
libtpu: 0.0.40
codegen_flags: <defaults>
</compile_context>

<pallas_src>
import functools
import numpy as np
import jax
import jax.numpy as jnp
from jax.experimental import pallas as pl
from jax.experimental.pallas import tpu as pltpu


def _round_up(x, m):
    return ((x + m - 1) // m) * m


def _cdiv(a, b):
    return (a + b - 1) // b


# ----------------------------------------------------------------------------
# Kernel 1: fused 1x1 conv (+ in-VMEM nearest-upsample of pooled groups)
#           + folded BatchNorm + Mish
# ----------------------------------------------------------------------------
def _make_conv_bn_mish_kernel(n_pool, kcat):
    """refs: x, pooled_0..{n_pool-1}, sel_0..{n_pool-1}, w (1 or 1+n_pool), scale, bias, out."""
    n_w = 1 if (kcat or n_pool == 0) else n_pool + 1

    def kernel(*refs):
        i = 0
        x_ref = refs[i]; i += 1                       # (1, TM, Cd)      bf16
        pooled_refs = refs[i:i + n_pool]; i += n_pool  # (1, Pg, c_hid)   bf16 (whole map)
        sel_refs = refs[i:i + n_pool]; i += n_pool     # (TM, 1)          int32
        w_refs = refs[i:i + n_w]; i += n_w             # (Cg, Cout)       bf16
        scale_ref = refs[i]; i += 1                    # (1, Cout)        f32
        bias_ref = refs[i]; i += 1                     # (1, Cout)        f32
        o_ref = refs[i]                                # (1, TM, Cout)

        tm = x_ref.shape[1]
        pieces = [x_ref[0]]                            # (TM, Cd)
        for g in range(n_pool):
            p = pooled_refs[g].shape[1]                # pooled spatial size Hg*Wg
            sel = sel_refs[g][...]                     # (TM, 1) nearest source index
            pos = jax.lax.broadcasted_iota(jnp.int32, (tm, p), 1)
            onehot = (pos == sel).astype(jnp.bfloat16)  # (TM, P) exact row selector
            # nearest-neighbour upsample as an MXU matmul: the upsampled feature is built
            # in VMEM/vregs only and never exists in HBM.
            up = jnp.dot(onehot, pooled_refs[g][0],
                         preferred_element_type=jnp.float32)
            pieces.append(up.astype(jnp.bfloat16))

        if n_w == 1 and n_pool > 0:
            # lane-aligned groups: concat along K in VMEM -> one MXU pass with K = c_cat
            x_cat = jnp.concatenate(pieces, axis=-1)
            acc = jnp.dot(x_cat, w_refs[0][...], preferred_element_type=jnp.float32)
        else:
            acc = jnp.dot(pieces[0], w_refs[0][...], preferred_element_type=jnp.float32)
            for g in range(1, len(pieces)):
                acc = acc + jnp.dot(pieces[g], w_refs[g][...],
                                    preferred_element_type=jnp.float32)

        y = acc * scale_ref[...] + bias_ref[...]       # folded BN, f32 epilogue

        # Mish(y) = y * tanh(softplus(y)) = y * (1 - 2 / ((1 + e^y)^2 + 1))
        # clamp: for y >= 25 the factor is exactly 1.0 in f32 and exp() cannot overflow.
        e = jnp.exp(jnp.minimum(y, 25.0))
        denom = (1.0 + e) * (1.0 + e) + 1.0
        r = pl.reciprocal(denom, approx=True)
        r = r * (2.0 - denom * r)                      # one Newton step -> ~f32 exact
        o_ref[0] = (y * (1.0 - 2.0 * r)).astype(o_ref.dtype)

    return kernel


def _pick_tm(hw, n_batch, *, target_steps=8, max_tm=1024, min_tm=128):
    """Row-tile size: aim for >= target_steps grid steps (megacore + DMA/compute overlap
    on v7x), cap at max_tm rows (VMEM), multiple of 8 for the (8,128) layout rule."""
    tiles_per_image = max(1, _cdiv(target_steps, max(n_batch, 1)))
    tm = _cdiv(hw, tiles_per_image)
    tm = max(min(tm, max_tm), min(min_tm, hw))
    tm = min(_round_up(tm, 8), _round_up(hw, 8))
    return tm


def conv_bn_mish(x, w, scale, bias, *, pooled=(), sels=(), out_dtype):
    """x: (N, HW, Cd). pooled[g]: (N, Pg, c_hid). sels[g]: (HW, 1) int32.

    Computes Mish(BN(concat([x] + [upsample(pooled_g)], ch) @ w)) without materializing
    either the upsampled features or the channel concat in HBM.
    """
    N, HW, Cd = x.shape
    Cout = w.shape[1]
    n_pool = len(pooled)
    widths = [Cd] + [p.shape[2] for p in pooled]
    assert w.shape[0] == sum(widths)

    # K-concat in VMEM only when every group is lane-aligned; otherwise per-group dots.
    kcat = n_pool > 0 and all(c % 128 == 0 for c in widths)

    TM = _pick_tm(HW, N)
    grid = (N, _cdiv(HW, TM))          # ragged last row block is masked by Pallas (no pad)

    ops = [x]
    in_specs = [pl.BlockSpec((1, TM, Cd), lambda n, t: (n, t, 0))]
    for g in range(n_pool):
        Pg, Cg = pooled[g].shape[1], pooled[g].shape[2]
        ops.append(pooled[g])
        # whole pooled map of batch n resident in VMEM (re-DMA'd only when n changes)
        in_specs.append(pl.BlockSpec((1, Pg, Cg), lambda n, t: (n, 0, 0)))
    for g in range(n_pool):
        ops.append(sels[g])
        in_specs.append(pl.BlockSpec((TM, 1), lambda n, t: (t, 0)))
    if kcat or n_pool == 0:
        w_list = [w]
    else:
        w_list, off = [], 0
        for c in widths:
            w_list.append(w[off:off + c])
            off += c
    for wg in w_list:
        ops.append(wg)
        in_specs.append(pl.BlockSpec(wg.shape, lambda n, t: (0, 0)))
    ops += [scale, bias]
    in_specs += [pl.BlockSpec((1, Cout), lambda n, t: (0, 0)),
                 pl.BlockSpec((1, Cout), lambda n, t: (0, 0))]

    return pl.pallas_call(
        _make_conv_bn_mish_kernel(n_pool, kcat),
        out_shape=jax.ShapeDtypeStruct((N, HW, Cout), out_dtype),
        grid=grid,
        in_specs=in_specs,
        out_specs=pl.BlockSpec((1, TM, Cout), lambda n, t: (n, t, 0)),
        compiler_params=pltpu.CompilerParams(
            dimension_semantics=("parallel", "parallel"),
            vmem_limit_bytes=32 * 1024 * 1024,   # leaves headroom on v7x (64 MiB total)
        ),
    )(*ops)


# ----------------------------------------------------------------------------
# Kernel 2: fused chain of stride-1 k x k max pools (padding=0), separable 1-D maxes
# ----------------------------------------------------------------------------
def _make_pool_chain_kernel(k, pool_repeats):
    def kernel(x_ref, *out_refs):
        src = x_ref[...]                              # (NB, H, W, TC) loaded once
        for r in range(pool_repeats):
            Hc, Wc = src.shape[1], src.shape[2]
            Ho, Wo = Hc - k + 1, Wc - k + 1
            rowmax = src[:, :, 0:Wo, :]               # 1-D max along W
            for dj in range(1, k):
                rowmax = jnp.maximum(rowmax, src[:, :, dj:dj + Wo, :])
            pooled = rowmax[:, 0:Ho]                  # 1-D max along H
            for di in range(1, k):
                pooled = jnp.maximum(pooled, rowmax[:, di:di + Ho])
            out_refs[r][...] = pooled.astype(out_refs[r].dtype)
            src = pooled                              # next level consumes this level
    return kernel


def pool_chain(x_nhwc, k, pool_repeats):
    """Returns [maxpool^1(x), ..., maxpool^R(x)] (kernel k, stride 1, no padding)."""
    N, H, W, C = x_nhwc.shape
    dsize = x_nhwc.dtype.itemsize
    # lane-dense channel tiles when possible.
    # TODO(synk): for tiny C (< 128) pack part of W into the lane dim to avoid masked
    #             partial stores; not done here.
    if C % 256 == 0:
        TC = 256
    elif C % 128 == 0:
        TC = 128
    else:
        TC = C
    # block several images per step when blocks are tiny (amortize ~0.35us per grid step)
    NB = N if N * H * W * TC * dsize <= (1 << 20) else 1

    out_shapes, out_specs = [], []
    Hr, Wr = H, W
    for _ in range(pool_repeats):
        Hr, Wr = Hr - k + 1, Wr - k + 1
        assert Hr >= 1 and Wr >= 1, "spatial dims too small for the pool chain"
        out_shapes.append(jax.ShapeDtypeStruct((N, Hr, Wr, C), x_nhwc.dtype))
        out_specs.append(pl.BlockSpec((NB, Hr, Wr, TC), lambda n, c: (n, 0, 0, c)))

    outs = pl.pallas_call(
        _make_pool_chain_kernel(k, pool_repeats),
        out_shape=tuple(out_shapes),
        grid=(N // NB, C // TC),
        in_specs=[pl.BlockSpec((NB, H, W, TC), lambda n, c: (n, 0, 0, c))],
        out_specs=tuple(out_specs),
        compiler_params=pltpu.CompilerParams(
            dimension_semantics=("parallel", "parallel"),
            vmem_limit_bytes=32 * 1024 * 1024),
    )(x_nhwc)
    return list(outs) if isinstance(outs, (tuple, list)) else [outs]


# ----------------------------------------------------------------------------
# Nearest-neighbor index helpers (PyTorch 'nearest' rule, float32 scale)
# ----------------------------------------------------------------------------
def _nearest_idx(out_size, in_size):
    s = np.float32(in_size) / np.float32(out_size)
    return np.minimum((np.arange(out_size, dtype=np.float32) * s).astype(np.int32),
                      in_size - 1)


def _nearest_sel(H, W, Hr, Wr):
    """(H*W, 1) int32: flattened pooled-map index selected by each full-res pixel."""
    ih = _nearest_idx(H, Hr)
    iw = _nearest_idx(W, Wr)
    sel = ih[:, None] * np.int32(Wr) + iw[None, :]
    return jnp.asarray(sel.reshape(H * W, 1).astype(np.int32))


def nearest_resize(x_nhwc, out_h, out_w):   # used by the pure-JAX reference only
    N, H, W, C = x_nhwc.shape
    return x_nhwc[:, _nearest_idx(out_h, H)][:, :, _nearest_idx(out_w, W)]


# ----------------------------------------------------------------------------
# Parameter construction (deterministic) with BN folded into scale/bias
# ----------------------------------------------------------------------------
def _fold_bn(gamma, beta, mean, var, eps=1e-5):
    scale = gamma / jnp.sqrt(var + eps)
    bias = beta - mean * scale
    return scale[None, :], bias[None, :]


def make_params(key, in_channels, pool_repeats):
    c_hid = in_channels // 2
    c_cat = c_hid * (pool_repeats + 1)
    ks = jax.random.split(key, 10)
    w1 = jax.random.normal(ks[0], (in_channels, c_hid), jnp.float32) * 0.3
    g1 = 1.0 + 0.1 * jax.random.normal(ks[1], (c_hid,), jnp.float32)
    b1 = 0.1 * jax.random.normal(ks[2], (c_hid,), jnp.float32)
    m1 = 0.1 * jax.random.normal(ks[3], (c_hid,), jnp.float32)
    v1 = jnp.abs(jax.random.normal(ks[4], (c_hid,), jnp.float32)) + 0.5
    scale1, bias1 = _fold_bn(g1, b1, m1, v1)
    w2 = jax.random.normal(ks[5], (c_cat, in_channels), jnp.float32) * 0.3
    g2 = 1.0 + 0.1 * jax.random.normal(ks[6], (in_channels,), jnp.float32)
    b2 = 0.1 * jax.random.normal(ks[7], (in_channels,), jnp.float32)
    m2 = 0.1 * jax.random.normal(ks[8], (in_channels,), jnp.float32)
    v2 = jnp.abs(jax.random.normal(ks[9], (in_channels,), jnp.float32)) + 0.5
    scale2, bias2 = _fold_bn(g2, b2, m2, v2)
    return dict(w1=w1, scale1=scale1, bias1=bias1,
                w2=w2, scale2=scale2, bias2=bias2)


# ----------------------------------------------------------------------------
# SPPFBlock forward (NCHW in / NCHW out, matching the PyTorch module)
# ----------------------------------------------------------------------------
def sppf_forward(x_nchw, params, pool_size, pool_repeats):
    N, C, H, W = x_nchw.shape
    HW = H * W
    c_hid = params["w1"].shape[1]

    # TODO(synk): the NCHW<->NHWC boundary transposes remain XLA glue.
    x = jnp.transpose(x_nchw, (0, 2, 3, 1)).reshape(N, HW, C).astype(jnp.bfloat16)

    # conv1: fused 1x1 conv + BN + Mish (bf16 MXU operands, f32 accumulate + epilogue)
    y = conv_bn_mish(x, params["w1"].astype(jnp.bfloat16),
                     params["scale1"], params["bias1"], out_dtype=jnp.bfloat16)

    # fused maxpool chain -> only the (small) pooled maps are written to HBM.
    # TODO(synk): conv1 + pool chain could be fused into one kernel to save one read of y.
    pooled_maps = (pool_chain(y.reshape(N, H, W, c_hid), pool_size, pool_repeats)
                   if pool_repeats > 0 else [])

    pooled2d, sels = [], []
    for p in pooled_maps:
        _, Hr, Wr, _ = p.shape
        pooled2d.append(p.reshape(N, Hr * Wr, c_hid))
        sels.append(_nearest_sel(H, W, Hr, Wr))

    # conv_out: nearest-upsample + channel concat + 1x1 conv + BN + Mish in ONE kernel;
    # the upsampled features and the concat never touch HBM.
    z = conv_bn_mish(y, params["w2"].astype(jnp.bfloat16),
                     params["scale2"], params["bias2"],
                     pooled=pooled2d, sels=sels, out_dtype=jnp.float32)
    return jnp.transpose(z.reshape(N, H, W, C), (0, 3, 1, 2))


# ----------------------------------------------------------------------------
# Pure-JAX f32 reference (mirrors the PyTorch module's forward) for correctness check
# ----------------------------------------------------------------------------
def sppf_reference(x_nchw, params, pool_size, pool_repeats):
    def conv_bn_mish_ref(x2d, w, scale, bias):
        y = (x2d @ w) * scale + bias
        return y * jnp.tanh(jax.nn.softplus(y))

    N, C, H, W = x_nchw.shape
    M = N * H * W
    k = pool_size
    x = jnp.transpose(x_nchw, (0, 2, 3, 1))
    y = conv_bn_mish_ref(x.reshape(M, C), params["w1"],
                         params["scale1"], params["bias1"]).reshape(N, H, W, -1)
    feats = [y]
    pool = y
    for _ in range(pool_repeats):
        Hc, Wc = pool.shape[1], pool.shape[2]
        Ho, Wo = Hc - k + 1, Wc - k + 1
        m = pool[:, 0:Ho, 0:Wo, :]
        for di in range(k):
            for dj in range(k):
                m = jnp.maximum(m, pool[:, di:di + Ho, dj:dj + Wo, :])
        pool = m
        feats.append(nearest_resize(pool, H, W))
    cat = jnp.concatenate(feats, axis=-1)
    z = conv_bn_mish_ref(cat.reshape(M, -1), params["w2"],
                         params["scale2"], params["bias2"]).reshape(N, H, W, C)
    return jnp.transpose(z, (0, 3, 1, 2))


if __name__ == "__main__":
    in_channels = 4
    pool_size = 5
    pool_repeats = 3
    N, H, W = 2, 16, 16          # pooled maps: 12, 8, 4; conv grids: (2, 2) row tiles

    key = jax.random.PRNGKey(0)
    k_x, k_p = jax.random.split(key)
    x = jax.random.normal(k_x, (N, in_channels, H, W), jnp.float32)
    params = make_params(k_p, in_channels, pool_repeats)

    fwd = jax.jit(functools.partial(sppf_forward, params=params,
                                    pool_size=pool_size, pool_repeats=pool_repeats))
    out = jax.block_until_ready(fwd(x))

    assert out.shape == (N, in_channels, H, W), out.shape
    assert bool(jnp.all(jnp.isfinite(out)))

    # correctness vs pure-JAX f32 reference (kernel uses bf16 MXU operands -> loose tol)
    ref = sppf_reference(x, params, pool_size, pool_repeats)
    assert bool(jnp.allclose(out, ref, rtol=5e-2, atol=5e-2)), \
        f"max abs err = {float(jnp.max(jnp.abs(out - ref)))}"
    print("KERNEL_OK")
</pallas_src>

<mosaic_0001>
module attributes {stable_mosaic.version = 11 : i64} {
  func.func @kernel(%arg0: i32, %arg1: i32, %arg2: memref<2x16x16x2xbf16, #tpu.memory_space<vmem>>, %arg3: memref<2x12x12x2xbf16, #tpu.memory_space<vmem>>, %arg4: memref<2x8x8x2xbf16, #tpu.memory_space<vmem>>, %arg5: memref<2x4x4x2xbf16, #tpu.memory_space<vmem>>) attributes {dimension_semantics = [#tpu.dimension_semantics<parallel>, #tpu.dimension_semantics<parallel>], iteration_bounds = array<i64: 1, 1>, scalar_prefetch = 0 : i64, scratch_operands = 0 : i64, tpu.core_type = #tpu.core_type<tc>, window_params = [{transform_indices = @transform_0, window_bounds = array<i64: 2, 16, 16, 2>}, {transform_indices = @transform_1, window_bounds = array<i64: 2, 12, 12, 2>}, {transform_indices = @transform_2, window_bounds = array<i64: 2, 8, 8, 2>}, {transform_indices = @transform_3, window_bounds = array<i64: 2, 4, 4, 2>}]} {
    %c0 = arith.constant 0 : index
    %c0_0 = arith.constant 0 : index
    %c0_1 = arith.constant 0 : index
    %c0_2 = arith.constant 0 : index
    %0 = vector.load %arg2[%c0, %c0_0, %c0_1, %c0_2] : memref<2x16x16x2xbf16, #tpu.memory_space<vmem>>, vector<2x16x16x2xbf16>
    %1 = vector.extract_strided_slice %0 {offsets = [0, 0, 0, 0], sizes = [2, 16, 12, 2], strides = [1, 1, 1, 1]} : vector<2x16x16x2xbf16> to vector<2x16x12x2xbf16>
    %2 = vector.extract_strided_slice %0 {offsets = [0, 0, 1, 0], sizes = [2, 16, 12, 2], strides = [1, 1, 1, 1]} : vector<2x16x16x2xbf16> to vector<2x16x12x2xbf16>
    %3 = arith.maximumf %1, %2 : vector<2x16x12x2xbf16>
    %4 = vector.extract_strided_slice %0 {offsets = [0, 0, 2, 0], sizes = [2, 16, 12, 2], strides = [1, 1, 1, 1]} : vector<2x16x16x2xbf16> to vector<2x16x12x2xbf16>
    %5 = arith.maximumf %3, %4 : vector<2x16x12x2xbf16>
    %6 = vector.extract_strided_slice %0 {offsets = [0, 0, 3, 0], sizes = [2, 16, 12, 2], strides = [1, 1, 1, 1]} : vector<2x16x16x2xbf16> to vector<2x16x12x2xbf16>
    %7 = arith.maximumf %5, %6 : vector<2x16x12x2xbf16>
    %8 = vector.extract_strided_slice %0 {offsets = [0, 0, 4, 0], sizes = [2, 16, 12, 2], strides = [1, 1, 1, 1]} : vector<2x16x16x2xbf16> to vector<2x16x12x2xbf16>
    %9 = arith.maximumf %7, %8 : vector<2x16x12x2xbf16>
    %10 = vector.extract_strided_slice %9 {offsets = [0, 0, 0, 0], sizes = [2, 12, 12, 2], strides = [1, 1, 1, 1]} : vector<2x16x12x2xbf16> to vector<2x12x12x2xbf16>
    %11 = vector.extract_strided_slice %9 {offsets = [0, 1, 0, 0], sizes = [2, 12, 12, 2], strides = [1, 1, 1, 1]} : vector<2x16x12x2xbf16> to vector<2x12x12x2xbf16>
    %12 = arith.maximumf %10, %11 : vector<2x12x12x2xbf16>
    %13 = vector.extract_strided_slice %9 {offsets = [0, 2, 0, 0], sizes = [2, 12, 12, 2], strides = [1, 1, 1, 1]} : vector<2x16x12x2xbf16> to vector<2x12x12x2xbf16>
    %14 = arith.maximumf %12, %13 : vector<2x12x12x2xbf16>
    %15 = vector.extract_strided_slice %9 {offsets = [0, 3, 0, 0], sizes = [2, 12, 12, 2], strides = [1, 1, 1, 1]} : vector<2x16x12x2xbf16> to vector<2x12x12x2xbf16>
    %16 = arith.maximumf %14, %15 : vector<2x12x12x2xbf16>
    %17 = vector.extract_strided_slice %9 {offsets = [0, 4, 0, 0], sizes = [2, 12, 12, 2], strides = [1, 1, 1, 1]} : vector<2x16x12x2xbf16> to vector<2x12x12x2xbf16>
    %18 = arith.maximumf %16, %17 : vector<2x12x12x2xbf16>
    %c0_3 = arith.constant 0 : index
    %c0_4 = arith.constant 0 : index
    %c0_5 = arith.constant 0 : index
    %c0_6 = arith.constant 0 : index
    %19 = vector.load %arg3[%c0_3, %c0_4, %c0_5, %c0_6] : memref<2x12x12x2xbf16, #tpu.memory_space<vmem>>, vector<2x12x12x2xbf16>
    tpu.vector_store %arg3[%c0_3, %c0_4, %c0_5, %c0_6], %18 {strides = array<i32>} : memref<2x12x12x2xbf16, #tpu.memory_space<vmem>>, vector<2x12x12x2xbf16>,
    %20 = vector.extract_strided_slice %18 {offsets = [0, 0, 0, 0], sizes = [2, 12, 8, 2], strides = [1, 1, 1, 1]} : vector<2x12x12x2xbf16> to vector<2x12x8x2xbf16>
    %21 = vector.extract_strided_slice %18 {offsets = [0, 0, 1, 0], sizes = [2, 12, 8, 2], strides = [1, 1, 1, 1]} : vector<2x12x12x2xbf16> to vector<2x12x8x2xbf16>
    %22 = arith.maximumf %20, %21 : vector<2x12x8x2xbf16>
    %23 = vector.extract_strided_slice %18 {offsets = [0, 0, 2, 0], sizes = [2, 12, 8, 2], strides = [1, 1, 1, 1]} : vector<2x12x12x2xbf16> to vector<2x12x8x2xbf16>
    %24 = arith.maximumf %22, %23 : vector<2x12x8x2xbf16>
    %25 = vector.extract_strided_slice %18 {offsets = [0, 0, 3, 0], sizes = [2, 12, 8, 2], strides = [1, 1, 1, 1]} : vector<2x12x12x2xbf16> to vector<2x12x8x2xbf16>
    %26 = arith.maximumf %24, %25 : vector<2x12x8x2xbf16>
    %27 = vector.extract_strided_slice %18 {offsets = [0, 0, 4, 0], sizes = [2, 12, 8, 2], strides = [1, 1, 1, 1]} : vector<2x12x12x2xbf16> to vector<2x12x8x2xbf16>
    %28 = arith.maximumf %26, %27 : vector<2x12x8x2xbf16>
    %29 = vector.extract_strided_slice %28 {offsets = [0, 0, 0, 0], sizes = [2, 8, 8, 2], strides = [1, 1, 1, 1]} : vector<2x12x8x2xbf16> to vector<2x8x8x2xbf16>
    %30 = vector.extract_strided_slice %28 {offsets = [0, 1, 0, 0], sizes = [2, 8, 8, 2], strides = [1, 1, 1, 1]} : vector<2x12x8x2xbf16> to vector<2x8x8x2xbf16>
    %31 = arith.maximumf %29, %30 : vector<2x8x8x2xbf16>
    %32 = vector.extract_strided_slice %28 {offsets = [0, 2, 0, 0], sizes = [2, 8, 8, 2], strides = [1, 1, 1, 1]} : vector<2x12x8x2xbf16> to vector<2x8x8x2xbf16>
    %33 = arith.maximumf %31, %32 : vector<2x8x8x2xbf16>
    %34 = vector.extract_strided_slice %28 {offsets = [0, 3, 0, 0], sizes = [2, 8, 8, 2], strides = [1, 1, 1, 1]} : vector<2x12x8x2xbf16> to vector<2x8x8x2xbf16>
    %35 = arith.maximumf %33, %34 : vector<2x8x8x2xbf16>
    %36 = vector.extract_strided_slice %28 {offsets = [0, 4, 0, 0], sizes = [2, 8, 8, 2], strides = [1, 1, 1, 1]} : vector<2x12x8x2xbf16> to vector<2x8x8x2xbf16>
    %37 = arith.maximumf %35, %36 : vector<2x8x8x2xbf16>
    %c0_7 = arith.constant 0 : index
    %c0_8 = arith.constant 0 : index
    %c0_9 = arith.constant 0 : index
    %c0_10 = arith.constant 0 : index
    %38 = vector.load %arg4[%c0_7, %c0_8, %c0_9, %c0_10] : memref<2x8x8x2xbf16, #tpu.memory_space<vmem>>, vector<2x8x8x2xbf16>
    tpu.vector_store %arg4[%c0_7, %c0_8, %c0_9, %c0_10], %37 {strides = array<i32>} : memref<2x8x8x2xbf16, #tpu.memory_space<vmem>>, vector<2x8x8x2xbf16>,
    %39 = vector.extract_strided_slice %37 {offsets = [0, 0, 0, 0], sizes = [2, 8, 4, 2], strides = [1, 1, 1, 1]} : vector<2x8x8x2xbf16> to vector<2x8x4x2xbf16>
    %40 = vector.extract_strided_slice %37 {offsets = [0, 0, 1, 0], sizes = [2, 8, 4, 2], strides = [1, 1, 1, 1]} : vector<2x8x8x2xbf16> to vector<2x8x4x2xbf16>
    %41 = arith.maximumf %39, %40 : vector<2x8x4x2xbf16>
    %42 = vector.extract_strided_slice %37 {offsets = [0, 0, 2, 0], sizes = [2, 8, 4, 2], strides = [1, 1, 1, 1]} : vector<2x8x8x2xbf16> to vector<2x8x4x2xbf16>
    %43 = arith.maximumf %41, %42 : vector<2x8x4x2xbf16>
    %44 = vector.extract_strided_slice %37 {offsets = [0, 0, 3, 0], sizes = [2, 8, 4, 2], strides = [1, 1, 1, 1]} : vector<2x8x8x2xbf16> to vector<2x8x4x2xbf16>
    %45 = arith.maximumf %43, %44 : vector<2x8x4x2xbf16>
    %46 = vector.extract_strided_slice %37 {offsets = [0, 0, 4, 0], sizes = [2, 8, 4, 2], strides = [1, 1, 1, 1]} : vector<2x8x8x2xbf16> to vector<2x8x4x2xbf16>
    %47 = arith.maximumf %45, %46 : vector<2x8x4x2xbf16>
    %48 = vector.extract_strided_slice %47 {offsets = [0, 0, 0, 0], sizes = [2, 4, 4, 2], strides = [1, 1, 1, 1]} : vector<2x8x4x2xbf16> to vector<2x4x4x2xbf16>
    %49 = vector.extract_strided_slice %47 {offsets = [0, 1, 0, 0], sizes = [2, 4, 4, 2], strides = [1, 1, 1, 1]} : vector<2x8x4x2xbf16> to vector<2x4x4x2xbf16>
    %50 = arith.maximumf %48, %49 : vector<2x4x4x2xbf16>
    %51 = vector.extract_strided_slice %47 {offsets = [0, 2, 0, 0], sizes = [2, 4, 4, 2], strides = [1, 1, 1, 1]} : vector<2x8x4x2xbf16> to vector<2x4x4x2xbf16>
    %52 = arith.maximumf %50, %51 : vector<2x4x4x2xbf16>
    %53 = vector.extract_strided_slice %47 {offsets = [0, 3, 0, 0], sizes = [2, 4, 4, 2], strides = [1, 1, 1, 1]} : vector<2x8x4x2xbf16> to vector<2x4x4x2xbf16>
    %54 = arith.maximumf %52, %53 : vector<2x4x4x2xbf16>
    %55 = vector.extract_strided_slice %47 {offsets = [0, 4, 0, 0], sizes = [2, 4, 4, 2], strides = [1, 1, 1, 1]} : vector<2x8x4x2xbf16> to vector<2x4x4x2xbf16>
    %56 = arith.maximumf %54, %55 : vector<2x4x4x2xbf16>
    %c0_11 = arith.constant 0 : index
    %c0_12 = arith.constant 0 : index
    %c0_13 = arith.constant 0 : index
    %c0_14 = arith.constant 0 : index
    %57 = vector.load %arg5[%c0_11, %c0_12, %c0_13, %c0_14] : memref<2x4x4x2xbf16, #tpu.memory_space<vmem>>, vector<2x4x4x2xbf16>
    tpu.vector_store %arg5[%c0_11, %c0_12, %c0_13, %c0_14], %56 {strides = array<i32>} : memref<2x4x4x2xbf16, #tpu.memory_space<vmem>>, vector<2x4x4x2xbf16>,
    return
  }
  func.func @transform_0(%arg0: i32, %arg1: i32) -> (i32, i32, i32, i32) {
    %c0_i32 = arith.constant 0 : i32
    %c0_i32_0 = arith.constant 0 : i32
    %c0_i32_1 = arith.constant 0 : i32
    return %arg0, %c0_i32, %c0_i32_0, %arg1 : i32, i32, i32, i32
  }
  func.func @transform_1(%arg0: i32, %arg1: i32) -> (i32, i32, i32, i32) {
    %c0_i32 = arith.constant 0 : i32
    %c0_i32_0 = arith.constant 0 : i32
    %c0_i32_1 = arith.constant 0 : i32
    return %arg0, %c0_i32, %c0_i32_0, %arg1 : i32, i32, i32, i32
  }
  func.func @transform_2(%arg0: i32, %arg1: i32) -> (i32, i32, i32, i32) {
    %c0_i32 = arith.constant 0 : i32
    %c0_i32_0 = arith.constant 0 : i32
    %c0_i32_1 = arith.constant 0 : i32
    return %arg0, %c0_i32, %c0_i32_0, %arg1 : i32, i32, i32, i32
  }
  func.func @transform_3(%arg0: i32, %arg1: i32) -> (i32, i32, i32, i32) {
    %c0_i32 = arith.constant 0 : i32
    %c0_i32_0 = arith.constant 0 : i32
    %c0_i32_1 = arith.constant 0 : i32
    return %arg0, %c0_i32, %c0_i32_0, %arg1 : i32, i32, i32, i32
  }
}

module attributes {stable_mosaic.version = 11 : i64} {
  func.func @kernel(%arg0: i32, %arg1: i32, %arg2: memref<1x128x4xbf16, #tpu.memory_space<vmem>>, %arg3: memref<4x2xbf16, #tpu.memory_space<vmem>>, %arg4: memref<1x2xf32, #tpu.memory_space<vmem>>, %arg5: memref<1x2xf32, #tpu.memory_space<vmem>>, %arg6: memref<1x128x2xbf16, #tpu.memory_space<vmem>>) attributes {dimension_semantics = [#tpu.dimension_semantics<parallel>, #tpu.dimension_semantics<parallel>], iteration_bounds = array<i64: 2, 2>, scalar_prefetch = 0 : i64, scratch_operands = 0 : i64, tpu.core_type = #tpu.core_type<tc>, window_params = [{transform_indices = @transform_0, window_bounds = array<i64: 1, 128, 4>}, {pipeline_mode = #tpu.pipeline_mode<synchronous>, transform_indices = @transform_1, window_bounds = array<i64: 4, 2>}, {pipeline_mode = #tpu.pipeline_mode<synchronous>, transform_indices = @transform_2, window_bounds = array<i64: 1, 2>}, {pipeline_mode = #tpu.pipeline_mode<synchronous>, transform_indices = @transform_3, window_bounds = array<i64: 1, 2>}, {transform_indices = @transform_4, window_bounds = array<i64: 1, 128, 2>}]} {
    %c0 = arith.constant 0 : index
    %c0_0 = arith.constant 0 : index
    %c0_1 = arith.constant 0 : index
    %0 = vector.load %arg2[%c0, %c0_0, %c0_1] : memref<1x128x4xbf16, #tpu.memory_space<vmem>>, vector<1x128x4xbf16>
    %1 = vector.shape_cast %0 : vector<1x128x4xbf16> to vector<128x4xbf16>
    %c0_2 = arith.constant 0 : index
    %c0_3 = arith.constant 0 : index
    %2 = vector.load %arg3[%c0_2, %c0_3] : memref<4x2xbf16, #tpu.memory_space<vmem>>, vector<4x2xbf16>
    %cst = arith.constant dense<0.000000e+00> : vector<128x2xf32>
    %3 = tpu.matmul %1, %2, %cst {dimension_numbers = #tpu.dot_dimension_numbers<[1], [0], [0], [1], [0, 0, 1, 1], [], []>} : vector<128x4xbf16>, vector<4x2xbf16>, vector<128x2xf32> -> vector<128x2xf32>
    %c0_4 = arith.constant 0 : index
    %c0_5 = arith.constant 0 : index
    %4 = vector.load %arg4[%c0_4, %c0_5] : memref<1x2xf32, #tpu.memory_space<vmem>>, vector<1x2xf32>
    %5 = vector.broadcast %4 : vector<1x2xf32> to vector<128x2xf32>
    %6 = arith.mulf %3, %5 : vector<128x2xf32>
    %c0_6 = arith.constant 0 : index
    %c0_7 = arith.constant 0 : index
    %7 = vector.load %arg5[%c0_6, %c0_7] : memref<1x2xf32, #tpu.memory_space<vmem>>, vector<1x2xf32>
    %8 = vector.broadcast %7 : vector<1x2xf32> to vector<128x2xf32>
    %9 = arith.addf %6, %8 : vector<128x2xf32>
    %cst_8 = arith.constant 2.500000e+01 : f32
    %10 = vector.broadcast %cst_8 : f32 to vector<128x2xf32>
    %11 = arith.minimumf %9, %10 : vector<128x2xf32>
    %12 = math.exp %11 : vector<128x2xf32>
    %cst_9 = arith.constant 1.000000e+00 : f32
    %13 = vector.broadcast %cst_9 : f32 to vector<128x2xf32>
    %14 = arith.addf %13, %12 : vector<128x2xf32>
    %cst_10 = arith.constant 1.000000e+00 : f32
    %15 = vector.broadcast %cst_10 : f32 to vector<128x2xf32>
    %16 = arith.addf %15, %12 : vector<128x2xf32>
    %17 = arith.mulf %14, %16 : vector<128x2xf32>
    %cst_11 = arith.constant 1.000000e+00 : f32
    %18 = vector.broadcast %cst_11 : f32 to vector<128x2xf32>
    %19 = arith.addf %17, %18 : vector<128x2xf32>
    %20 = tpu.reciprocal %19 {approx = true} : vector<128x2xf32> -> vector<128x2xf32>
    %21 = arith.mulf %19, %20 : vector<128x2xf32>
    %cst_12 = arith.constant 2.000000e+00 : f32
    %22 = vector.broadcast %cst_12 : f32 to vector<128x2xf32>
    %23 = arith.subf %22, %21 : vector<128x2xf32>
    %24 = arith.mulf %20, %23 : vector<128x2xf32>
    %cst_13 = arith.constant 2.000000e+00 : f32
    %25 = vector.broadcast %cst_13 : f32 to vector<128x2xf32>
    %26 = arith.mulf %25, %24 : vector<128x2xf32>
    %cst_14 = arith.constant 1.000000e+00 : f32
    %27 = vector.broadcast %cst_14 : f32 to vector<128x2xf32>
    %28 = arith.subf %27, %26 : vector<128x2xf32>
    %29 = arith.mulf %9, %28 : vector<128x2xf32>
    %30 = arith.truncf %29 : vector<128x2xf32> to vector<128x2xbf16>
    %c0_15 = arith.constant 0 : index
    %c0_16 = arith.constant 0 : index
    %c0_17 = arith.constant 0 : index
    %31 = vector.load %arg6[%c0_15, %c0_16, %c0_17] : memref<1x128x2xbf16, #tpu.memory_space<vmem>>, vector<1x128x2xbf16>
    %32 = vector.shape_cast %31 : vector<1x128x2xbf16> to vector<128x2xbf16>
    %33 = vector.shape_cast %30 : vector<128x2xbf16> to vector<1x128x2xbf16>
    tpu.vector_store %arg6[%c0_15, %c0_16, %c0_17], %33 {strides = array<i32>} : memref<1x128x2xbf16, #tpu.memory_space<vmem>>, vector<1x128x2xbf16>,
    return
  }
  func.func @transform_0(%arg0: i32, %arg1: i32) -> (i32, i32, i32) {
    %c0_i32 = arith.constant 0 : i32
    %c0_i32_0 = arith.constant 0 : i32
    return %arg0, %arg1, %c0_i32 : i32, i32, i32
  }
  func.func @transform_1(%arg0: i32, %arg1: i32) -> (i32, i32) {
    %c0_i32 = arith.constant 0 : i32
    %c0_i32_0 = arith.constant 0 : i32
    %c0_i32_1 = arith.constant 0 : i32
    return %c0_i32, %c0_i32_0 : i32, i32
  }
  func.func @transform_2(%arg0: i32, %arg1: i32) -> (i32, i32) {
    %c0_i32 = arith.constant 0 : i32
    %c0_i32_0 = arith.constant 0 : i32
    %c0_i32_1 = arith.constant 0 : i32
    return %c0_i32, %c0_i32_0 : i32, i32
  }
  func.func @transform_3(%arg0: i32, %arg1: i32) -> (i32, i32) {
    %c0_i32 = arith.constant 0 : i32
    %c0_i32_0 = arith.constant 0 : i32
    %c0_i32_1 = arith.constant 0 : i32
    return %c0_i32, %c0_i32_0 : i32, i32
  }
  func.func @transform_4(%arg0: i32, %arg1: i32) -> (i32, i32, i32) {
    %c0_i32 = arith.constant 0 : i32
    %c0_i32_0 = arith.constant 0 : i32
    return %arg0, %arg1, %c0_i32 : i32, i32, i32
  }
}

module attributes {stable_mosaic.version = 11 : i64} {
  func.func @kernel(%arg0: i32, %arg1: i32, %arg2: memref<1x128x2xbf16, #tpu.memory_space<vmem>>, %arg3: memref<1x144x2xbf16, #tpu.memory_space<vmem>>, %arg4: memref<1x64x2xbf16, #tpu.memory_space<vmem>>, %arg5: memref<1x16x2xbf16, #tpu.memory_space<vmem>>, %arg6: memref<128x1xi32, #tpu.memory_space<vmem>>, %arg7: memref<128x1xi32, #tpu.memory_space<vmem>>, %arg8: memref<128x1xi32, #tpu.memory_space<vmem>>, %arg9: memref<2x4xbf16, #tpu.memory_space<vmem>>, %arg10: memref<2x4xbf16, #tpu.memory_space<vmem>>, %arg11: memref<2x4xbf16, #tpu.memory_space<vmem>>, %arg12: memref<2x4xbf16, #tpu.memory_space<vmem>>, %arg13: memref<1x4xf32, #tpu.memory_space<vmem>>, %arg14: memref<1x4xf32, #tpu.memory_space<vmem>>, %arg15: memref<1x128x4xf32, #tpu.memory_space<vmem>>) attributes {dimension_semantics = [#tpu.dimension_semantics<parallel>, #tpu.dimension_semantics<parallel>], iteration_bounds = array<i64: 2, 2>, scalar_prefetch = 0 : i64, scratch_operands = 0 : i64, tpu.core_type = #tpu.core_type<tc>, window_params = [{transform_indices = @transform_0, window_bounds = array<i64: 1, 128, 2>}, {transform_indices = @transform_1, window_bounds = array<i64: 1, 144, 2>}, {transform_indices = @transform_2, window_bounds = array<i64: 1, 64, 2>}, {transform_indices = @transform_3, window_bounds = array<i64: 1, 16, 2>}, {transform_indices = @transform_4, window_bounds = array<i64: 128, 1>}, {transform_indices = @transform_5, window_bounds = array<i64: 128, 1>}, {transform_indices = @transform_6, window_bounds = array<i64: 128, 1>}, {pipeline_mode = #tpu.pipeline_mode<synchronous>, transform_indices = @transform_7, window_bounds = array<i64: 2, 4>}, {pipeline_mode = #tpu.pipeline_mode<synchronous>, transform_indices = @transform_8, window_bounds = array<i64: 2, 4>}, {pipeline_mode = #tpu.pipeline_mode<synchronous>, transform_indices = @transform_9, window_bounds = array<i64: 2, 4>}, {pipeline_mode = #tpu.pipeline_mode<synchronous>, transform_indices = @transform_10, window_bounds = array<i64: 2, 4>}, {pipeline_mode = #tpu.pipeline_mode<synchronous>, transform_indices = @transform_11, window_bounds = array<i64: 1, 4>}, {pipeline_mode = #tpu.pipeline_mode<synchronous>, transform_indices = @transform_12, window_bounds = array<i64: 1, 4>}, {transform_indices = @transform_13, window_bounds = array<i64: 1, 128, 4>}]} {
    %c0 = arith.constant 0 : index
    %c0_0 = arith.constant 0 : index
    %c0_1 = arith.constant 0 : index
    %0 = vector.load %arg2[%c0, %c0_0, %c0_1] : memref<1x128x2xbf16, #tpu.memory_space<vmem>>, vector<1x128x2xbf16>
    %1 = vector.shape_cast %0 : vector<1x128x2xbf16> to vector<128x2xbf16>
    %c0_2 = arith.constant 0 : index
    %c0_3 = arith.constant 0 : index
    %2 = vector.load %arg6[%c0_2, %c0_3] : memref<128x1xi32, #tpu.memory_space<vmem>>, vector<128x1xi32>
    %3 = tpu.iota {dimensions = array<i32: 1>} : vector<128x144xi32>
    %4 = vector.broadcast %2 : vector<128x1xi32> to vector<128x144xi32>
    %5 = arith.cmpi eq, %3, %4 : vector<128x144xi32>
    %6 = arith.extui %5 : vector<128x144xi1> to vector<128x144xi32>
    %7 = arith.sitofp %6 : vector<128x144xi32> to vector<128x144xf32>
    %8 = arith.truncf %7 : vector<128x144xf32> to vector<128x144xbf16>
    %c0_4 = arith.constant 0 : index
    %c0_5 = arith.constant 0 : index
    %c0_6 = arith.constant 0 : index
    %9 = vector.load %arg3[%c0_4, %c0_5, %c0_6] : memref<1x144x2xbf16, #tpu.memory_space<vmem>>, vector<1x144x2xbf16>
    %10 = vector.shape_cast %9 : vector<1x144x2xbf16> to vector<144x2xbf16>
    %cst = arith.constant dense<0.000000e+00> : vector<128x2xf32>
    %11 = tpu.matmul %8, %10, %cst {dimension_numbers = #tpu.dot_dimension_numbers<[1], [0], [0], [1], [0, 0, 1, 1], [], []>} : vector<128x144xbf16>, vector<144x2xbf16>, vector<128x2xf32> -> vector<128x2xf32>
    %12 = arith.truncf %11 : vector<128x2xf32> to vector<128x2xbf16>
    %c0_7 = arith.constant 0 : index
    %c0_8 = arith.constant 0 : index
    %13 = vector.load %arg7[%c0_7, %c0_8] : memref<128x1xi32, #tpu.memory_space<vmem>>, vector<128x1xi32>
    %14 = tpu.iota {dimensions = array<i32: 1>} : vector<128x64xi32>
    %15 = vector.broadcast %13 : vector<128x1xi32> to vector<128x64xi32>
    %16 = arith.cmpi eq, %14, %15 : vector<128x64xi32>
    %17 = arith.extui %16 : vector<128x64xi1> to vector<128x64xi32>
    %18 = arith.sitofp %17 : vector<128x64xi32> to vector<128x64xf32>
    %19 = arith.truncf %18 : vector<128x64xf32> to vector<128x64xbf16>
    %c0_9 = arith.constant 0 : index
    %c0_10 = arith.constant 0 : index
    %c0_11 = arith.constant 0 : index
    %20 = vector.load %arg4[%c0_9, %c0_10, %c0_11] : memref<1x64x2xbf16, #tpu.memory_space<vmem>>, vector<1x64x2xbf16>
    %21 = vector.shape_cast %20 : vector<1x64x2xbf16> to vector<64x2xbf16>
    %cst_12 = arith.constant dense<0.000000e+00> : vector<128x2xf32>
    %22 = tpu.matmul %19, %21, %cst_12 {dimension_numbers = #tpu.dot_dimension_numbers<[1], [0], [0], [1], [0, 0, 1, 1], [], []>} : vector<128x64xbf16>, vector<64x2xbf16>, vector<128x2xf32> -> vector<128x2xf32>
    %23 = arith.truncf %22 : vector<128x2xf32> to vector<128x2xbf16>
    %c0_13 = arith.constant 0 : index
    %c0_14 = arith.constant 0 : index
    %24 = vector.load %arg8[%c0_13, %c0_14] : memref<128x1xi32, #tpu.memory_space<vmem>>, vector<128x1xi32>
    %25 = tpu.iota {dimensions = array<i32: 1>} : vector<128x16xi32>
    %26 = vector.broadcast %24 : vector<128x1xi32> to vector<128x16xi32>
    %27 = arith.cmpi eq, %25, %26 : vector<128x16xi32>
    %28 = arith.extui %27 : vector<128x16xi1> to vector<128x16xi32>
    %29 = arith.sitofp %28 : vector<128x16xi32> to vector<128x16xf32>
    %30 = arith.truncf %29 : vector<128x16xf32> to vector<128x16xbf16>
    %c0_15 = arith.constant 0 : index
    %c0_16 = arith.constant 0 : index
    %c0_17 = arith.constant 0 : index
    %31 = vector.load %arg5[%c0_15, %c0_16, %c0_17] : memref<1x16x2xbf16, #tpu.memory_space<vmem>>, vector<1x16x2xbf16>
    %32 = vector.shape_cast %31 : vector<1x16x2xbf16> to vector<16x2xbf16>
    %cst_18 = arith.constant dense<0.000000e+00> : vector<128x2xf32>
    %33 = tpu.matmul %30, %32, %cst_18 {dimension_numbers = #tpu.dot_dimension_numbers<[1], [0], [0], [1], [0, 0, 1, 1], [], []>} : vector<128x16xbf16>, vector<16x2xbf16>, vector<128x2xf32> -> vector<128x2xf32>
    %34 = arith.truncf %33 : vector<128x2xf32> to vector<128x2xbf16>
    %c0_19 = arith.constant 0 : index
    %c0_20 = arith.constant 0 : index
    %35 = vector.load %arg9[%c0_19, %c0_20] : memref<2x4xbf16, #tpu.memory_space<vmem>>, vector<2x4xbf16>
    %cst_21 = arith.constant dense<0.000000e+00> : vector<128x4xf32>
    %36 = tpu.matmul %1, %35, %cst_21 {dimension_numbers = #tpu.dot_dimension_numbers<[1], [0], [0], [1], [0, 0, 1, 1], [], []>} : vector<128x2xbf16>, vector<2x4xbf16>, vector<128x4xf32> -> vector<128x4xf32>
    %c0_22 = arith.constant 0 : index
    %c0_23 = arith.constant 0 : index
    %37 = vector.load %arg10[%c0_22, %c0_23] : memref<2x4xbf16, #tpu.memory_space<vmem>>, vector<2x4xbf16>
    %cst_24 = arith.constant dense<0.000000e+00> : vector<128x4xf32>
    %38 = tpu.matmul %12, %37, %cst_24 {dimension_numbers = #tpu.dot_dimension_numbers<[1], [0], [0], [1], [0, 0, 1, 1], [], []>} : vector<128x2xbf16>, vector<2x4xbf16>, vector<128x4xf32> -> vector<128x4xf32>
    %39 = arith.addf %36, %38 : vector<128x4xf32>
    %c0_25 = arith.constant 0 : index
    %c0_26 = arith.constant 0 : index
    %40 = vector.load %arg11[%c0_25, %c0_26] : memref<2x4xbf16, #tpu.memory_space<vmem>>, vector<2x4xbf16>
    %cst_27 = arith.constant dense<0.000000e+00> : vector<128x4xf32>
    %41 = tpu.matmul %23, %40, %cst_27 {dimension_numbers = #tpu.dot_dimension_numbers<[1], [0], [0], [1], [0, 0, 1, 1], [], []>} : vector<128x2xbf16>, vector<2x4xbf16>, vector<128x4xf32> -> vector<128x4xf32>
    %42 = arith.addf %39, %41 : vector<128x4xf32>
    %c0_28 = arith.constant 0 : index
    %c0_29 = arith.constant 0 : index
    %43 = vector.load %arg12[%c0_28, %c0_29] : memref<2x4xbf16, #tpu.memory_space<vmem>>, vector<2x4xbf16>
    %cst_30 = arith.constant dense<0.000000e+00> : vector<128x4xf32>
    %44 = tpu.matmul %34, %43, %cst_30 {dimension_numbers = #tpu.dot_dimension_numbers<[1], [0], [0], [1], [0, 0, 1, 1], [], []>} : vector<128x2xbf16>, vector<2x4xbf16>, vector<128x4xf32> -> vector<128x4xf32>
    %45 = arith.addf %42, %44 : vector<128x4xf32>
    %c0_31 = arith.constant 0 : index
    %c0_32 = arith.constant 0 : index
    %46 = vector.load %arg13[%c0_31, %c0_32] : memref<1x4xf32, #tpu.memory_space<vmem>>, vector<1x4xf32>
    %47 = vector.broadcast %46 : vector<1x4xf32> to vector<128x4xf32>
    %48 = arith.mulf %45, %47 : vector<128x4xf32>
    %c0_33 = arith.constant 0 : index
    %c0_34 = arith.constant 0 : index
    %49 = vector.load %arg14[%c0_33, %c0_34] : memref<1x4xf32, #tpu.memory_space<vmem>>, vector<1x4xf32>
    %50 = vector.broadcast %49 : vector<1x4xf32> to vector<128x4xf32>
    %51 = arith.addf %48, %50 : vector<128x4xf32>
    %cst_35 = arith.constant 2.500000e+01 : f32
    %52 = vector.broadcast %cst_35 : f32 to vector<128x4xf32>
    %53 = arith.minimumf %51, %52 : vector<128x4xf32>
    %54 = math.exp %53 : vector<128x4xf32>
    %cst_36 = arith.constant 1.000000e+00 : f32
    %55 = vector.broadcast %cst_36 : f32 to vector<128x4xf32>
    %56 = arith.addf %55, %54 : vector<128x4xf32>
    %cst_37 = arith.constant 1.000000e+00 : f32
    %57 = vector.broadcast %cst_37 : f32 to vector<128x4xf32>
    %58 = arith.addf %57, %54 : vector<128x4xf32>
    %59 = arith.mulf %56, %58 : vector<128x4xf32>
    %cst_38 = arith.constant 1.000000e+00 : f32
    %60 = vector.broadcast %cst_38 : f32 to vector<128x4xf32>
    %61 = arith.addf %59, %60 : vector<128x4xf32>
    %62 = tpu.reciprocal %61 {approx = true} : vector<128x4xf32> -> vector<128x4xf32>
    %63 = arith.mulf %61, %62 : vector<128x4xf32>
    %cst_39 = arith.constant 2.000000e+00 : f32
    %64 = vector.broadcast %cst_39 : f32 to vector<128x4xf32>
    %65 = arith.subf %64, %63 : vector<128x4xf32>
    %66 = arith.mulf %62, %65 : vector<128x4xf32>
    %cst_40 = arith.constant 2.000000e+00 : f32
    %67 = vector.broadcast %cst_40 : f32 to vector<128x4xf32>
    %68 = arith.mulf %67, %66 : vector<128x4xf32>
    %cst_41 = arith.constant 1.000000e+00 : f32
    %69 = vector.broadcast %cst_41 : f32 to vector<128x4xf32>
    %70 = arith.subf %69, %68 : vector<128x4xf32>
    %71 = arith.mulf %51, %70 : vector<128x4xf32>
    %c0_42 = arith.constant 0 : index
    %c0_43 = arith.constant 0 : index
    %c0_44 = arith.constant 0 : index
    %72 = vector.load %arg15[%c0_42, %c0_43, %c0_44] : memref<1x128x4xf32, #tpu.memory_space<vmem>>, vector<1x128x4xf32>
    %73 = vector.shape_cast %72 : vector<1x128x4xf32> to vector<128x4xf32>
    %74 = vector.shape_cast %71 : vector<128x4xf32> to vector<1x128x4xf32>
    tpu.vector_store %arg15[%c0_42, %c0_43, %c0_44], %74 {strides = array<i32>} : memref<1x128x4xf32, #tpu.memory_space<vmem>>, vector<1x128x4xf32>,
    return
  }
  func.func @transform_0(%arg0: i32, %arg1: i32) -> (i32, i32, i32) {
    %c0_i32 = arith.constant 0 : i32
    %c0_i32_0 = arith.constant 0 : i32
    return %arg0, %arg1, %c0_i32 : i32, i32, i32
  }
  func.func @transform_1(%arg0: i32, %arg1: i32) -> (i32, i32, i32) {
    %c0_i32 = arith.constant 0 : i32
    %c0_i32_0 = arith.constant 0 : i32
    %c0_i32_1 = arith.constant 0 : i32
    return %arg0, %c0_i32, %c0_i32_0 : i32, i32, i32
  }
  func.func @transform_2(%arg0: i32, %arg1: i32) -> (i32, i32, i32) {
    %c0_i32 = arith.constant 0 : i32
    %c0_i32_0 = arith.constant 0 : i32
    %c0_i32_1 = arith.constant 0 : i32
    return %arg0, %c0_i32, %c0_i32_0 : i32, i32, i32
  }
  func.func @transform_3(%arg0: i32, %arg1: i32) -> (i32, i32, i32) {
    %c0_i32 = arith.constant 0 : i32
    %c0_i32_0 = arith.constant 0 : i32
    %c0_i32_1 = arith.constant 0 : i32
    return %arg0, %c0_i32, %c0_i32_0 : i32, i32, i32
  }
  func.func @transform_4(%arg0: i32, %arg1: i32) -> (i32, i32) {
    %c0_i32 = arith.constant 0 : i32
    %c0_i32_0 = arith.constant 0 : i32
    return %arg1, %c0_i32 : i32, i32
  }
  func.func @transform_5(%arg0: i32, %arg1: i32) -> (i32, i32) {
    %c0_i32 = arith.constant 0 : i32
    %c0_i32_0 = arith.constant 0 : i32
    return %arg1, %c0_i32 : i32, i32
  }
  func.func @transform_6(%arg0: i32, %arg1: i32) -> (i32, i32) {
    %c0_i32 = arith.constant 0 : i32
    %c0_i32_0 = arith.constant 0 : i32
    return %arg1, %c0_i32 : i32, i32
  }
  func.func @transform_7(%arg0: i32, %arg1: i32) -> (i32, i32) {
    %c0_i32 = arith.constant 0 : i32
    %c0_i32_0 = arith.constant 0 : i32
    %c0_i32_1 = arith.constant 0 : i32
    return %c0_i32, %c0_i32_0 : i32, i32
  }
  func.func @transform_8(%arg0: i32, %arg1: i32) -> (i32, i32) {
    %c0_i32 = arith.constant 0 : i32
    %c0_i32_0 = arith.constant 0 : i32
    %c0_i32_1 = arith.constant 0 : i32
    return %c0_i32, %c0_i32_0 : i32, i32
  }
  func.func @transform_9(%arg0: i32, %arg1: i32) -> (i32, i32) {
    %c0_i32 = arith.constant 0 : i32
    %c0_i32_0 = arith.constant 0 : i32
    %c0_i32_1 = arith.constant 0 : i32
    return %c0_i32, %c0_i32_0 : i32, i32
  }
  func.func @transform_10(%arg0: i32, %arg1: i32) -> (i32, i32) {
    %c0_i32 = arith.constant 0 : i32
    %c0_i32_0 = arith.constant 0 : i32
    %c0_i32_1 = arith.constant 0 : i32
    return %c0_i32, %c0_i32_0 : i32, i32
  }
  func.func @transform_11(%arg0: i32, %arg1: i32) -> (i32, i32) {
    %c0_i32 = arith.constant 0 : i32
    %c0_i32_0 = arith.constant 0 : i32
    %c0_i32_1 = arith.constant 0 : i32
    return %c0_i32, %c0_i32_0 : i32, i32
  }
  func.func @transform_12(%arg0: i32, %arg1: i32) -> (i32, i32) {
    %c0_i32 = arith.constant 0 : i32
    %c0_i32_0 = arith.constant 0 : i32
    %c0_i32_1 = arith.constant 0 : i32
    return %c0_i32, %c0_i32_0 : i32, i32
  }
  func.func @transform_13(%arg0: i32, %arg1: i32) -> (i32, i32, i32) {
    %c0_i32 = arith.constant 0 : i32
    %c0_i32_0 = arith.constant 0 : i32
    return %arg0, %arg1, %c0_i32 : i32, i32, i32
  }
}

</mosaic_0001>

<bundles_post_ra>
// kernel: sppf_forward.3
= control target key start
LH: loop header
LB: loop body
LE: loop exit
PB: predicated region body
PF: predicated region fallthrough
CT: control target
= control target key end

     0   :  { %s1117_s15 = smov 0   ;;  %s1119_s16 = smov 0   ;;  %s1357_s0 = inlined_call_operand.vmem [shape: bf16[2,256,4], index: 0, kind: input, shape index: {}]   ;;  %s1358_s1 = inlined_call_operand.vmem [shape: bf16[4,2], index: 1, kind: input, shape index: {}]   ;;  %s1359_s2 = inlined_call_operand.vmem [shape: f32[1,2], index: 2, kind: input, shape index: {}]   ;;  %s1360_s3 = inlined_call_operand.vmem [shape: f32[1,2], index: 3, kind: input, shape index: {}]   ;;  %s1361_s4 = inlined_call_operand.vmem [shape: bf16[2,256,2], index: 4, kind: output, shape index: {}]  }
   0x1   :  { %s1121_s17 = smov 0   ;;  %s1123_s18 = smov 0  }
   0x2   :  { %s1125_s19 = smov 0  }
   0x3 LB: > { %s23_s20 = sadd.s32 1, %s1082_s17  ;;  %s26_s21 = sadd.s32 1, %s1086_s18  ;;  %s1090_s19 = sphi %s1125_s19, %s14_s19   ;;  %s1086_s18 = sphi %s1123_s18, %s1365_s18   ;;  %s1082_s17 = sphi %s1121_s17, %s1364_s17   ;;  %s1078_s16 = sphi %s1119_s16, %s1363_s16   ;;  %s1074_s15 = sphi %s1117_s15, %s1362_s15  }
   0x4   : > { %p24_p0 = scmp.ge.s32.totalorder %s23_s20, 2  ;;  %p850_p1 = scmp.ge.s32.totalorder %s1090_s19, 1 }
   0x5   : > { %p183_p2 = scmp.lt.s32.totalorder %s1090_s19, 5 }
   0x6   : > { %s1367_s20 = smov (%p24_p0, %s23_s20), 0  ;;  %s1369_s21 = smov (!%p24_p0, %s26_s21), %s1086_s18 }
   0x7   : > { %p184_p3 = pnand %p850_p1, %p183_p2  ;;  %p28_p4 = scmp.ge.s32.totalorder %s1369_s21, 2 }
   0x8   : > { %v254_v0 = vld [vmem:[%s1358_s1] sm:$0x3] (!%p184_p3)  ;;  %vm320_vm0 = vcmask (!%p184_p3), 1041408   ;;  %s851_s24 = sshll.u32 (!%p184_p3), %s1074_s15, 4  ;;  %p218_p5 = scmp.lt.s32.totalorder (!%p184_p3), %s1078_s16, 1  ;;  %vm295_vm1 = vcmask (!%p184_p3), 31744  }
   0x9   : > { %s1371_s21 = smov (%p28_p4, %s1369_s21), 0  ;;  %187 = sbr.rel (%p184_p3) target bundleno = 324 (0x144), region = 36 }
   0xa   : > { %938 = vmatprep.subr.msk.bf16.mxu0 (!%p184_p3), %vm320_vm0, %v254_v0  ;;  %939 = vmatprep.subr.msk.bf16.mxu1 (!%p184_p3), %vm320_vm0, %v254_v0  ;;  %v322_v1 = vsel (!%p184_p3), %vm320_vm0, %v254_v0, 0  ;;  %p220_p6 = scmp.lt.s32.totalorder (!%p184_p3), %s851_s24, 31  ;;  %v1169_v10 = vld [vmem:[%s1359_s2] ss:$0 sm:$0xff] (!%p184_p3)  ;;  %vm739_vm2 = vcmask (!%p184_p3), 11264  }
   0xb   : > { %919 = vmatpush3.bf16.msra.mxu0 (!%p184_p3), %v322_v1  ;;  %937 = vmatpush3.bf16.msra.mxu1 (!%p184_p3), %v322_v1  ;;  %v1174_v12 = vld [vmem:[%s1360_s3] ss:$0 sm:$0xff] (!%p184_p3) }
  0x10   : > { %s1373_s16 = smov (!%p218_p5, %s1078_s16), 1  ;;  %s1375_s24 = smov (!%p220_p6, %s851_s24), 31 }
  0x11   : > { %s852_s25 = sshll.u32 %s1373_s16, 5 }
  0x12   : > { %s1150_s26 = sadd.s32 %s852_s25, %s1375_s24 }
  0x13   : > { %s853_s27 = sshll.u32 %s1150_s26, 2 }
  0x14   : > { %s225_s30 = scalar_lea.vmem %s1357_s0, %s853_s27  ;;  %s1285_s11 = scalar_lea.vmem %s1361_s4, %s853_s27 }
  0x15   : > { %v980_v2 = vld [vmem:[%s225_s30] sm:$0xff]   ;;  %v982_v4 = vld [vmem:[%s225_s30 + $0x8] sm:$0xff]   ;;  %v984_v6 = vld [vmem:[%s225_s30 + $0x10] sm:$0xff]  }
  0x16   : > { %v981_v3 = vld [vmem:[%s225_s30 + $0x20] sm:$0xff]   ;;  %920 = vmatprep.mubr.msk.bf16.mxu0 %vm295_vm1, %v980_v2  ;;  %v983_v5 = vld [vmem:[%s225_s30 + $0x28] sm:$0xff]   ;;  %v985_v7 = vld [vmem:[%s225_s30 + $0x30] sm:$0xff]  }
  0x17   : > { %928 = vmatprep.mubr.msk.bf16.mxu1 %vm295_vm1, %v981_v3  ;;  %921 = vmatmul.mubr.msk.bf16.vlgmr.msra.gmra.mrb[0].mxu0 %vm295_vm1, %v982_v4  ;;  %v986_v8 = vld [vmem:[%s225_s30 + $0x18] sm:$0xff]  }
  0x18   : > { %929 = vmatmul.mubr.msk.bf16.vlgmr.msra.gmra.mrb[0].mxu1 %vm295_vm1, %v983_v5  ;;  %924 = vmatprep.mubr.msk.bf16.mxu0 %vm295_vm1, %v984_v6  ;;  %v987_v9 = vld [vmem:[%s225_s30 + $0x38] sm:$0xff]  }
  0x19   : > { %932 = vmatprep.mubr.msk.bf16.mxu1 %vm295_vm1, %v985_v7 }
  0x1f   : > { %925 = vmatmul.mubr.msk.bf16.gmra.mrb[4].mxu0 %vm295_vm1, %v986_v8 }
  0x20   : > { %933 = vmatmul.mubr.msk.bf16.gmra.mrb[4].mxu1 %vm295_vm1, %v987_v9 }
  0xea   : > { %v922_v11 = vpop.f32.mrb[0].mxu0 }
  0xeb   : > { %v430_v13 = vmul.f32 %v922_v11, %v1169_v10  ;;  %v930_v14 = vpop.f32.mrb[0].mxu1  ;;  %v358_v15 = vpop.f32.mrb[1].mxu0 }
  0xec   : > { %v438_v16 = vmul.f32 %v930_v14, %v1169_v10  ;;  %v428_v17 = vmul.f32 %v1169_v10, %v358_v15  ;;  %v390_v18 = vpop.f32.mrb[1].mxu1  ;;  %v923_v19 = vpop.f32.mrb[2].mxu0 }
  0xed   : > { %v1180_v20 = vadd.f32 %v1174_v12, %v430_v13  ;;  %v436_v21 = vmul.f32 %v1169_v10, %v390_v18  ;;  %v431_v22 = vmul.f32 %v923_v19, %v1169_v10  ;;  %v931_v23 = vpop.f32.mrb[2].mxu1  ;;  %v361_v24 = vpop.f32.mrb[3].mxu0 }
  0xee   : > { %v1185_v25 = vadd.f32 %v1174_v12, %v438_v16  ;;  %v1188_v26 = vadd.f32 %v1174_v12, %v428_v17  ;;  %v439_v27 = vmul.f32 %v931_v23, %v1169_v10  ;;  %v429_v28 = vmul.f32 %v1169_v10, %v361_v24  ;;  %v393_v29 = vpop.f32.mrb[3].mxu1 }
  0xef   : > { %v469_v30 = vmin.f32 %v1180_v20, 25.0  ;;  %v1194_v31 = vadd.f32 %v1174_v12, %v436_v21  ;;  %v1197_v32 = vadd.f32 %v1174_v12, %v431_v22  ;;  %v437_v33 = vmul.f32 %v1169_v10, %v393_v29 }
  0xf0   : > { %v477_v34 = vmin.f32 %v1185_v25, 25.0  ;;  %v467_v35 = vmin.f32 %v1188_v26, 25.0  ;;  %v1203_v36 = vadd.f32 %v1174_v12, %v439_v27  ;;  %v1206_v37 = vadd.f32 %v1174_v12, %v429_v28 }
  0xf1   : > { %v487_v38 = vmul.f32 1.442695, %v469_v30  ;;  %v475_v39 = vmin.f32 %v1194_v31, 25.0  ;;  %v470_v40 = vmin.f32 %v1197_v32, 25.0  ;;  %v1211_v41 = vadd.f32 %v1174_v12, %v437_v33 }
  0xf2   : > { %v503_v42 = vmul.f32 1.442695, %v477_v34  ;;  %v483_v43 = vmul.f32 1.442695, %v467_v35  ;;  %v478_v44 = vmin.f32 %v1203_v36, 25.0  ;;  %v468_v45 = vmin.f32 %v1206_v37, 25.0 }
  0xf3   : > { %988 = vpow2.f32 %v487_v38  ;;  %v499_v46 = vmul.f32 1.442695, %v475_v39  ;;  %v489_v47 = vmul.f32 1.442695, %v470_v40  ;;  %v476_v48 = vmin.f32 %v1211_v41, 25.0  ;;  %v926_v49 = vpop.f32.mrb[4].mxu0 }
  0xf4   : > { %990 = vpow2.f32 %v503_v42  ;;  %v505_v50 = vmul.f32 1.442695, %v478_v44  ;;  %v485_v51 = vmul.f32 1.442695, %v468_v45  ;;  %v434_v52 = vmul.f32 %v926_v49, %v1169_v10  ;;  %v934_v53 = vpop.f32.mrb[4].mxu1  ;;  %v374_v54 = vpop.f32.mrb[5].mxu0 }
  0xf5   : > { %992 = vpow2.f32 %v483_v43  ;;  %v501_v55 = vmul.f32 1.442695, %v476_v48  ;;  %v442_v56 = vmul.f32 %v934_v53, %v1169_v10  ;;  %v432_v57 = vmul.f32 %v1169_v10, %v374_v54  ;;  %v406_v58 = vpop.f32.mrb[5].mxu1  ;;  %v927_v59 = vpop.f32.mrb[6].mxu0 }
  0xf6   : > { %994 = vpow2.f32 %v499_v46  ;;  %v1220_v60 = vadd.f32 %v1174_v12, %v434_v52  ;;  %v440_v61 = vmul.f32 %v1169_v10, %v406_v58  ;;  %v435_v62 = vmul.f32 %v927_v59, %v1169_v10  ;;  %v935_v63 = vpop.f32.mrb[6].mxu1  ;;  %v377_v0 = vpop.f32.mrb[7].mxu0 }
  0xf7   : > { %996 = vpow2.f32 %v489_v47  ;;  %v1225_v1 = vadd.f32 %v1174_v12, %v442_v56  ;;  %v1228_v2 = vadd.f32 %v1174_v12, %v432_v57  ;;  %v443_v3 = vmul.f32 %v935_v63, %v1169_v10  ;;  %v409_v4 = vpop.f32.mrb[7].mxu1 }
  0xf8   : > { %998 = vpow2.f32 %v505_v50  ;;  %v473_v5 = vmin.f32 %v1220_v60, 25.0  ;;  %v1233_v6 = vadd.f32 %v1174_v12, %v440_v61  ;;  %v1236_v7 = vadd.f32 %v1174_v12, %v435_v62 }
  0xf9   : > { %1000 = vpow2.f32 %v485_v51  ;;  %v481_v8 = vmin.f32 %v1225_v1, 25.0  ;;  %v471_v9 = vmin.f32 %v1228_v2, 25.0  ;;  %v1241_v11 = vadd.f32 %v1174_v12, %v443_v3 }
  0xfa   : > { %1002 = vpow2.f32 %v501_v55  ;;  %v495_v13 = vmul.f32 1.442695, %v473_v5  ;;  %v479_v14 = vmin.f32 %v1233_v6, 25.0  ;;  %v474_v15 = vmin.f32 %v1236_v7, 25.0 }
  0xfb   : > { %v511_v16 = vmul.f32 1.442695, %v481_v8  ;;  %v491_v17 = vmul.f32 1.442695, %v471_v9  ;;  %v482_v18 = vmin.f32 %v1241_v11, 25.0  ;;  %v433_v19 = vmul.f32 %v1169_v10, %v377_v0 }
  0xfc   : > { %1004 = vpow2.f32 %v495_v13  ;;  %v507_v21 = vmul.f32 1.442695, %v479_v14  ;;  %v497_v22 = vmul.f32 1.442695, %v474_v15  ;;  %v441_v23 = vmul.f32 %v1169_v10, %v409_v4 }
  0xfd   : > { %v989_v24 = vpop.eup %988  ;;  %1006 = vpow2.f32 %v511_v16  ;;  %v513_v27 = vmul.f32 1.442695, %v482_v18  ;;  %v1249_v28 = vadd.f32 %v1174_v12, %v433_v19 }
  0xfe   : > { %v991_v29 = vpop.eup %990  ;;  %v517_v30 = vadd.f32 1.0, %v989_v24  ;;  %1008 = vpow2.f32 %v491_v17  ;;  %v1252_v33 = vadd.f32 %v1174_v12, %v441_v23 }
  0xff   : > { %v993_v34 = vpop.eup %992  ;;  %v525_v35 = vadd.f32 1.0, %v991_v29  ;;  %1010 = vpow2.f32 %v507_v21  ;;  %v472_v38 = vmin.f32 %v1249_v28, 25.0 }
 0x100   : > { %v995_v39 = vpop.eup %994  ;;  %v533_v40 = vmul.f32 %v517_v30, %v517_v30  ;;  %v515_v10 = vadd.f32 1.0, %v993_v34  ;;  %1012 = vpow2.f32 %v497_v22  ;;  %v480_v12 = vmin.f32 %v1252_v33, 25.0 }
 0x101   : > { %v997_v42 = vpop.eup %996  ;;  %v541_v43 = vmul.f32 %v525_v35, %v525_v35  ;;  %v523_v44 = vadd.f32 1.0, %v995_v39  ;;  %1014 = vpow2.f32 %v513_v27  ;;  %v493_v45 = vmul.f32 1.442695, %v472_v38 }
 0x102   : > { %v999_v46 = vpop.eup %998  ;;  %v549_v47 = vadd.f32 1.0, %v533_v40  ;;  %v531_v48 = vmul.f32 %v515_v10, %v515_v10  ;;  %v518_v49 = vadd.f32 1.0, %v997_v42  ;;  %v509_v15 = vmul.f32 1.442695, %v480_v12 }
 0x103   : > { %v1001_v50 = vpop.eup %1000  ;;  %v557_v51 = vadd.f32 1.0, %v541_v43  ;;  %v539_v52 = vmul.f32 %v523_v44, %v523_v44  ;;  %v526_v53 = vadd.f32 1.0, %v999_v46  ;;  %1016 = vpow2.f32 %v493_v45 }
 0x104   : > { %v1003_v54 = vpop.eup %1002  ;;  %1018 = vrcp.f32 %v549_v47  ;;  %v547_v55 = vadd.f32 1.0, %v531_v48  ;;  %v534_v56 = vmul.f32 %v518_v49, %v518_v49  ;;  %v516_v57 = vadd.f32 1.0, %v1001_v50 }
 0x105   : > { %1020 = vrcp.f32 %v557_v51  ;;  %v555_v58 = vadd.f32 1.0, %v539_v52  ;;  %v542_v59 = vmul.f32 %v526_v53, %v526_v53  ;;  %v524_v61 = vadd.f32 1.0, %v1003_v54 }
 0x106   : > { %v1005_v62 = vpop.eup %1004  ;;  %1022 = vrcp.f32 %v547_v55  ;;  %v550_v63 = vadd.f32 1.0, %v534_v56  ;;  %v532_v0 = vmul.f32 %v516_v57, %v516_v57 }
 0x107   : > { %v1007_v3 = vpop.eup %1006  ;;  %1024 = vrcp.f32 %v555_v58  ;;  %v558_v4 = vadd.f32 1.0, %v542_v59  ;;  %v540_v5 = vmul.f32 %v524_v61, %v524_v61  ;;  %v521_v8 = vadd.f32 1.0, %v1005_v62 }
 0x108   : > { %v1009_v9 = vpop.eup %1008  ;;  %1026 = vrcp.f32 %v550_v63  ;;  %v548_v13 = vadd.f32 1.0, %v532_v0  ;;  %v529_v14 = vadd.f32 1.0, %v1007_v3 }
 0x109   : > { %v1011_v16 = vpop.eup %1010  ;;  %1028 = vrcp.f32 %v558_v4  ;;  %v556_v17 = vadd.f32 1.0, %v540_v5  ;;  %v537_v18 = vmul.f32 %v521_v8, %v521_v8  ;;  %v519_v19 = vadd.f32 1.0, %v1009_v9 }
 0x10a   : > { %v1013_v21 = vpop.eup %1012  ;;  %1030 = vrcp.f32 %v548_v13  ;;  %v545_v22 = vmul.f32 %v529_v14, %v529_v14  ;;  %v527_v23 = vadd.f32 1.0, %v1011_v16 }
 0x10b   : > { %v1015_v24 = vpop.eup %1014  ;;  %1032 = vrcp.f32 %v556_v17  ;;  %v1256_v27 = vadd.f32 1.0, %v537_v18  ;;  %v535_v29 = vmul.f32 %v519_v19, %v519_v19  ;;  %v522_v30 = vadd.f32 1.0, %v1013_v21 }
 0x10c   : > { %v1258_v34 = vadd.f32 1.0, %v545_v22  ;;  %v543_v35 = vmul.f32 %v527_v23, %v527_v23  ;;  %v530_v38 = vadd.f32 1.0, %v1015_v24  ;;  %1034 = vpow2.f32 %v509_v15 }
 0x10d   : > { %v1017_v39 = vpop.eup %1016  ;;  %v1260_v40 = vadd.f32 1.0, %v535_v29  ;;  %v538_v10 = vmul.f32 %v522_v30, %v522_v30  ;;  %1036 = vrcp.f32 %v1256_v27 }
 0x10e   : > { %v1019_v42 = vpop.eup %1018  ;;  %v1263_v43 = vadd.f32 1.0, %v543_v35  ;;  %v546_v44 = vmul.f32 %v530_v38, %v530_v38  ;;  %v520_v45 = vadd.f32 1.0, %v1017_v39  ;;  %1038 = vrcp.f32 %v1258_v34 }
 0x10f   : > { %v1021_v46 = vpop.eup %1020  ;;  %v581_v48 = vmul.f32 %v1019_v42, %v549_v47  ;;  %v1266_v49 = vadd.f32 1.0, %v538_v10  ;;  %1040 = vrcp.f32 %v1260_v40 }
 0x110   : > { %v1023_v12 = vpop.eup %1022  ;;  %v589_v50 = vmul.f32 %v1021_v46, %v557_v51  ;;  %v1269_v52 = vadd.f32 1.0, %v546_v44  ;;  %v536_v53 = vmul.f32 %v520_v45, %v520_v45  ;;  %1042 = vrcp.f32 %v1263_v43 }
 0x111   : > { %v1025_v54 = vpop.eup %1024  ;;  %v597_v56 = vsub.f32 2.0, %v581_v48  ;;  %v579_v57 = vmul.f32 %v1023_v12, %v547_v55  ;;  %1044 = vrcp.f32 %v1266_v49 }
 0x112   : > { %v1027_v59 = vpop.eup %1026  ;;  %v605_v61 = vsub.f32 2.0, %v589_v50  ;;  %v587_v47 = vmul.f32 %v1025_v54, %v555_v58  ;;  %v1273_v62 = vadd.f32 1.0, %v536_v53  ;;  %1046 = vrcp.f32 %v1269_v52 }
 0x113   : > { %v1029_v0 = vpop.eup %1028  ;;  %v613_v51 = vmul.f32 %v1019_v42, %v597_v56  ;;  %v595_v3 = vsub.f32 2.0, %v579_v57  ;;  %v582_v5 = vmul.f32 %v1027_v59, %v550_v63 }
 0x114   : > { %v1031_v8 = vpop.eup %1030  ;;  %v621_v9 = vmul.f32 %v1021_v46, %v605_v61  ;;  %v603_v14 = vsub.f32 2.0, %v587_v47  ;;  %v590_v55 = vmul.f32 %v1029_v0, %v558_v4  ;;  %1048 = vrcp.f32 %v1273_v62 }
 0x115   : > { %v1033_v15 = vpop.eup %1032  ;;  %v629_v16 = vmul.f32 2.0, %v613_v51  ;;  %v611_v18 = vmul.f32 %v1023_v12, %v595_v3  ;;  %v598_v58 = vsub.f32 2.0, %v582_v5  ;;  %v580_v19 = vmul.f32 %v1031_v8, %v548_v13 }
 0x116   : > { %v637_v21 = vmul.f32 2.0, %v621_v9  ;;  %v619_v22 = vmul.f32 %v1025_v54, %v603_v14  ;;  %v606_v23 = vsub.f32 2.0, %v590_v55  ;;  %v588_v24 = vmul.f32 %v1033_v15, %v556_v17  ;;  %v1277_v29 = vpop.eup %1034 }
 0x117   : > { %v645_v63 = vsub.f32 1.0, %v629_v16  ;;  %v627_v30 = vmul.f32 2.0, %v611_v18  ;;  %v614_v35 = vmul.f32 %v1027_v59, %v598_v58  ;;  %v596_v38 = vsub.f32 2.0, %v580_v19  ;;  %v1037_v39 = vpop.eup %1036 }
 0x118   : > { %v653_v4 = vsub.f32 1.0, %v637_v21  ;;  %v635_v10 = vmul.f32 2.0, %v619_v22  ;;  %v622_v42 = vmul.f32 %v1029_v0, %v606_v23  ;;  %v604_v44 = vsub.f32 2.0, %v588_v24  ;;  %v1039_v45 = vpop.eup %1038 }
 0x119   : > { %v661_v46 = vmul.f32 %v645_v63, %v1180_v20  ;;  %v643_v13 = vsub.f32 1.0, %v627_v30  ;;  %v630_v48 = vmul.f32 2.0, %v614_v35  ;;  %v612_v12 = vmul.f32 %v1031_v8, %v596_v38  ;;  %v1041_v50 = vpop.eup %1040 }
 0x11a   : > { %v669_v17 = vmul.f32 %v653_v4, %v1185_v25  ;;  %v651_v53 = vsub.f32 1.0, %v635_v10  ;;  %v638_v54 = vmul.f32 2.0, %v622_v42  ;;  %v620_v56 = vmul.f32 %v1033_v15, %v604_v44  ;;  %v1043_v57 = vpop.eup %1042 }
 0x11b   : > { %v895_v59 = vpack.c.bf16 %v661_v46, %v661_v46  ;;  %v659_v20 = vmul.f32 %v643_v13, %v1188_v26  ;;  %v646_v61 = vsub.f32 1.0, %v630_v48  ;;  %v628_v47 = vmul.f32 2.0, %v612_v12  ;;  %v1045_v0 = vpop.eup %1044 }
 0x11c   : > { %v903_v51 = vpack.c.bf16 %v669_v17, %v669_v17  ;;  %v667_v3 = vmul.f32 %v651_v53, %v1194_v31  ;;  %v654_v5 = vsub.f32 1.0, %v638_v54  ;;  %v636_v8 = vmul.f32 2.0, %v620_v56  ;;  %v1047_v9 = vpop.eup %1046 }
 0x11d   : > { %742 = vst.msk [vmem:[%s1285_s11 + $0x8] sm:$0xf] %vm739_vm2, %v895_v59  ;;  %v893_v25 = vpack.c.bf16 %v659_v20, %v659_v20  ;;  %v662_v14 = vmul.f32 %v646_v61, %v1197_v32  ;;  %v644_v55 = vsub.f32 1.0, %v628_v47  ;;  %v585_v15 = vmul.f32 %v1037_v39, %v1256_v27 }
 0x11e   : > { %v1049_v26 = vpop.eup %1048  ;;  %750 = vst.msk [vmem:[%s1285_s11 + $0x28] sm:$0xf] %vm739_vm2, %v903_v51  ;;  %v901_v16 = vpack.c.bf16 %v667_v3, %v667_v3  ;;  %v670_v18 = vmul.f32 %v654_v5, %v1203_v36  ;;  %v652_v31 = vsub.f32 1.0, %v636_v8  ;;  %v593_v58 = vmul.f32 %v1039_v45, %v1258_v34 }
 0x11f   : > { %740 = vst.msk [vmem:[%s1285_s11] sm:$0xf] %vm739_vm2, %v893_v25  ;;  %v896_v19 = vpack.c.bf16 %v662_v14, %v662_v14  ;;  %v660_v21 = vmul.f32 %v644_v55, %v1206_v37  ;;  %v601_v32 = vsub.f32 2.0, %v585_v15  ;;  %v583_v22 = vmul.f32 %v1041_v50, %v1260_v40 }
 0x120   : > { %748 = vst.msk [vmem:[%s1285_s11 + $0x20] sm:$0xf] %vm739_vm2, %v901_v16  ;;  %v904_v27 = vpack.c.bf16 %v670_v18, %v670_v18  ;;  %v668_v23 = vmul.f32 %v652_v31, %v1211_v41  ;;  %v609_v24 = vsub.f32 2.0, %v593_v58  ;;  %v591_v36 = vmul.f32 %v1043_v57, %v1263_v43 }
 0x121   : > { %743 = vst.msk [vmem:[%s1285_s11 + $0xc] sm:$0xf] %vm739_vm2, %v896_v19  ;;  %v894_v34 = vpack.c.bf16 %v660_v21, %v660_v21  ;;  %v617_v63 = vmul.f32 %v1037_v39, %v601_v32  ;;  %v599_v30 = vsub.f32 2.0, %v583_v22  ;;  %v586_v37 = vmul.f32 %v1045_v0, %v1266_v49 }
 0x122   : > { %751 = vst.msk [vmem:[%s1285_s11 + $0x2c] sm:$0xf] %vm739_vm2, %v904_v27  ;;  %v902_v40 = vpack.c.bf16 %v668_v23, %v668_v23  ;;  %v625_v35 = vmul.f32 %v1039_v45, %v609_v24  ;;  %v607_v38 = vsub.f32 2.0, %v591_v36  ;;  %v594_v4 = vmul.f32 %v1047_v9, %v1269_v52 }
 0x123   : > { %741 = vst.msk [vmem:[%s1285_s11 + $0x4] sm:$0xf] %vm739_vm2, %v894_v34  ;;  %v633_v41 = vmul.f32 2.0, %v617_v63  ;;  %v615_v10 = vmul.f32 %v1041_v50, %v599_v30  ;;  %v602_v43 = vsub.f32 2.0, %v586_v37  ;;  %v584_v42 = vmul.f32 %v1049_v26, %v1273_v62 }
 0x124   : > { %749 = vst.msk [vmem:[%s1285_s11 + $0x24] sm:$0xf] %vm739_vm2, %v902_v40  ;;  %v641_v39 = vmul.f32 2.0, %v625_v35  ;;  %v623_v44 = vmul.f32 %v1043_v57, %v607_v38  ;;  %v610_v46 = vsub.f32 2.0, %v594_v4  ;;  %v528_v49 = vadd.f32 1.0, %v1277_v29 }
 0x125   : > { %v649_v13 = vsub.f32 1.0, %v633_v41  ;;  %v631_v48 = vmul.f32 2.0, %v615_v10  ;;  %v618_v45 = vmul.f32 %v1045_v0, %v602_v43  ;;  %v600_v12 = vsub.f32 2.0, %v584_v42 }
 0x126   : > { %v657_v17 = vsub.f32 1.0, %v641_v39  ;;  %v639_v52 = vmul.f32 2.0, %v623_v44  ;;  %v626_v53 = vmul.f32 %v1047_v9, %v610_v46  ;;  %v544_v54 = vmul.f32 %v528_v49, %v528_v49 }
 0x127   : > { %v665_v50 = vmul.f32 %v649_v13, %v1220_v60  ;;  %v647_v56 = vsub.f32 1.0, %v631_v48  ;;  %v634_v62 = vmul.f32 2.0, %v618_v45  ;;  %v616_v59 = vmul.f32 %v1049_v26, %v600_v12 }
 0x128   : > { %v673_v20 = vmul.f32 %v657_v17, %v1225_v1  ;;  %v655_v57 = vsub.f32 1.0, %v639_v52  ;;  %v642_v61 = vmul.f32 2.0, %v626_v53  ;;  %v560_v29 = vadd.f32 1.0, %v544_v54 }
 0x129   : > { %v899_v47 = vpack.c.bf16 %v665_v50, %v665_v50  ;;  %v663_v0 = vmul.f32 %v647_v56, %v1228_v2  ;;  %v650_v51 = vsub.f32 1.0, %v634_v62  ;;  %v632_v3 = vmul.f32 2.0, %v616_v59 }
 0x12a   : > { %v907_v5 = vpack.c.bf16 %v673_v20, %v673_v20  ;;  %v671_v60 = vmul.f32 %v655_v57, %v1233_v6  ;;  %v658_v8 = vsub.f32 1.0, %v642_v61  ;;  %1050 = vrcp.f32 %v560_v29 }
 0x12b   : > { %746 = vst.msk [vmem:[%s1285_s11 + $0x18] sm:$0xf] %vm739_vm2, %v899_v47  ;;  %v897_v1 = vpack.c.bf16 %v663_v0, %v663_v0  ;;  %v666_v9 = vmul.f32 %v650_v51, %v1236_v7  ;;  %v648_v25 = vsub.f32 1.0, %v632_v3 }
 0x12c   : > { %754 = vst.msk [vmem:[%s1285_s11 + $0x38] sm:$0xf] %vm739_vm2, %v907_v5  ;;  %v905_v2 = vpack.c.bf16 %v671_v60, %v671_v60  ;;  %v674_v14 = vmul.f32 %v658_v8, %v1241_v11 }
 0x12d   : > { %744 = vst.msk [vmem:[%s1285_s11 + $0x10] sm:$0xf] %vm739_vm2, %v897_v1  ;;  %v900_v55 = vpack.c.bf16 %v666_v9, %v666_v9  ;;  %v664_v6 = vmul.f32 %v648_v25, %v1249_v28 }
 0x12e   : > { %752 = vst.msk [vmem:[%s1285_s11 + $0x30] sm:$0xf] %vm739_vm2, %v905_v2  ;;  %v908_v15 = vpack.c.bf16 %v674_v14, %v674_v14 }
 0x12f   : > { %747 = vst.msk [vmem:[%s1285_s11 + $0x1c] sm:$0xf] %vm739_vm2, %v900_v55  ;;  %v898_v26 = vpack.c.bf16 %v664_v6, %v664_v6 }
 0x130   : > { %755 = vst.msk [vmem:[%s1285_s11 + $0x3c] sm:$0xf] %vm739_vm2, %v908_v15 }
 0x131   : > { %745 = vst.msk [vmem:[%s1285_s11 + $0x14] sm:$0xf] %vm739_vm2, %v898_v26 }
 0x134   : > { %v1051_v7 = vpop.eup %1050 }
 0x135   : > { %v592_v16 = vmul.f32 %v1051_v7, %v560_v29 }
 0x137   : > { %v608_v18 = vsub.f32 2.0, %v592_v16 }
 0x139   : > { %v624_v11 = vmul.f32 %v1051_v7, %v608_v18 }
 0x13b   : > { %v640_v31 = vmul.f32 2.0, %v624_v11 }
 0x13d   : > { %v656_v58 = vsub.f32 1.0, %v640_v31 }
 0x13f   : > { %v672_v19 = vmul.f32 %v656_v58, %v1252_v33 }
 0x141   : > { %v906_v21 = vpack.c.bf16 %v672_v19, %v672_v19 }
 0x143   : > { %753 = vst.msk [vmem:[%s1285_s11 + $0x34] sm:$0xf] %vm739_vm2, %v906_v21 }
 0x144 PF: > { %s14_s19 = sadd.s32 1, %s1090_s19   ;;  %s1362_s15 = smov %s1082_s17 }
 0x145   : > { %p11_p7 = scmp.ge.s32.totalorder %s14_s19, 6   ;;  %s1363_s16 = smov %s1086_s18 }
 0x146   : > { %s1364_s17 = smov %s1367_s20  ;;  %s1365_s18 = smov %s1371_s21 }
 0x147   :  { %13 = sbr.rel (!%p11_p7) target bundleno = 3 (0x3), region = 66 }

// kernel: sppf_forward.5
= control target key start
LH: loop header
LB: loop body
LE: loop exit
PB: predicated region body
PF: predicated region fallthrough
CT: control target
= control target key end

     0   :  { %s3206_s25 = smov 0   ;;  %s3208_s26 = smov 0   ;;  %s3819_s0 = inlined_call_operand.vmem [shape: bf16[2,256,2], index: 0, kind: input, shape index: {}]   ;;  %s3820_s1 = inlined_call_operand.vmem [shape: bf16[2,144,2], index: 1, kind: input, shape index: {}]   ;;  %s3821_s2 = inlined_call_operand.vmem [shape: bf16[2,64,2], index: 2, kind: input, shape index: {}]   ;;  %s3822_s3 = inlined_call_operand.vmem [shape: bf16[2,16,2], index: 3, kind: input, shape index: {}]   ;;  %s3823_s4 = inlined_call_operand.vmem [shape: s32[256,1], index: 4, kind: input, shape index: {}]   ;;  %s3824_s5 = inlined_call_operand.vmem [shape: s32[256,1], index: 5, kind: input, shape index: {}]   ;;  %s3825_s6 = inlined_call_operand.vmem [shape: s32[256,1], index: 6, kind: input, shape index: {}]   ;;  %s3826_s7 = inlined_call_operand.vmem [shape: bf16[2,4], index: 7, kind: input, shape index: {}]   ;;  %s3827_s8 = inlined_call_operand.vmem [shape: bf16[2,4], index: 8, kind: input, shape index: {}]   ;;  %s3828_s9 = inlined_call_operand.vmem [shape: bf16[2,4], index: 9, kind: input, shape index: {}]   ;;  %s3829_s10 = inlined_call_operand.vmem [shape: bf16[2,4], index: 10, kind: input, shape index: {}]   ;;  %s3830_s11 = inlined_call_operand.vmem [shape: f32[1,4], index: 11, kind: input, shape index: {}]   ;;  %s3831_s12 = inlined_call_operand.vmem [shape: f32[1,4], index: 12, kind: input, shape index: {}]   ;;  %s3832_s13 = inlined_call_operand.vmem [shape: f32[2,256,4], index: 13, kind: output, shape index: {}]  }
   0x1   :  { %3833 = sst [smem:[#allocation2_spill]] %s3820_s1  ;;  %s3210_s27 = smov 0  }
   0x2   :  { %s3212_s28 = smov 0   ;;  %s3214_s29 = smov 0  }
   0x3 LB: > { %s32_s30 = sadd.s32 1, %s3123_s27  ;;  %s35_s14 = sadd.s32 1, %s3127_s28  ;;  %s3131_s29 = sphi %s3214_s29, %s23_s29   ;;  %s3127_s28 = sphi %s3212_s28, %s3838_s28   ;;  %s3123_s27 = sphi %s3210_s27, %s3837_s27   ;;  %s3119_s26 = sphi %s3208_s26, %s3836_s26   ;;  %s3115_s25 = sphi %s3206_s25, %s3835_s25  }
   0x4   : > { %p33_p0 = scmp.ge.s32.totalorder %s32_s30, 2  ;;  %p2554_p1 = scmp.ge.s32.totalorder %s3131_s29, 1 }
   0x5   : > { %p471_p2 = scmp.lt.s32.totalorder %s3131_s29, 5 }
   0x6   : > { %s3840_s30 = smov (%p33_p0, %s32_s30), 0  ;;  %s3842_s14 = smov (!%p33_p0, %s35_s14), %s3127_s28 }
   0x7   : > { %p472_p3 = pnand %p2554_p1, %p471_p2  ;;  %p37_p4 = scmp.ge.s32.totalorder %s3842_s14, 2 }
   0x8   : > { %s2555_s15 = sshll.u32 (!%p472_p3), %s3115_s25, 4  ;;  %v3133_v0 = vmov (!%p472_p3), 0   ;;  %p554_p6 = scmp.lt.s32.totalorder (!%p472_p3), %s3119_s26, 1  ;;  %v639_v60 = vlaneseq (!%p472_p3)  ;;  %vm874_vm4 = vcmask (!%p472_p3), 130048  }
   0x9   : > { %s3844_s14 = smov (%p37_p4, %s3842_s14), 0  ;;  %475 = sbr.rel (%p472_p3) target bundleno = 799 (0x31f), region = 72 }
   0xa   : > { %3006 = vset.pattern.permute.xlu1 (!%p472_p3), %v3133_v0  ;;  %3005 = vset.pattern.permute.xlu0 (!%p472_p3), %v3133_v0  ;;  %p556_p5 = scmp.lt.s32.totalorder (!%p472_p3), %s2555_s15, 31  ;;  %s3834_s1 = sld [smem:[#allocation2_spill]] (!%p472_p3)  ;;  %v3366_v61 = vand.u32 (!%p472_p3), 127, %v639_v60 }
   0xb   : > { %899 = vmatprep.subr.bf16.mxu0 (!%p472_p3), %v3133_v0 }
   0xc   : > { %v3369_v62 = vadd.s32 (!%p472_p3), 128, %v3366_v61 }
  0x10   : > { %s3846_s15 = smov (!%p556_p5, %s2555_s15), 31  ;;  %s3848_s26 = smov (!%p554_p6, %s3119_s26), 1 }
  0x11   : > { %s3244_s16 = sshll.u32 %s3846_s15, 3  ;;  %s2961_s20 = smul.u32 72, %s3848_s26 }
  0x12   : > { %s3250_s19 = scalar_lea.vmem %s3823_s4, %s3244_s16  ;;  %s3288_s17 = scalar_lea.vmem %s3824_s5, %s3244_s16 }
  0x13   : > { %v625_v1 = vld [vmem:[%s3250_s19 + $0x10] sm:$0xff]  ;;  %v623_v2 = vld [vmem:[%s3250_s19] sm:$0xff]  ;;  %v626_v3 = vld [vmem:[%s3250_s19 + $0x18] sm:$0xff]  ;;  %s3268_s23 = scalar_lea.vmem %s3834_s1, %s2961_s20  ;;  %s2556_s18 = sshll.u32 %s3848_s26, 5 }
  0x14   : > { %649 = vperm.xlu1 %3006, %v625_v1   ;;  %643 = vperm.xlu0 %3005, %v623_v2   ;;  %v624_v4 = vld [vmem:[%s3250_s19 + $0x8] sm:$0xff]  ;;  %v627_v6 = vld [vmem:[%s3250_s19 + $0x20] sm:$0xff]  ;;  %v630_v7 = vld [vmem:[%s3250_s19 + $0x38] sm:$0xff]  ;;  %s3311_s22 = scalar_lea.vmem %s3821_s2, %s2556_s18  ;;  %s3340_s20 = scalar_lea.vmem %s3825_s6, %s3244_s16  ;;  %v3134_v1 = vmov 0.0  }
  0x15   : > { %v628_v5 = vld [vmem:[%s3250_s19 + $0x28] sm:$0xff]  ;;  %v629_v8 = vld [vmem:[%s3250_s19 + $0x30] sm:$0xff]  ;;  %v631_v10 = vld [vmem:[%s3250_s19 + $0x40] sm:$0xff]  ;;  %s2735_s16 = sshll.u32 %s3848_s26, 3 }
  0x16   : > { %v632_v9 = vld [vmem:[%s3250_s19 + $0x48] sm:$0xff]  ;;  %v634_v11 = vld [vmem:[%s3250_s19 + $0x58] sm:$0xff]  ;;  %v3007_v12 = vld [vmem:[%s3268_s23] sm:$0xff]  }
  0x17   : > { %v633_v13 = vld [vmem:[%s3250_s19 + $0x50] sm:$0xff]  ;;  %900 = vmatpush1.bf16.msra.mxu0 %v3007_v12  ;;  %v3008_v14 = vld [vmem:[%s3268_s23 + $0x8] sm:$0xff]   ;;  %v635_v16 = vld [vmem:[%s3250_s19 + $0x60] sm:$0xff] }
  0x18   : > { %652 = vperm.xlu1 %3006, %v626_v3   ;;  %646 = vperm.xlu0 %3005, %v624_v4   ;;  %v636_v15 = vld [vmem:[%s3250_s19 + $0x68] sm:$0xff]  ;;  %v3009_v17 = vld [vmem:[%s3268_s23 + $0x10] sm:$0xff]   ;;  %v638_v18 = vld [vmem:[%s3250_s19 + $0x78] sm:$0xff] }
  0x19   : > { %901 = vmatprep.subr.bf16.mxu0 %v3133_v0  ;;  %v637_v19 = vld [vmem:[%s3250_s19 + $0x70] sm:$0xff]  ;;  %v3010_v20 = vld [vmem:[%s3268_s23 + $0x18] sm:$0xff]   ;;  %v1005_v21 = vld [vmem:[%s3288_s17 + $0x8] sm:$0xff]  ;;  %s3306_s19 = sadd.s32 %s2556_s18, %s3846_s15 }
  0x1a   : > { %v1004_v22 = vld [vmem:[%s3288_s17] sm:$0xff]  ;;  %v1007_v24 = vld [vmem:[%s3288_s17 + $0x18] sm:$0xff]  ;;  %v1006_v25 = vld [vmem:[%s3288_s17 + $0x10] sm:$0xff]  ;;  %s2557_s24 = sshll.u32 %s3306_s19, 2  ;;  %s2571_s26 = sshll.u32 %s3306_s19, 3 }
  0x1b   : > { %902 = vmatpush1.bf16.msra.mxu0 %v3008_v14  ;;  %v3011_v23 = vld [vmem:[%s3268_s23 + $0x20] sm:$0xff]   ;;  %v3012_v26 = vld [vmem:[%s3268_s23 + $0x28] sm:$0xff]   ;;  %v3013_v29 = vld [vmem:[%s3268_s23 + $0x30] sm:$0xff]   ;;  %s3320_s1 = scalar_lea.vmem %s3819_s0, %s2557_s24  ;;  %s577_s24 = scalar_lea.vmem %s3822_s3, %s2735_s16 }
  0x1c   : > { %658 = vperm.xlu1 %3006, %v628_v5   ;;  %655 = vperm.xlu0 %3005, %v627_v6   ;;  %v1009_v27 = vld [vmem:[%s3288_s17 + $0x28] sm:$0xff]  ;;  %v1008_v28 = vld [vmem:[%s3288_s17 + $0x20] sm:$0xff]  ;;  %v1011_v30 = vld [vmem:[%s3288_s17 + $0x38] sm:$0xff]  ;;  %s3745_s19 = scalar_lea.vmem %s3832_s13, %s2571_s26 }
  0x1d   : > { %903 = vmatprep.subr.bf16.mxu0 %v3133_v0  ;;  %v1010_v31 = vld [vmem:[%s3288_s17 + $0x30] sm:$0xff]  ;;  %v3014_v32 = vld [vmem:[%s3268_s23 + $0x38] sm:$0xff]   ;;  %v1013_v33 = vld [vmem:[%s3288_s17 + $0x48] sm:$0xff] }
  0x1e   : > { %v1012_v34 = vld [vmem:[%s3288_s17 + $0x40] sm:$0xff]  ;;  %v1015_v37 = vld [vmem:[%s3288_s17 + $0x58] sm:$0xff]  ;;  %v1014_v38 = vld [vmem:[%s3288_s17 + $0x50] sm:$0xff] }
  0x1f   : > { %904 = vmatpush1.bf16.msra.mxu0 %v3009_v17  ;;  %v3015_v35 = vld [vmem:[%s3268_s23 + $0x40] sm:$0xff]   ;;  %v1017_v39 = vld [vmem:[%s3288_s17 + $0x68] sm:$0xff]  ;;  %v1019_v41 = vld [vmem:[%s3288_s17 + $0x78] sm:$0xff] }
  0x20   : > { %664 = vperm.xlu1 %3006, %v630_v7   ;;  %661 = vperm.xlu0 %3005, %v629_v8   ;;  %v3326_v36 = vld [vmem:[%s3311_s22] sm:$0xff]   ;;  %v1018_v42 = vld [vmem:[%s3288_s17 + $0x70] sm:$0xff]  ;;  %v1287_v43 = vld [vmem:[%s3340_s20 + $0x8] sm:$0xff] }
  0x21   : > { %905 = vmatprep.subr.bf16.mxu0 %v3133_v0  ;;  %v1016_v40 = vld [vmem:[%s3288_s17 + $0x60] sm:$0xff]  ;;  %v1289_v45 = vld [vmem:[%s3340_s20 + $0x18] sm:$0xff]  ;;  %v1288_v46 = vld [vmem:[%s3340_s20 + $0x10] sm:$0xff] }
  0x22   : > { %v1286_v44 = vld [vmem:[%s3340_s20] sm:$0xff]  ;;  %v1291_v47 = vld [vmem:[%s3340_s20 + $0x28] sm:$0xff]  ;;  %v1293_v49 = vld [vmem:[%s3340_s20 + $0x38] sm:$0xff] }
  0x23   : > { %906 = vmatpush1.bf16.msra.mxu0 %v3010_v20  ;;  %v1290_v48 = vld [vmem:[%s3340_s20 + $0x20] sm:$0xff]  ;;  %v1292_v50 = vld [vmem:[%s3340_s20 + $0x30] sm:$0xff]  ;;  %v1295_v51 = vld [vmem:[%s3340_s20 + $0x48] sm:$0xff] }
  0x24   : > { %670 = vperm.xlu1 %3006, %v632_v9   ;;  %667 = vperm.xlu0 %3005, %v631_v10   ;;  %v1294_v52 = vld [vmem:[%s3340_s20 + $0x40] sm:$0xff]  ;;  %v1297_v53 = vld [vmem:[%s3340_s20 + $0x58] sm:$0xff]  ;;  %v1296_v54 = vld [vmem:[%s3340_s20 + $0x50] sm:$0xff] }
  0x25   : > { %907 = vmatprep.subr.bf16.mxu0 %v3133_v0  ;;  %v3358_v55 = vld [vmem:[%s577_s24] sm:$0xff]   ;;  %v1299_v56 = vld [vmem:[%s3340_s20 + $0x68] sm:$0xff]  ;;  %v1301_v58 = vld [vmem:[%s3340_s20 + $0x78] sm:$0xff] }
  0x26   : > { %v1298_v57 = vld [vmem:[%s3340_s20 + $0x60] sm:$0xff]  ;;  %2907 = vmatprep.subr.bf16.mxu1 %v3358_v55  ;;  %v1300_v59 = vld [vmem:[%s3340_s20 + $0x70] sm:$0xff]  ;;  %v3017_v12 = vld [vmem:[%s3311_s22 + $0x8] sm:$0xff]  }
  0x27   : > { %908 = vmatpush1.bf16.msra.mxu0 %v3011_v23  ;;  %2908 = vmatpush3.bf16.msra.mxu1 %v3358_v55 }
  0x28   : > { %676 = vperm.xlu1 %3006, %v634_v11   ;;  %673 = vperm.xlu0 %3005, %v633_v13   ;;  %v3135_v13 = vmov 1.0|1.0  }
  0x29   : > { %909 = vmatprep.subr.bf16.mxu0 %v3133_v0 }
  0x2b   : > { %910 = vmatpush1.bf16.msra.mxu0 %v3012_v26 }
  0x2c   : > { %682 = vperm.xlu1 %3006, %v636_v15   ;;  %679 = vperm.xlu0 %3005, %v635_v16   ;;  %v3018_v16 = vld [vmem:[%s3311_s22 + $0x10] sm:$0xff]  }
  0x2d   : > { %911 = vmatprep.subr.bf16.mxu0 %v3133_v0 }
  0x2f   : > { %912 = vmatpush1.bf16.msra.mxu0 %v3013_v29 }
  0x30   : > { %688 = vperm.xlu1 %3006, %v638_v18   ;;  %685 = vperm.xlu0 %3005, %v637_v19  }
  0x31   : > { %913 = vmatprep.subr.bf16.mxu0 %v3133_v0 }
  0x33   : > { %914 = vmatpush1.bf16.msra.mxu0 %v3014_v32 }
  0x34   : > { %1024 = vperm.xlu1 %3006, %v1005_v21   ;;  %1021 = vperm.xlu0 %3005, %v1004_v22   ;;  %v3019_v21 = vld [vmem:[%s3311_s22 + $0x18] sm:$0xff]  }
  0x35   : > { %915 = vmatprep.subr.bf16.mxu0 %v3133_v0 }
  0x37   : > { %916 = vmatpush1.bf16.msra.mxu0 %v3015_v35 }
  0x38   : > { %1030 = vperm.xlu1 %3006, %v1007_v24   ;;  %1027 = vperm.xlu0 %3005, %v1006_v25  }
  0x39   : > { %2793 = vmatprep.subr.bf16.mxu0 %v3326_v36 }
  0x3c   : > { %1036 = vperm.xlu1 %3006, %v1009_v27   ;;  %1033 = vperm.xlu0 %3005, %v1008_v28  }
  0x40   : > { %1042 = vperm.xlu1 %3006, %v1011_v30   ;;  %1039 = vperm.xlu0 %3005, %v1010_v31  }
  0x44   : > { %1048 = vperm.xlu1 %3006, %v1013_v33   ;;  %1045 = vperm.xlu0 %3005, %v1012_v34  }
  0x48   : > { %1054 = vperm.xlu1 %3006, %v1015_v37   ;;  %1051 = vperm.xlu0 %3005, %v1014_v38  }
  0x4c   : > { %1060 = vperm.xlu1 %3006, %v1017_v39   ;;  %1057 = vperm.xlu0 %3005, %v1016_v40  }
  0x50   : > { %1066 = vperm.xlu1 %3006, %v1019_v41   ;;  %1063 = vperm.xlu0 %3005, %v1018_v42  }
  0x54   : > { %1306 = vperm.xlu1 %3006, %v1287_v43   ;;  %1303 = vperm.xlu0 %3005, %v1286_v44  }
  0x58   : > { %1312 = vperm.xlu1 %3006, %v1289_v45   ;;  %1309 = vperm.xlu0 %3005, %v1288_v46  }
  0x5c   : > { %1318 = vperm.xlu1 %3006, %v1291_v47   ;;  %1315 = vperm.xlu0 %3005, %v1290_v48  }
  0x60   : > { %1324 = vperm.xlu1 %3006, %v1293_v49   ;;  %1321 = vperm.xlu0 %3005, %v1292_v50  }
  0x64   : > { %1330 = vperm.xlu1 %3006, %v1295_v51   ;;  %1327 = vperm.xlu0 %3005, %v1294_v52  }
  0x68   : > { %1336 = vperm.xlu1 %3006, %v1297_v53   ;;  %1333 = vperm.xlu0 %3005, %v1296_v54  }
  0x6c   : > { %1342 = vperm.xlu1 %3006, %v1299_v56   ;;  %1339 = vperm.xlu0 %3005, %v1298_v57  }
  0x70   : > { %1348 = vperm.xlu1 %3006, %v1301_v58   ;;  %1345 = vperm.xlu0 %3005, %v1300_v59  }
  0x93   : > { %v650_v63 = vpop.permute.xlu1 %649  ;;  %v644_v0 = vpop.permute.xlu0 %643 }
  0x94   : > { %vm695_vm0 = vcmp.eq.s32.totalorder %v3369_v62, %v650_v63  ;;  %vm691_vm1 = vcmp.eq.s32.totalorder %v3369_v62, %v644_v0  ;;  %vm690_vm6 = vcmp.eq.s32.totalorder %v3366_v61, %v644_v0  ;;  %vm694_vm10 = vcmp.eq.s32.totalorder %v3366_v61, %v650_v63 }
  0x95   : > { %v2577_v2 = vsel %vm695_vm0, 1.0, %v3134_v1  ;;  %v2573_v6 = vsel %vm691_vm1, 1.0, %v3134_v1 }
  0x97   : > { %v653_v3 = vpop.permute.xlu1 %652  ;;  %v647_v4 = vpop.permute.xlu0 %646 }
  0x98   : > { %vm697_vm2 = vcmp.eq.s32.totalorder %v3369_v62, %v653_v3  ;;  %vm693_vm3 = vcmp.eq.s32.totalorder %v3369_v62, %v647_v4  ;;  %vm692_vm5 = vcmp.eq.s32.totalorder %v3366_v61, %v647_v4  ;;  %vm696_vm11 = vcmp.eq.s32.totalorder %v3366_v61, %v653_v3 }
  0x99   : > { %v2579_v5 = vsel %vm697_vm2, 1.0, %v3134_v1  ;;  %v2575_v7 = vsel %vm693_vm3, 1.0, %v3134_v1  ;;  %vm2614_vm7 = vmpackc.low %vm692_vm5, %vm690_vm6 }
  0x9a   : > { %v789_v8 = vpack.c.bf16 %v2579_v5, %v2577_v2  ;;  %v787_v9 = vpack.c.bf16 %v2575_v7, %v2573_v6  ;;  %vm2617_vm12 = vmpackc.low %vm696_vm11, %vm694_vm10 }
  0x9b   : > { %v659_v10 = vpop.permute.xlu1 %658  ;;  %v656_v11 = vpop.permute.xlu0 %655 }
  0x9c   : > { %2613 = vmatprep.mubr.msk.bf16.mxu0 %vm874_vm4, %v787_v9  ;;  %vm701_vm8 = vcmp.eq.s32.totalorder %v3369_v62, %v659_v10  ;;  %vm699_vm9 = vcmp.eq.s32.totalorder %v3369_v62, %v656_v11  ;;  %vm700_vm15 = vcmp.eq.s32.totalorder %v3366_v61, %v659_v10  ;;  %vm698_vm0 = vcmp.eq.s32.totalorder %v3366_v61, %v656_v11 }
  0x9d   : > { %2615 = vmatmul.mubr.msk.bf16.vlgmr.msra.gmra.mrb[0].mxu0 %vm2614_vm7, %v3135_v13  ;;  %v2583_v17 = vsel %vm701_vm8, 1.0, %v3134_v1  ;;  %v2581_v18 = vsel %vm699_vm9, 1.0, %v3134_v1  ;;  %vm2620_vm1 = vmpackc.low %vm700_vm15, %vm698_vm0 }
  0x9e   : > { %2616 = vmatprep.mubr.msk.bf16.mxu0 %vm874_vm4, %v789_v8  ;;  %2794 = vmatpush3.bf16.msra.mxu0 %v3326_v36  ;;  %v791_v22 = vpack.c.bf16 %v2583_v17, %v2581_v18 }
  0x9f   : > { %v665_v14 = vpop.permute.xlu1 %664  ;;  %v662_v15 = vpop.permute.xlu0 %661  ;;  %2795 = vmatprep.subr.bf16.mxu0 %v3017_v12 }
  0xa0   : > { %vm705_vm13 = vcmp.eq.s32.totalorder %v3369_v62, %v665_v14  ;;  %vm703_vm14 = vcmp.eq.s32.totalorder %v3369_v62, %v662_v15  ;;  %vm704_vm5 = vcmp.eq.s32.totalorder %v3366_v61, %v665_v14  ;;  %vm702_vm6 = vcmp.eq.s32.totalorder %v3366_v61, %v662_v15 }
  0xa1   : > { %v2587_v25 = vsel %vm705_vm13, 1.0, %v3134_v1  ;;  %v2585_v26 = vsel %vm703_vm14, 1.0, %v3134_v1  ;;  %vm2623_vm7 = vmpackc.low %vm704_vm5, %vm702_vm6 }
  0xa2   : > { %2796 = vmatpush3.bf16.msra.mxu0 %v3017_v12  ;;  %v793_v29 = vpack.c.bf16 %v2587_v25, %v2585_v26 }
  0xa3   : > { %v671_v19 = vpop.permute.xlu1 %670  ;;  %v668_v20 = vpop.permute.xlu0 %667  ;;  %2797 = vmatprep.subr.bf16.mxu0 %v3018_v16 }
  0xa4   : > { %vm709_vm2 = vcmp.eq.s32.totalorder %v3369_v62, %v671_v19  ;;  %vm707_vm3 = vcmp.eq.s32.totalorder %v3369_v62, %v668_v20  ;;  %vm708_vm10 = vcmp.eq.s32.totalorder %v3366_v61, %v671_v19  ;;  %vm706_vm11 = vcmp.eq.s32.totalorder %v3366_v61, %v668_v20 }
  0xa5   : > { %2618 = vmatmul.mubr.msk.bf16.gmra.mrb[4].mxu0 %vm2617_vm12, %v3135_v13  ;;  %v2591_v32 = vsel %vm709_vm2, 1.0, %v3134_v1  ;;  %v2589_v33 = vsel %vm707_vm3, 1.0, %v3134_v1  ;;  %vm2626_vm12 = vmpackc.low %vm708_vm10, %vm706_vm11 }
  0xa6   : > { %2619 = vmatprep.mubr.msk.bf16.mxu0 %vm874_vm4, %v791_v22  ;;  %2798 = vmatpush3.bf16.msra.mxu0 %v3018_v16  ;;  %v795_v36 = vpack.c.bf16 %v2591_v32, %v2589_v33 }
  0xa7   : > { %v677_v23 = vpop.permute.xlu1 %676  ;;  %v674_v24 = vpop.permute.xlu0 %673  ;;  %2799 = vmatprep.subr.bf16.mxu0 %v3019_v21 }
  0xa8   : > { %vm713_vm8 = vcmp.eq.s32.totalorder %v3369_v62, %v677_v23  ;;  %vm711_vm9 = vcmp.eq.s32.totalorder %v3369_v62, %v674_v24  ;;  %vm712_vm15 = vcmp.eq.s32.totalorder %v3366_v61, %v677_v23  ;;  %vm710_vm0 = vcmp.eq.s32.totalorder %v3366_v61, %v674_v24 }
  0xa9   : > { %v2595_v39 = vsel %vm713_vm8, 1.0, %v3134_v1  ;;  %v2593_v40 = vsel %vm711_vm9, 1.0, %v3134_v1 }
  0xaa   : > { %2800 = vmatpush3.bf16.msra.mxu0 %v3019_v21  ;;  %v797_v43 = vpack.c.bf16 %v2595_v39, %v2593_v40 }
  0xab   : > { %v683_v27 = vpop.permute.xlu1 %682  ;;  %v680_v28 = vpop.permute.xlu0 %679  ;;  %2817 = vmatprep.subr.bf16.mxu0 %v3358_v55 }
  0xac   : > { %vm717_vm13 = vcmp.eq.s32.totalorder %v3369_v62, %v683_v27  ;;  %vm715_vm14 = vcmp.eq.s32.totalorder %v3369_v62, %v680_v28  ;;  %vm716_vm5 = vcmp.eq.s32.totalorder %v3366_v61, %v683_v27  ;;  %vm714_vm6 = vcmp.eq.s32.totalorder %v3366_v61, %v680_v28 }
  0xad   : > { %2621 = vmatmul.mubr.msk.bf16.gmra.mrb[8].mxu0 %vm2620_vm1, %v3135_v13  ;;  %v2599_v46 = vsel %vm717_vm13, 1.0, %v3134_v1  ;;  %v2597_v47 = vsel %vm715_vm14, 1.0, %v3134_v1  ;;  %vm2629_vm1 = vmpackc.low %vm712_vm15, %vm710_vm0 }
  0xae   : > { %2622 = vmatprep.mubr.msk.bf16.mxu0 %vm874_vm4, %v793_v29  ;;  %v799_v50 = vpack.c.bf16 %v2599_v46, %v2597_v47 }
  0xaf   : > { %v3407_v30 = vpop.permute.xlu1 %688  ;;  %v3409_v31 = vpop.permute.xlu0 %685 }
  0xb0   : > { %vm721_vm2 = vcmp.eq.s32.totalorder %v3369_v62, %v3407_v30  ;;  %vm719_vm3 = vcmp.eq.s32.totalorder %v3369_v62, %v3409_v31  ;;  %vm720_vm10 = vcmp.eq.s32.totalorder %v3366_v61, %v3407_v30  ;;  %vm718_vm11 = vcmp.eq.s32.totalorder %v3366_v61, %v3409_v31 }
  0xb1   : > { %v2603_v53 = vsel %vm721_vm2, 1.0, %v3134_v1  ;;  %v2601_v54 = vsel %vm719_vm3, 1.0, %v3134_v1  ;;  %vm2635_vm13 = vmpackc.low %vm720_vm10, %vm718_vm11 }
  0xb2   : > { %v801_v58 = vpack.c.bf16 %v2603_v53, %v2601_v54 }
  0xb3   : > { %v1025_v34 = vpop.permute.xlu1 %1024  ;;  %v1022_v35 = vpop.permute.xlu0 %1021 }
  0xb4   : > { %vm1069_vm8 = vcmp.eq.s32.totalorder %v3366_v61, %v1025_v34  ;;  %vm1068_vm9 = vcmp.eq.s32.totalorder %v3366_v61, %v1022_v35 }
  0xb5   : > { %2624 = vmatmul.mubr.msk.bf16.gmra.mrb[12].mxu0 %vm2623_vm7, %v3135_v13  ;;  %vm2632_vm7 = vmpackc.low %vm716_vm5, %vm714_vm6  ;;  %v2638_v62 = vsel %vm1069_vm8, 1.0, %v3134_v1  ;;  %v2637_v63 = vsel %vm1068_vm9, 1.0, %v3134_v1 }
  0xb6   : > { %2625 = vmatprep.mubr.msk.bf16.mxu0 %vm874_vm4, %v795_v36  ;;  %v1116_v3 = vpack.c.bf16 %v2638_v62, %v2637_v63 }
  0xb7   : > { %v1031_v37 = vpop.permute.xlu1 %1030  ;;  %v1028_v38 = vpop.permute.xlu0 %1027 }
  0xb8   : > { %vm1071_vm14 = vcmp.eq.s32.totalorder %v3366_v61, %v1031_v37  ;;  %vm1070_vm15 = vcmp.eq.s32.totalorder %v3366_v61, %v1028_v38 }
  0xb9   : > { %v2640_v6 = vsel %vm1071_vm14, 1.0, %v3134_v1  ;;  %v2639_v7 = vsel %vm1070_vm15, 1.0, %v3134_v1 }
  0xba   : > { %v1117_v10 = vpack.c.bf16 %v2640_v6, %v2639_v7 }
  0xbb   : > { %v1037_v41 = vpop.permute.xlu1 %1036  ;;  %v1034_v42 = vpop.permute.xlu0 %1033 }
  0xbc   : > { %vm1073_vm0 = vcmp.eq.s32.totalorder %v3366_v61, %v1037_v41 }
  0xbd   : > { %2627 = vmatmul.mubr.msk.bf16.gmra.mrb[16].mxu0 %vm2626_vm12, %v3135_v13  ;;  %vm1156_vm12 = vcmask 523264   ;;  %v2642_v8 = vsel %vm1073_vm0, 1.0, %v3134_v1 }
  0xbe   : > { %2628 = vmatprep.mubr.msk.bf16.mxu0 %vm874_vm4, %v797_v43 }
  0xbf   : > { %v3427_v44 = vpop.permute.xlu1 %1042  ;;  %v3429_v45 = vpop.permute.xlu0 %1039 }
  0xc0   : > { %vm1075_vm2 = vcmp.eq.s32.totalorder %v3366_v61, %v3427_v44  ;;  %vm1074_vm3 = vcmp.eq.s32.totalorder %v3366_v61, %v3429_v45 }
  0xc1   : > { %v2644_v16 = vsel %vm1075_vm2, 1.0, %v3134_v1  ;;  %v2643_v17 = vsel %vm1074_vm3, 1.0, %v3134_v1 }
  0xc2   : > { %v1119_v20 = vpack.c.bf16 %v2644_v16, %v2643_v17 }
  0xc3   : > { %v1049_v48 = vpop.permute.xlu1 %1048  ;;  %v1046_v49 = vpop.permute.xlu0 %1045 }
  0xc4   : > { %vm1077_vm5 = vcmp.eq.s32.totalorder %v3366_v61, %v1049_v48  ;;  %vm1076_vm6 = vcmp.eq.s32.totalorder %v3366_v61, %v1046_v49 }
  0xc5   : > { %2630 = vmatmul.mubr.msk.bf16.gmra.mrb[20].mxu0 %vm2629_vm1, %v3135_v13  ;;  %vm1072_vm1 = vcmp.eq.s32.totalorder %v3366_v61, %v1034_v42  ;;  %v2646_v18 = vsel %vm1077_vm5, 1.0, %v3134_v1  ;;  %v2645_v19 = vsel %vm1076_vm6, 1.0, %v3134_v1 }
  0xc6   : > { %2631 = vmatprep.mubr.msk.bf16.mxu0 %vm874_vm4, %v799_v50  ;;  %v2641_v9 = vsel %vm1072_vm1, 1.0, %v3134_v1  ;;  %v1120_v23 = vpack.c.bf16 %v2646_v18, %v2645_v19 }
  0xc7   : > { %v3441_v51 = vpop.permute.xlu1 %1054  ;;  %v3443_v52 = vpop.permute.xlu0 %1051 }
  0xc8   : > { %vm1079_vm9 = vcmp.eq.s32.totalorder %v3366_v61, %v3441_v51  ;;  %vm1078_vm10 = vcmp.eq.s32.totalorder %v3366_v61, %v3443_v52 }
  0xc9   : > { %v2648_v28 = vsel %vm1079_vm9, 1.0, %v3134_v1  ;;  %v2647_v29 = vsel %vm1078_vm10, 1.0, %v3134_v1 }
  0xca   : > { %v1121_v35 = vpack.c.bf16 %v2648_v28, %v2647_v29 }
  0xcb   : > { %v3449_v56 = vpop.permute.xlu1 %1060  ;;  %v3451_v57 = vpop.permute.xlu0 %1057 }
  0xcc   : > { %vm1081_vm11 = vcmp.eq.s32.totalorder %v3366_v61, %v3449_v56 }
  0xcd   : > { %2633 = vmatmul.mubr.msk.bf16.gmra.mrb[24].mxu0 %vm2632_vm7, %v3135_v13  ;;  %v2650_v30 = vsel %vm1081_vm11, 1.0, %v3134_v1 }
  0xce   : > { %2634 = vmatprep.mubr.msk.bf16.mxu0 %vm874_vm4, %v801_v58  ;;  %v1544_v58 = vld [vmem:[%s3827_s8] sm:$0x1] }
  0xcf   : > { %v3457_v59 = vpop.permute.xlu1 %1066  ;;  %v3459_v60 = vpop.permute.xlu0 %1063 }
  0xd0   : > { %vm1083_vm2 = vcmp.eq.s32.totalorder %v3366_v61, %v3457_v59  ;;  %vm1082_vm3 = vcmp.eq.s32.totalorder %v3366_v61, %v3459_v60 }
  0xd1   : > { %v2652_v44 = vsel %vm1083_vm2, 1.0, %v3134_v1  ;;  %v2651_v45 = vsel %vm1082_vm3, 1.0, %v3134_v1 }
  0xd2   : > { %v1123_v51 = vpack.c.bf16 %v2652_v44, %v2651_v45 }
  0xd3   : > { %v3467_v0 = vpop.permute.xlu1 %1306  ;;  %v3469_v2 = vpop.permute.xlu0 %1303 }
  0xd4   : > { %vm1351_vm5 = vcmp.eq.s32.totalorder %v3366_v61, %v3467_v0  ;;  %vm1350_vm6 = vcmp.eq.s32.totalorder %v3366_v61, %v3469_v2 }
  0xd5   : > { %2636 = vmatmul.mubr.msk.bf16.gmra.mrb[28].mxu0 %vm2635_vm13, %v3135_v13  ;;  %v1118_v13 = vpack.c.bf16 %v2642_v8, %v2641_v9  ;;  %vm1080_vm13 = vcmp.eq.s32.totalorder %v3366_v61, %v3451_v57  ;;  %v2666_v46 = vsel %vm1351_vm5, 1.0, %v3134_v1  ;;  %v2665_v47 = vsel %vm1350_vm6, 1.0, %v3134_v1 }
  0xd6   : > { %2801 = vmatprep.mubr.msk.bf16.mxu0 %vm1156_vm12, %v1116_v3  ;;  %v2649_v31 = vsel %vm1080_vm13, 1.0, %v3134_v1  ;;  %v1398_v52 = vpack.c.bf16 %v2666_v46, %v2665_v47  ;;  %v1543_v3 = vld [vmem:[%s3826_s7] sm:$0x1]  ;;  %v3022_v46 = vld [vmem:[%s3320_s1 + $0x8] sm:$0xff]  }
  0xd7   : > { %v3477_v4 = vpop.permute.xlu1 %1312  ;;  %v3479_v5 = vpop.permute.xlu0 %1309  ;;  %v1122_v38 = vpack.c.bf16 %v2650_v30, %v2649_v31 }
  0xd8   : > { %vm1353_vm9 = vcmp.eq.s32.totalorder %v3366_v61, %v3477_v4  ;;  %vm1352_vm10 = vcmp.eq.s32.totalorder %v3366_v61, %v3479_v5 }
  0xd9   : > { %v2668_v53 = vsel %vm1353_vm9, 1.0, %v3134_v1  ;;  %v2667_v54 = vsel %vm1352_vm10, 1.0, %v3134_v1 }
  0xda   : > { %v1399_v60 = vpack.c.bf16 %v2668_v53, %v2667_v54  ;;  %v1976_v53 = vld [vmem:[%s3829_s10] sm:$0x1] }
  0xdb   : > { %v3485_v11 = vpop.permute.xlu1 %1318  ;;  %v3487_v12 = vpop.permute.xlu0 %1315 }
  0xdc   : > { %vm1355_vm11 = vcmp.eq.s32.totalorder %v3366_v61, %v3485_v11  ;;  %vm1354_vm13 = vcmp.eq.s32.totalorder %v3366_v61, %v3487_v12 }
  0xdd   : > { %2802 = vmatmul.mubr.msk.bf16.vlgmr.msra.gmra.mrb[32].mxu0 %vm1156_vm12, %v1117_v10  ;;  %v2670_v56 = vsel %vm1355_vm11, 1.0, %v3134_v1  ;;  %v2669_v57 = vsel %vm1354_vm13, 1.0, %v3134_v1 }
  0xde   : > { %2805 = vmatprep.mubr.msk.bf16.mxu0 %vm1156_vm12, %v1118_v13  ;;  %2818 = vmatpush3.bf16.msra.mxu0 %v3358_v55  ;;  %v1400_v62 = vpack.c.bf16 %v2670_v56, %v2669_v57  ;;  %v1835_v13 = vld [vmem:[%s3828_s9] sm:$0x1]  ;;  %v3024_v57 = vld [vmem:[%s3320_s1 + $0x18] sm:$0xff]  }
  0xdf   : > { %v3498_v14 = vpop.permute.xlu1 %1324  ;;  %v3500_v15 = vpop.permute.xlu0 %1321 }
  0xe3   : > { %v1331_v21 = vpop.permute.xlu1 %1330  ;;  %v1328_v22 = vpop.permute.xlu0 %1327 }
  0xe4   : > { %vm1359_vm7 = vcmp.eq.s32.totalorder %v3366_v61, %v1331_v21  ;;  %vm1358_vm8 = vcmp.eq.s32.totalorder %v3366_v61, %v1328_v22 }
  0xe5   : > { %v2674_v55 = vsel %vm1359_vm7, 1.0, %v3134_v1  ;;  %v2673_v24 = vsel %vm1358_vm8, 1.0, %v3134_v1  ;;  %2806 = vmatmul.mubr.msk.bf16.gmra.mrb[36].mxu0 %vm1156_vm12, %v1119_v20 }
  0xe6   : > { %2809 = vmatprep.mubr.msk.bf16.mxu0 %vm1156_vm12, %v1120_v23  ;;  %v1402_v25 = vpack.c.bf16 %v2674_v55, %v2673_v24 }
  0xe7   : > { %v1337_v26 = vpop.permute.xlu1 %1336  ;;  %v1334_v27 = vpop.permute.xlu0 %1333 }
  0xe8   : > { %vm1361_vm14 = vcmp.eq.s32.totalorder %v3366_v61, %v1337_v26  ;;  %vm1360_vm15 = vcmp.eq.s32.totalorder %v3366_v61, %v1334_v27  ;;  %2827 = vmatprep.mubr.msk.bf16.mxu1 %vm874_vm4, %v1402_v25 }
  0xe9   : > { %v2676_v32 = vsel %vm1361_vm14, 1.0, %v3134_v1  ;;  %v2675_v33 = vsel %vm1360_vm15, 1.0, %v3134_v1  ;;  %vm1357_vm14 = vcmp.eq.s32.totalorder %v3366_v61, %v3498_v14  ;;  %vm1356_vm15 = vcmp.eq.s32.totalorder %v3366_v61, %v3500_v15 }
  0xea   : > { %v1403_v34 = vpack.c.bf16 %v2676_v32, %v2675_v33  ;;  %v2672_v63 = vsel %vm1357_vm14, 1.0, %v3134_v1  ;;  %v2671_v0 = vsel %vm1356_vm15, 1.0, %v3134_v1 }
  0xeb   : > { %v1343_v36 = vpop.permute.xlu1 %1342  ;;  %v1340_v37 = vpop.permute.xlu0 %1339  ;;  %v1401_v2 = vpack.c.bf16 %v2672_v63, %v2671_v0 }
  0xec   : > { %vm1363_vm0 = vcmp.eq.s32.totalorder %v3366_v61, %v1343_v36  ;;  %vm1362_vm1 = vcmp.eq.s32.totalorder %v3366_v61, %v1340_v37  ;;  %2828 = vmatmul.mubr.msk.bf16.vlgmr.msra.gmra.mrb[0].mxu1 %vm874_vm4, %v1403_v34 }
  0xed   : > { %v2678_v39 = vsel %vm1363_vm0, 1.0, %v3134_v1  ;;  %v2677_v40 = vsel %vm1362_vm1, 1.0, %v3134_v1  ;;  %2810 = vmatmul.mubr.msk.bf16.gmra.mrb[40].mxu0 %vm1156_vm12, %v1121_v35  ;;  %vm1545_vm0 = vcmask 15360  }
  0xee   : > { %v1404_v41 = vpack.c.bf16 %v2678_v39, %v2677_v40  ;;  %2813 = vmatprep.mubr.msk.bf16.mxu0 %vm1156_vm12, %v1122_v38 }
  0xef   : > { %v1349_v42 = vpop.permute.xlu1 %1348  ;;  %v1346_v43 = vpop.permute.xlu0 %1345 }
  0xf0   : > { %vm1365_vm7 = vcmp.eq.s32.totalorder %v3366_v61, %v1349_v42  ;;  %vm1364_vm8 = vcmp.eq.s32.totalorder %v3366_v61, %v1346_v43  ;;  %2831 = vmatprep.mubr.msk.bf16.mxu1 %vm874_vm4, %v1404_v41  ;;  %v3021_v41 = vld [vmem:[%s3320_s1] sm:$0xff]  }
  0xf1   : > { %v2680_v48 = vsel %vm1365_vm7, 1.0, %v3134_v1  ;;  %v2679_v49 = vsel %vm1364_vm8, 1.0, %v3134_v1 }
  0xf2   : > { %v1405_v50 = vpack.c.bf16 %v2680_v48, %v2679_v49  ;;  %v3023_v48 = vld [vmem:[%s3320_s1 + $0x10] sm:$0xff]  }
  0xf4   : > { %2832 = vmatmul.mubr.msk.bf16.gmra.mrb[4].mxu1 %vm874_vm4, %v1405_v50 }
  0xf5   : > { %2814 = vmatmul.mubr.msk.bf16.gmra.mrb[44].mxu0 %vm1156_vm12, %v1123_v51  ;;  %vm1570_vm12 = vcmask 1040384  }
  0xf6   : > { %2819 = vmatprep.mubr.msk.bf16.mxu0 %vm874_vm4, %v1398_v52  ;;  %2957 = vmatprep.subr.msk.bf16.mxu1 %vm1570_vm12, %v1544_v58  ;;  %v1572_v59 = vsel %vm1570_vm12, %v1544_v58, 0  ;;  %v1736_v12 = vsel %vm1570_vm12, %v1543_v3, 0  ;;  %v1861_v51 = vsel %vm1570_vm12, %v1835_v13, 0 }
  0xf7   : > { %2836 = vmatpush3.bf16.msra.mxu1 %v1572_v59  ;;  %v3025_v59 = vld [vmem:[%s3320_s1 + $0x20] sm:$0xff]  }
  0xf8   : > { %2958 = vmatprep.subr.msk.bf16.mxu1 %vm1570_vm12, %v1543_v3 }
  0xfd   : > { %2820 = vmatmul.mubr.msk.bf16.vlgmr.msra.gmra.mrb[48].mxu0 %vm874_vm4, %v1399_v60 }
  0xfe   : > { %2823 = vmatprep.mubr.msk.bf16.mxu0 %vm874_vm4, %v1400_v62 }
 0x105   : > { %2824 = vmatmul.mubr.msk.bf16.gmra.mrb[52].mxu0 %vm874_vm4, %v1401_v2  ;;  %vm2371_vm4 = vcmask 31744  }
 0x170   : > { %v933_v4 = vpop.f32.mrb[0].mxu0 }
 0x171   : > { %v935_v5 = vpop.f32.mrb[1].mxu0 }
 0x172   : > { %v936_v61 = vpop.f32.mrb[2].mxu0 }
 0x173   : > { %v996_v6 = vpack.c.bf16 %v936_v61, %v933_v4  ;;  %v938_v7 = vpop.f32.mrb[3].mxu0  ;;  %v3026_v61 = vld [vmem:[%s3320_s1 + $0x28] sm:$0xff]  }
 0x175   : > { %2837 = vmatprep.mubr.msk.bf16.mxu1 %vm1545_vm0, %v996_v6 }
 0x178   : > { %v941_v8 = vpop.f32.mrb[4].mxu0 }
 0x179   : > { %v943_v9 = vpop.f32.mrb[5].mxu0 }
 0x17a   : > { %v944_v1 = vpop.f32.mrb[6].mxu0  ;;  %v3027_v9 = vld [vmem:[%s3320_s1 + $0x30] sm:$0xff]  }
 0x17b   : > { %v997_v10 = vpack.c.bf16 %v944_v1, %v941_v8  ;;  %v946_v11 = vpop.f32.mrb[7].mxu0 }
 0x17d   : > { %2838 = vmatmul.mubr.msk.bf16.vlgmr.msra.gmra.mrb[8].mxu1 %vm1545_vm0, %v997_v10 }
 0x17e   : > { %2854 = vmatpush3.bf16.msra.mxu1 %v1736_v12 }
 0x17f   : > { %2959 = vmatprep.subr.msk.bf16.mxu1 %vm1570_vm12, %v1835_v13 }
 0x180   : > { %v949_v14 = vpop.f32.mrb[8].mxu0 }
 0x181   : > { %v951_v15 = vpop.f32.mrb[9].mxu0 }
 0x182   : > { %v952_v16 = vpop.f32.mrb[10].mxu0 }
 0x183   : > { %v998_v17 = vpack.c.bf16 %v952_v16, %v949_v14  ;;  %v954_v18 = vpop.f32.mrb[11].mxu0 }
 0x184   : > { %v3028_v18 = vld [vmem:[%s3320_s1 + $0x38] sm:$0xff]  }
 0x185   : > { %2841 = vmatprep.mubr.msk.bf16.mxu1 %vm1545_vm0, %v998_v17 }
 0x188   : > { %v957_v19 = vpop.f32.mrb[12].mxu0 }
 0x189   : > { %v959_v20 = vpop.f32.mrb[13].mxu0 }
 0x18a   : > { %v960_v21 = vpop.f32.mrb[14].mxu0 }
 0x18b   : > { %v999_v22 = vpack.c.bf16 %v960_v21, %v957_v19  ;;  %v962_v23 = vpop.f32.mrb[15].mxu0 }
 0x18d   : > { %2842 = vmatmul.mubr.msk.bf16.gmra.mrb[12].mxu1 %vm1545_vm0, %v999_v22 }
 0x190   : > { %v965_v55 = vpop.f32.mrb[16].mxu0 }
 0x191   : > { %v967_v24 = vpop.f32.mrb[17].mxu0 }
 0x192   : > { %v968_v25 = vpop.f32.mrb[18].mxu0 }
 0x193   : > { %v1000_v26 = vpack.c.bf16 %v968_v25, %v965_v55  ;;  %v970_v27 = vpop.f32.mrb[19].mxu0 }
 0x195   : > { %2845 = vmatprep.mubr.msk.bf16.mxu1 %vm1545_vm0, %v1000_v26 }
 0x198   : > { %v973_v28 = vpop.f32.mrb[20].mxu0 }
 0x199   : > { %v975_v29 = vpop.f32.mrb[21].mxu0 }
 0x19a   : > { %v976_v30 = vpop.f32.mrb[22].mxu0 }
 0x19b   : > { %v1001_v31 = vpack.c.bf16 %v976_v30, %v973_v28  ;;  %v978_v32 = vpop.f32.mrb[23].mxu0  ;;  %v2002_v30 = vsel %vm1570_vm12, %v1976_v53, 0 }
 0x19d   : > { %2846 = vmatmul.mubr.msk.bf16.gmra.mrb[16].mxu1 %vm1545_vm0, %v1001_v31 }
 0x1a0   : > { %v981_v33 = vpop.f32.mrb[24].mxu0 }
 0x1a1   : > { %v983_v34 = vpop.f32.mrb[25].mxu0 }
 0x1a2   : > { %v984_v35 = vpop.f32.mrb[26].mxu0 }
 0x1a3   : > { %v1002_v36 = vpack.c.bf16 %v984_v35, %v981_v33  ;;  %v986_v37 = vpop.f32.mrb[27].mxu0 }
 0x1a5   : > { %2849 = vmatprep.mubr.msk.bf16.mxu1 %vm1545_vm0, %v1002_v36 }
 0x1a8   : > { %v989_v38 = vpop.f32.mrb[28].mxu0 }
 0x1a9   : > { %v991_v39 = vpop.f32.mrb[29].mxu0 }
 0x1aa   : > { %v992_v40 = vpop.f32.mrb[30].mxu0 }
 0x1ab   : > { %v1003_v42 = vpack.c.bf16 %v992_v40, %v989_v38  ;;  %v994_v43 = vpop.f32.mrb[31].mxu0  ;;  %v3643_v38 = vld [vmem:[%s3830_s11] ss:$0 sm:$0xff] }
 0x1ac   : > { %v3648_v40 = vld [vmem:[%s3831_s12] ss:$0 sm:$0xff] }
 0x1ad   : > { %2850 = vmatmul.mubr.msk.bf16.gmra.mrb[20].mxu1 %vm1545_vm0, %v1003_v42 }
 0x1ae   : > { %2855 = vmatprep.mubr.msk.bf16.mxu1 %vm1545_vm0, %v3021_v41 }
 0x1b0   : > { %v3601_v44 = vpop.f32.mrb[32].mxu0 }
 0x1b1   : > { %v1215_v45 = vpop.f32.mrb[33].mxu0 }
 0x1b2   : > { %v2804_v47 = vpop.f32.mrb[34].mxu0 }
 0x1b3   : > { %v1279_v49 = vpack.c.bf16 %v2804_v47, %v3601_v44  ;;  %v1218_v50 = vpop.f32.mrb[35].mxu0 }
 0x1b4   : > { %v1278_v52 = vpack.c.bf16 %v1218_v50, %v1215_v45 }
 0x1b5   : > { %2856 = vmatmul.mubr.msk.bf16.vlgmr.msra.gmra.mrb[8].mxu1 %vm1545_vm0, %v3022_v46 }
 0x1b6   : > { %2872 = vmatpush3.bf16.msra.mxu1 %v1861_v51  ;;  %2859 = vmatprep.mubr.msk.bf16.mxu1 %vm1545_vm0, %v3023_v48 }
 0x1b7   : > { %2960 = vmatprep.subr.msk.bf16.mxu1 %vm1570_vm12, %v1976_v53 }
 0x1b8   : > { %v2807_v54 = vpop.f32.mrb[36].mxu0 }
 0x1b9   : > { %v1231_v56 = vpop.f32.mrb[37].mxu0 }
 0x1ba   : > { %v2808_v58 = vpop.f32.mrb[38].mxu0 }
 0x1bb   : > { %v1281_v60 = vpack.c.bf16 %v2808_v58, %v2807_v54  ;;  %v1234_v62 = vpop.f32.mrb[39].mxu0 }
 0x1bc   : > { %v1280_v63 = vpack.c.bf16 %v1234_v62, %v1231_v56 }
 0x1bd   : > { %2860 = vmatmul.mubr.msk.bf16.gmra.mrb[12].mxu1 %vm1545_vm0, %v3024_v57 }
 0x1be   : > { %2863 = vmatprep.mubr.msk.bf16.mxu1 %vm1545_vm0, %v3025_v59 }
 0x1bf   : > { %v2829_v0 = vpop.f32.mrb[0].mxu1 }
 0x1c0   : > { %v2811_v2 = vpop.f32.mrb[40].mxu0  ;;  %v1504_v3 = vpop.f32.mrb[1].mxu1 }
 0x1c1   : > { %v1247_v4 = vpop.f32.mrb[41].mxu0  ;;  %v2830_v5 = vpop.f32.mrb[2].mxu1 }
 0x1c2   : > { %v1540_v6 = vpack.c.bf16 %v2830_v5, %v2829_v0  ;;  %v2812_v7 = vpop.f32.mrb[42].mxu0  ;;  %v1507_v8 = vpop.f32.mrb[3].mxu1 }
 0x1c3   : > { %v1283_v1 = vpack.c.bf16 %v2812_v7, %v2811_v2  ;;  %v1539_v10 = vpack.c.bf16 %v1507_v8, %v1504_v3  ;;  %v1250_v11 = vpop.f32.mrb[43].mxu0 }
 0x1c4   : > { %v1282_v12 = vpack.c.bf16 %v1250_v11, %v1247_v4 }
 0x1c5   : > { %2864 = vmatmul.mubr.msk.bf16.gmra.mrb[16].mxu1 %vm1545_vm0, %v3026_v61 }
 0x1c6   : > { %2867 = vmatprep.mubr.msk.bf16.mxu1 %vm1545_vm0, %v3027_v9 }
 0x1c7   : > { %v2833_v13 = vpop.f32.mrb[4].mxu1 }
 0x1c8   : > { %v2815_v14 = vpop.f32.mrb[44].mxu0  ;;  %v1520_v15 = vpop.f32.mrb[5].mxu1 }
 0x1c9   : > { %v1263_v16 = vpop.f32.mrb[45].mxu0  ;;  %v2834_v17 = vpop.f32.mrb[6].mxu1 }
 0x1ca   : > { %v1542_v19 = vpack.c.bf16 %v2834_v17, %v2833_v13  ;;  %v2816_v20 = vpop.f32.mrb[46].mxu0  ;;  %v1523_v21 = vpop.f32.mrb[7].mxu1 }
 0x1cb   : > { %v1285_v22 = vpack.c.bf16 %v2816_v20, %v2815_v14  ;;  %v1541_v23 = vpack.c.bf16 %v1523_v21, %v1520_v15  ;;  %v1266_v55 = vpop.f32.mrb[47].mxu0 }
 0x1cc   : > { %v1284_v24 = vpack.c.bf16 %v1266_v55, %v1263_v16 }
 0x1cd   : > { %2868 = vmatmul.mubr.msk.bf16.gmra.mrb[20].mxu1 %vm1545_vm0, %v3028_v18 }
 0x1ce   : > { %2873 = vmatprep.mubr.msk.bf16.mxu1 %vm1545_vm0, %v1278_v52 }
 0x1d0   : > { %v2821_v25 = vpop.f32.mrb[48].mxu0 }
 0x1d1   : > { %v1472_v26 = vpop.f32.mrb[49].mxu0 }
 0x1d2   : > { %v2822_v27 = vpop.f32.mrb[50].mxu0 }
 0x1d3   : > { %v1536_v28 = vpack.c.bf16 %v2822_v27, %v2821_v25  ;;  %v1475_v29 = vpop.f32.mrb[51].mxu0 }
 0x1d4   : > { %v1535_v31 = vpack.c.bf16 %v1475_v29, %v1472_v26 }
 0x1d5   : > { %2874 = vmatmul.mubr.msk.bf16.vlgmr.msra.gmra.mrb[8].mxu1 %vm1545_vm0, %v1279_v49 }
 0x1d6   : > { %2890 = vmatpush3.bf16.msra.mxu1 %v2002_v30  ;;  %2877 = vmatprep.mubr.msk.bf16.mxu1 %vm1545_vm0, %v1280_v63 }
 0x1d8   : > { %v2825_v32 = vpop.f32.mrb[52].mxu0 }
 0x1d9   : > { %v1488_v33 = vpop.f32.mrb[53].mxu0 }
 0x1da   : > { %v2826_v34 = vpop.f32.mrb[54].mxu0 }
 0x1db   : > { %v1538_v35 = vpack.c.bf16 %v2826_v34, %v2825_v32  ;;  %v1491_v36 = vpop.f32.mrb[55].mxu0 }
 0x1dc   : > { %v1537_v37 = vpack.c.bf16 %v1491_v36, %v1488_v33 }
 0x1dd   : > { %2878 = vmatmul.mubr.msk.bf16.gmra.mrb[12].mxu1 %vm1545_vm0, %v1281_v60 }
 0x1de   : > { %2881 = vmatprep.mubr.msk.bf16.mxu1 %vm1545_vm0, %v1282_v12 }
 0x1e5   : > { %2882 = vmatmul.mubr.msk.bf16.gmra.mrb[16].mxu1 %vm1545_vm0, %v1283_v1 }
 0x1e6   : > { %2885 = vmatprep.mubr.msk.bf16.mxu1 %vm1545_vm0, %v1284_v24 }
 0x1ed   : > { %2886 = vmatmul.mubr.msk.bf16.gmra.mrb[20].mxu1 %vm1545_vm0, %v1285_v22 }
 0x1ee   : > { %2891 = vmatprep.mubr.msk.bf16.mxu1 %vm1545_vm0, %v1535_v31 }
 0x1f5   : > { %2892 = vmatmul.mubr.msk.bf16.vlgmr.msra.gmra.mrb[8].mxu1 %vm1545_vm0, %v1536_v28 }
 0x1f6   : > { %2895 = vmatprep.mubr.msk.bf16.mxu1 %vm1545_vm0, %v1537_v37 }
 0x1fd   : > { %2896 = vmatmul.mubr.msk.bf16.gmra.mrb[12].mxu1 %vm1545_vm0, %v1538_v35 }
 0x1fe   : > { %2899 = vmatprep.mubr.msk.bf16.mxu1 %vm1545_vm0, %v1539_v10 }
 0x205   : > { %2900 = vmatmul.mubr.msk.bf16.gmra.mrb[16].mxu1 %vm1545_vm0, %v1540_v6 }
 0x206   : > { %2903 = vmatprep.mubr.msk.bf16.mxu1 %vm1545_vm0, %v1541_v23 }
 0x20d   : > { %2904 = vmatmul.mubr.msk.bf16.gmra.mrb[20].mxu1 %vm1545_vm0, %v1542_v19 }
 0x2c8   : > { %v2893_v39 = vpop.f32.mrb[8].mxu1 }
 0x2c9   : > { %v2126_v41 = vmul.f32 %v2893_v39, %v3643_v38  ;;  %v2038_v42 = vpop.f32.mrb[9].mxu1 }
 0x2ca   : > { %v2124_v43 = vmul.f32 %v3643_v38, %v2038_v42  ;;  %v2894_v44 = vpop.f32.mrb[10].mxu1 }
 0x2cb   : > { %v3653_v45 = vadd.f32 %v3648_v40, %v2126_v41  ;;  %v2127_v46 = vmul.f32 %v2894_v44, %v3643_v38  ;;  %v2041_v47 = vpop.f32.mrb[11].mxu1 }
 0x2cc   : > { %v3657_v48 = vadd.f32 %v3648_v40, %v2124_v43  ;;  %v2125_v49 = vmul.f32 %v3643_v38, %v2041_v47 }
 0x2cd   : > { %v2165_v50 = vmin.f32 %v3653_v45, 25.0  ;;  %v3662_v51 = vadd.f32 %v3648_v40, %v2127_v46 }
 0x2ce   : > { %v2163_v52 = vmin.f32 %v3657_v48, 25.0  ;;  %v3666_v53 = vadd.f32 %v3648_v40, %v2125_v49 }
 0x2cf   : > { %v2183_v54 = vmul.f32 1.442695, %v2165_v50  ;;  %v2166_v56 = vmin.f32 %v3662_v51, 25.0 }
 0x2d0   : > { %v2179_v57 = vmul.f32 1.442695, %v2163_v52  ;;  %v2164_v58 = vmin.f32 %v3666_v53, 25.0  ;;  %v2897_v59 = vpop.f32.mrb[12].mxu1 }
 0x2d1   : > { %3029 = vpow2.f32 %v2183_v54  ;;  %v2185_v60 = vmul.f32 1.442695, %v2166_v56  ;;  %v2130_v62 = vmul.f32 %v2897_v59, %v3643_v38  ;;  %v2054_v63 = vpop.f32.mrb[13].mxu1 }
 0x2d2   : > { %3031 = vpow2.f32 %v2179_v57  ;;  %v2181_v0 = vmul.f32 1.442695, %v2164_v58  ;;  %v2128_v2 = vmul.f32 %v3643_v38, %v2054_v63  ;;  %v2898_v3 = vpop.f32.mrb[14].mxu1 }
 0x2d3   : > { %3033 = vpow2.f32 %v2185_v60  ;;  %v3673_v4 = vadd.f32 %v3648_v40, %v2130_v62  ;;  %v2131_v5 = vmul.f32 %v2898_v3, %v3643_v38  ;;  %v2057_v61 = vpop.f32.mrb[15].mxu1 }
 0x2d4   : > { %3035 = vpow2.f32 %v2181_v0  ;;  %v3677_v6 = vadd.f32 %v3648_v40, %v2128_v2  ;;  %v2129_v7 = vmul.f32 %v3643_v38, %v2057_v61 }
 0x2d5   : > { %v2169_v8 = vmin.f32 %v3673_v4, 25.0  ;;  %v3682_v9 = vadd.f32 %v3648_v40, %v2131_v5 }
 0x2d6   : > { %v2167_v1 = vmin.f32 %v3677_v6, 25.0  ;;  %v3686_v10 = vadd.f32 %v3648_v40, %v2129_v7 }
 0x2d7   : > { %v2191_v11 = vmul.f32 1.442695, %v2169_v8  ;;  %v2170_v12 = vmin.f32 %v3682_v9, 25.0 }
 0x2d8   : > { %v2187_v13 = vmul.f32 1.442695, %v2167_v1  ;;  %v2168_v14 = vmin.f32 %v3686_v10, 25.0  ;;  %v2901_v15 = vpop.f32.mrb[16].mxu1 }
 0x2d9   : > { %3037 = vpow2.f32 %v2191_v11  ;;  %v2193_v16 = vmul.f32 1.442695, %v2170_v12  ;;  %v2134_v17 = vmul.f32 %v2901_v15, %v3643_v38  ;;  %v2070_v18 = vpop.f32.mrb[17].mxu1 }
 0x2da   : > { %3039 = vpow2.f32 %v2187_v13  ;;  %v2189_v19 = vmul.f32 1.442695, %v2168_v14  ;;  %v2132_v20 = vmul.f32 %v3643_v38, %v2070_v18  ;;  %v2902_v21 = vpop.f32.mrb[18].mxu1 }
 0x2db   : > { %v3030_v22 = vpop.eup %3029  ;;  %3041 = vpow2.f32 %v2193_v16  ;;  %v3693_v23 = vadd.f32 %v3648_v40, %v2134_v17  ;;  %v2135_v55 = vmul.f32 %v2902_v21, %v3643_v38  ;;  %v2073_v24 = vpop.f32.mrb[19].mxu1 }
 0x2dc   : > { %v3032_v25 = vpop.eup %3031  ;;  %v2213_v26 = vadd.f32 1.0, %v3030_v22  ;;  %3043 = vpow2.f32 %v2189_v19  ;;  %v3697_v27 = vadd.f32 %v3648_v40, %v2132_v20  ;;  %v2133_v28 = vmul.f32 %v3643_v38, %v2073_v24 }
 0x2dd   : > { %v3034_v29 = vpop.eup %3033  ;;  %v2211_v30 = vadd.f32 1.0, %v3032_v25  ;;  %v2173_v31 = vmin.f32 %v3693_v23, 25.0  ;;  %v3702_v32 = vadd.f32 %v3648_v40, %v2135_v55 }
 0x2de   : > { %v3036_v33 = vpop.eup %3035  ;;  %v2229_v34 = vmul.f32 %v2213_v26, %v2213_v26  ;;  %v2214_v35 = vadd.f32 1.0, %v3034_v29  ;;  %v2171_v36 = vmin.f32 %v3697_v27, 25.0  ;;  %v3706_v37 = vadd.f32 %v3648_v40, %v2133_v28 }
 0x2df   : > { %v2227_v39 = vmul.f32 %v2211_v30, %v2211_v30  ;;  %v2212_v41 = vadd.f32 1.0, %v3036_v33  ;;  %v2199_v42 = vmul.f32 1.442695, %v2173_v31  ;;  %v2174_v43 = vmin.f32 %v3702_v32, 25.0 }
 0x2e0   : > { %v2245_v44 = vadd.f32 1.0, %v2229_v34  ;;  %v2230_v46 = vmul.f32 %v2214_v35, %v2214_v35  ;;  %v2195_v47 = vmul.f32 1.442695, %v2171_v36  ;;  %v2172_v49 = vmin.f32 %v3706_v37, 25.0  ;;  %v2905_v50 = vpop.f32.mrb[20].mxu1 }
 0x2e1   : > { %v2243_v52 = vadd.f32 1.0, %v2227_v39  ;;  %v2228_v54 = vmul.f32 %v2212_v41, %v2212_v41  ;;  %3045 = vpow2.f32 %v2199_v42  ;;  %v2201_v56 = vmul.f32 1.442695, %v2174_v43  ;;  %v2086_v57 = vpop.f32.mrb[21].mxu1 }
 0x2e2   : > { %3047 = vrcp.f32 %v2245_v44  ;;  %v2246_v58 = vadd.f32 1.0, %v2230_v46  ;;  %v2197_v59 = vmul.f32 1.442695, %v2172_v49  ;;  %v2138_v60 = vmul.f32 %v2905_v50, %v3643_v38  ;;  %v2906_v62 = vpop.f32.mrb[22].mxu1 }
 0x2e3   : > { %v3038_v63 = vpop.eup %3037  ;;  %3049 = vrcp.f32 %v2243_v52  ;;  %v2244_v0 = vadd.f32 1.0, %v2228_v54  ;;  %v2136_v2 = vmul.f32 %v3643_v38, %v2086_v57  ;;  %v2139_v3 = vmul.f32 %v2906_v62, %v3643_v38  ;;  %v2089_v5 = vpop.f32.mrb[23].mxu1 }
 0x2e4   : > { %v3040_v61 = vpop.eup %3039  ;;  %3051 = vrcp.f32 %v2246_v58  ;;  %v2217_v7 = vadd.f32 1.0, %v3038_v63  ;;  %v3714_v8 = vadd.f32 %v3648_v40, %v2138_v60  ;;  %v2137_v1 = vmul.f32 %v3643_v38, %v2089_v5 }
 0x2e5   : > { %v3042_v11 = vpop.eup %3041  ;;  %3053 = vrcp.f32 %v2244_v0  ;;  %v2215_v12 = vadd.f32 1.0, %v3040_v61  ;;  %v3718_v13 = vadd.f32 %v3648_v40, %v2136_v2  ;;  %v3721_v14 = vadd.f32 %v3648_v40, %v2139_v3 }
 0x2e6   : > { %v3044_v15 = vpop.eup %3043  ;;  %v2233_v16 = vmul.f32 %v2217_v7, %v2217_v7  ;;  %v2218_v17 = vadd.f32 1.0, %v3042_v11  ;;  %3055 = vpow2.f32 %v2195_v47  ;;  %v2177_v18 = vmin.f32 %v3714_v8, 25.0 }
 0x2e7   : > { %v2231_v19 = vmul.f32 %v2215_v12, %v2215_v12  ;;  %v2216_v20 = vadd.f32 1.0, %v3044_v15  ;;  %3057 = vpow2.f32 %v2201_v56  ;;  %v2175_v38 = vmin.f32 %v3718_v13, 25.0 }
 0x2e8   : > { %v2249_v21 = vadd.f32 1.0, %v2233_v16  ;;  %v2234_v22 = vmul.f32 %v2218_v17, %v2218_v17  ;;  %3059 = vpow2.f32 %v2197_v59  ;;  %v2178_v25 = vmin.f32 %v3721_v14, 25.0 }
 0x2e9   : > { %v2247_v55 = vadd.f32 1.0, %v2231_v19  ;;  %v2232_v24 = vmul.f32 %v2216_v20, %v2216_v20  ;;  %v2207_v28 = vmul.f32 1.442695, %v2177_v18  ;;  %v3729_v29 = vadd.f32 %v3648_v40, %v2137_v1 }
 0x2ea   : > { %3061 = vrcp.f32 %v2249_v21  ;;  %v3726_v26 = vadd.f32 1.0, %v2234_v22  ;;  %v2203_v33 = vmul.f32 1.442695, %v2175_v38  ;;  %v2209_v36 = vmul.f32 1.442695, %v2178_v25 }
 0x2eb   : > { %v3046_v30 = vpop.eup %3045  ;;  %3063 = vrcp.f32 %v2247_v55  ;;  %v3731_v31 = vadd.f32 1.0, %v2232_v24  ;;  %v2176_v39 = vmin.f32 %v3729_v29, 25.0 }
 0x2ec   : > { %v3048_v34 = vpop.eup %3047  ;;  %3065 = vrcp.f32 %v3726_v26  ;;  %v2221_v35 = vadd.f32 1.0, %v3046_v30 }
 0x2ed   : > { %v3050_v41 = vpop.eup %3049  ;;  %v2277_v42 = vmul.f32 %v3048_v34, %v2245_v44  ;;  %3067 = vrcp.f32 %v3731_v31  ;;  %v2205_v54 = vmul.f32 1.442695, %v2176_v39 }
 0x2ee   : > { %v3052_v43 = vpop.eup %3051  ;;  %v2275_v46 = vmul.f32 %v3050_v41, %v2243_v52  ;;  %v2237_v40 = vmul.f32 %v2221_v35, %v2221_v35  ;;  %3069 = vpow2.f32 %v2207_v28 }
 0x2ef   : > { %v3054_v47 = vpop.eup %3053  ;;  %v2293_v49 = vsub.f32 2.0, %v2277_v42  ;;  %v2278_v50 = vmul.f32 %v3052_v43, %v2246_v58  ;;  %3071 = vpow2.f32 %v2203_v33 }
 0x2f0   : > { %v3056_v56 = vpop.eup %3055  ;;  %v2291_v57 = vsub.f32 2.0, %v2275_v46  ;;  %v2276_v59 = vmul.f32 %v3054_v47, %v2244_v0  ;;  %v3736_v60 = vadd.f32 1.0, %v2237_v40  ;;  %3073 = vpow2.f32 %v2209_v36 }
 0x2f1   : > { %v3058_v62 = vpop.eup %3057  ;;  %v2309_v44 = vmul.f32 %v3048_v34, %v2293_v49  ;;  %v2294_v63 = vsub.f32 2.0, %v2278_v50  ;;  %v2219_v2 = vadd.f32 1.0, %v3056_v56 }
 0x2f2   : > { %v3060_v52 = vpop.eup %3059  ;;  %v2307_v3 = vmul.f32 %v3050_v41, %v2291_v57  ;;  %v2292_v5 = vsub.f32 2.0, %v2276_v59  ;;  %3075 = vrcp.f32 %v3736_v60  ;;  %v2222_v58 = vadd.f32 1.0, %v3058_v62 }
 0x2f3   : > { %v2325_v61 = vmul.f32 2.0, %v2309_v44  ;;  %v2310_v7 = vmul.f32 %v3052_v43, %v2294_v63  ;;  %v2235_v1 = vmul.f32 %v2219_v2, %v2219_v2  ;;  %3077 = vpow2.f32 %v2205_v54 }
 0x2f4   : > { %v3062_v0 = vpop.eup %3061  ;;  %v2323_v11 = vmul.f32 2.0, %v2307_v3  ;;  %v2308_v12 = vmul.f32 %v3054_v47, %v2292_v5  ;;  %v2238_v15 = vmul.f32 %v2222_v58, %v2222_v58  ;;  %v2220_v16 = vadd.f32 1.0, %v3060_v52 }
 0x2f5   : > { %v3064_v17 = vpop.eup %3063  ;;  %v2341_v18 = vsub.f32 1.0, %v2325_v61  ;;  %v2326_v19 = vmul.f32 2.0, %v2310_v7  ;;  %v2281_v20 = vmul.f32 %v3062_v0, %v2249_v21  ;;  %v3740_v38 = vadd.f32 1.0, %v2235_v1 }
 0x2f6   : > { %v3066_v22 = vpop.eup %3065  ;;  %v2339_v24 = vsub.f32 1.0, %v2323_v11  ;;  %v2324_v25 = vmul.f32 2.0, %v2308_v12  ;;  %v2279_v28 = vmul.f32 %v3064_v17, %v2247_v55  ;;  %v3747_v30 = vadd.f32 1.0, %v2238_v15 }
 0x2f7   : > { %v3068_v33 = vpop.eup %3067  ;;  %v2357_v34 = vmul.f32 %v2341_v18, %v3653_v45  ;;  %v2342_v35 = vsub.f32 1.0, %v2326_v19  ;;  %v2297_v21 = vsub.f32 2.0, %v2281_v20  ;;  %v2282_v36 = vmul.f32 %v3066_v22, %v3726_v26 }
 0x2f8   : > { %v3070_v39 = vpop.eup %3069  ;;  %v2355_v41 = vmul.f32 %v2339_v24, %v3657_v48  ;;  %v2340_v42 = vsub.f32 1.0, %v2324_v25  ;;  %v2295_v43 = vsub.f32 2.0, %v2279_v28  ;;  %v2280_v46 = vmul.f32 %v3068_v33, %v3731_v31 }
 0x2f9   : > { %v3072_v40 = vpop.eup %3071  ;;  %2374 = vst.msk [vmem:[%s3745_s19 + $0x10] sm:$0xff] %vm2371_vm4, %v2357_v34  ;;  %v2358_v55 = vmul.f32 %v2342_v35, %v3662_v51  ;;  %v2313_v45 = vmul.f32 %v3062_v0, %v2297_v21  ;;  %v2298_v47 = vsub.f32 2.0, %v2282_v36  ;;  %3079 = vrcp.f32 %v3740_v38 }
 0x2fa   : > { %v3074_v49 = vpop.eup %3073  ;;  %2372 = vst.msk [vmem:[%s3745_s19] sm:$0xff] %vm2371_vm4, %v2355_v41  ;;  %v2356_v48 = vmul.f32 %v2340_v42, %v3666_v53  ;;  %v2311_v26 = vmul.f32 %v3064_v17, %v2295_v43  ;;  %v2296_v50 = vsub.f32 2.0, %v2280_v46  ;;  %3081 = vrcp.f32 %v3747_v30 }
 0x2fb   : > { %2375 = vst.msk [vmem:[%s3745_s19 + $0x18] sm:$0xff] %vm2371_vm4, %v2358_v55  ;;  %v2329_v31 = vmul.f32 2.0, %v2313_v45  ;;  %v2314_v54 = vmul.f32 %v3066_v22, %v2298_v47  ;;  %v2236_v56 = vmul.f32 %v2220_v16, %v2220_v16  ;;  %v2225_v51 = vadd.f32 1.0, %v3070_v39 }
 0x2fc   : > { %v3076_v57 = vpop.eup %3075  ;;  %2373 = vst.msk [vmem:[%s3745_s19 + $0x8] sm:$0xff] %vm2371_vm4, %v2356_v48  ;;  %v2327_v59 = vmul.f32 2.0, %v2311_v26  ;;  %v2312_v62 = vmul.f32 %v3068_v33, %v2296_v50  ;;  %v2223_v44 = vadd.f32 1.0, %v3072_v40  ;;  %v2226_v63 = vadd.f32 1.0, %v3074_v49 }
 0x2fd   : > { %v3078_v2 = vpop.eup %3077  ;;  %v2345_v52 = vsub.f32 1.0, %v2329_v31  ;;  %v2330_v53 = vmul.f32 2.0, %v2314_v54  ;;  %v2285_v3 = vmul.f32 %v3076_v57, %v3736_v60  ;;  %v2252_v5 = vadd.f32 1.0, %v2236_v56 }
 0x2fe   : > { %v2343_v58 = vsub.f32 1.0, %v2327_v59  ;;  %v2328_v61 = vmul.f32 2.0, %v2312_v62  ;;  %v2241_v7 = vmul.f32 %v2225_v51, %v2225_v51  ;;  %v2239_v1 = vmul.f32 %v2223_v44, %v2223_v44 }
 0x2ff   : > { %v2361_v0 = vmul.f32 %v2345_v52, %v3673_v4  ;;  %v2346_v11 = vsub.f32 1.0, %v2330_v53  ;;  %v2301_v12 = vsub.f32 2.0, %v2285_v3  ;;  %3083 = vrcp.f32 %v2252_v5 }
 0x300   : > { %v2359_v15 = vmul.f32 %v2343_v58, %v3677_v6  ;;  %v2344_v16 = vsub.f32 1.0, %v2328_v61  ;;  %v2257_v17 = vadd.f32 1.0, %v2241_v7  ;;  %v2255_v18 = vadd.f32 1.0, %v2239_v1 }
 0x301   : > { %2378 = vst.msk [vmem:[%s3745_s19 + $0x30] sm:$0xff] %vm2371_vm4, %v2361_v0  ;;  %v2362_v60 = vmul.f32 %v2346_v11, %v3682_v9  ;;  %v2317_v19 = vmul.f32 %v3076_v57, %v2301_v12  ;;  %v2242_v20 = vmul.f32 %v2226_v63, %v2226_v63  ;;  %v2224_v22 = vadd.f32 1.0, %v3078_v2 }
 0x302   : > { %2376 = vst.msk [vmem:[%s3745_s19 + $0x20] sm:$0xff] %vm2371_vm4, %v2359_v15  ;;  %v2360_v4 = vmul.f32 %v2344_v16, %v3686_v10  ;;  %3085 = vrcp.f32 %v2257_v17 }
 0x303   : > { %v3080_v24 = vpop.eup %3079  ;;  %2379 = vst.msk [vmem:[%s3745_s19 + $0x38] sm:$0xff] %vm2371_vm4, %v2362_v60  ;;  %v2333_v6 = vmul.f32 2.0, %v2317_v19  ;;  %3087 = vrcp.f32 %v2255_v18  ;;  %v2258_v25 = vadd.f32 1.0, %v2242_v20  ;;  %v2240_v28 = vmul.f32 %v2224_v22, %v2224_v22 }
 0x304   : > { %v3082_v33 = vpop.eup %3081  ;;  %2377 = vst.msk [vmem:[%s3745_s19 + $0x28] sm:$0xff] %vm2371_vm4, %v2360_v4  ;;  %v2283_v9 = vmul.f32 %v3080_v24, %v3740_v38 }
 0x305   : > { %v2349_v34 = vsub.f32 1.0, %v2333_v6  ;;  %v2286_v35 = vmul.f32 %v3082_v33, %v3747_v30  ;;  %3089 = vrcp.f32 %v2258_v25  ;;  %v2256_v21 = vadd.f32 1.0, %v2240_v28 }
 0x306   : > { %v2299_v10 = vsub.f32 2.0, %v2283_v9 }
 0x307   : > { %v2365_v36 = vmul.f32 %v2349_v34, %v3693_v23  ;;  %v2302_v39 = vsub.f32 2.0, %v2286_v35  ;;  %3091 = vrcp.f32 %v2256_v21 }
 0x308   : > { %v2315_v41 = vmul.f32 %v3080_v24, %v2299_v10 }
 0x309   : > { %v3084_v42 = vpop.eup %3083  ;;  %2382 = vst.msk [vmem:[%s3745_s19 + $0x50] sm:$0xff] %vm2371_vm4, %v2365_v36  ;;  %v2318_v43 = vmul.f32 %v3082_v33, %v2302_v39 }
 0x30a   : > { %v2331_v46 = vmul.f32 2.0, %v2315_v41  ;;  %v2284_v40 = vmul.f32 %v3084_v42, %v2252_v5 }
 0x30b   : > { %v2334_v55 = vmul.f32 2.0, %v2318_v43 }
 0x30c   : > { %v3086_v38 = vpop.eup %3085  ;;  %v2347_v45 = vsub.f32 1.0, %v2331_v46  ;;  %v2300_v30 = vsub.f32 2.0, %v2284_v40 }
 0x30d   : > { %v3088_v47 = vpop.eup %3087  ;;  %v2350_v49 = vsub.f32 1.0, %v2334_v55  ;;  %v2289_v48 = vmul.f32 %v3086_v38, %v2257_v17 }
 0x30e   : > { %v2363_v23 = vmul.f32 %v2347_v45, %v3697_v27  ;;  %v2316_v26 = vmul.f32 %v3084_v42, %v2300_v30  ;;  %v2287_v50 = vmul.f32 %v3088_v47, %v2255_v18 }
 0x30f   : > { %v3090_v31 = vpop.eup %3089  ;;  %v2366_v54 = vmul.f32 %v2350_v49, %v3702_v32  ;;  %v2305_v56 = vsub.f32 2.0, %v2289_v48 }
 0x310   : > { %2380 = vst.msk [vmem:[%s3745_s19 + $0x40] sm:$0xff] %vm2371_vm4, %v2363_v23  ;;  %v2332_v51 = vmul.f32 2.0, %v2316_v26  ;;  %v2303_v57 = vsub.f32 2.0, %v2287_v50  ;;  %v2290_v59 = vmul.f32 %v3090_v31, %v2258_v25 }
 0x311   : > { %v3092_v62 = vpop.eup %3091  ;;  %2383 = vst.msk [vmem:[%s3745_s19 + $0x58] sm:$0xff] %vm2371_vm4, %v2366_v54  ;;  %v2321_v44 = vmul.f32 %v3086_v38, %v2305_v56 }
 0x312   : > { %v2348_v63 = vsub.f32 1.0, %v2332_v51  ;;  %v2319_v2 = vmul.f32 %v3088_v47, %v2303_v57  ;;  %v2306_v52 = vsub.f32 2.0, %v2290_v59  ;;  %v2288_v27 = vmul.f32 %v3092_v62, %v2256_v21 }
 0x313   : > { %v2337_v53 = vmul.f32 2.0, %v2321_v44 }
 0x314   : > { %v2364_v32 = vmul.f32 %v2348_v63, %v3706_v37  ;;  %v2335_v3 = vmul.f32 2.0, %v2319_v2  ;;  %v2322_v5 = vmul.f32 %v3090_v31, %v2306_v52  ;;  %v2304_v58 = vsub.f32 2.0, %v2288_v27 }
 0x315   : > { %v2353_v61 = vsub.f32 1.0, %v2337_v53 }
 0x316   : > { %2381 = vst.msk [vmem:[%s3745_s19 + $0x48] sm:$0xff] %vm2371_vm4, %v2364_v32  ;;  %v2351_v7 = vsub.f32 1.0, %v2335_v3  ;;  %v2338_v1 = vmul.f32 2.0, %v2322_v5  ;;  %v2320_v0 = vmul.f32 %v3092_v62, %v2304_v58 }
 0x317   : > { %v2369_v11 = vmul.f32 %v2353_v61, %v3714_v8 }
 0x318   : > { %v2367_v12 = vmul.f32 %v2351_v7, %v3718_v13  ;;  %v2354_v15 = vsub.f32 1.0, %v2338_v1  ;;  %v2336_v16 = vmul.f32 2.0, %v2320_v0 }
 0x319   : > { %2386 = vst.msk [vmem:[%s3745_s19 + $0x70] sm:$0xff] %vm2371_vm4, %v2369_v11 }
 0x31a   : > { %2384 = vst.msk [vmem:[%s3745_s19 + $0x60] sm:$0xff] %vm2371_vm4, %v2367_v12  ;;  %v2370_v37 = vmul.f32 %v2354_v15, %v3721_v14  ;;  %v2352_v17 = vsub.f32 1.0, %v2336_v16 }
 0x31c   : > { %2387 = vst.msk [vmem:[%s3745_s19 + $0x78] sm:$0xff] %vm2371_vm4, %v2370_v37  ;;  %v2368_v18 = vmul.f32 %v2352_v17, %v3729_v29 }
 0x31e   : > { %2385 = vst.msk [vmem:[%s3745_s19 + $0x68] sm:$0xff] %vm2371_vm4, %v2368_v18 }
 0x31f PF: > { %s23_s29 = sadd.s32 1, %s3131_s29   ;;  %s3835_s25 = smov %s3123_s27 }
 0x320   : > { %p20_p7 = scmp.ge.s32.totalorder %s23_s29, 6   ;;  %s3836_s26 = smov %s3127_s28 }
 0x321   : > { %s3837_s27 = smov %s3840_s30  ;;  %s3838_s28 = smov %s3844_s14 }
 0x322   :  { %22 = sbr.rel (!%p20_p7) target bundleno = 3 (0x3), region = 120 }

// kernel: sppf_forward.4
= control target key start
LH: loop header
LB: loop body
LE: loop exit
PB: predicated region body
PF: predicated region fallthrough
CT: control target
= control target key end

     0   :  { %vm75_vm0 = vsmask.f32 3328  ;;  %vm76_vm1 = vsmask.f32 7440  ;;  %vm878_vm2 = vcmask 1042432   ;;  %vm879_vm3 = vcmask 1046532   ;;  %s6809_s0 = inlined_call_operand.vmem [shape: bf16[2,16,16,2], index: 0, kind: input, shape index: {}]   ;;  %s6810_s1 = inlined_call_operand.vmem [shape: bf16[2,12,12,2], index: 1, kind: output, shape index: {0}]   ;;  %s6811_s2 = inlined_call_operand.vmem [shape: bf16[2,8,8,2], index: 2, kind: output, shape index: {1}]   ;;  %s6812_s3 = inlined_call_operand.vmem [shape: bf16[2,4,4,2], index: 3, kind: output, shape index: {2}]  }
   0x1   :  { %v3844_v0 = vld [vmem:[%s6809_s0] sm:$0xf]  ;;  %v3849_v1 = vld [vmem:[%s6809_s0 + $0x4] sm:$0xf]  ;;  %v3854_v2 = vld [vmem:[%s6809_s0 + $0x8] sm:$0xf] }
   0x2   :  { %v3859_v3 = vld [vmem:[%s6809_s0 + $0xc] sm:$0xf]  ;;  %v3864_v4 = vld [vmem:[%s6809_s0 + $0x10] sm:$0xf]  ;;  %v79_v5 = vshrl.u32 %v3844_v0, 16  ;;  %v82_v6 = vshll.u32 %v3844_v0, 16  ;;  %vm3918_vm4 = vmor %vm75_vm0, %vm76_vm1 }
   0x3   :  { %v88_v7 = vshll.u32 %v3849_v1, 16  ;;  %v92_v8 = vshrl.u32 %v3849_v1, 16  ;;  %v3873_v9 = vld [vmem:[%s6809_s0 + $0x14] sm:$0xf]  ;;  %v98_v10 = vshrl.u32 %v3854_v2, 16  ;;  %v101_v11 = vshll.u32 %v3854_v2, 16  ;;  %vm3974_vm5 = vmor %vm878_vm2, %vm879_vm3 }
   0x4   :  { %v107_v12 = vshll.u32 %v3859_v3, 16  ;;  %v111_v13 = vshrl.u32 %v3859_v3, 16  ;;  %v3882_v14 = vld [vmem:[%s6809_s0 + $0x18] sm:$0xf]  ;;  %v81_v15 = vrot.slane %v79_v5, 4  ;;  %v84_v16 = vrot.slane %v82_v6, 5 }
   0x5   :  { %v3890_v17 = vrot.slane %v88_v7, 5  ;;  %v117_v18 = vshrl.u32 %v3864_v4, 16  ;;  %v3896_v19 = vld [vmem:[%s6809_s0 + $0x1c] sm:$0xf]  ;;  %v100_v20 = vrot.slane %v98_v10, 4  ;;  %v103_v21 = vrot.slane %v101_v11, 5 }
   0x6   :  { %v3904_v22 = vrot.slane %v107_v12, 5  ;;  %v120_v23 = vshll.u32 %v3864_v4, 16  ;;  %v85_v24 = vor.u32 %v84_v16, %v81_v15  ;;  %v126_v26 = vshll.u32 %v3873_v9, 16  ;;  %v3914_v28 = vld [vmem:[%s6809_s0 + $0x20] sm:$0xf] }
   0x7   :  { %v119_v25 = vrot.slane %v117_v18, 4  ;;  %v130_v27 = vshrl.u32 %v3873_v9, 16  ;;  %v104_v30 = vor.u32 %v103_v21, %v100_v20  ;;  %v136_v32 = vshrl.u32 %v3882_v14, 16  ;;  %v3929_v34 = vld [vmem:[%s6809_s0 + $0x24] sm:$0xf] }
   0x8   :  { %v122_v31 = vrot.slane %v120_v23, 5  ;;  %v139_v33 = vshll.u32 %v3882_v14, 16  ;;  %v86_v35 = vrot.slane %v85_v24, 4  ;;  %v3933_v36 = vrot.slane %v126_v26, 5 }
   0x9   :  { %v145_v37 = vshll.u32 %v3896_v19, 16  ;;  %v149_v38 = vshrl.u32 %v3896_v19, 16  ;;  %v105_v39 = vrot.slane %v104_v30, 4  ;;  %v138_v41 = vrot.slane %v136_v32, 4 }
   0xa   :  { %v123_v40 = vor.u32 %v122_v31, %v119_v25  ;;  %v141_v42 = vrot.slane %v139_v33, 5  ;;  %v91_v43 = vsel %vm3918_vm4, %v86_v35, %v3890_v17  ;;  %v155_v45 = vshrl.u32 %v3914_v28, 16 }
   0xb   :  { %v3946_v44 = vrot.slane %v145_v37, 5  ;;  %v158_v46 = vshll.u32 %v3914_v28, 16  ;;  %v110_v47 = vsel %vm3918_vm4, %v105_v39, %v3904_v22  ;;  %v164_v50 = vshll.u32 %v3929_v34, 16 }
   0xc   :  { %v124_v48 = vrot.slane %v123_v40, 4  ;;  %v142_v49 = vor.u32 %v141_v42, %v138_v41  ;;  %v157_v51 = vrot.slane %v155_v45, 4  ;;  %v168_v53 = vshrl.u32 %v3929_v34, 16 }
   0xd   :  { %v160_v52 = vrot.slane %v158_v46, 5  ;;  %v3960_v54 = vmax.bf16 %v91_v43, %v3844_v0  ;;  %v3967_v57 = vrot.slane %v164_v50, 5  ;;  %v3970_v58 = vmax.bf16 %v110_v47, %v3854_v2 }
   0xe   :  { %v129_v55 = vsel %vm3918_vm4, %v124_v48, %v3933_v36  ;;  %v143_v56 = vrot.slane %v142_v49, 4  ;;  %v3677_v62 = vrot.slane %v3844_v0, 9  ;;  %v883_v63 = vrot.slane %v3849_v1, 5 }
   0xf   :  { %v161_v60 = vor.u32 %v160_v52, %v157_v51  ;;  %v3979_v61 = vmax.bf16 %v129_v55, %v3864_v4  ;;  %v3678_v16 = vrot.slane %v3854_v2, 9  ;;  %v888_v20 = vrot.slane %v3859_v3, 5 }
  0x10   :  { %v148_v15 = vsel %vm3918_vm4, %v143_v56, %v3946_v44  ;;  %v3679_v21 = vrot.slane %v3864_v4, 9  ;;  %v884_v30 = vsel %vm3974_vm5, %v3677_v62, %v883_v63  ;;  %v893_v31 = vrot.slane %v3873_v9, 5 }
  0x11   :  { %v162_v24 = vrot.slane %v161_v60, 4  ;;  %v3990_v25 = vmax.bf16 %v148_v15, %v3882_v14  ;;  %v889_v35 = vsel %vm3974_vm5, %v3678_v16, %v888_v20  ;;  %v3680_v39 = vrot.slane %v3882_v14, 9 }
  0x12   :  { %v898_v40 = vrot.slane %v3896_v19, 5  ;;  %v3681_v41 = vrot.slane %v3914_v28, 9  ;;  %v894_v43 = vsel %vm3974_vm5, %v3679_v21, %v893_v31  ;;  %v903_v47 = vrot.slane %v3929_v34, 5 }
  0x13   :  { %v167_v42 = vsel %vm3918_vm4, %v162_v24, %v3967_v57  ;;  %v1105_v48 = vmax.bf16 %v884_v30, %v3960_v54  ;;  %v1107_v52 = vmax.bf16 %v889_v35, %v3970_v58  ;;  %v1109_v55 = vmax.bf16 %v894_v43, %v3979_v61 }
  0x14   :  { %v4014_v49 = vmax.bf16 %v167_v42, %v3914_v28  ;;  %v899_v51 = vsel %vm3974_vm5, %v3680_v39, %v898_v40  ;;  %v4026_v56 = vsel %vm3974_vm5, %v3681_v41, %v903_v47  ;;  %vm1169_vm6 = vsmask.f32 2304 }
  0x15   :  { %v1111_v54 = vmax.bf16 %v899_v51, %v3990_v25  ;;  %vm1170_vm7 = vsmask.f32 6416  ;;  %v1172_v62 = vrot.slane %v79_v5, 5  ;;  %v1173_v58 = vrot.slane %v82_v6, 6 }
  0x16   :  { %v1113_v60 = vmax.bf16 %v4026_v56, %v4014_v49  ;;  %v1176_v61 = vrot.slane %v92_v8, 5  ;;  %v1177_v15 = vrot.slane %v88_v7, 6  ;;  %v1181_v16 = vrot.slane %v98_v10, 5  ;;  %vm4051_vm8 = vmor %vm1169_vm6, %vm1170_vm7 }
  0x17   :  { %v1182_v21 = vrot.slane %v101_v11, 6  ;;  %v1185_v24 = vrot.slane %v111_v13, 5  ;;  %v1174_v25 = vor.u32 %v1173_v58, %v1172_v62  ;;  %v1186_v5 = vrot.slane %v107_v12, 6 }
  0x18   :  { %v1190_v6 = vrot.slane %v117_v18, 5  ;;  %v1191_v30 = vrot.slane %v120_v23, 6  ;;  %v4055_v10 = vor.u32 %v1177_v15, %v1176_v61  ;;  %v1194_v35 = vrot.slane %v130_v27, 5 }
  0x19   :  { %v1183_v11 = vor.u32 %v1182_v21, %v1181_v16  ;;  %v1195_v39 = vrot.slane %v126_v26, 6  ;;  %v1175_v12 = vrot.slane %v1174_v25, 4  ;;  %v4061_v41 = vor.u32 %v1186_v5, %v1185_v24 }
  0x1a   :  { %v1192_v18 = vor.u32 %v1191_v30, %v1190_v6  ;;  %v1199_v23 = vrot.slane %v136_v32, 5  ;;  %v1200_v49 = vrot.slane %v139_v33, 6  ;;  %v1203_v51 = vrot.slane %v149_v38, 5 }
  0x1b   :  { %v1184_v42 = vrot.slane %v1183_v11, 4  ;;  %v4065_v43 = vor.u32 %v1195_v39, %v1194_v35  ;;  %v1179_v26 = vsel %vm4051_vm8, %v1175_v12, %v4055_v10  ;;  %v1204_v62 = vrot.slane %v145_v37, 6 }
  0x1c   :  { %v1193_v56 = vrot.slane %v1192_v18, 4  ;;  %v1208_v32 = vrot.slane %v155_v45, 5  ;;  %v1201_v61 = vor.u32 %v1200_v49, %v1199_v23  ;;  %v1209_v33 = vrot.slane %v158_v46, 6 }
  0x1d   :  { %v1188_v58 = vsel %vm4051_vm8, %v1184_v42, %v4061_v41  ;;  %v1212_v15 = vrot.slane %v168_v53, 5  ;;  %v4088_v21 = vor.u32 %v1204_v62, %v1203_v51  ;;  %v1213_v37 = vrot.slane %v164_v50, 6 }
  0x1e   :  { %v1197_v16 = vsel %vm4051_vm8, %v1193_v56, %v4065_v43  ;;  %v1524_v45 = vmax.bf16 %v1179_v26, %v1105_v48  ;;  %v1202_v24 = vrot.slane %v1201_v61, 4  ;;  %v1210_v25 = vor.u32 %v1209_v33, %v1208_v32 }
  0x1f   :  { %v1526_v5 = vmax.bf16 %v1188_v58, %v1107_v52  ;;  %v1528_v6 = vmax.bf16 %v1197_v16, %v1109_v55  ;;  %v4092_v30 = vor.u32 %v1213_v37, %v1212_v15  ;;  %vm1588_vm9 = vcmask 1041408  }
  0x20   :  { %vm1589_vm10 = vcmask 1045508   ;;  %v3709_v46 = vrot.slane %v3844_v0, 10  ;;  %v1206_v11 = vsel %vm4051_vm8, %v1202_v24, %v4088_v21  ;;  %v1211_v35 = vrot.slane %v1210_v25, 4 }
  0x21   :  { %vm4098_vm11 = vmor %vm1588_vm9, %vm1589_vm10  ;;  %v1593_v50 = vrot.slane %v3849_v1, 6  ;;  %v3710_v48 = vrot.slane %v3854_v2, 10  ;;  %v1530_v52 = vmax.bf16 %v1206_v11, %v1111_v54  ;;  %v1598_v55 = vrot.slane %v3859_v3, 6 }
  0x22   :  { %v3711_v12 = vrot.slane %v3864_v4, 10  ;;  %v1603_v0 = vrot.slane %v3873_v9, 6  ;;  %v1215_v18 = vsel %vm4051_vm8, %v1211_v35, %v4092_v30  ;;  %v3712_v42 = vrot.slane %v3882_v14, 10 }
  0x23   :  { %v1594_v23 = vsel %vm4098_vm11, %v3709_v46, %v1593_v50  ;;  %v1608_v2 = vrot.slane %v3896_v19, 6  ;;  %v1532_v54 = vmax.bf16 %v1215_v18, %v1113_v60  ;;  %v1599_v4 = vsel %vm4098_vm11, %v3710_v48, %v1598_v55 }
  0x24   :  { %v1604_v49 = vsel %vm4098_vm11, %v3711_v12, %v1603_v0  ;;  %v3713_v51 = vrot.slane %v3914_v28, 10  ;;  %v1613_v26 = vrot.slane %v3929_v34, 6  ;;  %v1815_v60 = vmax.bf16 %v1594_v23, %v1524_v45 }
  0x25   :  { %v1609_v14 = vsel %vm4098_vm11, %v3712_v42, %v1608_v2  ;;  %v4130_v56 = vmax.bf16 %v1599_v4, %v1526_v5  ;;  %v4132_v62 = vmax.bf16 %v1604_v49, %v1528_v6  ;;  %vm2071_vm12 = vcmask 11264  }
  0x26   :  { %v4134_v32 = vmax.bf16 %v1609_v14, %v1530_v52  ;;  %v94_v58 = vrot.slane %v92_v8, 4  ;;  %v1614_v28 = vsel %vm4098_vm11, %v3713_v51, %v1613_v26  ;;  %v113_v33 = vrot.slane %v111_v13, 4 }
  0x27   :  { %v1879_v61 = vmax.bf16 %v4130_v56, %v1815_v60  ;;  %v132_v15 = vrot.slane %v130_v27, 4  ;;  %v4145_v16 = vmax.bf16 %v1614_v28, %v1532_v54  ;;  %v151_v45 = vrot.slane %v149_v38, 4 }
  0x28   :  { %v95_v37 = vor.u32 %v94_v58, %v3890_v17  ;;  %v170_v8 = vrot.slane %v168_v53, 4  ;;  %v114_v25 = vor.u32 %v113_v33, %v3904_v22  ;;  %v885_v13 = vrot.slane %v883_v63, 4 }
  0x29   :  { %v1927_v24 = vmax.bf16 %v1879_v61, %v4132_v62  ;;  %v133_v5 = vor.u32 %v132_v15, %v3933_v36  ;;  %v152_v6 = vor.u32 %v151_v45, %v3946_v44  ;;  %v890_v38 = vrot.slane %v888_v20, 4 }
  0x2a   :  { %v96_v27 = vrot.slane %v95_v37, 4  ;;  %v171_v17 = vor.u32 %v170_v8, %v3967_v57  ;;  %v115_v53 = vrot.slane %v114_v25, 4  ;;  %v895_v22 = vrot.slane %v893_v31, 4 }
  0x2b   :  { %v1975_v46 = vmax.bf16 %v1927_v24, %v4134_v32  ;;  %v134_v11 = vrot.slane %v133_v5, 4  ;;  %v153_v35 = vrot.slane %v152_v6, 4  ;;  %v900_v63 = vrot.slane %v898_v40, 4 }
  0x2c   :  { %v172_v36 = vrot.slane %v171_v17, 4  ;;  %v751_v48 = vmax.bf16 %v96_v27, %v3849_v1  ;;  %v753_v57 = vmax.bf16 %v115_v53, %v3859_v3  ;;  %v905_v52 = vrot.slane %v903_v47, 4  ;;  %v4206_v1 = vld [vmem:[%s6809_s0 + $0x2c] sm:$0xf] }
  0x2d   :  { %v4168_v44 = vmax.bf16 %v1975_v46, %v4145_v16  ;;  %v755_v20 = vmax.bf16 %v134_v11, %v3873_v9  ;;  %v757_v12 = vmax.bf16 %v153_v35, %v3896_v19  ;;  %v1180_v23 = vrot.slane %v4055_v10, 4 }
  0x2e   :  { %v759_v31 = vmax.bf16 %v172_v36, %v3929_v34  ;;  %v1106_v18 = vmax.bf16 %v885_v13, %v751_v48  ;;  %v1108_v54 = vmax.bf16 %v890_v38, %v753_v57  ;;  %v1189_v51 = vrot.slane %v4061_v41, 4 }
  0x2f   :  { %2072 = vst.msk [vmem:[%s6810_s1] sm:$0xf] %vm2071_vm12, %v4168_v44  ;;  %v6818_v40 = vshrl.u32 %v4168_v44, 16  ;;  %v6817_v42 = vshll.u32 %v4168_v44, 16  ;;  %v1110_v4 = vmax.bf16 %v895_v22, %v755_v20  ;;  %v1112_v47 = vmax.bf16 %v900_v63, %v757_v12 }
  0x30   :  { %v1114_v49 = vmax.bf16 %v905_v52, %v759_v31  ;;  %v1198_v34 = vrot.slane %v4065_v43, 4  ;;  %v1207_v60 = vrot.slane %v4088_v21, 4  ;;  %v1216_v58 = vrot.slane %v4092_v30, 4  ;;  %v21_v21 = vld [vmem:[%s6809_s0 + $0x28] sm:$0xf] }
  0x31   :  { %v2124_v10 = vrot.slane %v6818_v40, 4  ;;  %v2127_v14 = vrot.slane %v6817_v42, 5  ;;  %v1525_v28 = vmax.bf16 %v1180_v23, %v1106_v18  ;;  %v1527_v61 = vmax.bf16 %v1189_v51, %v1108_v54 }
  0x32   :  { %v1529_v33 = vmax.bf16 %v1198_v34, %v1110_v4  ;;  %v1595_v15 = vrot.slane %v1593_v50, 4  ;;  %v1531_v37 = vmax.bf16 %v1207_v60, %v1112_v47  ;;  %v1533_v41 = vmax.bf16 %v1216_v58, %v1114_v49 }
  0x33   :  { %v1600_v43 = vrot.slane %v1598_v55, 4  ;;  %v1605_v45 = vrot.slane %v1603_v0, 4  ;;  %v1610_v30 = vrot.slane %v1608_v2, 4  ;;  %v1615_v8 = vrot.slane %v1613_v26, 4 }
  0x34   :  { %v1816_v24 = vmax.bf16 %v1595_v15, %v1525_v28  ;;  %vm2073_vm13 = vcmask 9216   ;;  %v2128_v9 = vor.u32 %v2127_v14, %v2124_v10  ;;  %v3741_v55 = vrot.slane %v4168_v44, 9 }
  0x35   :  { %v4208_v3 = vmax.bf16 %v1600_v43, %v1527_v61  ;;  %v4210_v50 = vmax.bf16 %v1605_v45, %v1529_v33  ;;  %v4213_v0 = vmax.bf16 %v1610_v30, %v1531_v37  ;;  %v4215_v25 = vmax.bf16 %v1615_v8, %v1533_v41  ;;  %v4253_v45 = vld [vmem:[%s6809_s0 + $0x30] sm:$0xf] }
  0x36   :  { %v174_v19 = vshrl.u32 %v21_v21, 16  ;;  %v177_v2 = vshll.u32 %v21_v21, 16  ;;  %v4218_v5 = vrot.slane %v2128_v9, 4  ;;  %v183_v13 = vshll.u32 %v4206_v1, 16  ;;  %v4268_v9 = vld [vmem:[%s6809_s0 + $0x34] sm:$0xf] }
  0x37   :  { %v1880_v26 = vmax.bf16 %v4208_v3, %v1816_v24  ;;  %v187_v27 = vshrl.u32 %v4206_v1, 16  ;;  %v3682_v38 = vrot.slane %v21_v21, 9  ;;  %v908_v46 = vrot.slane %v4206_v1, 5 }
  0x38   :  { %v176_v6 = vrot.slane %v174_v19, 4  ;;  %v179_v17 = vrot.slane %v177_v2, 5  ;;  %v185_v11 = vrot.slane %v183_v13, 5  ;;  %v1217_v22 = vrot.slane %v174_v19, 5 }
  0x39   :  { %v1928_v53 = vmax.bf16 %v1880_v26, %v4210_v50  ;;  %v1218_v35 = vrot.slane %v177_v2, 6  ;;  %v909_v48 = vsel %vm3974_vm5, %v3682_v38, %v908_v46  ;;  %v1221_v63 = vrot.slane %v187_v27, 5 }
  0x3a   :  { %v180_v36 = vor.u32 %v179_v17, %v176_v6  ;;  %v1222_v57 = vrot.slane %v183_v13, 6  ;;  %v3714_v12 = vrot.slane %v21_v21, 10  ;;  %v1618_v31 = vrot.slane %v4206_v1, 6 }
  0x3b   :  { %v1976_v20 = vmax.bf16 %v1928_v53, %v4213_v0  ;;  %v1219_v52 = vor.u32 %v1218_v35, %v1217_v22  ;;  %v1881_v54 = vmax.bf16 %v4132_v62, %v4130_v56  ;;  %v189_v4 = vrot.slane %v187_v27, 4 }
  0x3c   :  { %v181_v18 = vrot.slane %v180_v36, 4  ;;  %v1223_v23 = vor.u32 %v1222_v57, %v1221_v63  ;;  %v1619_v51 = vsel %vm4098_vm11, %v3714_v12, %v1618_v31  ;;  %v910_v34 = vrot.slane %v908_v46, 4 }
  0x3d   :  { %v4231_v47 = vmax.bf16 %v1976_v20, %v4215_v25  ;;  %v1220_v49 = vrot.slane %v1219_v52, 4  ;;  %v1929_v14 = vmax.bf16 %v1881_v54, %v4134_v32  ;;  %v190_v60 = vor.u32 %v189_v4, %v185_v11 }
  0x3e   :  { %v186_v10 = vsel %vm3918_vm4, %v181_v18, %v185_v11  ;;  %v1225_v58 = vrot.slane %v1223_v23, 4  ;;  %v1620_v26 = vrot.slane %v1618_v31, 4  ;;  %v1882_v13 = vmax.bf16 %v4210_v50, %v4208_v3 }
  0x3f   :  { %6938 = vst [vmem:[#allocation2_spill] sm:$0xff] %v4231_v47  ;;  %2074 = vst.msk [vmem:[%s6810_s1 + $0x4] sm:$0x3] %vm2073_vm13, %v4231_v47  ;;  %v2131_v56 = vshll.u32 %v4231_v47, 16  ;;  %v2555_v28 = vrot.slane %v4231_v47, 5  ;;  %v2701_v61 = vshrl.u32 %v4231_v47, 16  ;;  %v760_v15 = vmax.bf16 %v186_v10, %v21_v21 }
  0x40   :  { %v1224_v37 = vsel %vm4051_vm8, %v1220_v49, %v1223_v23  ;;  %v1977_v41 = vmax.bf16 %v1929_v14, %v4145_v16  ;;  %v191_v43 = vrot.slane %v190_v60, 4  ;;  %v193_v6 = vshrl.u32 %v4253_v45, 16 }
  0x41   :  { %v4255_v30 = vrot.slane %v2131_v56, 5  ;;  %v4259_v8 = vsel %vm3974_vm5, %v3741_v55, %v2555_v28  ;;  %v4261_v24 = vrot.slane %v2701_v61, 5  ;;  %v4263_v21 = vrot.slane %v2131_v56, 6 }
  0x42   :  { %v1115_v19 = vmax.bf16 %v909_v48, %v760_v15  ;;  %v761_v2 = vmax.bf16 %v191_v43, %v4206_v1  ;;  %v196_v17 = vshll.u32 %v4253_v45, 16  ;;  %v1930_v1 = vmax.bf16 %v1882_v13, %v4213_v0 }
  0x43   :  { %6939 = vst [vmem:[#allocation3_spill] sm:$0xff] %v4261_v24  ;;  %6940 = vst [vmem:[#allocation4_spill] sm:$0xff] %v4263_v21  ;;  %v202_v53 = vshll.u32 %v4268_v9, 16  ;;  %v195_v11 = vrot.slane %v193_v6, 4  ;;  %v206_v22 = vshrl.u32 %v4268_v9, 16  ;;  %v3683_v35 = vrot.slane %v4253_v45, 9 }
  0x44   :  { %v1534_v38 = vmax.bf16 %v1224_v37, %v1115_v19  ;;  %v1116_v46 = vmax.bf16 %v910_v34, %v761_v2  ;;  %v198_v3 = vrot.slane %v196_v17, 5  ;;  %v1978_v63 = vmax.bf16 %v1930_v1, %v4215_v25 }
  0x45   :  { %v204_v57 = vrot.slane %v202_v53, 5  ;;  %v913_v52 = vrot.slane %v4268_v9, 5  ;;  %v1226_v12 = vrot.slane %v193_v6, 5  ;;  %v1227_v31 = vrot.slane %v196_v17, 6 }
  0x46   :  { %v4285_v36 = vmax.bf16 %v1619_v51, %v1534_v38  ;;  %v1535_v48 = vmax.bf16 %v1225_v58, %v1116_v46  ;;  %v199_v20 = vor.u32 %v198_v3, %v195_v11  ;;  %v1230_v54 = vrot.slane %v206_v22, 5 }
  0x47   :  { %v1231_v4 = vrot.slane %v202_v53, 6  ;;  %v914_v51 = vsel %vm3974_vm5, %v3683_v35, %v913_v52  ;;  %v1228_v34 = vor.u32 %v1227_v31, %v1226_v12  ;;  %v3715_v10 = vrot.slane %v4253_v45, 10 }
  0x48   :  { %v4290_v18 = vmax.bf16 %v1977_v41, %v4285_v36  ;;  %v4292_v23 = vmax.bf16 %v1620_v26, %v1535_v48  ;;  %v200_v49 = vrot.slane %v199_v20, 4  ;;  %v1623_v37 = vrot.slane %v4268_v9, 6  ;;  %v25_v48 = vld [vmem:[%s6809_s0 + $0x38] sm:$0xf] }
  0x49   :  { %v1229_v61 = vrot.slane %v1228_v34, 4  ;;  %v4310_v15 = vor.u32 %v1231_v4, %v1230_v54  ;;  %v208_v20 = vrot.slane %v206_v22, 4  ;;  %v915_v12 = vrot.slane %v913_v52, 4  ;;  %v4353_v54 = vld [vmem:[%s6809_s0 + $0x3c] sm:$0xf] }
  0x4a   :  { %2075 = vst.msk [vmem:[%s6810_s1 + $0x8] sm:$0xf] %vm2071_vm12, %v4290_v18  ;;  %v6816_v14 = vshrl.u32 %v4290_v18, 16  ;;  %v6815_v60 = vshll.u32 %v4290_v18, 16  ;;  %v4305_v58 = vmax.bf16 %v1978_v63, %v4292_v23  ;;  %v3742_v56 = vrot.slane %v4290_v18, 9 }
  0x4b   :  { %v205_v28 = vsel %vm3918_vm4, %v200_v49, %v204_v57  ;;  %v1233_v17 = vsel %vm4051_vm8, %v1229_v61, %v4310_v15  ;;  %v1624_v35 = vsel %vm4098_vm11, %v3715_v10, %v1623_v37  ;;  %v1234_v31 = vrot.slane %v4310_v15, 4 }
  0x4c   :  { %6941 = vst [vmem:[#allocation5_spill] sm:$0xff] %v4305_v58  ;;  %v2138_v41 = vrot.slane %v6816_v14, 4  ;;  %v2141_v43 = vrot.slane %v6815_v60, 5  ;;  %2076 = vst.msk [vmem:[%s6810_s1 + $0xc] sm:$0x3] %vm2073_vm13, %v4305_v58  ;;  %v2145_v19 = vshll.u32 %v4305_v58, 16  ;;  %v762_v6 = vmax.bf16 %v205_v28, %v4253_v45 }
  0x4d   :  { %v2559_v2 = vrot.slane %v4305_v58, 5  ;;  %v2711_v26 = vshrl.u32 %v4305_v58, 16  ;;  %v1883_v45 = vmax.bf16 %v4134_v32, %v4132_v62  ;;  %v209_v52 = vor.u32 %v208_v20, %v204_v57 }
  0x4e   :  { %v2142_v38 = vor.u32 %v2141_v43, %v2138_v41  ;;  %v4330_v46 = vrot.slane %v2145_v19, 5  ;;  %v4336_v53 = vrot.slane %v2145_v19, 6  ;;  %v1117_v3 = vmax.bf16 %v914_v51, %v762_v6 }
  0x4f   :  { %v4334_v1 = vsel %vm3974_vm5, %v3742_v56, %v2559_v2  ;;  %v4338_v11 = vrot.slane %v2711_v26, 5  ;;  %v1931_v62 = vmax.bf16 %v1883_v45, %v4145_v16  ;;  %v1625_v51 = vrot.slane %v1623_v37, 4 }
  0x50   :  { %6942 = vst [vmem:[#allocation6_spill] sm:$0xff] %v4336_v53  ;;  %v4347_v63 = vrot.slane %v2142_v38, 4  ;;  %v1536_v49 = vmax.bf16 %v1233_v17, %v1117_v3  ;;  %v1884_v34 = vmax.bf16 %v4213_v0, %v4210_v50  ;;  %v212_v10 = vshrl.u32 %v25_v48, 16 }
  0x51   :  { %6943 = vst [vmem:[#allocation7_spill] sm:$0xff] %v4338_v11  ;;  %v1979_v28 = vmax.bf16 %v1931_v62, %v4285_v36  ;;  %v215_v61 = vshll.u32 %v25_v48, 16  ;;  %v221_v15 = vshll.u32 %v4353_v54, 16  ;;  %v210_v41 = vrot.slane %v209_v52, 4 }
  0x52   :  { %v4364_v56 = vmax.bf16 %v1624_v35, %v1536_v49  ;;  %v1932_v37 = vmax.bf16 %v1884_v34, %v4215_v25  ;;  %v214_v43 = vrot.slane %v212_v10, 4  ;;  %v225_v19 = vshrl.u32 %v4353_v54, 16 }
  0x53   :  { %v217_v57 = vrot.slane %v215_v61, 5  ;;  %v223_v26 = vrot.slane %v221_v15, 5  ;;  %v3684_v50 = vrot.slane %v25_v48, 9  ;;  %v763_v6 = vmax.bf16 %v210_v41, %v4268_v9 }
  0x54   :  { %v4371_v2 = vmax.bf16 %v1979_v28, %v4364_v56  ;;  %v1980_v17 = vmax.bf16 %v1932_v37, %v4292_v23  ;;  %v918_v38 = vrot.slane %v4353_v54, 5  ;;  %v1235_v3 = vrot.slane %v212_v10, 5 }
  0x55   :  { %v218_v49 = vor.u32 %v217_v57, %v214_v43  ;;  %v1118_v62 = vmax.bf16 %v915_v12, %v763_v6  ;;  %v1236_v52 = vrot.slane %v215_v61, 6  ;;  %v1239_v34 = vrot.slane %v225_v19, 5 }
  0x56   :  { %2077 = vst.msk [vmem:[%s6810_s1 + $0x10] sm:$0xf] %vm2071_vm12, %v4371_v2  ;;  %v6813_v35 = vshrl.u32 %v4371_v2, 16  ;;  %v6814_v45 = vshll.u32 %v4371_v2, 16  ;;  %v3743_v20 = vrot.slane %v4371_v2, 9  ;;  %v919_v9 = vsel %vm3974_vm5, %v3684_v50, %v918_v38 }
  0x57   :  { %v219_v41 = vrot.slane %v218_v49, 4  ;;  %v1240_v37 = vrot.slane %v221_v15, 6  ;;  %v1537_v13 = vmax.bf16 %v1234_v31, %v1118_v62  ;;  %v1237_v4 = vor.u32 %v1236_v52, %v1235_v3 }
  0x58   :  { %v2152_v10 = vrot.slane %v6813_v35, 4  ;;  %v2155_v28 = vrot.slane %v6814_v45, 5  ;;  %v3716_v33 = vrot.slane %v25_v48, 10  ;;  %v1628_v27 = vrot.slane %v4353_v54, 6 }
  0x59   :  { %v224_v12 = vsel %vm3918_vm4, %v219_v41, %v223_v26  ;;  %v1241_v57 = vor.u32 %v1240_v37, %v1239_v34  ;;  %v1885_v61 = vmax.bf16 %v4145_v16, %v4134_v32  ;;  %v4395_v50 = vmax.bf16 %v1625_v51, %v1537_v13 }
  0x5a   :  { %v2156_v43 = vor.u32 %v2155_v28, %v2152_v10  ;;  %v764_v6 = vmax.bf16 %v224_v12, %v25_v48  ;;  %v1238_v35 = vrot.slane %v1237_v4, 4  ;;  %v1629_v15 = vsel %vm4098_vm11, %v3716_v33, %v1628_v27  ;;  %v4410_v48 = vld [vmem:[%s6809_s0 + $0x40] sm:$0xf] }
  0x5b   :  { %v1933_v3 = vmax.bf16 %v1885_v61, %v4285_v36  ;;  %v227_v49 = vrot.slane %v225_v19, 4  ;;  %v920_v62 = vrot.slane %v918_v38, 4  ;;  %v4403_v52 = vmax.bf16 %v1980_v17, %v4395_v50 }
  0x5c   :  { %v4399_v31 = vrot.slane %v2156_v43, 4  ;;  %v1119_v34 = vmax.bf16 %v919_v9, %v764_v6  ;;  %v1242_v32 = vsel %vm4051_vm8, %v1238_v35, %v1241_v57  ;;  %v1243_v13 = vrot.slane %v1241_v57, 4 }
  0x5d   :  { %6944 = vst [vmem:[#allocation8_spill] sm:$0xff] %v4403_v52  ;;  %v1981_v33 = vmax.bf16 %v1933_v3, %v4364_v56  ;;  %v228_v4 = vor.u32 %v227_v49, %v223_v26  ;;  %v1630_v51 = vrot.slane %v1628_v27, 4  ;;  %v1886_v19 = vmax.bf16 %v4215_v25, %v4213_v0  ;;  %2078 = vst.msk [vmem:[%s6810_s1 + $0x14] sm:$0x3] %vm2073_vm13, %v4403_v52  ;;  %v4428_v0 = vld [vmem:[%s6809_s0 + $0x44] sm:$0xf] }
  0x5e   :  { %v2159_v17 = vshll.u32 %v4403_v52, 16  ;;  %v2563_v38 = vrot.slane %v4403_v52, 5  ;;  %v2721_v35 = vshrl.u32 %v4403_v52, 16  ;;  %v1538_v10 = vmax.bf16 %v1242_v32, %v1119_v34 }
  0x5f   :  { %v229_v26 = vrot.slane %v228_v4, 4  ;;  %v1934_v27 = vmax.bf16 %v1886_v19, %v4292_v23  ;;  %v231_v28 = vshrl.u32 %v4410_v48, 16  ;;  %v234_v34 = vshll.u32 %v4410_v48, 16 }
  0x60   :  { %v4431_v41 = vrot.slane %v2159_v17, 5  ;;  %v4435_v37 = vsel %vm3974_vm5, %v3743_v20, %v2563_v38  ;;  %v4437_v43 = vrot.slane %v2721_v35, 5  ;;  %v4439_v12 = vrot.slane %v2159_v17, 6 }
  0x61   :  { %v4441_v57 = vmax.bf16 %v1629_v15, %v1538_v10  ;;  %v765_v61 = vmax.bf16 %v229_v26, %v4353_v54  ;;  %v1982_v6 = vmax.bf16 %v1934_v27, %v4395_v50  ;;  %v233_v3 = vrot.slane %v231_v28, 4 }
  0x62   :  { %6945 = vst [vmem:[#allocation9_spill] sm:$0xff] %v4437_v43  ;;  %6946 = vst [vmem:[#allocation10_spill] sm:$0xff] %v4439_v12  ;;  %v240_v32 = vshll.u32 %v4428_v0, 16  ;;  %v244_v54 = vshrl.u32 %v4428_v0, 16  ;;  %v3685_v19 = vrot.slane %v4410_v48, 9  ;;  %v236_v17 = vrot.slane %v234_v34, 5 }
  0x63   :  { %v4454_v15 = vmax.bf16 %v1981_v33, %v4441_v57  ;;  %v1120_v4 = vmax.bf16 %v920_v62, %v765_v61  ;;  %v923_v35 = vrot.slane %v4428_v0, 5  ;;  %v1244_v10 = vrot.slane %v231_v28, 5 }
  0x64   :  { %v242_v38 = vrot.slane %v240_v32, 5  ;;  %v237_v61 = vor.u32 %v236_v17, %v233_v3  ;;  %v1245_v20 = vrot.slane %v234_v34, 6  ;;  %v1248_v45 = vrot.slane %v244_v54, 5 }
  0x65   :  { %2079 = vst.msk [vmem:[%s6810_s1 + $0x18] sm:$0xf] %vm2071_vm12, %v4454_v15  ;;  %v6820_v26 = vshrl.u32 %v4454_v15, 16  ;;  %v6819_v33 = vshll.u32 %v4454_v15, 16  ;;  %v1539_v62 = vmax.bf16 %v1243_v13, %v1120_v4  ;;  %v3744_v27 = vrot.slane %v4454_v15, 9 }
  0x66   :  { %v924_v9 = vsel %vm3974_vm5, %v3685_v19, %v923_v35  ;;  %v1249_v42 = vrot.slane %v240_v32, 6  ;;  %v238_v40 = vrot.slane %v237_v61, 4  ;;  %v1246_v49 = vor.u32 %v1245_v20, %v1244_v10 }
  0x67   :  { %v2166_v28 = vrot.slane %v6820_v26, 4  ;;  %v2169_v60 = vrot.slane %v6819_v33, 5  ;;  %v4473_v14 = vmax.bf16 %v1630_v51, %v1539_v62  ;;  %v3717_v13 = vrot.slane %v4410_v48, 10 }
  0x68   :  { %v1633_v3 = vrot.slane %v4428_v0, 6  ;;  %v1250_v19 = vor.u32 %v1249_v42, %v1248_v45  ;;  %v1887_v17 = vmax.bf16 %v4285_v36, %v4145_v16  ;;  %v243_v33 = vsel %vm3918_vm4, %v238_v40, %v242_v38 }
  0x69   :  { %v4478_v4 = vmax.bf16 %v1982_v6, %v4473_v14  ;;  %v2170_v34 = vor.u32 %v2169_v60, %v2166_v28  ;;  %v1247_v51 = vrot.slane %v1246_v49, 4  ;;  %v246_v20 = vrot.slane %v244_v54, 4 }
  0x6a   :  { %v1634_v32 = vsel %vm4098_vm11, %v3717_v13, %v1633_v3  ;;  %v766_v45 = vmax.bf16 %v243_v33, %v4410_v48  ;;  %v1935_v54 = vmax.bf16 %v1887_v17, %v4364_v56  ;;  %v925_v26 = vrot.slane %v923_v35, 4  ;;  %v4511_v48 = vld [vmem:[%s6809_s0 + $0x48] sm:$0xf]  ;;  %v4516_v33 = vld [vmem:[%s6809_s0 + $0x4c] sm:$0xf] }
  0x6b   :  { %6947 = vst [vmem:[#allocation11_spill] sm:$0xff] %v4478_v4  ;;  %2080 = vst.msk [vmem:[%s6810_s1 + $0x1c] sm:$0x3] %vm2073_vm13, %v4478_v4  ;;  %v2171_v6 = vrot.slane %v2170_v34, 4  ;;  %v2173_v42 = vshll.u32 %v4478_v4, 16  ;;  %v2567_v60 = vrot.slane %v4478_v4, 5  ;;  %v1251_v49 = vsel %vm4051_vm8, %v1247_v51, %v1250_v19 }
  0x6c   :  { %v2731_v16 = vshrl.u32 %v4478_v4, 16  ;;  %v1121_v13 = vmax.bf16 %v924_v9, %v766_v45  ;;  %v1983_v34 = vmax.bf16 %v1935_v54, %v4441_v57  ;;  %v247_v40 = vor.u32 %v246_v20, %v242_v38 }
  0x6d   :  { %v2175_v10 = vrot.slane %v2173_v42, 5  ;;  %v4501_v62 = vsel %vm3974_vm5, %v3744_v27, %v2567_v60  ;;  %v4505_v28 = vrot.slane %v2173_v42, 6  ;;  %v1252_v17 = vrot.slane %v1250_v19, 4 }
  0x6e   :  { %6948 = vst [vmem:[#allocation12_spill] sm:$0xff] %v4501_v62  ;;  %v4503_v61 = vrot.slane %v2731_v16, 5  ;;  %v1635_v51 = vrot.slane %v1633_v3, 4  ;;  %v1540_v35 = vmax.bf16 %v1251_v49, %v1121_v13  ;;  %v248_v20 = vrot.slane %v247_v40, 4 }
  0x6f   :  { %6950 = vst [vmem:[#allocation14_spill] sm:$0xff] %v4505_v28  ;;  %v2176_v27 = vsel %vm3918_vm4, %v2171_v6, %v2175_v10  ;;  %v1888_v42 = vmax.bf16 %v4292_v23, %v4215_v25  ;;  %v250_v60 = vshrl.u32 %v4511_v48, 16  ;;  %v253_v16 = vshll.u32 %v4511_v48, 16 }
  0x70   :  { %6949 = vst [vmem:[#allocation13_spill] sm:$0xff] %v4503_v61  ;;  %v4523_v38 = vmax.bf16 %v2176_v27, %v4454_v15  ;;  %v259_v45 = vshll.u32 %v4516_v33, 16  ;;  %v263_v6 = vshrl.u32 %v4516_v33, 16  ;;  %v4533_v3 = vmax.bf16 %v1634_v32, %v1540_v35 }
  0x71   :  { %v767_v54 = vmax.bf16 %v248_v20, %v4428_v0  ;;  %v1936_v40 = vmax.bf16 %v1888_v42, %v4395_v50  ;;  %v252_v49 = vrot.slane %v250_v60, 4  ;;  %v255_v10 = vrot.slane %v253_v16, 5 }
  0x72   :  { %6951 = vst [vmem:[#allocation15_spill] sm:$0xff] %v4523_v38  ;;  %v261_v25 = vrot.slane %v259_v45, 5  ;;  %v3686_v13 = vrot.slane %v4511_v48, 9  ;;  %v2031_v27 = vmax.bf16 %v1983_v34, %v4533_v3  ;;  %v928_v55 = vrot.slane %v4516_v33, 5 }
  0x73   :  { %v1122_v9 = vmax.bf16 %v925_v26, %v767_v54  ;;  %v1984_v22 = vmax.bf16 %v1936_v40, %v4473_v14  ;;  %v256_v4 = vor.u32 %v255_v10, %v252_v49  ;;  %v1253_v19 = vrot.slane %v250_v60, 5 }
  0x74   :  { %v1254_v32 = vrot.slane %v253_v16, 6  ;;  %v1257_v35 = vrot.slane %v263_v6, 5  ;;  %2081 = vst.msk [vmem:[%s6810_s1 + $0x20] sm:$0xf] %vm2071_vm12, %v2031_v27  ;;  %v2178_v0 = vshrl.u32 %v2031_v27, 16  ;;  %v2181_v20 = vshll.u32 %v2031_v27, 16 }
  0x75   :  { %v1541_v42 = vmax.bf16 %v1252_v17, %v1122_v9  ;;  %v3745_v38 = vrot.slane %v2031_v27, 9  ;;  %v3769_v62 = vrot.slane %v2031_v27, 10  ;;  %v257_v34 = vrot.slane %v256_v4, 4 }
  0x76   :  { %v929_v26 = vsel %vm3974_vm5, %v3686_v13, %v928_v55  ;;  %v1255_v54 = vor.u32 %v1254_v32, %v1253_v19  ;;  %v2180_v40 = vrot.slane %v2178_v0, 4  ;;  %v2183_v49 = vrot.slane %v2181_v20, 5 }
  0x77   :  { %v2737_v60 = vrot.slane %v2178_v0, 5  ;;  %v2738_v16 = vrot.slane %v2181_v20, 6  ;;  %v4547_v10 = vmax.bf16 %v1635_v51, %v1541_v42  ;;  %v262_v52 = vsel %vm3918_vm4, %v257_v34, %v261_v25 }
  0x78   :  { %v1256_v61 = vrot.slane %v1255_v54, 4  ;;  %v1258_v28 = vrot.slane %v259_v45, 6  ;;  %v2184_v43 = vor.u32 %v2183_v49, %v2180_v40  ;;  %v768_v17 = vmax.bf16 %v262_v52, %v4511_v48 }
  0x79   :  { %v2739_v9 = vor.u32 %v2738_v16, %v2737_v60  ;;  %v3718_v4 = vrot.slane %v4511_v48, 10  ;;  %v2032_v13 = vmax.bf16 %v1984_v22, %v4547_v10  ;;  %v1638_v32 = vrot.slane %v4516_v33, 6 }
  0x7a   :  { %v1259_v19 = vor.u32 %v1258_v28, %v1257_v35  ;;  %v1889_v51 = vmax.bf16 %v4364_v56, %v4285_v36  ;;  %v2185_v0 = vrot.slane %v2184_v43, 4  ;;  %v1123_v42 = vmax.bf16 %v929_v26, %v768_v17 }
  0x7b   :  { %v2740_v20 = vrot.slane %v2739_v9, 4  ;;  %v265_v34 = vrot.slane %v263_v6, 4  ;;  %2082 = vst.msk [vmem:[%s6810_s1 + $0x24] sm:$0x3] %vm2073_vm13, %v2032_v13  ;;  %v2187_v52 = vshll.u32 %v2032_v13, 16  ;;  %v2571_v45 = vrot.slane %v2032_v13, 5 }
  0x7c   :  { %v2741_v48 = vshrl.u32 %v2032_v13, 16  ;;  %v3003_v54 = vrot.slane %v2032_v13, 6  ;;  %v1260_v22 = vsel %vm4051_vm8, %v1256_v61, %v1259_v19  ;;  %v1639_v28 = vsel %vm4098_vm11, %v3718_v4, %v1638_v32  ;;  %v4578_v9 = vld [vmem:[%s6809_s0 + $0x50] sm:$0xf] }
  0x7d   :  { %v1937_v36 = vmax.bf16 %v1889_v51, %v4441_v57  ;;  %v266_v43 = vor.u32 %v265_v34, %v261_v25  ;;  %v2189_v35 = vrot.slane %v2187_v52, 5  ;;  %v4568_v6 = vsel %vm3974_vm5, %v3745_v38, %v2571_v45 }
  0x7e   :  { %v2743_v26 = vrot.slane %v2741_v48, 5  ;;  %v2744_v40 = vrot.slane %v2187_v52, 6  ;;  %v4572_v49 = vsel %vm4098_vm11, %v3769_v62, %v3003_v54  ;;  %v1542_v60 = vmax.bf16 %v1260_v22, %v1123_v42  ;;  %v4585_v62 = vld [vmem:[%s6809_s0 + $0x54] sm:$0xf] }
  0x7f   :  { %6952 = vst [vmem:[#allocation16_spill] sm:$0xff] %v4572_v49  ;;  %v1985_v61 = vmax.bf16 %v1937_v36, %v4533_v3  ;;  %v267_v16 = vrot.slane %v266_v43, 4  ;;  %v2190_v25 = vsel %vm3918_vm4, %v2185_v0, %v2189_v35  ;;  %v930_v17 = vrot.slane %v928_v55, 4 }
  0x80   :  { %v2745_v38 = vor.u32 %v2744_v40, %v2743_v26  ;;  %v1261_v4 = vrot.slane %v1259_v19, 4  ;;  %v4587_v13 = vmax.bf16 %v2190_v25, %v2031_v27  ;;  %v4589_v51 = vmax.bf16 %v1639_v28, %v1542_v60 }
  0x81   :  { %v769_v42 = vmax.bf16 %v267_v16, %v4516_v33  ;;  %v1640_v34 = vrot.slane %v1638_v32, 4  ;;  %v1890_v55 = vmax.bf16 %v4395_v50, %v4292_v23  ;;  %v269_v19 = vshrl.u32 %v4578_v9, 16 }
  0x82   :  { %v4594_v52 = vsel %vm4051_vm8, %v2740_v20, %v2745_v38  ;;  %v272_v0 = vshll.u32 %v4578_v9, 16  ;;  %v2033_v45 = vmax.bf16 %v1985_v61, %v4589_v51  ;;  %v278_v33 = vshll.u32 %v4585_v62, 16 }
  0x83   :  { %v1124_v48 = vmax.bf16 %v930_v17, %v769_v42  ;;  %v1938_v32 = vmax.bf16 %v1890_v55, %v4473_v14  ;;  %v271_v54 = vrot.slane %v269_v19, 4  ;;  %v282_v22 = vshrl.u32 %v4585_v62, 16 }
  0x84   :  { %v274_v20 = vrot.slane %v272_v0, 5  ;;  %2083 = vst.msk [vmem:[%s6810_s1 + $0x28] sm:$0xf] %vm2071_vm12, %v2033_v45  ;;  %v2192_v23 = vshrl.u32 %v2033_v45, 16  ;;  %v2195_v28 = vshll.u32 %v2033_v45, 16  ;;  %v3746_v43 = vrot.slane %v2033_v45, 9 }
  0x85   :  { %v1543_v36 = vmax.bf16 %v1261_v4, %v1124_v48  ;;  %v1986_v35 = vmax.bf16 %v1938_v32, %v4547_v10  ;;  %v3770_v26 = vrot.slane %v2033_v45, 10  ;;  %v280_v60 = vrot.slane %v278_v33, 5 }
  0x86   :  { %v275_v40 = vor.u32 %v274_v20, %v271_v54  ;;  %v2194_v61 = vrot.slane %v2192_v23, 4  ;;  %v2197_v16 = vrot.slane %v2195_v28, 5  ;;  %v2747_v25 = vrot.slane %v2192_v23, 5 }
  0x87   :  { %v2748_v38 = vrot.slane %v2195_v28, 6  ;;  %v4611_v17 = vmax.bf16 %v1640_v34, %v1543_v36  ;;  %v3687_v55 = vrot.slane %v4578_v9, 9  ;;  %v933_v27 = vrot.slane %v4585_v62, 5 }
  0x88   :  { %v276_v42 = vrot.slane %v275_v40, 4  ;;  %v2198_v49 = vor.u32 %v2197_v16, %v2194_v61  ;;  %v1262_v4 = vrot.slane %v269_v19, 5  ;;  %v1263_v48 = vrot.slane %v272_v0, 6 }
  0x89   :  { %v2749_v12 = vor.u32 %v2748_v38, %v2747_v25  ;;  %v2034_v32 = vmax.bf16 %v1986_v35, %v4611_v17  ;;  %v934_v20 = vsel %vm3974_vm5, %v3687_v55, %v933_v27  ;;  %v1266_v23 = vrot.slane %v282_v22, 5 }
  0x8a   :  { %v281_v54 = vsel %vm3918_vm4, %v276_v42, %v280_v60  ;;  %v2199_v34 = vrot.slane %v2198_v49, 4  ;;  %v1264_v40 = vor.u32 %v1263_v48, %v1262_v4  ;;  %v1267_v38 = vrot.slane %v278_v33, 6 }
  0x8b   :  { %v2750_v28 = vrot.slane %v2749_v12, 4  ;;  %v770_v36 = vmax.bf16 %v281_v54, %v4578_v9  ;;  %2084 = vst.msk [vmem:[%s6810_s1 + $0x2c] sm:$0x3] %vm2073_vm13, %v2034_v32  ;;  %v2201_v19 = vshll.u32 %v2034_v32, 16  ;;  %v2575_v0 = vrot.slane %v2034_v32, 5 }
  0x8c   :  { %v2751_v35 = vshrl.u32 %v2034_v32, 16  ;;  %v3007_v61 = vrot.slane %v2034_v32, 6  ;;  %v1265_v25 = vrot.slane %v1264_v40, 4  ;;  %v3719_v42 = vrot.slane %v4578_v9, 10 }
  0x8d   :  { %v1125_v16 = vmax.bf16 %v934_v20, %v770_v36  ;;  %v2203_v55 = vrot.slane %v2201_v19, 5  ;;  %v4628_v12 = vsel %vm3974_vm5, %v3746_v43, %v2575_v0  ;;  %v2754_v4 = vrot.slane %v2201_v19, 6  ;;  %v4656_v19 = vld [vmem:[%s6809_s0 + $0x5c] sm:$0xf] }
  0x8e   :  { %6953 = vst [vmem:[#allocation17_spill] sm:$0xff] %v4628_v12  ;;  %v2753_v49 = vrot.slane %v2751_v35, 5  ;;  %v4632_v48 = vsel %vm4098_vm11, %v3770_v26, %v3007_v61  ;;  %v1268_v54 = vor.u32 %v1267_v38, %v1266_v23  ;;  %v1643_v58 = vrot.slane %v4585_v62, 6 }
  0x8f   :  { %6954 = vst [vmem:[#allocation18_spill] sm:$0xff] %v4632_v48  ;;  %v1891_v32 = vmax.bf16 %v4441_v57, %v4364_v56  ;;  %v2204_v9 = vsel %vm3918_vm4, %v2199_v34, %v2203_v55  ;;  %v284_v20 = vrot.slane %v282_v22, 4  ;;  %v935_v36 = vrot.slane %v933_v27, 4  ;;  %v33_v56 = vld [vmem:[%s6809_s0 + $0x58] sm:$0xf] }
  0x90   :  { %v2755_v33 = vor.u32 %v2754_v4, %v2753_v49  ;;  %v4639_v43 = vmax.bf16 %v2204_v9, %v2033_v45  ;;  %v1269_v40 = vsel %vm4051_vm8, %v1265_v25, %v1268_v54  ;;  %v1644_v26 = vsel %vm4098_vm11, %v3719_v42, %v1643_v58 }
  0x91   :  { %v1939_v23 = vmax.bf16 %v1891_v32, %v4533_v3  ;;  %v1544_v22 = vmax.bf16 %v1269_v40, %v1125_v16  ;;  %v285_v27 = vor.u32 %v284_v20, %v280_v60  ;;  %v1270_v45 = vrot.slane %v1268_v54, 4 }
  0x92   :  { %6955 = vst [vmem:[#allocation19_spill] sm:$0xff] %v4639_v43  ;;  %v4651_v34 = vsel %vm4051_vm8, %v2750_v28, %v2755_v33  ;;  %v1645_v61 = vrot.slane %v1643_v58, 4  ;;  %v1892_v25 = vmax.bf16 %v4473_v14, %v4395_v50  ;;  %v288_v16 = vshrl.u32 %v33_v56, 16 }
  0x93   :  { %6956 = vst [vmem:[#allocation20_spill] sm:$0xff] %v4651_v34  ;;  %v1987_v35 = vmax.bf16 %v1939_v23, %v4589_v51  ;;  %v4663_v38 = vmax.bf16 %v1644_v26, %v1544_v22  ;;  %v286_v28 = vrot.slane %v285_v27, 4  ;;  %v291_v60 = vshll.u32 %v33_v56, 16 }
  0x94   :  { %v1940_v42 = vmax.bf16 %v1892_v25, %v4547_v10  ;;  %v297_v55 = vshll.u32 %v4656_v19, 16  ;;  %v301_v49 = vshrl.u32 %v4656_v19, 16  ;;  %v3688_v4 = vrot.slane %v33_v56, 9 }
  0x95   :  { %v4669_v54 = vmax.bf16 %v1987_v35, %v4663_v38  ;;  %v771_v58 = vmax.bf16 %v286_v28, %v4585_v62  ;;  %v290_v32 = vrot.slane %v288_v16, 4  ;;  %v293_v9 = vrot.slane %v291_v60, 5 }
  0x96   :  { %v1988_v50 = vmax.bf16 %v1940_v42, %v4611_v17  ;;  %v299_v33 = vrot.slane %v297_v55, 5  ;;  %v938_v20 = vrot.slane %v4656_v19, 5  ;;  %v1271_v40 = vrot.slane %v288_v16, 5 }
  0x97   :  { %2085 = vst.msk [vmem:[%s6810_s1 + $0x30] sm:$0xf] %vm2071_vm12, %v4669_v54  ;;  %v2206_v26 = vshrl.u32 %v4669_v54, 16  ;;  %v2209_v23 = vshll.u32 %v4669_v54, 16  ;;  %v1126_v22 = vmax.bf16 %v935_v36, %v771_v58  ;;  %v3747_v62 = vrot.slane %v4669_v54, 9 }
  0x98   :  { %v3771_v27 = vrot.slane %v4669_v54, 10  ;;  %v294_v35 = vor.u32 %v293_v9, %v290_v32  ;;  %v939_v25 = vsel %vm3974_vm5, %v3688_v4, %v938_v20  ;;  %v1272_v28 = vrot.slane %v291_v60, 6 }
  0x99   :  { %v2208_v16 = vrot.slane %v2206_v26, 4  ;;  %v2211_v42 = vrot.slane %v2209_v23, 5  ;;  %v2757_v0 = vrot.slane %v2206_v26, 5  ;;  %v2758_v48 = vrot.slane %v2209_v23, 6 }
  0x9a   :  { %v1545_v34 = vmax.bf16 %v1270_v45, %v1126_v22  ;;  %v295_v43 = vrot.slane %v294_v35, 4  ;;  %v1273_v12 = vor.u32 %v1272_v28, %v1271_v40  ;;  %v1275_v11 = vrot.slane %v301_v49, 5  ;;  %v4705_v22 = vld [vmem:[%s6809_s0 + $0x60] sm:$0xf] }
  0x9b   :  { %v2212_v53 = vor.u32 %v2211_v42, %v2208_v16  ;;  %v2759_v47 = vor.u32 %v2758_v48, %v2757_v0  ;;  %v1276_v36 = vrot.slane %v297_v55, 6  ;;  %v3720_v58 = vrot.slane %v33_v56, 10 }
  0x9c   :  { %v4685_v24 = vmax.bf16 %v1645_v61, %v1545_v34  ;;  %v300_v32 = vsel %vm3918_vm4, %v295_v43, %v299_v33  ;;  %v1274_v9 = vrot.slane %v1273_v12, 4  ;;  %v1648_v60 = vrot.slane %v4656_v19, 6 }
  0x9d   :  { %v2213_v4 = vrot.slane %v2212_v53, 4  ;;  %v2760_v21 = vrot.slane %v2759_v47, 4  ;;  %v772_v26 = vmax.bf16 %v300_v32, %v33_v56  ;;  %v1277_v23 = vor.u32 %v1276_v36, %v1275_v11 }
  0x9e   :  { %v2036_v45 = vmax.bf16 %v1988_v50, %v4685_v24  ;;  %v1649_v40 = vsel %vm4098_vm11, %v3720_v58, %v1648_v60  ;;  %v1893_v48 = vmax.bf16 %v4533_v3, %v4441_v57  ;;  %v303_v34 = vrot.slane %v301_v49, 4  ;;  %v4721_v58 = vld [vmem:[%s6809_s0 + $0x64] sm:$0xf] }
  0x9f   :  { %v1127_v0 = vmax.bf16 %v939_v25, %v772_v26  ;;  %v1278_v43 = vsel %vm4051_vm8, %v1274_v9, %v1277_v23  ;;  %v940_v12 = vrot.slane %v938_v20, 4  ;;  %v1279_v61 = vrot.slane %v1277_v23, 4 }
  0xa0   :  { %2086 = vst.msk [vmem:[%s6810_s1 + $0x34] sm:$0x3] %vm2073_vm13, %v2036_v45  ;;  %v2215_v47 = vshll.u32 %v2036_v45, 16  ;;  %v2579_v53 = vrot.slane %v2036_v45, 5  ;;  %v2761_v11 = vshrl.u32 %v2036_v45, 16  ;;  %v3011_v56 = vrot.slane %v2036_v45, 6 }
  0xa1   :  { %v1546_v55 = vmax.bf16 %v1278_v43, %v1127_v0  ;;  %v1941_v50 = vmax.bf16 %v1893_v48, %v4589_v51  ;;  %v304_v57 = vor.u32 %v303_v34, %v299_v33  ;;  %v1650_v49 = vrot.slane %v1648_v60, 4 }
  0xa2   :  { %v2217_v20 = vrot.slane %v2215_v47, 5  ;;  %v4709_v35 = vsel %vm3974_vm5, %v3747_v62, %v2579_v53  ;;  %v2763_v25 = vrot.slane %v2761_v11, 5  ;;  %v2764_v28 = vrot.slane %v2215_v47, 6 }
  0xa3   :  { %6957 = vst [vmem:[#allocation21_spill] sm:$0xff] %v4709_v35  ;;  %v4713_v16 = vsel %vm4098_vm11, %v3771_v27, %v3011_v56  ;;  %v4715_v42 = vmax.bf16 %v1649_v40, %v1546_v55  ;;  %v1989_v33 = vmax.bf16 %v1941_v50, %v4663_v38  ;;  %v305_v36 = vrot.slane %v304_v57, 4 }
  0xa4   :  { %6958 = vst [vmem:[#allocation22_spill] sm:$0xff] %v4713_v16  ;;  %v2218_v62 = vsel %vm3918_vm4, %v2213_v4, %v2217_v20  ;;  %v2765_v32 = vor.u32 %v2764_v28, %v2763_v25  ;;  %v1894_v9 = vmax.bf16 %v4547_v10, %v4473_v14  ;;  %v307_v27 = vshrl.u32 %v4705_v22, 16 }
  0xa5   :  { %v4729_v60 = vmax.bf16 %v2218_v62, %v4669_v54  ;;  %v4732_v26 = vmax.bf16 %v1989_v33, %v4715_v42  ;;  %v773_v23 = vmax.bf16 %v305_v36, %v4656_v19  ;;  %v310_v45 = vshll.u32 %v4705_v22, 16 }
  0xa6   :  { %v4738_v40 = vsel %vm4051_vm8, %v2760_v21, %v2765_v32  ;;  %v1942_v4 = vmax.bf16 %v1894_v9, %v4611_v17  ;;  %v309_v48 = vrot.slane %v307_v27, 4  ;;  %v316_v14 = vshll.u32 %v4721_v58, 16 }
  0xa7   :  { %6959 = vst [vmem:[#allocation23_spill] sm:$0xff] %v4729_v60  ;;  %6960 = vst [vmem:[#allocation24_spill] sm:$0xff] %v4738_v40  ;;  %v2220_v19 = vshrl.u32 %v4732_v26, 16  ;;  %v2223_v34 = vshll.u32 %v4732_v26, 16  ;;  %v1128_v21 = vmax.bf16 %v940_v12, %v773_v23  ;;  %v3748_v43 = vrot.slane %v4732_v26, 9 }
  0xa8   :  { %2087 = vst.msk [vmem:[%s6810_s1 + $0x38] sm:$0xf] %vm2071_vm12, %v4732_v26  ;;  %v1990_v0 = vmax.bf16 %v1942_v4, %v4685_v24  ;;  %v3772_v47 = vrot.slane %v4732_v26, 10  ;;  %v312_v53 = vrot.slane %v310_v45, 5  ;;  %v318_v25 = vrot.slane %v316_v14, 5 }
  0xa9   :  { %v2222_v11 = vrot.slane %v2220_v19, 4  ;;  %v2225_v56 = vrot.slane %v2223_v34, 5  ;;  %v2767_v55 = vrot.slane %v2220_v19, 5  ;;  %v2768_v50 = vrot.slane %v2223_v34, 6 }
  0xaa   :  { %v1547_v57 = vmax.bf16 %v1279_v61, %v1128_v21  ;;  %v313_v20 = vor.u32 %v312_v53, %v309_v48  ;;  %v320_v28 = vshrl.u32 %v4721_v58, 16  ;;  %v3689_v12 = vrot.slane %v4705_v22, 9 }
  0xab   :  { %v2226_v33 = vor.u32 %v2225_v56, %v2222_v11  ;;  %v2769_v36 = vor.u32 %v2768_v50, %v2767_v55  ;;  %v943_v62 = vrot.slane %v4721_v58, 5  ;;  %v1280_v23 = vrot.slane %v307_v27, 5 }
  0xac   :  { %v4757_v32 = vmax.bf16 %v1650_v49, %v1547_v57  ;;  %v314_v9 = vrot.slane %v313_v20, 4  ;;  %v1281_v4 = vrot.slane %v310_v45, 6  ;;  %v1284_v48 = vrot.slane %v320_v28, 5 }
  0xad   :  { %v2227_v54 = vrot.slane %v2226_v33, 4  ;;  %v2770_v16 = vrot.slane %v2769_v36, 4  ;;  %v944_v61 = vsel %vm3974_vm5, %v3689_v12, %v943_v62  ;;  %v1285_v53 = vrot.slane %v316_v14, 6 }
  0xae   :  { %v2038_v19 = vmax.bf16 %v1990_v0, %v4757_v32  ;;  %v319_v34 = vsel %vm3918_vm4, %v314_v9, %v318_v25  ;;  %v1282_v21 = vor.u32 %v1281_v4, %v1280_v23  ;;  %v3721_v49 = vrot.slane %v4705_v22, 10 }
  0xaf   :  { %v774_v11 = vmax.bf16 %v319_v34, %v4705_v22  ;;  %v1653_v27 = vrot.slane %v4721_v58, 6  ;;  %v1895_v45 = vmax.bf16 %v4589_v51, %v4533_v3  ;;  %v1286_v20 = vor.u32 %v1285_v53, %v1284_v48 }
  0xb0   :  { %2088 = vst.msk [vmem:[%s6810_s1 + $0x3c] sm:$0x3] %vm2073_vm13, %v2038_v19  ;;  %v2229_v0 = vshll.u32 %v2038_v19, 16  ;;  %v2583_v56 = vrot.slane %v2038_v19, 5  ;;  %v2771_v55 = vshrl.u32 %v2038_v19, 16  ;;  %v3015_v50 = vrot.slane %v2038_v19, 6 }
  0xb1   :  { %v1129_v57 = vmax.bf16 %v944_v61, %v774_v11  ;;  %v1283_v14 = vrot.slane %v1282_v21, 4  ;;  %v1654_v22 = vsel %vm4098_vm11, %v3721_v49, %v1653_v27  ;;  %v1943_v4 = vmax.bf16 %v1895_v45, %v4663_v38 }
  0xb2   :  { %v2231_v33 = vrot.slane %v2229_v0, 5  ;;  %v4777_v36 = vsel %vm3974_vm5, %v3748_v43, %v2583_v56  ;;  %v2773_v3 = vrot.slane %v2771_v55, 5  ;;  %v2774_v12 = vrot.slane %v2229_v0, 6  ;;  %v37_v43 = vld [vmem:[%s6809_s0 + $0x68] sm:$0xf] }
  0xb3   :  { %6961 = vst [vmem:[#allocation25_spill] sm:$0xff] %v4777_v36  ;;  %v4781_v9 = vsel %vm4098_vm11, %v3772_v47, %v3015_v50  ;;  %v1287_v23 = vsel %vm4051_vm8, %v1283_v14, %v1286_v20  ;;  %v322_v61 = vrot.slane %v320_v28, 4  ;;  %v945_v21 = vrot.slane %v943_v62, 4  ;;  %v4798_v28 = vld [vmem:[%s6809_s0 + $0x6c] sm:$0xf] }
  0xb4   :  { %6962 = vst [vmem:[#allocation26_spill] sm:$0xff] %v4781_v9  ;;  %v2232_v48 = vsel %vm3918_vm4, %v2227_v54, %v2231_v33  ;;  %v2775_v19 = vor.u32 %v2774_v12, %v2773_v3  ;;  %v1548_v34 = vmax.bf16 %v1287_v23, %v1129_v57  ;;  %v1991_v47 = vmax.bf16 %v1943_v4, %v4715_v42 }
  0xb5   :  { %v4792_v53 = vmax.bf16 %v2232_v48, %v4732_v26  ;;  %v323_v11 = vor.u32 %v322_v61, %v318_v25  ;;  %v1288_v49 = vrot.slane %v1286_v20, 4  ;;  %v1655_v45 = vrot.slane %v1653_v27, 4 }
  0xb6   :  { %v4802_v54 = vsel %vm4051_vm8, %v2770_v16, %v2775_v19  ;;  %v4804_v62 = vmax.bf16 %v1654_v22, %v1548_v34  ;;  %v1896_v26 = vmax.bf16 %v4611_v17, %v4547_v10  ;;  %v326_v56 = vshrl.u32 %v37_v43, 16 }
  0xb7   :  { %6963 = vst [vmem:[#allocation27_spill] sm:$0xff] %v4792_v53  ;;  %6964 = vst [vmem:[#allocation28_spill] sm:$0xff] %v4802_v54  ;;  %v324_v25 = vrot.slane %v323_v11, 4  ;;  %v329_v55 = vshll.u32 %v37_v43, 16  ;;  %v335_v16 = vshll.u32 %v4798_v28, 16  ;;  %v339_v14 = vshrl.u32 %v4798_v28, 16 }
  0xb8   :  { %v4811_v50 = vmax.bf16 %v1991_v47, %v4804_v62  ;;  %v1944_v57 = vmax.bf16 %v1896_v26, %v4685_v24  ;;  %v328_v20 = vrot.slane %v326_v56, 4  ;;  %v3690_v10 = vrot.slane %v37_v43, 9 }
  0xb9   :  { %v775_v27 = vmax.bf16 %v324_v25, %v4721_v58  ;;  %v331_v22 = vrot.slane %v329_v55, 5  ;;  %v337_v58 = vrot.slane %v335_v16, 5  ;;  %v948_v48 = vrot.slane %v4798_v28, 5 }
  0xba   :  { %6965 = vst [vmem:[#allocation29_spill] sm:$0xff] %v4811_v50  ;;  %2089 = vst.msk [vmem:[%s6810_s1 + $0x40] sm:$0xf] %vm2071_vm12, %v4811_v50  ;;  %v6837_v33 = vshrl.u32 %v4811_v50, 16  ;;  %v6840_v3 = vshll.u32 %v4811_v50, 16  ;;  %v1992_v12 = vmax.bf16 %v1944_v57, %v4757_v32  ;;  %v3749_v23 = vrot.slane %v4811_v50, 9 }
  0xbb   :  { %v1130_v4 = vmax.bf16 %v945_v21, %v775_v27  ;;  %v332_v61 = vor.u32 %v331_v22, %v328_v20  ;;  %v1289_v47 = vrot.slane %v326_v56, 5  ;;  %v1290_v11 = vrot.slane %v329_v55, 6 }
  0xbc   :  { %v2236_v19 = vrot.slane %v6837_v33, 4  ;;  %v2239_v34 = vrot.slane %v6840_v3, 5  ;;  %v949_v57 = vsel %vm3974_vm5, %v3690_v10, %v948_v48  ;;  %v1293_v0 = vrot.slane %v339_v14, 5 }
  0xbd   :  { %v1549_v26 = vmax.bf16 %v1288_v49, %v1130_v4  ;;  %v333_v25 = vrot.slane %v332_v61, 4  ;;  %v1291_v21 = vor.u32 %v1290_v11, %v1289_v47  ;;  %v1294_v27 = vrot.slane %v335_v16, 6 }
  0xbe   :  { %v2240_v9 = vor.u32 %v2239_v34, %v2236_v19  ;;  %v3722_v20 = vrot.slane %v37_v43, 10  ;;  %v1658_v50 = vrot.slane %v4798_v28, 6  ;;  %v1897_v56 = vmax.bf16 %v4663_v38, %v4589_v51 }
  0xbf   :  { %v4833_v22 = vmax.bf16 %v1655_v45, %v1549_v26  ;;  %v338_v33 = vsel %vm3918_vm4, %v333_v25, %v337_v58  ;;  %v1292_v4 = vrot.slane %v1291_v21, 4  ;;  %v1295_v10 = vor.u32 %v1294_v27, %v1293_v0 }
  0xc0   :  { %v4840_v49 = vrot.slane %v2240_v9, 4  ;;  %v776_v55 = vmax.bf16 %v338_v33, %v37_v43  ;;  %v1659_v45 = vsel %vm4098_vm11, %v3722_v20, %v1658_v50  ;;  %v1945_v16 = vmax.bf16 %v1897_v56, %v4715_v42  ;;  %v39_v33 = vld [vmem:[%s6809_s0 + $0x70] sm:$0xf] }
  0xc1   :  { %v4843_v61 = vmax.bf16 %v1992_v12, %v4833_v22  ;;  %v341_v19 = vrot.slane %v339_v14, 4  ;;  %v1296_v47 = vsel %vm4051_vm8, %v1292_v4, %v1295_v10  ;;  %v950_v11 = vrot.slane %v948_v48, 4 }
  0xc2   :  { %6966 = vst [vmem:[#allocation30_spill] sm:$0xff] %v4840_v49  ;;  %v1131_v34 = vmax.bf16 %v949_v57, %v776_v55  ;;  %v1297_v51 = vrot.slane %v1295_v10, 4  ;;  %v1993_v48 = vmax.bf16 %v1945_v16, %v4804_v62  ;;  %v1660_v25 = vrot.slane %v1658_v50, 4  ;;  %v4866_v57 = vld [vmem:[%s6809_s0 + $0x74] sm:$0xf] }
  0xc3   :  { %6967 = vst [vmem:[#allocation31_spill] sm:$0xff] %v4843_v61  ;;  %2090 = vst.msk [vmem:[%s6810_s1 + $0x44] sm:$0x3] %vm2073_vm13, %v4843_v61  ;;  %v2243_v9 = vshll.u32 %v4843_v61, 16  ;;  %v2587_v43 = vrot.slane %v4843_v61, 5  ;;  %v2781_v0 = vshrl.u32 %v4843_v61, 16  ;;  %v342_v26 = vor.u32 %v341_v19, %v337_v58 }
  0xc4   :  { %v1550_v12 = vmax.bf16 %v1296_v47, %v1131_v34  ;;  %v1898_v50 = vmax.bf16 %v4685_v24, %v4611_v17  ;;  %v345_v58 = vshrl.u32 %v39_v33, 16  ;;  %v348_v16 = vshll.u32 %v39_v33, 16 }
  0xc5   :  { %v4868_v21 = vrot.slane %v2243_v9, 5  ;;  %v4872_v27 = vsel %vm3974_vm5, %v3749_v23, %v2587_v43  ;;  %v4874_v20 = vrot.slane %v2781_v0, 5  ;;  %v4876_v56 = vrot.slane %v2243_v9, 6 }
  0xc6   :  { %6969 = vst [vmem:[#allocation33_spill] sm:$0xff] %v4872_v27  ;;  %v4878_v55 = vmax.bf16 %v1659_v45, %v1550_v12  ;;  %v343_v4 = vrot.slane %v342_v26, 4  ;;  %v354_v19 = vshll.u32 %v4866_v57, 16  ;;  %v1946_v47 = vmax.bf16 %v1898_v50, %v4757_v32 }
  0xc7   :  { %6968 = vst [vmem:[#allocation32_spill] sm:$0xff] %v4868_v21  ;;  %6970 = vst [vmem:[#allocation34_spill] sm:$0xff] %v4874_v20  ;;  %v347_v17 = vrot.slane %v345_v58, 4  ;;  %v350_v9 = vrot.slane %v348_v16, 5  ;;  %v358_v0 = vshrl.u32 %v4866_v57, 16  ;;  %v3691_v12 = vrot.slane %v39_v33, 9 }
  0xc8   :  { %6971 = vst [vmem:[#allocation35_spill] sm:$0xff] %v4876_v56  ;;  %v4890_v34 = vmax.bf16 %v1993_v48, %v4878_v55  ;;  %v777_v45 = vmax.bf16 %v343_v4, %v4798_v28  ;;  %v356_v43 = vrot.slane %v354_v19, 5  ;;  %v1994_v48 = vmax.bf16 %v1946_v47, %v4833_v22 }
  0xc9   :  { %v953_v23 = vrot.slane %v4866_v57, 5  ;;  %v1298_v28 = vrot.slane %v345_v58, 5  ;;  %v351_v4 = vor.u32 %v350_v9, %v347_v17  ;;  %v1299_v50 = vrot.slane %v348_v16, 6 }
  0xca   :  { %6972 = vst [vmem:[#allocation36_spill] sm:$0xff] %v4890_v34  ;;  %2091 = vst.msk [vmem:[%s6810_s1 + $0x48] sm:$0xf] %vm2071_vm12, %v4890_v34  ;;  %v1132_v26 = vmax.bf16 %v950_v11, %v777_v45  ;;  %v1302_v14 = vrot.slane %v358_v0, 5  ;;  %v1303_v3 = vrot.slane %v354_v19, 6  ;;  %v3723_v56 = vrot.slane %v39_v33, 10 }
  0xcb   :  { %v954_v20 = vsel %vm3974_vm5, %v3691_v12, %v953_v23  ;;  %v1663_v61 = vrot.slane %v4866_v57, 6  ;;  %v352_v27 = vrot.slane %v351_v4, 4  ;;  %v1300_v21 = vor.u32 %v1299_v50, %v1298_v28 }
  0xcc   :  { %v1551_v10 = vmax.bf16 %v1297_v51, %v1132_v26  ;;  %v1304_v34 = vor.u32 %v1303_v3, %v1302_v14  ;;  %v1899_v11 = vmax.bf16 %v4715_v42, %v4663_v38  ;;  %v360_v16 = vrot.slane %v358_v0, 4  ;;  %v41_v51 = vld [vmem:[%s6809_s0 + $0x78] sm:$0xf] }
  0xcd   :  { %v1664_v58 = vsel %vm4098_vm11, %v3723_v56, %v1663_v61  ;;  %v955_v19 = vrot.slane %v953_v23, 4  ;;  %v357_v47 = vsel %vm3918_vm4, %v352_v27, %v356_v43  ;;  %v1301_v17 = vrot.slane %v1300_v21, 4 }
  0xce   :  { %v4907_v45 = vmax.bf16 %v1660_v25, %v1551_v10  ;;  %v1947_v3 = vmax.bf16 %v1899_v11, %v4804_v62  ;;  %v1306_v14 = vrot.slane %v1304_v34, 4  ;;  %v778_v25 = vmax.bf16 %v357_v47, %v39_v33 }
  0xcf   :  { %v361_v10 = vor.u32 %v360_v16, %v356_v43  ;;  %v1665_v9 = vrot.slane %v1663_v61, 4  ;;  %v1305_v56 = vsel %vm4051_vm8, %v1301_v17, %v1304_v34  ;;  %v1900_v0 = vmax.bf16 %v4757_v32, %v4685_v24  ;;  %v4937_v34 = vld [vmem:[%s6809_s0 + $0x7c] sm:$0xf] }
  0xd0   :  { %v4918_v38 = vmax.bf16 %v1994_v48, %v4907_v45  ;;  %v1995_v23 = vmax.bf16 %v1947_v3, %v4878_v55  ;;  %v364_v12 = vshrl.u32 %v41_v51, 16  ;;  %v1133_v24 = vmax.bf16 %v954_v20, %v778_v25 }
  0xd1   :  { %v362_v43 = vrot.slane %v361_v10, 4  ;;  %v1948_v26 = vmax.bf16 %v1900_v0, %v4833_v22  ;;  %v367_v11 = vshll.u32 %v41_v51, 16  ;;  %v373_v3 = vshll.u32 %v4937_v34, 16 }
  0xd2   :  { %6973 = vst [vmem:[#allocation37_spill] sm:$0xff] %v4918_v38  ;;  %2092 = vst.msk [vmem:[%s6810_s1 + $0x4c] sm:$0x3] %vm2073_vm13, %v4918_v38  ;;  %v2257_v21 = vshll.u32 %v4918_v38, 16  ;;  %v2791_v61 = vshrl.u32 %v4918_v38, 16  ;;  %v366_v48 = vrot.slane %v364_v12, 4  ;;  %v1552_v16 = vmax.bf16 %v1305_v56, %v1133_v24 }
  0xd3   :  { %v779_v47 = vmax.bf16 %v362_v43, %v4866_v57  ;;  %v1996_v17 = vmax.bf16 %v1948_v26, %v4907_v45  ;;  %v369_v25 = vrot.slane %v367_v11, 5  ;;  %v377_v10 = vshrl.u32 %v4937_v34, 16 }
  0xd4   :  { %v4940_v28 = vrot.slane %v2257_v21, 5  ;;  %v4942_v4 = vrot.slane %v2791_v61, 5  ;;  %v4944_v50 = vrot.slane %v2257_v21, 6  ;;  %v3692_v0 = vrot.slane %v41_v51, 9 }
  0xd5   :  { %v4952_v27 = vmax.bf16 %v1664_v58, %v1552_v16  ;;  %v1134_v61 = vmax.bf16 %v955_v19, %v779_v47  ;;  %v375_v21 = vrot.slane %v373_v3, 5  ;;  %v958_v33 = vrot.slane %v4937_v34, 5 }
  0xd6   :  { %6974 = vst [vmem:[#allocation38_spill] sm:$0xff] %v4940_v28  ;;  %6975 = vst [vmem:[#allocation39_spill] sm:$0xff] %v4942_v4  ;;  %v370_v56 = vor.u32 %v369_v25, %v366_v48  ;;  %v1307_v24 = vrot.slane %v364_v12, 5  ;;  %v1308_v57 = vrot.slane %v367_v11, 6  ;;  %v1311_v43 = vrot.slane %v377_v10, 5 }
  0xd7   :  { %6976 = vst [vmem:[#allocation40_spill] sm:$0xff] %v4944_v50  ;;  %v4956_v26 = vmax.bf16 %v1995_v23, %v4952_v27  ;;  %v1553_v28 = vmax.bf16 %v1306_v14, %v1134_v61  ;;  %v959_v20 = vsel %vm3974_vm5, %v3692_v0, %v958_v33  ;;  %v1312_v4 = vrot.slane %v373_v3, 6 }
  0xd8   :  { %v371_v50 = vrot.slane %v370_v56, 4  ;;  %v1309_v38 = vor.u32 %v1308_v57, %v1307_v24  ;;  %v3724_v58 = vrot.slane %v41_v51, 10  ;;  %v1668_v19 = vrot.slane %v4937_v34, 6  ;;  %v5006_v56 = vld [vmem:[%s6809_s0 + $0x88] sm:$0xf] }
  0xd9   :  { %6977 = vst [vmem:[#allocation41_spill] sm:$0xff] %v4956_v26  ;;  %2093 = vst.msk [vmem:[%s6810_s1 + $0x50] sm:$0xf] %vm2071_vm12, %v4956_v26  ;;  %v4966_v12 = vmax.bf16 %v1665_v9, %v1553_v28  ;;  %v1313_v23 = vor.u32 %v1312_v4, %v1311_v43  ;;  %v1901_v14 = vmax.bf16 %v4804_v62, %v4715_v42  ;;  %v379_v48 = vrot.slane %v377_v10, 4 }
  0xda   :  { %v376_v11 = vsel %vm3918_vm4, %v371_v50, %v375_v21  ;;  %v1310_v16 = vrot.slane %v1309_v38, 4  ;;  %v1669_v47 = vsel %vm4098_vm11, %v3724_v58, %v1668_v19  ;;  %v960_v3 = vrot.slane %v958_v33, 4  ;;  %v4985_v38 = vld [vmem:[%s6809_s0 + $0x80] sm:$0xf] }
  0xdb   :  { %v4975_v25 = vmax.bf16 %v1996_v17, %v4966_v12  ;;  %v780_v0 = vmax.bf16 %v376_v11, %v41_v51  ;;  %v1949_v9 = vmax.bf16 %v1901_v14, %v4878_v55  ;;  %v380_v28 = vor.u32 %v379_v48, %v375_v21  ;;  %v5001_v21 = vld [vmem:[%s6809_s0 + $0x84] sm:$0xf] }
  0xdc   :  { %v1314_v4 = vsel %vm4051_vm8, %v1310_v16, %v1313_v23  ;;  %v1315_v42 = vrot.slane %v1313_v23, 4  ;;  %v1670_v62 = vrot.slane %v1668_v19, 4  ;;  %v1902_v50 = vmax.bf16 %v4833_v22, %v4757_v32  ;;  %v5020_v19 = vld [vmem:[%s6809_s0 + $0x8c] sm:$0xf] }
  0xdd   :  { %6978 = vst [vmem:[#allocation42_spill] sm:$0xff] %v4975_v25  ;;  %2094 = vst.msk [vmem:[%s6810_s1 + $0x54] sm:$0x3] %vm2073_vm13, %v4975_v25  ;;  %v2271_v55 = vshll.u32 %v4975_v25, 16  ;;  %v2801_v33 = vshrl.u32 %v4975_v25, 16  ;;  %v1135_v32 = vmax.bf16 %v959_v20, %v780_v0  ;;  %v1997_v22 = vmax.bf16 %v1949_v9, %v4952_v27 }
  0xde   :  { %v381_v10 = vrot.slane %v380_v28, 4  ;;  %v1950_v61 = vmax.bf16 %v1902_v50, %v4907_v45  ;;  %v6860_v27 = vshrl.u32 %v4985_v38, 16  ;;  %v6859_v23 = vshll.u32 %v4985_v38, 16  ;;  %v5036_v9 = vld [vmem:[%s6809_s0 + $0x94] sm:$0xf] }
  0xdf   :  { %v5008_v24 = vrot.slane %v2271_v55, 5  ;;  %v5010_v57 = vrot.slane %v2801_v33, 5  ;;  %v5012_v20 = vrot.slane %v2271_v55, 6  ;;  %v1554_v43 = vmax.bf16 %v1314_v4, %v1135_v32 }
  0xe0   :  { %v781_v45 = vmax.bf16 %v381_v10, %v4937_v34  ;;  %v1998_v58 = vmax.bf16 %v1950_v61, %v4966_v12  ;;  %v385_v14 = vrot.slane %v6860_v27, 4  ;;  %v6858_v48 = vshll.u32 %v5001_v21, 16  ;;  %v5031_v12 = vld [vmem:[%s6809_s0 + $0x90] sm:$0xf]  ;;  %v5054_v10 = vld [vmem:[%s6809_s0 + $0x98] sm:$0xf] }
  0xe1   :  { %6979 = vst [vmem:[#allocation43_spill] sm:$0xff] %v5008_v24  ;;  %6980 = vst [vmem:[#allocation44_spill] sm:$0xff] %v5010_v57  ;;  %v6857_v16 = vshrl.u32 %v5006_v56, 16  ;;  %v1845_v0 = vmax.bf16 %v1669_v47, %v1554_v43  ;;  %v388_v28 = vrot.slane %v6859_v23, 5  ;;  %v6852_v4 = vshll.u32 %v5006_v56, 16 }
  0xe2   :  { %6981 = vst [vmem:[#allocation45_spill] sm:$0xff] %v5012_v20  ;;  %v1136_v34 = vmax.bf16 %v960_v3, %v781_v45  ;;  %v5043_v50 = vrot.slane %v6858_v48, 5  ;;  %v6851_v3 = vshll.u32 %v5020_v19, 16  ;;  %v6855_v17 = vshrl.u32 %v5031_v12, 16 }
  0xe3   :  { %v404_v47 = vrot.slane %v6857_v16, 4  ;;  %v5049_v33 = vmax.bf16 %v1997_v22, %v1845_v0  ;;  %v389_v61 = vor.u32 %v388_v28, %v385_v14  ;;  %v407_v43 = vrot.slane %v6852_v4, 5  ;;  %v5073_v14 = vld [vmem:[%s6809_s0 + $0x9c] sm:$0xf]  ;;  %v5094_v28 = vld [vmem:[%s6809_s0 + $0xa0] sm:$0xf] }
  0xe4   :  { %v1555_v32 = vmax.bf16 %v1315_v42, %v1136_v34  ;;  %v5060_v45 = vrot.slane %v6851_v3, 5  ;;  %v6853_v51 = vshll.u32 %v5031_v12, 16  ;;  %v6854_v22 = vshll.u32 %v5036_v9, 16 }
  0xe5   :  { %6982 = vst [vmem:[#allocation46_spill] sm:$0xff] %v5049_v33  ;;  %2095 = vst.msk [vmem:[%s6810_s1 + $0x58] sm:$0xf] %vm2071_vm12, %v5049_v33  ;;  %v390_v0 = vrot.slane %v389_v61, 4  ;;  %v408_v34 = vor.u32 %v407_v43, %v404_v47  ;;  %v423_v3 = vrot.slane %v6855_v17, 4  ;;  %v6861_v43 = vshll.u32 %v5054_v10, 16 }
  0xe6   :  { %v1846_v42 = vmax.bf16 %v1670_v62, %v1555_v32  ;;  %v426_v55 = vrot.slane %v6853_v51, 5  ;;  %v5082_v4 = vrot.slane %v6854_v22, 5  ;;  %v6856_v62 = vshrl.u32 %v5054_v10, 16 }
  0xe7   :  { %v395_v47 = vsel %vm3918_vm4, %v390_v0, %v5043_v50  ;;  %v409_v61 = vrot.slane %v408_v34, 4  ;;  %v6862_v17 = vshll.u32 %v5073_v14, 16  ;;  %v445_v16 = vrot.slane %v6861_v43, 5 }
  0xe8   :  { %v5085_v32 = vmax.bf16 %v1998_v58, %v1846_v42  ;;  %v427_v51 = vor.u32 %v426_v55, %v423_v3  ;;  %v442_v22 = vrot.slane %v6856_v62, 4  ;;  %v5112_v55 = vld [vmem:[%s6809_s0 + $0xa4] sm:$0xf]  ;;  %v6863_v23 = vshrl.u32 %v5094_v28, 16 }
  0xe9   :  { %v414_v58 = vsel %vm3918_vm4, %v409_v61, %v5060_v45  ;;  %v5121_v0 = vrot.slane %v6862_v17, 5  ;;  %v6864_v27 = vshll.u32 %v5094_v28, 16  ;;  %v6865_v43 = vshll.u32 %v5112_v55, 16 }
  0xea   :  { %6983 = vst [vmem:[#allocation47_spill] sm:$0xff] %v5085_v32  ;;  %2096 = vst.msk [vmem:[%s6810_s1 + $0x5c] sm:$0x3] %vm2073_vm13, %v5085_v32  ;;  %v2285_v42 = vshll.u32 %v5085_v32, 16  ;;  %v2811_v34 = vshrl.u32 %v5085_v32, 16  ;;  %v428_v62 = vrot.slane %v427_v51, 4  ;;  %v446_v51 = vor.u32 %v445_v16, %v442_v22 }
  0xeb   :  { %v461_v17 = vrot.slane %v6863_v23, 4  ;;  %v5148_v16 = vrot.slane %v6865_v43, 5  ;;  %v3693_v23 = vrot.slane %v4985_v38, 9  ;;  %v6871_v43 = vrot.slane %v5036_v9, 5 }
  0xec   :  { %v5123_v48 = vrot.slane %v2285_v42, 5  ;;  %v5125_v3 = vrot.slane %v2811_v34, 5  ;;  %v5127_v11 = vrot.slane %v2285_v42, 6  ;;  %v433_v61 = vsel %vm3918_vm4, %v428_v62, %v5082_v4 }
  0xed   :  { %v5139_v34 = vmax.bf16 %v395_v47, %v4985_v38  ;;  %v5142_v42 = vmax.bf16 %v414_v58, %v5006_v56  ;;  %v464_v62 = vrot.slane %v6864_v27, 5  ;;  %v5151_v22 = vmax.bf16 %v433_v61, %v5031_v12 }
  0xee   :  { %6984 = vst [vmem:[#allocation48_spill] sm:$0xff] %v5123_v48  ;;  %6985 = vst [vmem:[#allocation49_spill] sm:$0xff] %v5125_v3  ;;  %v6870_v48 = vrot.slane %v5001_v21, 5  ;;  %v3694_v47 = vrot.slane %v5006_v56, 9  ;;  %v6872_v58 = vrot.slane %v5020_v19, 5  ;;  %v3695_v3 = vrot.slane %v5031_v12, 9 }
  0xef   :  { %6986 = vst [vmem:[#allocation50_spill] sm:$0xff] %v5127_v11  ;;  %v447_v11 = vrot.slane %v446_v51, 4  ;;  %v465_v27 = vor.u32 %v464_v62, %v461_v17  ;;  %v3697_v33 = vrot.slane %v5094_v28, 9  ;;  %v6988_v20 = vshll.u32 %v4985_v38, 16 }
  0xf0   :  { %v964_v32 = vsel %vm3974_vm5, %v3693_v23, %v6870_v48  ;;  %v969_v24 = vsel %vm3974_vm5, %v3694_v47, %v6872_v58  ;;  %v974_v62 = vsel %vm3974_vm5, %v3695_v3, %v6871_v43  ;;  %v6987_v43 = vshrl.u32 %v4985_v38, 16 }
  0xf1   :  { %v452_v51 = vsel %vm3918_vm4, %v447_v11, %v5121_v0  ;;  %v3696_v11 = vrot.slane %v5054_v10, 9  ;;  %v466_v17 = vrot.slane %v465_v27, 4  ;;  %v1137_v23 = vmax.bf16 %v964_v32, %v5139_v34 }
  0xf2   :  { %v5163_v61 = vmax.bf16 %v452_v51, %v5054_v10  ;;  %v6873_v51 = vrot.slane %v5073_v14, 5  ;;  %v1139_v48 = vmax.bf16 %v969_v24, %v5142_v42  ;;  %v1141_v47 = vmax.bf16 %v974_v62, %v5151_v22 }
  0xf3   :  { %v471_v27 = vsel %vm3918_vm4, %v466_v17, %v5148_v16  ;;  %v1316_v58 = vrot.slane %v6987_v43, 5  ;;  %v1317_v57 = vrot.slane %v6988_v20, 6  ;;  %v6989_v24 = vrot.slane %v5112_v55, 5 }
  0xf4   :  { %v979_v3 = vsel %vm3974_vm5, %v3696_v11, %v6873_v51  ;;  %v790_v32 = vmax.bf16 %v471_v27, %v5094_v28  ;;  %v6990_v22 = vshrl.u32 %v5001_v21, 16  ;;  %v6991_v11 = vshll.u32 %v5001_v21, 16 }
  0xf5   :  { %v984_v34 = vsel %vm3974_vm5, %v3697_v33, %v6989_v24  ;;  %v1143_v42 = vmax.bf16 %v979_v3, %v5163_v61  ;;  %v1318_v62 = vor.u32 %v1317_v57, %v1316_v58  ;;  %v6992_v43 = vshrl.u32 %v5006_v56, 16 }
  0xf6   :  { %v1320_v17 = vrot.slane %v6990_v22, 5  ;;  %v1321_v51 = vrot.slane %v6991_v11, 6  ;;  %v6993_v20 = vshll.u32 %v5006_v56, 16  ;;  %v1145_v26 = vmax.bf16 %v984_v34, %v790_v32 }
  0xf7   :  { %v1325_v25 = vrot.slane %v6992_v43, 5  ;;  %v6994_v49 = vshrl.u32 %v5020_v19, 16  ;;  %v6995_v33 = vshll.u32 %v5020_v19, 16  ;;  %v6996_v3 = vshrl.u32 %v5031_v12, 16 }
  0xf8   :  { %v1326_v27 = vrot.slane %v6993_v20, 6  ;;  %v1319_v57 = vrot.slane %v1318_v62, 4  ;;  %v5215_v58 = vor.u32 %v1321_v51, %v1320_v17  ;;  %v6997_v11 = vshll.u32 %v5031_v12, 16 }
  0xf9   :  { %v1329_v54 = vrot.slane %v6994_v49, 5  ;;  %v1330_v61 = vrot.slane %v6995_v33, 6  ;;  %v1334_v24 = vrot.slane %v6996_v3, 5  ;;  %v6998_v32 = vshrl.u32 %v5036_v9, 16 }
  0xfa   :  { %v1327_v22 = vor.u32 %v1326_v27, %v1325_v25  ;;  %v1335_v43 = vrot.slane %v6997_v11, 6  ;;  %v6999_v49 = vshll.u32 %v5036_v9, 16  ;;  %v7000_v33 = vshrl.u32 %v5054_v10, 16 }
  0xfb   :  { %v5219_v53 = vor.u32 %v1330_v61, %v1329_v54  ;;  %v1338_v34 = vrot.slane %v6998_v32, 5  ;;  %v1323_v51 = vsel %vm4051_vm8, %v1319_v57, %v5215_v58  ;;  %v7001_v62 = vshll.u32 %v5054_v10, 16 }
  0xfc   :  { %v1339_v20 = vrot.slane %v6999_v49, 6  ;;  %v1343_v36 = vrot.slane %v7000_v33, 5  ;;  %v1328_v17 = vrot.slane %v1327_v22, 4  ;;  %v1336_v25 = vor.u32 %v1335_v43, %v1334_v24 }
  0xfd   :  { %v1344_v27 = vrot.slane %v7001_v62, 6  ;;  %v7002_v61 = vshrl.u32 %v5073_v14, 16  ;;  %v7003_v11 = vshll.u32 %v5073_v14, 16  ;;  %v7004_v49 = vshrl.u32 %v5094_v28, 16 }
  0xfe   :  { %v5232_v54 = vor.u32 %v1339_v20, %v1338_v34  ;;  %v1332_v57 = vsel %vm4051_vm8, %v1328_v17, %v5219_v53  ;;  %v1337_v22 = vrot.slane %v1336_v25, 4  ;;  %v7005_v43 = vshll.u32 %v5094_v28, 16 }
  0xff   :  { %v1347_v3 = vrot.slane %v7002_v61, 5  ;;  %v1348_v32 = vrot.slane %v7003_v11, 6  ;;  %v1352_v33 = vrot.slane %v7004_v49, 5  ;;  %v1345_v24 = vor.u32 %v1344_v27, %v1343_v36 }
 0x100   :  { %v1353_v62 = vrot.slane %v7005_v43, 6  ;;  %v7006_v20 = vshrl.u32 %v5112_v55, 16  ;;  %v7007_v40 = vshll.u32 %v5112_v55, 16  ;;  %v1556_v60 = vmax.bf16 %v1323_v51, %v1137_v23 }
 0x101   :  { %v5245_v34 = vor.u32 %v1348_v32, %v1347_v3  ;;  %v1341_v49 = vsel %vm4051_vm8, %v1337_v22, %v5232_v54  ;;  %v1346_v35 = vrot.slane %v1345_v24, 4  ;;  %v1558_v25 = vmax.bf16 %v1332_v57, %v1139_v48 }
 0x102   :  { %v1356_v61 = vrot.slane %v7006_v20, 5  ;;  %v1357_v11 = vrot.slane %v7007_v40, 6  ;;  %v1354_v17 = vor.u32 %v1353_v62, %v1352_v33  ;;  %v1560_v27 = vmax.bf16 %v1341_v49, %v1141_v47 }
 0x103   :  { %v3725_v3 = vrot.slane %v4985_v38, 10  ;;  %v1673_v32 = vrot.slane %v5001_v21, 6  ;;  %v1350_v43 = vsel %vm4051_vm8, %v1346_v35, %v5245_v34  ;;  %v3726_v23 = vrot.slane %v5006_v56, 10 }
 0x104   :  { %v5254_v36 = vor.u32 %v1357_v11, %v1356_v61  ;;  %v1355_v40 = vrot.slane %v1354_v17, 4  ;;  %v1678_v51 = vrot.slane %v5020_v19, 6  ;;  %v1562_v22 = vmax.bf16 %v1350_v43, %v1143_v42 }
 0x105   :  { %v1674_v48 = vsel %vm4098_vm11, %v3725_v3, %v1673_v32  ;;  %v3727_v47 = vrot.slane %v5031_v12, 10  ;;  %v1683_v38 = vrot.slane %v5036_v9, 6  ;;  %v3728_v56 = vrot.slane %v5054_v10, 10 }
 0x106   :  { %v1359_v33 = vsel %vm4051_vm8, %v1355_v40, %v5254_v36  ;;  %v1679_v35 = vsel %vm4098_vm11, %v3726_v23, %v1678_v51  ;;  %v1688_v42 = vrot.slane %v5073_v14, 6  ;;  %v3729_v24 = vrot.slane %v5094_v28, 10 }
 0x107   :  { %v1564_v57 = vmax.bf16 %v1359_v33, %v1145_v26  ;;  %v1684_v12 = vsel %vm4098_vm11, %v3727_v47, %v1683_v38  ;;  %v1693_v62 = vrot.slane %v5112_v55, 6  ;;  %v1847_v61 = vmax.bf16 %v1674_v48, %v1556_v60 }
 0x108   :  { %v1689_v20 = vsel %vm4098_vm11, %v3728_v56, %v1688_v42  ;;  %v5288_v11 = vmax.bf16 %v1679_v35, %v1558_v25  ;;  %v5290_v10 = vmax.bf16 %v1684_v12, %v1560_v27  ;;  %v7008_v17 = vshrl.u32 %v5001_v21, 16 }
 0x109   :  { %v1694_v26 = vsel %vm4098_vm11, %v3729_v24, %v1693_v62  ;;  %v5294_v49 = vmax.bf16 %v1689_v20, %v1562_v22  ;;  %v7009_v3 = vshrl.u32 %v5020_v19, 16  ;;  %v7010_v60 = vshrl.u32 %v5036_v9, 16 }
 0x10a   :  { %v398_v28 = vrot.slane %v7008_v17, 4  ;;  %v5300_v40 = vmax.bf16 %v1694_v26, %v1564_v57  ;;  %v1903_v23 = vmax.bf16 %v5288_v11, %v1847_v61  ;;  %v7011_v27 = vshrl.u32 %v5073_v14, 16 }
 0x10b   :  { %v417_v43 = vrot.slane %v7009_v3, 4  ;;  %v436_v25 = vrot.slane %v7010_v60, 4  ;;  %v7012_v33 = vshrl.u32 %v5112_v55, 16  ;;  %v7013_v56 = vrot.slane %v5001_v21, 5 }
 0x10c   :  { %v455_v48 = vrot.slane %v7011_v27, 4  ;;  %v399_v47 = vor.u32 %v398_v28, %v5043_v50  ;;  %v1951_v57 = vmax.bf16 %v1903_v23, %v5290_v10  ;;  %v7014_v61 = vrot.slane %v5020_v19, 5 }
 0x10d   :  { %v418_v22 = vor.u32 %v417_v43, %v5060_v45  ;;  %v474_v35 = vrot.slane %v7012_v33, 4  ;;  %v965_v12 = vrot.slane %v7013_v56, 4  ;;  %v437_v24 = vor.u32 %v436_v25, %v5082_v4 }
 0x10e   :  { %v456_v20 = vor.u32 %v455_v48, %v5121_v0  ;;  %v970_v26 = vrot.slane %v7014_v61, 4  ;;  %v400_v17 = vrot.slane %v399_v47, 4  ;;  %v7015_v45 = vrot.slane %v5036_v9, 5 }
 0x10f   :  { %v419_v3 = vrot.slane %v418_v22, 4  ;;  %v475_v50 = vor.u32 %v474_v35, %v5148_v16  ;;  %v1999_v43 = vmax.bf16 %v1951_v57, %v5294_v49  ;;  %v438_v60 = vrot.slane %v437_v24, 4 }
 0x110   :  { %v975_v28 = vrot.slane %v7015_v45, 4  ;;  %v457_v27 = vrot.slane %v456_v20, 4  ;;  %v7016_v23 = vrot.slane %v5073_v14, 5  ;;  %v783_v0 = vmax.bf16 %v400_v17, %v5001_v21 }
 0x111   :  { %v476_v4 = vrot.slane %v475_v50, 4  ;;  %v785_v25 = vmax.bf16 %v419_v3, %v5020_v19  ;;  %v7017_v48 = vrot.slane %v5112_v55, 5  ;;  %v5329_v16 = vmax.bf16 %v1999_v43, %v5300_v40 }
 0x112   :  { %v980_v33 = vrot.slane %v7016_v23, 4  ;;  %v787_v22 = vmax.bf16 %v438_v60, %v5036_v9  ;;  %v789_v35 = vmax.bf16 %v457_v27, %v5073_v14  ;;  %v1324_v56 = vrot.slane %v5215_v58, 4 }
 0x113   :  { %v985_v47 = vrot.slane %v7017_v48, 4  ;;  %v791_v57 = vmax.bf16 %v476_v4, %v5112_v55  ;;  %v1138_v24 = vmax.bf16 %v965_v12, %v783_v0  ;;  %v1140_v20 = vmax.bf16 %v970_v26, %v785_v25  ;;  %2097 = vst.msk [vmem:[%s6810_s1 + $0x60] sm:$0xf] %vm2071_vm12, %v5329_v16  ;;  %v5364_v48 = vld [vmem:[%s6809_s0 + $0xac] sm:$0xf] }
 0x114   :  { %v1333_v61 = vrot.slane %v5219_v53, 4  ;;  %v6884_v17 = vshrl.u32 %v5329_v16, 16  ;;  %v6883_v3 = vshll.u32 %v5329_v16, 16  ;;  %v1142_v50 = vmax.bf16 %v975_v28, %v787_v22  ;;  %v53_v28 = vld [vmem:[%s6809_s0 + $0xa8] sm:$0xf] }
 0x115   :  { %v1144_v45 = vmax.bf16 %v980_v33, %v789_v35  ;;  %v1146_v43 = vmax.bf16 %v985_v47, %v791_v57  ;;  %v1342_v58 = vrot.slane %v5232_v54, 4  ;;  %v1351_v55 = vrot.slane %v5245_v34, 4 }
 0x116   :  { %v1360_v12 = vrot.slane %v5254_v36, 4  ;;  %v2292_v53 = vrot.slane %v6884_v17, 4  ;;  %v2295_v26 = vrot.slane %v6883_v3, 5  ;;  %v1557_v60 = vmax.bf16 %v1324_v56, %v1138_v24 }
 0x117   :  { %v1559_v27 = vmax.bf16 %v1333_v61, %v1140_v20  ;;  %v1561_v23 = vmax.bf16 %v1342_v58, %v1142_v50  ;;  %v1563_v33 = vmax.bf16 %v1351_v55, %v1144_v45  ;;  %v1675_v54 = vrot.slane %v1673_v32, 4 }
 0x118   :  { %v1565_v4 = vmax.bf16 %v1360_v12, %v1146_v43  ;;  %v1680_v34 = vrot.slane %v1678_v51, 4  ;;  %v1685_v36 = vrot.slane %v1683_v38, 4  ;;  %v1690_v0 = vrot.slane %v1688_v42, 4 }
 0x119   :  { %v1695_v25 = vrot.slane %v1693_v62, 4  ;;  %v1848_v47 = vmax.bf16 %v1675_v54, %v1557_v60  ;;  %v2296_v22 = vor.u32 %v2295_v26, %v2292_v53  ;;  %v3753_v21 = vrot.slane %v5329_v16, 9 }
 0x11a   :  { %v478_v32 = vshrl.u32 %v53_v28, 16  ;;  %v1850_v35 = vmax.bf16 %v1680_v34, %v1559_v27  ;;  %v5367_v19 = vmax.bf16 %v1685_v36, %v1561_v23  ;;  %v5369_v51 = vmax.bf16 %v1690_v0, %v1563_v33 }
 0x11b   :  { %v5371_v9 = vmax.bf16 %v1695_v25, %v1565_v4  ;;  %v5373_v14 = vrot.slane %v2296_v22, 4  ;;  %v481_v42 = vshll.u32 %v53_v28, 16  ;;  %v487_v62 = vshll.u32 %v5364_v48, 16 }
 0x11c   :  { %v480_v38 = vrot.slane %v478_v32, 4  ;;  %v1904_v56 = vmax.bf16 %v1850_v35, %v1848_v47  ;;  %v491_v57 = vshrl.u32 %v5364_v48, 16  ;;  %v3698_v24 = vrot.slane %v53_v28, 9 }
 0x11d   :  { %v988_v20 = vrot.slane %v5364_v48, 5  ;;  %v483_v61 = vrot.slane %v481_v42, 5  ;;  %v489_v50 = vrot.slane %v487_v62, 5  ;;  %v1361_v45 = vrot.slane %v478_v32, 5 }
 0x11e   :  { %v1362_v43 = vrot.slane %v481_v42, 6  ;;  %v1952_v58 = vmax.bf16 %v1904_v56, %v5367_v19  ;;  %v1365_v12 = vrot.slane %v491_v57, 5  ;;  %v1366_v53 = vrot.slane %v487_v62, 6 }
 0x11f   :  { %v989_v55 = vsel %vm3974_vm5, %v3698_v24, %v988_v20  ;;  %v484_v26 = vor.u32 %v483_v61, %v480_v38  ;;  %v3730_v27 = vrot.slane %v53_v28, 10  ;;  %v1698_v23 = vrot.slane %v5364_v48, 6 }
 0x120   :  { %v1363_v60 = vor.u32 %v1362_v43, %v1361_v45  ;;  %v2000_v33 = vmax.bf16 %v1952_v58, %v5369_v51  ;;  %v1367_v4 = vor.u32 %v1366_v53, %v1365_v12  ;;  %v1905_v54 = vmax.bf16 %v5290_v10, %v5288_v11  ;;  %v55_v45 = vld [vmem:[%s6809_s0 + $0xb0] sm:$0xf]  ;;  %v5413_v53 = vld [vmem:[%s6809_s0 + $0xb4] sm:$0xf] }
 0x121   :  { %v493_v34 = vrot.slane %v491_v57, 4  ;;  %v485_v36 = vrot.slane %v484_v26, 4  ;;  %v1699_v25 = vsel %vm4098_vm11, %v3730_v27, %v1698_v23  ;;  %v990_v47 = vrot.slane %v988_v20, 4 }
 0x122   :  { %v1364_v0 = vrot.slane %v1363_v60, 4  ;;  %v5388_v22 = vmax.bf16 %v2000_v33, %v5371_v9  ;;  %v1953_v32 = vmax.bf16 %v1905_v54, %v5294_v49  ;;  %v1369_v42 = vrot.slane %v1367_v4, 4 }
 0x123   :  { %v494_v38 = vor.u32 %v493_v34, %v489_v50  ;;  %v490_v62 = vsel %vm3918_vm4, %v485_v36, %v489_v50  ;;  %v1700_v56 = vrot.slane %v1698_v23, 4  ;;  %v1906_v57 = vmax.bf16 %v5367_v19, %v1850_v35 }
 0x124   :  { %7018 = vst [vmem:[#allocation51_spill] sm:$0xff] %v5388_v22  ;;  %v1368_v11 = vsel %vm4051_vm8, %v1364_v0, %v1367_v4  ;;  %2098 = vst.msk [vmem:[%s6810_s1 + $0x64] sm:$0x3] %vm2073_vm13, %v5388_v22  ;;  %v2299_v24 = vshll.u32 %v5388_v22, 16  ;;  %v2603_v20 = vrot.slane %v5388_v22, 5  ;;  %v2821_v61 = vshrl.u32 %v5388_v22, 16 }
 0x125   :  { %v792_v43 = vmax.bf16 %v490_v62, %v53_v28  ;;  %v2001_v35 = vmax.bf16 %v1953_v32, %v5300_v40  ;;  %v495_v58 = vrot.slane %v494_v38, 4  ;;  %v1954_v12 = vmax.bf16 %v1906_v57, %v5369_v51 }
 0x126   :  { %v5415_v26 = vrot.slane %v2299_v24, 5  ;;  %v5419_v60 = vsel %vm3974_vm5, %v3753_v21, %v2603_v20  ;;  %v5421_v27 = vrot.slane %v2821_v61, 5  ;;  %v5423_v23 = vrot.slane %v2299_v24, 6 }
 0x127   :  { %7020 = vst [vmem:[#allocation53_spill] sm:$0xff] %v5419_v60  ;;  %v1147_v28 = vmax.bf16 %v989_v55, %v792_v43  ;;  %v793_v33 = vmax.bf16 %v495_v58, %v5364_v48  ;;  %v2002_v4 = vmax.bf16 %v1954_v12, %v5371_v9  ;;  %v497_v54 = vshrl.u32 %v55_v45, 16 }
 0x128   :  { %7019 = vst [vmem:[#allocation52_spill] sm:$0xff] %v5415_v26  ;;  %7021 = vst [vmem:[#allocation54_spill] sm:$0xff] %v5421_v27  ;;  %v500_v21 = vshll.u32 %v55_v45, 16  ;;  %v506_v0 = vshll.u32 %v5413_v53, 16  ;;  %v510_v55 = vshrl.u32 %v5413_v53, 16  ;;  %v3699_v24 = vrot.slane %v55_v45, 9 }
 0x129   :  { %7022 = vst [vmem:[#allocation55_spill] sm:$0xff] %v5423_v23  ;;  %v1566_v32 = vmax.bf16 %v1368_v11, %v1147_v28  ;;  %v1148_v38 = vmax.bf16 %v990_v47, %v793_v33  ;;  %v499_v62 = vrot.slane %v497_v54, 4  ;;  %v993_v20 = vrot.slane %v5413_v53, 5 }
 0x12a   :  { %v502_v48 = vrot.slane %v500_v21, 5  ;;  %v508_v57 = vrot.slane %v506_v0, 5  ;;  %v1370_v58 = vrot.slane %v497_v54, 5  ;;  %v1371_v12 = vrot.slane %v500_v21, 6 }
 0x12b   :  { %v5436_v61 = vmax.bf16 %v1699_v25, %v1566_v32  ;;  %v1567_v43 = vmax.bf16 %v1369_v42, %v1148_v38  ;;  %v994_v36 = vsel %vm3974_vm5, %v3699_v24, %v993_v20  ;;  %v1374_v3 = vrot.slane %v510_v55, 5 }
 0x12c   :  { %v503_v50 = vor.u32 %v502_v48, %v499_v62  ;;  %v1375_v11 = vrot.slane %v506_v0, 6  ;;  %v1372_v33 = vor.u32 %v1371_v12, %v1370_v58  ;;  %v3731_v17 = vrot.slane %v55_v45, 10 }
 0x12d   :  { %v5441_v47 = vmax.bf16 %v2001_v35, %v5436_v61  ;;  %v5443_v28 = vmax.bf16 %v1700_v56, %v1567_v43  ;;  %v1703_v25 = vrot.slane %v5413_v53, 6  ;;  %v1907_v42 = vmax.bf16 %v5294_v49, %v5290_v10 }
 0x12e   :  { %v504_v34 = vrot.slane %v503_v50, 4  ;;  %v5445_v27 = vor.u32 %v1375_v11, %v1374_v3  ;;  %v1373_v21 = vrot.slane %v1372_v33, 4  ;;  %v512_v62 = vrot.slane %v510_v55, 4 }
 0x12f   :  { %7023 = vst [vmem:[#allocation56_spill] sm:$0xff] %v5441_v47  ;;  %2099 = vst.msk [vmem:[%s6810_s1 + $0x68] sm:$0xf] %vm2071_vm12, %v5441_v47  ;;  %v6887_v35 = vshrl.u32 %v5441_v47, 16  ;;  %v6886_v56 = vshll.u32 %v5441_v47, 16  ;;  %v5458_v54 = vmax.bf16 %v2002_v4, %v5443_v28  ;;  %v3754_v3 = vrot.slane %v5441_v47, 9 }
 0x130   :  { %v509_v50 = vsel %vm3918_vm4, %v504_v34, %v508_v57  ;;  %v1704_v10 = vsel %vm4098_vm11, %v3731_v17, %v1703_v25  ;;  %v1955_v0 = vmax.bf16 %v1907_v42, %v5300_v40  ;;  %v1377_v24 = vsel %vm4051_vm8, %v1373_v21, %v5445_v27 }
 0x131   :  { %7024 = vst [vmem:[#allocation57_spill] sm:$0xff] %v5458_v54  ;;  %v2306_v32 = vrot.slane %v6887_v35, 4  ;;  %v2309_v38 = vrot.slane %v6886_v56, 5  ;;  %2100 = vst.msk [vmem:[%s6810_s1 + $0x6c] sm:$0x3] %vm2073_vm13, %v5458_v54  ;;  %v2313_v4 = vshll.u32 %v5458_v54, 16  ;;  %v794_v48 = vmax.bf16 %v509_v50, %v55_v45 }
 0x132   :  { %v2607_v34 = vrot.slane %v5458_v54, 5  ;;  %v2831_v17 = vshrl.u32 %v5458_v54, 16  ;;  %v2003_v56 = vmax.bf16 %v1955_v0, %v5436_v61  ;;  %v57_v45 = vld [vmem:[%s6809_s0 + $0xb8] sm:$0xf]  ;;  %v5499_v50 = vld [vmem:[%s6809_s0 + $0xbc] sm:$0xf]  ;;  %v513_v55 = vor.u32 %v512_v62, %v508_v57 }
 0x133   :  { %v2310_v43 = vor.u32 %v2309_v38, %v2306_v32  ;;  %v5482_v58 = vrot.slane %v2313_v4, 5  ;;  %v5488_v11 = vrot.slane %v2313_v4, 6  ;;  %v1149_v42 = vmax.bf16 %v994_v36, %v794_v48 }
 0x134   :  { %v5486_v12 = vsel %vm3974_vm5, %v3754_v3, %v2607_v34  ;;  %v5490_v33 = vrot.slane %v2831_v17, 5  ;;  %v995_v3 = vrot.slane %v993_v20, 4  ;;  %v1378_v32 = vrot.slane %v5445_v27, 4 }
 0x135   :  { %7025 = vst [vmem:[#allocation58_spill] sm:$0xff] %v5482_v58  ;;  %7026 = vst [vmem:[#allocation59_spill] sm:$0xff] %v5486_v12  ;;  %v5501_v21 = vrot.slane %v2310_v43, 4  ;;  %v1705_v38 = vrot.slane %v1703_v25, 4  ;;  %v1568_v0 = vmax.bf16 %v1377_v24, %v1149_v42  ;;  %v1908_v4 = vmax.bf16 %v5369_v51, %v5367_v19 }
 0x136   :  { %7027 = vst [vmem:[#allocation60_spill] sm:$0xff] %v5488_v11  ;;  %7028 = vst [vmem:[#allocation61_spill] sm:$0xff] %v5490_v33  ;;  %v516_v17 = vshrl.u32 %v57_v45, 16  ;;  %v519_v48 = vshll.u32 %v57_v45, 16  ;;  %v525_v20 = vshll.u32 %v5499_v50, 16  ;;  %v514_v27 = vrot.slane %v513_v55, 4 }
 0x137   :  { %7029 = vst [vmem:[#allocation62_spill] sm:$0xff] %v5501_v21  ;;  %v5513_v43 = vmax.bf16 %v1704_v10, %v1568_v0  ;;  %v1956_v25 = vmax.bf16 %v1908_v4, %v5371_v9  ;;  %v529_v24 = vshrl.u32 %v5499_v50, 16  ;;  %v3700_v19 = vrot.slane %v57_v45, 9 }
 0x138   :  { %v518_v57 = vrot.slane %v516_v17, 4  ;;  %v521_v62 = vrot.slane %v519_v48, 5  ;;  %v527_v42 = vrot.slane %v525_v20, 5  ;;  %v795_v35 = vmax.bf16 %v514_v27, %v5413_v53 }
 0x139   :  { %v5518_v36 = vmax.bf16 %v2003_v56, %v5513_v43  ;;  %v2004_v34 = vmax.bf16 %v1956_v25, %v5443_v28  ;;  %v998_v33 = vrot.slane %v5499_v50, 5  ;;  %v1379_v0 = vrot.slane %v516_v17, 5 }
 0x13a   :  { %v522_v10 = vor.u32 %v521_v62, %v518_v57  ;;  %v1380_v55 = vrot.slane %v519_v48, 6  ;;  %v1383_v11 = vrot.slane %v529_v24, 5  ;;  %v1150_v54 = vmax.bf16 %v995_v3, %v795_v35 }
 0x13b   :  { %7030 = vst [vmem:[#allocation63_spill] sm:$0xff] %v5518_v36  ;;  %2101 = vst.msk [vmem:[%s6810_s1 + $0x70] sm:$0xf] %vm2071_vm12, %v5518_v36  ;;  %v6894_v4 = vshrl.u32 %v5518_v36, 16  ;;  %v6893_v56 = vshll.u32 %v5518_v36, 16  ;;  %v3755_v53 = vrot.slane %v5518_v36, 9  ;;  %v999_v25 = vsel %vm3974_vm5, %v3700_v19, %v998_v33 }
 0x13c   :  { %v523_v27 = vrot.slane %v522_v10, 4  ;;  %v1381_v17 = vor.u32 %v1380_v55, %v1379_v0  ;;  %v1384_v48 = vrot.slane %v525_v20, 6  ;;  %v1569_v23 = vmax.bf16 %v1378_v32, %v1150_v54 }
 0x13d   :  { %v2320_v57 = vrot.slane %v6894_v4, 4  ;;  %v2323_v62 = vrot.slane %v6893_v56, 5  ;;  %v3732_v22 = vrot.slane %v57_v45, 10  ;;  %v1708_v10 = vrot.slane %v5499_v50, 6 }
 0x13e   :  { %v528_v12 = vsel %vm3918_vm4, %v523_v27, %v527_v42  ;;  %v1382_v35 = vrot.slane %v1381_v17, 4  ;;  %v1385_v3 = vor.u32 %v1384_v48, %v1383_v11  ;;  %v5540_v60 = vmax.bf16 %v1705_v38, %v1569_v23 }
 0x13f   :  { %v2324_v19 = vor.u32 %v2323_v62, %v2320_v57  ;;  %v796_v0 = vmax.bf16 %v528_v12, %v57_v45  ;;  %v1909_v20 = vmax.bf16 %v5300_v40, %v5294_v49  ;;  %v1709_v54 = vsel %vm4098_vm11, %v3732_v22, %v1708_v10  ;;  %v5573_v62 = vld [vmem:[%s6809_s0 + $0xc4] sm:$0xf] }
 0x140   :  { %v1386_v55 = vsel %vm4051_vm8, %v1382_v35, %v1385_v3  ;;  %v531_v32 = vrot.slane %v529_v24, 4  ;;  %v1000_v56 = vrot.slane %v998_v33, 4  ;;  %v5549_v27 = vmax.bf16 %v2004_v34, %v5540_v60 }
 0x141   :  { %v5551_v11 = vrot.slane %v2324_v19, 4  ;;  %v1151_v23 = vmax.bf16 %v999_v25, %v796_v0  ;;  %v1957_v38 = vmax.bf16 %v1909_v20, %v5436_v61  ;;  %v1387_v45 = vrot.slane %v1385_v3, 4 }
 0x142   :  { %7031 = vst [vmem:[#allocation64_spill] sm:$0xff] %v5549_v27  ;;  %v532_v12 = vor.u32 %v531_v32, %v527_v42  ;;  %v1710_v17 = vrot.slane %v1708_v10, 4  ;;  %v1910_v49 = vmax.bf16 %v5371_v9, %v5369_v51  ;;  %2102 = vst.msk [vmem:[%s6810_s1 + $0x74] sm:$0x3] %vm2073_vm13, %v5549_v27  ;;  %v2327_v22 = vshll.u32 %v5549_v27, 16 }
 0x143   :  { %7032 = vst [vmem:[#allocation65_spill] sm:$0xff] %v5551_v11  ;;  %v2611_v33 = vrot.slane %v5549_v27, 5  ;;  %v2841_v34 = vshrl.u32 %v5549_v27, 16  ;;  %v59_v42 = vld [vmem:[%s6809_s0 + $0xc0] sm:$0xf]  ;;  %v1570_v25 = vmax.bf16 %v1386_v55, %v1151_v23  ;;  %v2005_v51 = vmax.bf16 %v1957_v38, %v5513_v43 }
 0x144   :  { %v533_v48 = vrot.slane %v532_v12, 4  ;;  %v1958_v57 = vmax.bf16 %v1910_v49, %v5443_v28  ;;  %v5575_v35 = vrot.slane %v2327_v22, 5  ;;  %v5583_v19 = vrot.slane %v2327_v22, 6 }
 0x145   :  { %v5579_v3 = vsel %vm3974_vm5, %v3755_v53, %v2611_v33  ;;  %v5581_v10 = vrot.slane %v2841_v34, 5  ;;  %v5585_v0 = vmax.bf16 %v1709_v54, %v1570_v25  ;;  %v535_v32 = vshrl.u32 %v59_v42, 16 }
 0x146   :  { %7033 = vst [vmem:[#allocation66_spill] sm:$0xff] %v5575_v35  ;;  %7034 = vst [vmem:[#allocation67_spill] sm:$0xff] %v5579_v3  ;;  %v797_v20 = vmax.bf16 %v533_v48, %v5499_v50  ;;  %v2006_v55 = vmax.bf16 %v1958_v57, %v5540_v60  ;;  %v538_v38 = vshll.u32 %v59_v42, 16  ;;  %v544_v12 = vshll.u32 %v5573_v62, 16 }
 0x147   :  { %7035 = vst [vmem:[#allocation68_spill] sm:$0xff] %v5581_v10  ;;  %7036 = vst [vmem:[#allocation69_spill] sm:$0xff] %v5583_v19  ;;  %v5597_v49 = vmax.bf16 %v2005_v51, %v5585_v0  ;;  %v537_v22 = vrot.slane %v535_v32, 4  ;;  %v548_v50 = vshrl.u32 %v5573_v62, 16  ;;  %v3701_v25 = vrot.slane %v59_v42, 9 }
 0x148   :  { %v1152_v54 = vmax.bf16 %v1000_v56, %v797_v20  ;;  %v540_v33 = vrot.slane %v538_v38, 5  ;;  %v546_v34 = vrot.slane %v544_v12, 5  ;;  %v1003_v48 = vrot.slane %v5573_v62, 5 }
 0x149   :  { %7037 = vst [vmem:[#allocation70_spill] sm:$0xff] %v5597_v49  ;;  %2103 = vst.msk [vmem:[%s6810_s1 + $0x78] sm:$0xf] %vm2071_vm12, %v5597_v49  ;;  %v6901_v57 = vshrl.u32 %v5597_v49, 16  ;;  %v6900_v51 = vshll.u32 %v5597_v49, 16  ;;  %v3756_v56 = vrot.slane %v5597_v49, 9 }
 0x14a   :  { %v1571_v53 = vmax.bf16 %v1387_v45, %v1152_v54  ;;  %v541_v20 = vor.u32 %v540_v33, %v537_v22  ;;  %v1004_v24 = vsel %vm3974_vm5, %v3701_v25, %v1003_v48  ;;  %v1388_v4 = vrot.slane %v535_v32, 5 }
 0x14b   :  { %v1389_v23 = vrot.slane %v538_v38, 6  ;;  %v2334_v10 = vrot.slane %v6901_v57, 4  ;;  %v2337_v19 = vrot.slane %v6900_v51, 5  ;;  %v1392_v3 = vrot.slane %v548_v50, 5 }
 0x14c   :  { %v5615_v27 = vmax.bf16 %v1710_v17, %v1571_v53  ;;  %v542_v35 = vrot.slane %v541_v20, 4  ;;  %v1393_v45 = vrot.slane %v544_v12, 6  ;;  %v3733_v54 = vrot.slane %v59_v42, 10 }
 0x14d   :  { %v1390_v11 = vor.u32 %v1389_v23, %v1388_v4  ;;  %v2338_v33 = vor.u32 %v2337_v19, %v2334_v10  ;;  %v1713_v32 = vrot.slane %v5573_v62, 6  ;;  %v1911_v38 = vmax.bf16 %v5436_v61, %v5300_v40 }
 0x14e   :  { %v5618_v22 = vmax.bf16 %v2006_v55, %v5615_v27  ;;  %v547_v25 = vsel %vm3918_vm4, %v542_v35, %v546_v34  ;;  %v1394_v17 = vor.u32 %v1393_v45, %v1392_v3  ;;  %v550_v53 = vrot.slane %v548_v50, 4 }
 0x14f   :  { %v1391_v51 = vrot.slane %v1390_v11, 4  ;;  %v2339_v4 = vrot.slane %v2338_v33, 4  ;;  %v798_v23 = vmax.bf16 %v547_v25, %v59_v42  ;;  %v1714_v35 = vsel %vm4098_vm11, %v3733_v54, %v1713_v32  ;;  %v5655_v54 = vld [vmem:[%s6809_s0 + $0xcc] sm:$0xf] }
 0x150   :  { %7038 = vst [vmem:[#allocation71_spill] sm:$0xff] %v5618_v22  ;;  %2104 = vst.msk [vmem:[%s6810_s1 + $0x7c] sm:$0x3] %vm2073_vm13, %v5618_v22  ;;  %v2341_v10 = vshll.u32 %v5618_v22, 16  ;;  %v2615_v19 = vrot.slane %v5618_v22, 5  ;;  %v2851_v55 = vshrl.u32 %v5618_v22, 16  ;;  %v1959_v33 = vmax.bf16 %v1911_v38, %v5513_v43 }
 0x151   :  { %v1395_v11 = vsel %vm4051_vm8, %v1391_v51, %v1394_v17  ;;  %v1153_v45 = vmax.bf16 %v1004_v24, %v798_v23  ;;  %v551_v40 = vor.u32 %v550_v53, %v546_v34  ;;  %v1005_v42 = vrot.slane %v1003_v48, 4  ;;  %v5650_v51 = vld [vmem:[%s6809_s0 + $0xc8] sm:$0xf] }
 0x152   :  { %v2343_v3 = vrot.slane %v2341_v10, 5  ;;  %v5640_v12 = vsel %vm3974_vm5, %v3756_v56, %v2615_v19  ;;  %v5642_v50 = vrot.slane %v2851_v55, 5  ;;  %v5644_v20 = vrot.slane %v2341_v10, 6 }
 0x153   :  { %7039 = vst [vmem:[#allocation72_spill] sm:$0xff] %v5640_v12  ;;  %v1396_v25 = vrot.slane %v1394_v17, 4  ;;  %v1715_v38 = vrot.slane %v1713_v32, 4  ;;  %v1572_v48 = vmax.bf16 %v1395_v11, %v1153_v45  ;;  %v2007_v53 = vmax.bf16 %v1959_v33, %v5585_v0 }
 0x154   :  { %7040 = vst [vmem:[#allocation73_spill] sm:$0xff] %v5642_v50  ;;  %7041 = vst [vmem:[#allocation74_spill] sm:$0xff] %v5644_v20  ;;  %v2344_v56 = vsel %vm3918_vm4, %v2339_v4, %v2343_v3  ;;  %v552_v10 = vrot.slane %v551_v40, 4  ;;  %v1912_v19 = vmax.bf16 %v5443_v28, %v5371_v9  ;;  %v554_v55 = vshrl.u32 %v5650_v51, 16 }
 0x155   :  { %v5662_v34 = vmax.bf16 %v2344_v56, %v5597_v49  ;;  %v557_v23 = vshll.u32 %v5650_v51, 16  ;;  %v563_v4 = vshll.u32 %v5655_v54, 16  ;;  %v5672_v32 = vmax.bf16 %v1714_v35, %v1572_v48 }
 0x156   :  { %v799_v3 = vmax.bf16 %v552_v10, %v5573_v62  ;;  %v567_v11 = vshrl.u32 %v5655_v54, 16  ;;  %v1960_v40 = vmax.bf16 %v1912_v19, %v5540_v60  ;;  %v556_v45 = vrot.slane %v554_v55, 4 }
 0x157   :  { %7042 = vst [vmem:[#allocation75_spill] sm:$0xff] %v5662_v34  ;;  %v559_v33 = vrot.slane %v557_v23, 5  ;;  %v5677_v9 = vrot.slane %v563_v4, 5  ;;  %v2055_v56 = vmax.bf16 %v2007_v53, %v5672_v32  ;;  %v3702_v57 = vrot.slane %v5650_v51, 9 }
 0x158   :  { %v1154_v24 = vmax.bf16 %v1005_v42, %v799_v3  ;;  %v1008_v22 = vrot.slane %v5655_v54, 5  ;;  %v2008_v35 = vmax.bf16 %v1960_v40, %v5615_v27  ;;  %v1397_v17 = vrot.slane %v554_v55, 5 }
 0x159   :  { %v560_v48 = vor.u32 %v559_v33, %v556_v45  ;;  %v1398_v62 = vrot.slane %v557_v23, 6  ;;  %2105 = vst.msk [vmem:[%s6810_s1 + $0x80] sm:$0xf] %vm2071_vm12, %v2055_v56  ;;  %v2346_v10 = vshrl.u32 %v2055_v56, 16  ;;  %v2349_v19 = vshll.u32 %v2055_v56, 16 }
 0x15a   :  { %v1573_v34 = vmax.bf16 %v1396_v25, %v1154_v24  ;;  %v3757_v12 = vrot.slane %v2055_v56, 9  ;;  %v3781_v53 = vrot.slane %v2055_v56, 10  ;;  %v1009_v3 = vsel %vm3974_vm5, %v3702_v57, %v1008_v22 }
 0x15b   :  { %v561_v42 = vrot.slane %v560_v48, 4  ;;  %v1399_v50 = vor.u32 %v1398_v62, %v1397_v17  ;;  %v2348_v20 = vrot.slane %v2346_v10, 4  ;;  %v2351_v40 = vrot.slane %v2349_v19, 5 }
 0x15c   :  { %v2857_v45 = vrot.slane %v2346_v10, 5  ;;  %v2858_v55 = vrot.slane %v2349_v19, 6  ;;  %v5689_v23 = vmax.bf16 %v1715_v38, %v1573_v34  ;;  %v1401_v36 = vrot.slane %v567_v11, 5 }
 0x15d   :  { %v566_v33 = vsel %vm3918_vm4, %v561_v42, %v5677_v9  ;;  %v1400_v49 = vrot.slane %v1399_v50, 4  ;;  %v2352_v24 = vor.u32 %v2351_v40, %v2348_v20  ;;  %v1402_v58 = vrot.slane %v563_v4, 6 }
 0x15e   :  { %v2859_v25 = vor.u32 %v2858_v55, %v2857_v45  ;;  %v800_v48 = vmax.bf16 %v566_v33, %v5650_v51  ;;  %v2056_v57 = vmax.bf16 %v2008_v35, %v5689_v23  ;;  %v3734_v17 = vrot.slane %v5650_v51, 10 }
 0x15f   :  { %v1718_v62 = vrot.slane %v5655_v54, 6  ;;  %v1913_v38 = vmax.bf16 %v5513_v43, %v5436_v61  ;;  %v2353_v34 = vrot.slane %v2352_v24, 4  ;;  %v1403_v42 = vor.u32 %v1402_v58, %v1401_v36 }
 0x160   :  { %v2860_v10 = vrot.slane %v2859_v25, 4  ;;  %v1155_v19 = vmax.bf16 %v1009_v3, %v800_v48  ;;  %2106 = vst.msk [vmem:[%s6810_s1 + $0x84] sm:$0x3] %vm2073_vm13, %v2056_v57  ;;  %v2355_v50 = vshll.u32 %v2056_v57, 16  ;;  %v2619_v20 = vrot.slane %v2056_v57, 5 }
 0x161   :  { %v2861_v4 = vshrl.u32 %v2056_v57, 16  ;;  %v3051_v35 = vrot.slane %v2056_v57, 6  ;;  %v1404_v51 = vsel %vm4051_vm8, %v1400_v49, %v1403_v42  ;;  %v1719_v40 = vsel %vm4098_vm11, %v3734_v17, %v1718_v62 }
 0x162   :  { %v1961_v61 = vmax.bf16 %v1913_v38, %v5585_v0  ;;  %v569_v45 = vrot.slane %v567_v11, 4  ;;  %v2357_v3 = vrot.slane %v2355_v50, 5  ;;  %v5711_v58 = vsel %vm3974_vm5, %v3757_v12, %v2619_v20  ;;  %v5722_v11 = vld [vmem:[%s6809_s0 + $0xd0] sm:$0xf] }
 0x163   :  { %7043 = vst [vmem:[#allocation76_spill] sm:$0xff] %v5711_v58  ;;  %v2863_v36 = vrot.slane %v2861_v4, 5  ;;  %v2864_v55 = vrot.slane %v2355_v50, 6  ;;  %v5715_v33 = vsel %vm4098_vm11, %v3781_v53, %v3051_v35  ;;  %v1574_v24 = vmax.bf16 %v1404_v51, %v1155_v19  ;;  %v5729_v53 = vld [vmem:[%s6809_s0 + $0xd4] sm:$0xf] }
 0x164   :  { %7044 = vst [vmem:[#allocation77_spill] sm:$0xff] %v5715_v33  ;;  %v2009_v49 = vmax.bf16 %v1961_v61, %v5672_v32  ;;  %v570_v25 = vor.u32 %v569_v45, %v5677_v9  ;;  %v2358_v12 = vsel %vm3918_vm4, %v2353_v34, %v2357_v3  ;;  %v1010_v57 = vrot.slane %v1008_v22, 4 }
 0x165   :  { %v2865_v48 = vor.u32 %v2864_v55, %v2863_v36  ;;  %v1405_v17 = vrot.slane %v1403_v42, 4  ;;  %v5731_v38 = vmax.bf16 %v2358_v12, %v2055_v56  ;;  %v5733_v19 = vmax.bf16 %v1719_v40, %v1574_v24 }
 0x166   :  { %v571_v9 = vrot.slane %v570_v25, 4  ;;  %v1720_v50 = vrot.slane %v1718_v62, 4  ;;  %v1914_v34 = vmax.bf16 %v5540_v60, %v5443_v28  ;;  %v573_v22 = vshrl.u32 %v5722_v11, 16 }
 0x167   :  { %7045 = vst [vmem:[#allocation78_spill] sm:$0xff] %v5731_v38  ;;  %v5737_v20 = vsel %vm4051_vm8, %v2860_v10, %v2865_v48  ;;  %v576_v42 = vshll.u32 %v5722_v11, 16  ;;  %v5746_v56 = vmax.bf16 %v2009_v49, %v5733_v19  ;;  %v582_v62 = vshll.u32 %v5729_v53, 16 }
 0x168   :  { %7046 = vst [vmem:[#allocation79_spill] sm:$0xff] %v5737_v20  ;;  %v801_v35 = vmax.bf16 %v571_v9, %v5655_v54  ;;  %v1962_v10 = vmax.bf16 %v1914_v34, %v5615_v27  ;;  %v575_v51 = vrot.slane %v573_v22, 4  ;;  %v586_v28 = vshrl.u32 %v5729_v53, 16 }
 0x169   :  { %v578_v40 = vrot.slane %v576_v42, 5  ;;  %2107 = vst.msk [vmem:[%s6810_s1 + $0x88] sm:$0xf] %vm2071_vm12, %v5746_v56  ;;  %v2360_v61 = vshrl.u32 %v5746_v56, 16  ;;  %v2363_v45 = vshll.u32 %v5746_v56, 16  ;;  %v3758_v54 = vrot.slane %v5746_v56, 9 }
 0x16a   :  { %v1156_v3 = vmax.bf16 %v1010_v57, %v801_v35  ;;  %v2010_v36 = vmax.bf16 %v1962_v10, %v5689_v23  ;;  %v3782_v55 = vrot.slane %v5746_v56, 10  ;;  %v584_v49 = vrot.slane %v582_v62, 5 }
 0x16b   :  { %v579_v24 = vor.u32 %v578_v40, %v575_v51  ;;  %v2362_v25 = vrot.slane %v2360_v61, 4  ;;  %v2365_v12 = vrot.slane %v2363_v45, 5  ;;  %v2867_v48 = vrot.slane %v2360_v61, 5 }
 0x16c   :  { %v2868_v9 = vrot.slane %v2363_v45, 6  ;;  %v1575_v34 = vmax.bf16 %v1405_v17, %v1156_v3  ;;  %v3703_v33 = vrot.slane %v5722_v11, 9  ;;  %v1013_v20 = vrot.slane %v5729_v53, 5 }
 0x16d   :  { %v580_v4 = vrot.slane %v579_v24, 4  ;;  %v2366_v38 = vor.u32 %v2365_v12, %v2362_v25  ;;  %v1406_v35 = vrot.slane %v573_v22, 5  ;;  %v1407_v58 = vrot.slane %v576_v42, 6 }
 0x16e   :  { %v2869_v57 = vor.u32 %v2868_v9, %v2867_v48  ;;  %v5764_v21 = vmax.bf16 %v1720_v50, %v1575_v34  ;;  %v1014_v51 = vsel %vm3974_vm5, %v3703_v33, %v1013_v20  ;;  %v1410_v40 = vrot.slane %v586_v28, 5 }
 0x16f   :  { %v585_v10 = vsel %vm3918_vm4, %v580_v4, %v584_v49  ;;  %v2367_v61 = vrot.slane %v2366_v38, 4  ;;  %v1408_v3 = vor.u32 %v1407_v58, %v1406_v35  ;;  %v1411_v25 = vrot.slane %v582_v62, 6 }
 0x170   :  { %v2870_v17 = vrot.slane %v2869_v57, 4  ;;  %v802_v45 = vmax.bf16 %v585_v10, %v5722_v11  ;;  %v2058_v24 = vmax.bf16 %v2010_v36, %v5764_v21  ;;  %v3735_v22 = vrot.slane %v5722_v11, 10 }
 0x171   :  { %v1723_v50 = vrot.slane %v5729_v53, 6  ;;  %v1409_v12 = vrot.slane %v1408_v3, 4  ;;  %v1915_v4 = vmax.bf16 %v5585_v0, %v5513_v43  ;;  %v588_v48 = vrot.slane %v586_v28, 4 }
 0x172   :  { %v1157_v42 = vmax.bf16 %v1014_v51, %v802_v45  ;;  %2108 = vst.msk [vmem:[%s6810_s1 + $0x8c] sm:$0x3] %vm2073_vm13, %v2058_v24  ;;  %v2369_v33 = vshll.u32 %v2058_v24, 16  ;;  %v2623_v58 = vrot.slane %v2058_v24, 5  ;;  %v2871_v38 = vshrl.u32 %v2058_v24, 16 }
 0x173   :  { %v3055_v36 = vrot.slane %v2058_v24, 6  ;;  %v1412_v62 = vor.u32 %v1411_v25, %v1410_v40  ;;  %v1724_v11 = vsel %vm4098_vm11, %v3735_v22, %v1723_v50  ;;  %v1963_v9 = vmax.bf16 %v1915_v4, %v5672_v32 }
 0x174   :  { %v589_v34 = vor.u32 %v588_v48, %v584_v49  ;;  %v2371_v57 = vrot.slane %v2369_v33, 5  ;;  %v5785_v43 = vsel %vm3974_vm5, %v3758_v54, %v2623_v58  ;;  %v2873_v28 = vrot.slane %v2871_v38, 5  ;;  %v5797_v49 = vld [vmem:[%s6809_s0 + $0xd8] sm:$0xf] }
 0x175   :  { %7047 = vst [vmem:[#allocation80_spill] sm:$0xff] %v5785_v43  ;;  %v2874_v35 = vrot.slane %v2369_v33, 6  ;;  %v5789_v10 = vsel %vm4098_vm11, %v3782_v55, %v3055_v36  ;;  %v1413_v51 = vsel %vm4051_vm8, %v1409_v12, %v1412_v62  ;;  %v2011_v40 = vmax.bf16 %v1963_v9, %v5733_v19  ;;  %v5804_v55 = vld [vmem:[%s6809_s0 + $0xdc] sm:$0xf] }
 0x176   :  { %7048 = vst [vmem:[#allocation81_spill] sm:$0xff] %v5789_v10  ;;  %v590_v45 = vrot.slane %v589_v34, 4  ;;  %v2372_v54 = vsel %vm3918_vm4, %v2367_v61, %v2371_v57  ;;  %v1576_v24 = vmax.bf16 %v1413_v51, %v1157_v42  ;;  %v1015_v25 = vrot.slane %v1013_v20, 4 }
 0x177   :  { %v2875_v3 = vor.u32 %v2874_v35, %v2873_v28  ;;  %v5807_v22 = vmax.bf16 %v2372_v54, %v5746_v56  ;;  %v1414_v4 = vrot.slane %v1412_v62, 4  ;;  %v1725_v48 = vrot.slane %v1723_v50, 4 }
 0x178   :  { %v803_v12 = vmax.bf16 %v590_v45, %v5729_v53  ;;  %v5814_v61 = vmax.bf16 %v1724_v11, %v1576_v24  ;;  %v1916_v20 = vmax.bf16 %v5615_v27, %v5540_v60  ;;  %v592_v42 = vshrl.u32 %v5797_v49, 16 }
 0x179   :  { %7049 = vst [vmem:[#allocation82_spill] sm:$0xff] %v5807_v22  ;;  %v5812_v33 = vsel %vm4051_vm8, %v2870_v17, %v2875_v3  ;;  %v595_v38 = vshll.u32 %v5797_v49, 16  ;;  %v601_v53 = vshll.u32 %v5804_v55, 16  ;;  %v605_v62 = vshrl.u32 %v5804_v55, 16 }
 0x17a   :  { %7050 = vst [vmem:[#allocation83_spill] sm:$0xff] %v5812_v33  ;;  %v1158_v56 = vmax.bf16 %v1015_v25, %v803_v12  ;;  %v2059_v50 = vmax.bf16 %v2011_v40, %v5814_v61  ;;  %v1964_v17 = vmax.bf16 %v1916_v20, %v5689_v23  ;;  %v594_v36 = vrot.slane %v592_v42, 4 }
 0x17b   :  { %v597_v9 = vrot.slane %v595_v38, 5  ;;  %v5826_v60 = vrot.slane %v601_v53, 5  ;;  %v3704_v34 = vrot.slane %v5797_v49, 9  ;;  %v1018_v3 = vrot.slane %v5804_v55, 5 }
 0x17c   :  { %v1577_v11 = vmax.bf16 %v1414_v4, %v1158_v56  ;;  %2109 = vst.msk [vmem:[%s6810_s1 + $0x90] sm:$0xf] %vm2071_vm12, %v2059_v50  ;;  %v2374_v57 = vshrl.u32 %v2059_v50, 16  ;;  %v2377_v28 = vshll.u32 %v2059_v50, 16  ;;  %v2012_v35 = vmax.bf16 %v1964_v17, %v5764_v21 }
 0x17d   :  { %v3759_v51 = vrot.slane %v2059_v50, 9  ;;  %v3783_v45 = vrot.slane %v2059_v50, 10  ;;  %v598_v54 = vor.u32 %v597_v9, %v594_v36  ;;  %v1019_v58 = vsel %vm3974_vm5, %v3704_v34, %v1018_v3 }
 0x17e   :  { %v5834_v40 = vmax.bf16 %v1725_v48, %v1577_v11  ;;  %v2376_v24 = vrot.slane %v2374_v57, 4  ;;  %v2379_v25 = vrot.slane %v2377_v28, 5  ;;  %v2877_v12 = vrot.slane %v2374_v57, 5 }
 0x17f   :  { %v2878_v4 = vrot.slane %v2377_v28, 6  ;;  %v599_v56 = vrot.slane %v598_v54, 4  ;;  %v1415_v10 = vrot.slane %v592_v42, 5  ;;  %v1416_v22 = vrot.slane %v595_v38, 6 }
 0x180   :  { %v2060_v20 = vmax.bf16 %v2012_v35, %v5834_v40  ;;  %v2380_v33 = vor.u32 %v2379_v25, %v2376_v24  ;;  %v1419_v48 = vrot.slane %v605_v62, 5 }
 0x181   :  { %v2879_v17 = vor.u32 %v2878_v4, %v2877_v12  ;;  %v604_v34 = vsel %vm3918_vm4, %v599_v56, %v5826_v60  ;;  %v1417_v42 = vor.u32 %v1416_v22, %v1415_v10  ;;  %v3736_v10 = vrot.slane %v5797_v49, 10 }
 0x182   :  { %2110 = vst.msk [vmem:[%s6810_s1 + $0x94] sm:$0x3] %vm2073_vm13, %v2060_v20  ;;  %v2383_v36 = vshll.u32 %v2060_v20, 16  ;;  %v2627_v11 = vrot.slane %v2060_v20, 5  ;;  %v2881_v9 = vshrl.u32 %v2060_v20, 16  ;;  %v3059_v57 = vrot.slane %v2060_v20, 6 }
 0x183   :  { %v2381_v28 = vrot.slane %v2380_v33, 4  ;;  %v2880_v35 = vrot.slane %v2879_v17, 4  ;;  %v804_v4 = vmax.bf16 %v604_v34, %v5797_v49  ;;  %v1418_v33 = vrot.slane %v1417_v42, 4  ;;  %v5873_v49 = vld [vmem:[%s6809_s0 + $0xe0] sm:$0xf] }
 0x184   :  { %v2385_v54 = vrot.slane %v2383_v36, 5  ;;  %v5849_v38 = vsel %vm3974_vm5, %v3759_v51, %v2627_v11  ;;  %v2883_v24 = vrot.slane %v2881_v9, 5  ;;  %v2884_v25 = vrot.slane %v2383_v36, 6 }
 0x185   :  { %7051 = vst [vmem:[#allocation84_spill] sm:$0xff] %v5849_v38  ;;  %v5853_v12 = vsel %vm4098_vm11, %v3783_v45, %v3059_v57  ;;  %v1420_v20 = vrot.slane %v601_v53, 6  ;;  %v1728_v22 = vrot.slane %v5804_v55, 6  ;;  %v1159_v11 = vmax.bf16 %v1019_v58, %v804_v4  ;;  %v5878_v58 = vld [vmem:[%s6809_s0 + $0xe4] sm:$0xf] }
 0x186   :  { %7052 = vst [vmem:[#allocation85_spill] sm:$0xff] %v5853_v12  ;;  %v2386_v17 = vsel %vm3918_vm4, %v2381_v28, %v2385_v54  ;;  %v2885_v56 = vor.u32 %v2884_v25, %v2883_v24  ;;  %v1917_v45 = vmax.bf16 %v5672_v32, %v5585_v0  ;;  %v607_v57 = vrot.slane %v605_v62, 4 }
 0x187   :  { %v5860_v51 = vmax.bf16 %v2386_v17, %v2059_v50  ;;  %v1421_v36 = vor.u32 %v1420_v20, %v1419_v48  ;;  %v1729_v53 = vsel %vm4098_vm11, %v3736_v10, %v1728_v22  ;;  %v1020_v28 = vrot.slane %v1018_v3, 4 }
 0x188   :  { %v5866_v9 = vsel %vm4051_vm8, %v2880_v35, %v2885_v56  ;;  %v1965_v48 = vmax.bf16 %v1917_v45, %v5733_v19  ;;  %v608_v35 = vor.u32 %v607_v57, %v5826_v60  ;;  %v1730_v34 = vrot.slane %v1728_v22, 4 }
 0x189   :  { %7053 = vst [vmem:[#allocation86_spill] sm:$0xff] %v5860_v51  ;;  %7054 = vst [vmem:[#allocation87_spill] sm:$0xff] %v5866_v9  ;;  %v1422_v50 = vsel %vm4051_vm8, %v1418_v33, %v1421_v36  ;;  %v1423_v62 = vrot.slane %v1421_v36, 4  ;;  %v1918_v42 = vmax.bf16 %v5689_v23, %v5615_v27  ;;  %v611_v24 = vshrl.u32 %v5873_v49, 16 }
 0x18a   :  { %v1578_v3 = vmax.bf16 %v1422_v50, %v1159_v11  ;;  %v2013_v54 = vmax.bf16 %v1965_v48, %v5814_v61  ;;  %v614_v25 = vshll.u32 %v5873_v49, 16  ;;  %v620_v4 = vshll.u32 %v5878_v58, 16 }
 0x18b   :  { %v609_v33 = vrot.slane %v608_v35, 4  ;;  %v1966_v17 = vmax.bf16 %v1918_v42, %v5764_v21  ;;  %v624_v56 = vshrl.u32 %v5878_v58, 16  ;;  %v613_v60 = vrot.slane %v611_v24, 4 }
 0x18c   :  { %v5892_v20 = vmax.bf16 %v1729_v53, %v1578_v3  ;;  %v616_v10 = vrot.slane %v614_v25, 5  ;;  %v622_v22 = vrot.slane %v620_v4, 5  ;;  %v3705_v27 = vrot.slane %v5873_v49, 9 }
 0x18d   :  { %v805_v36 = vmax.bf16 %v609_v33, %v5804_v55  ;;  %v2014_v45 = vmax.bf16 %v1966_v17, %v5834_v40  ;;  %v1023_v53 = vrot.slane %v5878_v58, 5  ;;  %v1424_v50 = vrot.slane %v611_v24, 5 }
 0x18e   :  { %v5898_v11 = vmax.bf16 %v2013_v54, %v5892_v20  ;;  %v617_v57 = vor.u32 %v616_v10, %v613_v60  ;;  %v1425_v48 = vrot.slane %v614_v25, 6  ;;  %v1428_v3 = vrot.slane %v624_v56, 5 }
 0x18f   :  { %v1160_v54 = vmax.bf16 %v1020_v28, %v805_v36  ;;  %v1024_v24 = vsel %vm3974_vm5, %v3705_v27, %v1023_v53  ;;  %v1429_v43 = vrot.slane %v620_v4, 6 }
 0x190   :  { %2111 = vst.msk [vmem:[%s6810_s1 + $0x98] sm:$0xf] %vm2071_vm12, %v5898_v11  ;;  %v2388_v35 = vshrl.u32 %v5898_v11, 16  ;;  %v2391_v42 = vshll.u32 %v5898_v11, 16  ;;  %v3760_v55 = vrot.slane %v5898_v11, 9  ;;  %v3784_v33 = vrot.slane %v5898_v11, 10 }
 0x191   :  { %v618_v17 = vrot.slane %v617_v57, 4  ;;  %v1426_v25 = vor.u32 %v1425_v48, %v1424_v50  ;;  %v1579_v9 = vmax.bf16 %v1423_v62, %v1160_v54  ;;  %v3737_v57 = vrot.slane %v5873_v49, 10 }
 0x192   :  { %v2390_v60 = vrot.slane %v2388_v35, 4  ;;  %v2393_v10 = vrot.slane %v2391_v42, 5  ;;  %v2887_v0 = vrot.slane %v2388_v35, 5  ;;  %v2888_v12 = vrot.slane %v2391_v42, 6 }
 0x193   :  { %v623_v51 = vsel %vm3918_vm4, %v618_v17, %v622_v22  ;;  %v1427_v38 = vrot.slane %v1426_v25, 4  ;;  %v5918_v26 = vmax.bf16 %v1730_v34, %v1579_v9  ;;  %v1430_v27 = vor.u32 %v1429_v43, %v1428_v3 }
 0x194   :  { %v2394_v28 = vor.u32 %v2393_v10, %v2390_v60  ;;  %v2889_v36 = vor.u32 %v2888_v12, %v2887_v0  ;;  %v806_v47 = vmax.bf16 %v623_v51, %v5873_v49  ;;  %v1733_v50 = vrot.slane %v5878_v58, 6 }
 0x195   :  { %v1919_v48 = vmax.bf16 %v5733_v19, %v5672_v32  ;;  %v626_v54 = vrot.slane %v624_v56, 4  ;;  %v2062_v4 = vmax.bf16 %v2014_v45, %v5918_v26  ;;  %v1431_v12 = vsel %vm4051_vm8, %v1427_v38, %v1430_v27 }
 0x196   :  { %v2395_v62 = vrot.slane %v2394_v28, 4  ;;  %v2890_v35 = vrot.slane %v2889_v36, 4  ;;  %v1161_v42 = vmax.bf16 %v1024_v24, %v806_v47  ;;  %v1734_v51 = vsel %vm4098_vm11, %v3737_v57, %v1733_v50 }
 0x197   :  { %v1967_v9 = vmax.bf16 %v1919_v48, %v5814_v61  ;;  %v627_v49 = vor.u32 %v626_v54, %v622_v22  ;;  %v1025_v0 = vrot.slane %v1023_v53, 4  ;;  %v1432_v34 = vrot.slane %v1430_v27, 4  ;;  %2112 = vst.msk [vmem:[%s6810_s1 + $0x9c] sm:$0x3] %vm2073_vm13, %v2062_v4  ;;  %v5939_v22 = vld [vmem:[%s6809_s0 + $0xe8] sm:$0xf] }
 0x198   :  { %v1580_v43 = vmax.bf16 %v1431_v12, %v1161_v42  ;;  %v2397_v47 = vshll.u32 %v2062_v4, 16  ;;  %v2631_v32 = vrot.slane %v2062_v4, 5  ;;  %v2891_v56 = vshrl.u32 %v2062_v4, 16 }
 0x199   :  { %v3063_v45 = vrot.slane %v2062_v4, 6  ;;  %v2015_v38 = vmax.bf16 %v1967_v9, %v5892_v20  ;;  %v628_v17 = vrot.slane %v627_v49, 4  ;;  %v1735_v24 = vrot.slane %v1733_v50, 4 }
 0x19a   :  { %v5933_v3 = vmax.bf16 %v1734_v51, %v1580_v43  ;;  %v2399_v53 = vrot.slane %v2397_v47, 5  ;;  %v5943_v25 = vsel %vm3974_vm5, %v3760_v55, %v2631_v32  ;;  %v2893_v60 = vrot.slane %v2891_v56, 5 }
 0x19b   :  { %v2894_v10 = vrot.slane %v2397_v47, 6  ;;  %v5947_v28 = vsel %vm4098_vm11, %v3784_v33, %v3063_v45  ;;  %v807_v57 = vmax.bf16 %v628_v17, %v5878_v58  ;;  %v1920_v27 = vmax.bf16 %v5764_v21, %v5689_v23 }
 0x19c   :  { %7055 = vst [vmem:[#allocation88_spill] sm:$0xff] %v5947_v28  ;;  %v5950_v36 = vmax.bf16 %v2015_v38, %v5933_v3  ;;  %v2400_v50 = vsel %vm3918_vm4, %v2395_v62, %v2399_v53  ;;  %v630_v55 = vshrl.u32 %v5939_v22, 16  ;;  %v633_v42 = vshll.u32 %v5939_v22, 16  ;;  %v5972_v62 = vld [vmem:[%s6809_s0 + $0xec] sm:$0xf] }
 0x19d   :  { %v2895_v48 = vor.u32 %v2894_v10, %v2893_v60  ;;  %v5960_v54 = vmax.bf16 %v2400_v50, %v5898_v11  ;;  %v1162_v33 = vmax.bf16 %v1025_v0, %v807_v57  ;;  %v1968_v4 = vmax.bf16 %v1920_v27, %v5834_v40 }
 0x19e   :  { %2113 = vst.msk [vmem:[%s6810_s1 + $0xa0] sm:$0xf] %vm2071_vm12, %v5950_v36  ;;  %v6923_v58 = vshrl.u32 %v5950_v36, 16  ;;  %v6922_v23 = vshll.u32 %v5950_v36, 16  ;;  %v3761_v12 = vrot.slane %v5950_v36, 9  ;;  %v632_v51 = vrot.slane %v630_v55, 4 }
 0x19f   :  { %v5976_v11 = vsel %vm4051_vm8, %v2890_v35, %v2895_v48  ;;  %v1581_v0 = vmax.bf16 %v1432_v34, %v1162_v33  ;;  %v2016_v47 = vmax.bf16 %v1968_v4, %v5918_v26  ;;  %v635_v32 = vrot.slane %v633_v42, 5 }
 0x1a0   :  { %v2404_v43 = vrot.slane %v6923_v58, 4  ;;  %v2407_v49 = vrot.slane %v6922_v23, 5  ;;  %v639_v35 = vshll.u32 %v5972_v62, 16  ;;  %v643_v56 = vshrl.u32 %v5972_v62, 16 }
 0x1a1   :  { %v5989_v45 = vmax.bf16 %v1735_v24, %v1581_v0  ;;  %v3706_v17 = vrot.slane %v5939_v22, 9  ;;  %v1028_v53 = vrot.slane %v5972_v62, 5  ;;  %v636_v60 = vor.u32 %v635_v32, %v632_v51 }
 0x1a2   :  { %v2408_v38 = vor.u32 %v2407_v49, %v2404_v43  ;;  %v641_v10 = vrot.slane %v639_v35, 5  ;;  %v1433_v57 = vrot.slane %v630_v55, 5  ;;  %v1434_v27 = vrot.slane %v633_v42, 6 }
 0x1a3   :  { %v5994_v34 = vmax.bf16 %v2016_v47, %v5989_v45  ;;  %v1029_v48 = vsel %vm3974_vm5, %v3706_v17, %v1028_v53  ;;  %v1437_v33 = vrot.slane %v643_v56, 5  ;;  %v637_v24 = vrot.slane %v636_v60, 4 }
 0x1a4   :  { %v5996_v50 = vrot.slane %v2408_v38, 4  ;;  %v1435_v4 = vor.u32 %v1434_v27, %v1433_v57  ;;  %v1438_v43 = vrot.slane %v639_v35, 6  ;;  %v3738_v49 = vrot.slane %v5939_v22, 10 }
 0x1a5   :  { %7056 = vst [vmem:[#allocation89_spill] sm:$0xff] %v5994_v34  ;;  %2114 = vst.msk [vmem:[%s6810_s1 + $0xa4] sm:$0x3] %vm2073_vm13, %v5994_v34  ;;  %v2411_v55 = vshll.u32 %v5994_v34, 16  ;;  %v2635_v42 = vrot.slane %v5994_v34, 5  ;;  %v2901_v51 = vshrl.u32 %v5994_v34, 16  ;;  %v642_v47 = vsel %vm3918_vm4, %v637_v24, %v641_v10 }
 0x1a6   :  { %v1436_v32 = vrot.slane %v1435_v4, 4  ;;  %v1439_v35 = vor.u32 %v1438_v43, %v1437_v33  ;;  %v1738_v38 = vrot.slane %v5972_v62, 6  ;;  %v808_v23 = vmax.bf16 %v642_v47, %v5939_v22 }
 0x1a7   :  { %v6013_v17 = vrot.slane %v2411_v55, 5  ;;  %v6017_v60 = vsel %vm3974_vm5, %v3761_v12, %v2635_v42  ;;  %v6019_v57 = vrot.slane %v2901_v51, 5  ;;  %v6021_v27 = vrot.slane %v2411_v55, 6  ;;  %v71_v12 = vld [vmem:[%s6809_s0 + $0xf0] sm:$0xf] }
 0x1a8   :  { %7058 = vst [vmem:[#allocation91_spill] sm:$0xff] %v6017_v60  ;;  %v1440_v0 = vsel %vm4051_vm8, %v1436_v32, %v1439_v35  ;;  %v1739_v33 = vsel %vm4098_vm11, %v3738_v49, %v1738_v38  ;;  %v1921_v24 = vmax.bf16 %v5814_v61, %v5733_v19  ;;  %v645_v43 = vrot.slane %v643_v56, 4  ;;  %v6042_v49 = vld [vmem:[%s6809_s0 + $0xf4] sm:$0xf] }
 0x1a9   :  { %7057 = vst [vmem:[#allocation90_spill] sm:$0xff] %v6013_v17  ;;  %7059 = vst [vmem:[#allocation92_spill] sm:$0xff] %v6019_v57  ;;  %v1030_v55 = vrot.slane %v1028_v53, 4  ;;  %v1163_v19 = vmax.bf16 %v1029_v48, %v808_v23  ;;  %v1441_v51 = vrot.slane %v1439_v35, 4  ;;  %v1740_v47 = vrot.slane %v1738_v38, 4 }
 0x1aa   :  { %7060 = vst [vmem:[#allocation93_spill] sm:$0xff] %v6021_v27  ;;  %v1969_v42 = vmax.bf16 %v1921_v24, %v5892_v20  ;;  %v646_v32 = vor.u32 %v645_v43, %v641_v10  ;;  %v1922_v58 = vmax.bf16 %v5834_v40, %v5764_v21  ;;  %v649_v4 = vshrl.u32 %v71_v12, 16 }
 0x1ab   :  { %v652_v9 = vshll.u32 %v71_v12, 16  ;;  %v1582_v34 = vmax.bf16 %v1440_v0, %v1163_v19  ;;  %v658_v53 = vshll.u32 %v6042_v49, 16  ;;  %v662_v22 = vshrl.u32 %v6042_v49, 16 }
 0x1ac   :  { %v2017_v56 = vmax.bf16 %v1969_v42, %v5933_v3  ;;  %v647_v57 = vrot.slane %v646_v32, 4  ;;  %v1970_v23 = vmax.bf16 %v1922_v58, %v5918_v26  ;;  %v651_v48 = vrot.slane %v649_v4, 4 }
 0x1ad   :  { %v654_v24 = vrot.slane %v652_v9, 5  ;;  %v6051_v35 = vmax.bf16 %v1739_v33, %v1582_v34  ;;  %v660_v10 = vrot.slane %v658_v53, 5  ;;  %v3707_v38 = vrot.slane %v71_v12, 9 }
 0x1ae   :  { %v1033_v21 = vrot.slane %v6042_v49, 5  ;;  %v809_v43 = vmax.bf16 %v647_v57, %v5972_v62  ;;  %v2018_v0 = vmax.bf16 %v1970_v23, %v5989_v45  ;;  %v1442_v42 = vrot.slane %v649_v4, 5 }
 0x1af   :  { %v655_v19 = vor.u32 %v654_v24, %v651_v48  ;;  %v6057_v27 = vmax.bf16 %v2017_v56, %v6051_v35  ;;  %v1443_v32 = vrot.slane %v652_v9, 6  ;;  %v1446_v60 = vrot.slane %v662_v22, 5 }
 0x1b0   :  { %v1034_v58 = vsel %vm3974_vm5, %v3707_v38, %v1033_v21  ;;  %v1164_v34 = vmax.bf16 %v1030_v55, %v809_v43  ;;  %v1447_v28 = vrot.slane %v658_v53, 6  ;;  %v3739_v17 = vrot.slane %v71_v12, 10 }
 0x1b1   :  { %v656_v33 = vrot.slane %v655_v19, 4  ;;  %2115 = vst.msk [vmem:[%s6810_s1 + $0xa8] sm:$0xf] %vm2071_vm12, %v6057_v27  ;;  %v1444_v62 = vor.u32 %v1443_v32, %v1442_v42  ;;  %v1743_v57 = vrot.slane %v6042_v49, 6  ;;  %v1923_v4 = vmax.bf16 %v5892_v20, %v5814_v61  ;;  %v73_v19 = vld [vmem:[%s6809_s0 + $0xf8] sm:$0xf] }
 0x1b2   :  { %v664_v56 = vrot.slane %v662_v22, 4  ;;  %v1583_v23 = vmax.bf16 %v1441_v51, %v1164_v34  ;;  %v1448_v55 = vor.u32 %v1447_v28, %v1446_v60  ;;  %v1035_v53 = vrot.slane %v1033_v21, 4  ;;  %v6082_v28 = vld [vmem:[%s6809_s0 + $0xfc] sm:$0xf] }
 0x1b3   :  { %v661_v9 = vsel %vm3918_vm4, %v656_v33, %v660_v10  ;;  %v1445_v24 = vrot.slane %v1444_v62, 4  ;;  %v1744_v38 = vsel %vm4098_vm11, %v3739_v17, %v1743_v57  ;;  %v1971_v43 = vmax.bf16 %v1923_v4, %v5933_v3 }
 0x1b4   :  { %v810_v48 = vmax.bf16 %v661_v9, %v71_v12  ;;  %v6077_v42 = vmax.bf16 %v1740_v47, %v1583_v23  ;;  %v665_v61 = vor.u32 %v664_v56, %v660_v10  ;;  %v1450_v22 = vrot.slane %v1448_v55, 4 }
 0x1b5   :  { %v1745_v51 = vrot.slane %v1743_v57, 4  ;;  %v1449_v17 = vsel %vm4051_vm8, %v1445_v24, %v1448_v55  ;;  %v2019_v12 = vmax.bf16 %v1971_v43, %v6051_v35  ;;  %v1924_v21 = vmax.bf16 %v5918_v26, %v5834_v40 }
 0x1b6   :  { %v1165_v60 = vmax.bf16 %v1034_v58, %v810_v48  ;;  %v6090_v47 = vmax.bf16 %v2018_v0, %v6077_v42  ;;  %v666_v10 = vrot.slane %v665_v61, 4  ;;  %v668_v32 = vshrl.u32 %v73_v19, 16 }
 0x1b7   :  { %v671_v34 = vshll.u32 %v73_v19, 16  ;;  %v1972_v62 = vmax.bf16 %v1924_v21, %v5989_v45  ;;  %v677_v57 = vshll.u32 %v6082_v28, 16  ;;  %v681_v58 = vshrl.u32 %v6082_v28, 16 }
 0x1b8   :  { %v1584_v33 = vmax.bf16 %v1449_v17, %v1165_v60  ;;  %2116 = vst.msk [vmem:[%s6810_s1 + $0xac] sm:$0x3] %vm2073_vm13, %v6090_v47  ;;  %v2425_v40 = vshll.u32 %v6090_v47, 16  ;;  %v2911_v4 = vshrl.u32 %v6090_v47, 16  ;;  %v811_v9 = vmax.bf16 %v666_v10, %v6042_v49 }
 0x1b9   :  { %v2020_v55 = vmax.bf16 %v1972_v62, %v6077_v42  ;;  %v670_v48 = vrot.slane %v668_v32, 4  ;;  %v673_v60 = vrot.slane %v671_v34, 5  ;;  %v679_v0 = vrot.slane %v677_v57, 5 }
 0x1ba   :  { %v6104_v23 = vmax.bf16 %v1744_v38, %v1584_v33  ;;  %v6108_v24 = vrot.slane %v2425_v40, 5  ;;  %v6110_v43 = vrot.slane %v2911_v4, 5  ;;  %v6112_v61 = vrot.slane %v2425_v40, 6 }
 0x1bb   :  { %v1166_v21 = vmax.bf16 %v1035_v53, %v811_v9  ;;  %v3708_v56 = vrot.slane %v73_v19, 9  ;;  %v674_v49 = vor.u32 %v673_v60, %v670_v48  ;;  %v1038_v10 = vrot.slane %v6082_v28, 5 }
 0x1bc   :  { %7061 = vst [vmem:[#allocation94_spill] sm:$0xff] %v6108_v24  ;;  %7062 = vst [vmem:[#allocation95_spill] sm:$0xff] %v6110_v43  ;;  %v6115_v17 = vmax.bf16 %v2019_v12, %v6104_v23  ;;  %v1451_v33 = vrot.slane %v668_v32, 5  ;;  %v1452_v40 = vrot.slane %v671_v34, 6  ;;  %v1455_v12 = vrot.slane %v681_v58, 5 }
 0x1bd   :  { %7063 = vst [vmem:[#allocation96_spill] sm:$0xff] %v6112_v61  ;;  %v1585_v62 = vmax.bf16 %v1450_v22, %v1166_v21  ;;  %v1456_v4 = vrot.slane %v677_v57, 6  ;;  %v675_v53 = vrot.slane %v674_v49, 4  ;;  %v1039_v9 = vsel %vm3974_vm5, %v3708_v56, %v1038_v10 }
 0x1be   :  { %2117 = vst.msk [vmem:[%s6810_s1 + $0xb0] sm:$0xf] %vm2071_vm12, %v6115_v17  ;;  %v3740_v24 = vrot.slane %v73_v19, 10  ;;  %v1748_v48 = vrot.slane %v6082_v28, 6  ;;  %v1453_v32 = vor.u32 %v1452_v40, %v1451_v33  ;;  %v1925_v43 = vmax.bf16 %v5933_v3, %v5892_v20 }
 0x1bf   :  { %v6128_v60 = vmax.bf16 %v1745_v51, %v1585_v62  ;;  %v1457_v38 = vor.u32 %v1456_v4, %v1455_v12  ;;  %v680_v22 = vsel %vm3918_vm4, %v675_v53, %v679_v0  ;;  %v683_v57 = vrot.slane %v681_v58, 4 }
 0x1c0   :  { %v1749_v34 = vsel %vm4098_vm11, %v3740_v24, %v1748_v48  ;;  %v1040_v21 = vrot.slane %v1038_v10, 4  ;;  %v812_v49 = vmax.bf16 %v680_v22, %v73_v19  ;;  %v1454_v61 = vrot.slane %v1453_v32, 4 }
 0x1c1   :  { %v6137_v56 = vmax.bf16 %v2020_v55, %v6128_v60  ;;  %v1973_v51 = vmax.bf16 %v1925_v43, %v6051_v35  ;;  %v684_v33 = vor.u32 %v683_v57, %v679_v0  ;;  %v1459_v62 = vrot.slane %v1457_v38, 4 }
 0x1c2   :  { %v1750_v40 = vrot.slane %v1748_v48, 4  ;;  %v1926_v20 = vmax.bf16 %v5989_v45, %v5918_v26  ;;  %v1167_v0 = vmax.bf16 %v1039_v9, %v812_v49  ;;  %v1458_v55 = vsel %vm4051_vm8, %v1454_v61, %v1457_v38 }
 0x1c3   :  { %2118 = vst.msk [vmem:[%s6810_s1 + $0xb4] sm:$0x3] %vm2073_vm13, %v6137_v56  ;;  %v2439_v3 = vshll.u32 %v6137_v56, 16  ;;  %v2921_v19 = vshrl.u32 %v6137_v56, 16  ;;  %v2021_v26 = vmax.bf16 %v1973_v51, %v6104_v23  ;;  %v685_v45 = vrot.slane %v684_v33, 4 }
 0x1c4   :  { %v1974_v12 = vmax.bf16 %v1926_v20, %v6077_v42  ;;  %v1586_v4 = vmax.bf16 %v1458_v55, %v1167_v0  ;;  %v7064_v61 = vsel %vm3918_vm4, %v4218_v5, %v4255_v30  ;;  %v7065_v23 = vsel %vm3918_vm4, %v4347_v63, %v4330_v46 }
 0x1c5   :  { %v6154_v24 = vrot.slane %v2439_v3, 5  ;;  %v6156_v43 = vrot.slane %v2921_v19, 5  ;;  %v6158_v10 = vrot.slane %v2439_v3, 6  ;;  %v813_v53 = vmax.bf16 %v685_v45, %v6082_v28 }
 0x1c6   :  { %v2481_v38 = vmax.bf16 %v7064_v61, %v4168_v44  ;;  %v2482_v9 = vmax.bf16 %v7065_v23, %v4290_v18  ;;  %v2022_v48 = vmax.bf16 %v1974_v12, %v6128_v60  ;;  %v7066_v42 = vsel %vm3918_vm4, %v4399_v31, %v4431_v41  ;;  %v7076_v23 = vld [vmem:[#allocation4_spill] sm:$0xff] }
 0x1c7   :  { %v2483_v28 = vmax.bf16 %v7066_v42, %v4371_v2  ;;  %v7067_v32 = vshrl.u32 %v4168_v44, 16  ;;  %v7068_v30 = vshll.u32 %v4168_v44, 16  ;;  %v1877_v57 = vmax.bf16 %v1749_v34, %v1586_v4 }
 0x1c8   :  { %v1168_v49 = vmax.bf16 %v1040_v21, %v813_v53  ;;  %v2673_v46 = vmax.bf16 %v4259_v8, %v2481_v38  ;;  %v2674_v63 = vmax.bf16 %v4334_v1, %v2482_v9  ;;  %v7069_v33 = vshrl.u32 %v4290_v18, 16  ;;  %v7077_v9 = vld [vmem:[#allocation3_spill] sm:$0xff] }
 0x1c9   :  { %v2697_v5 = vrot.slane %v7067_v32, 5  ;;  %v2698_v22 = vrot.slane %v7068_v30, 6  ;;  %v2675_v60 = vmax.bf16 %v4435_v37, %v2483_v28  ;;  %v7070_v31 = vshll.u32 %v4290_v18, 16 }
 0x1ca   :  { %v2707_v20 = vrot.slane %v7069_v33, 5  ;;  %v6192_v3 = vmax.bf16 %v2021_v26, %v1877_v57  ;;  %v1587_v19 = vmax.bf16 %v1459_v62, %v1168_v49  ;;  %v7071_v0 = vshrl.u32 %v4371_v2, 16  ;;  %v7079_v49 = vld [vmem:[#allocation2_spill] sm:$0xff] }
 0x1cb   :  { %v2699_v51 = vor.u32 %v2698_v22, %v2697_v5  ;;  %v2708_v41 = vrot.slane %v7070_v31, 6  ;;  %v7072_v21 = vshll.u32 %v4371_v2, 16  ;;  %v7073_v37 = vshrl.u32 %v4454_v15, 16  ;;  %v7084_v31 = vld [vmem:[#allocation5_spill] sm:$0xff] }
 0x1cc   :  { %v2717_v34 = vrot.slane %v7071_v0, 5  ;;  %v7074_v12 = vshll.u32 %v4454_v15, 16  ;;  %2119 = vst.msk [vmem:[%s6810_s1 + $0xb8] sm:$0xf] %vm2071_vm12, %v6192_v3  ;;  %v1878_v62 = vmax.bf16 %v1750_v40, %v1587_v19  ;;  %v7075_v53 = vmax.bf16 %v4568_v6, %v4587_v13 }
 0x1cd   :  { %v2718_v8 = vrot.slane %v7072_v21, 6  ;;  %v2700_v55 = vrot.slane %v2699_v51, 4  ;;  %v2709_v1 = vor.u32 %v2708_v41, %v2707_v20  ;;  %v2727_v45 = vrot.slane %v7073_v37, 5  ;;  %v7086_v21 = vld [vmem:[#allocation10_spill] sm:$0xff]  ;;  %v7090_v37 = vld [vmem:[#allocation13_spill] sm:$0xff] }
 0x1ce   :  { %v2728_v4 = vrot.slane %v7074_v12, 6  ;;  %v2965_v61 = vmax.bf16 %v4594_v52, %v7075_v53  ;;  %v3765_v38 = vrot.slane %v4168_v44, 10  ;;  %v7078_v42 = vor.u32 %v7076_v23, %v7077_v9  ;;  %v7081_v44 = vld [vmem:[#allocation6_spill] sm:$0xff]  ;;  %v7082_v52 = vld [vmem:[#allocation7_spill] sm:$0xff] }
 0x1cf   :  { %v2719_v26 = vor.u32 %v2718_v8, %v2717_v34  ;;  %v2710_v32 = vrot.slane %v2709_v1, 4  ;;  %v3766_v30 = vrot.slane %v4290_v18, 10  ;;  %v6218_v22 = vmax.bf16 %v2022_v48, %v1878_v62  ;;  %v7087_v8 = vld [vmem:[#allocation9_spill] sm:$0xff]  ;;  %v7089_v1 = vld [vmem:[#allocation14_spill] sm:$0xff]  ;;  %v7092_v62 = vld [vmem:[#allocation8_spill] sm:$0xff] }
 0x1d0   :  { %v2706_v28 = vsel %vm4051_vm8, %v2700_v55, %v7078_v42  ;;  %v2729_v5 = vor.u32 %v2728_v4, %v2727_v45  ;;  %v7080_v6 = vrot.slane %v7079_v49, 6  ;;  %v7083_v51 = vor.u32 %v7081_v44, %v7082_v52  ;;  %v7097_v44 = vld [vmem:[#allocation16_spill] sm:$0xff] }
 0x1d1   :  { %v2720_v40 = vrot.slane %v2719_v26, 4  ;;  %v2961_v57 = vmax.bf16 %v2706_v28, %v2673_v46  ;;  %v7085_v41 = vrot.slane %v7084_v31, 6  ;;  %v3767_v48 = vrot.slane %v4371_v2, 10  ;;  %2120 = vst.msk [vmem:[%s6810_s1 + $0xbc] sm:$0x3] %vm2073_vm13, %v6218_v22  ;;  %v7094_v28 = vld [vmem:[#allocation12_spill] sm:$0xff] }
 0x1d2   :  { %v2988_v13 = vsel %vm4098_vm11, %v3765_v38, %v7080_v6  ;;  %v2716_v33 = vsel %vm4051_vm8, %v2710_v32, %v7083_v51  ;;  %v2730_v20 = vrot.slane %v2729_v5, 4  ;;  %v2453_v46 = vshll.u32 %v6218_v22, 16  ;;  %v7095_v32 = vld [vmem:[#allocation15_spill] sm:$0xff]  ;;  %v7098_v51 = vld [vmem:[#allocation17_spill] sm:$0xff]  ;;  %v7101_v31 = vld [vmem:[#allocation20_spill] sm:$0xff] }
 0x1d3   :  { %v2992_v18 = vsel %vm4098_vm11, %v3766_v30, %v7085_v41  ;;  %v2931_v0 = vshrl.u32 %v6218_v22, 16  ;;  %v7088_v55 = vor.u32 %v7086_v21, %v7087_v8  ;;  %v7091_v45 = vor.u32 %v7089_v1, %v7090_v37  ;;  %v7106_v8 = vld [vmem:[#allocation11_spill] sm:$0xff]  ;;  %v7112_v37 = vld [vmem:[#allocation29_spill] sm:$0xff] }
 0x1d4   :  { %v2962_v4 = vmax.bf16 %v2716_v33, %v2674_v63  ;;  %v7093_v26 = vrot.slane %v7092_v62, 6  ;;  %v6257_v38 = vrot.slane %v2453_v46, 5  ;;  %v6261_v9 = vrot.slane %v2453_v46, 6  ;;  %v7099_v33 = vld [vmem:[#allocation19_spill] sm:$0xff] }
 0x1d5   :  { %v2726_v2 = vsel %vm4051_vm8, %v2720_v40, %v7088_v55  ;;  %v2736_v12 = vsel %vm4051_vm8, %v2730_v20, %v7091_v45  ;;  %v6259_v23 = vrot.slane %v2931_v0, 5  ;;  %v7096_v5 = vmax.bf16 %v7094_v28, %v7095_v32  ;;  %v7103_v46 = vld [vmem:[#allocation23_spill] sm:$0xff]  ;;  %v7113_v45 = vld [vmem:[#allocation30_spill] sm:$0xff] }
 0x1d6   :  { %v2996_v53 = vsel %vm4098_vm11, %v3767_v48, %v7093_v26  ;;  %v2963_v42 = vmax.bf16 %v2726_v2, %v2675_v60  ;;  %v3768_v40 = vrot.slane %v4454_v15, 10  ;;  %v3105_v49 = vmax.bf16 %v2988_v13, %v2961_v57  ;;  %v7102_v48 = vld [vmem:[#allocation21_spill] sm:$0xff]  ;;  %v7105_v60 = vld [vmem:[#allocation24_spill] sm:$0xff]  ;;  %v7117_v32 = vld [vmem:[#allocation22_spill] sm:$0xff] }
 0x1d7   :  { %v2964_v30 = vmax.bf16 %v2736_v12, %v7096_v5  ;;  %v3106_v63 = vmax.bf16 %v2992_v18, %v2962_v4  ;;  %v3109_v52 = vmax.bf16 %v7097_v44, %v2965_v61  ;;  %v7100_v20 = vmax.bf16 %v7098_v51, %v7099_v33  ;;  %v7108_v13 = vld [vmem:[#allocation25_spill] sm:$0xff]  ;;  %v7109_v18 = vld [vmem:[#allocation27_spill] sm:$0xff]  ;;  %v7111_v61 = vld [vmem:[#allocation28_spill] sm:$0xff] }
 0x1d8   :  { %v3107_v6 = vmax.bf16 %v2996_v53, %v2963_v42  ;;  %v7104_v0 = vmax.bf16 %v7102_v48, %v7103_v46  ;;  %v7107_v55 = vrot.slane %v7106_v8, 6  ;;  %v7110_v2 = vmax.bf16 %v7108_v13, %v7109_v18  ;;  %v7114_v12 = vld [vmem:[#allocation32_spill] sm:$0xff]  ;;  %v7116_v53 = vld [vmem:[#allocation18_spill] sm:$0xff]  ;;  %v7119_v51 = vld [vmem:[#allocation33_spill] sm:$0xff] }
 0x1d9   :  { %v2966_v41 = vmax.bf16 %v7101_v31, %v7100_v20  ;;  %v3129_v57 = vmax.bf16 %v3106_v63, %v3105_v49  ;;  %v7115_v4 = vsel %vm3918_vm4, %v7113_v45, %v7114_v12  ;;  %v7118_v49 = vld [vmem:[#allocation26_spill] sm:$0xff]  ;;  %v7120_v20 = vshrl.u32 %v7112_v37, 16  ;;  %v7122_v8 = vld [vmem:[#allocation36_spill] sm:$0xff] }
 0x1da   :  { %v2967_v21 = vmax.bf16 %v7105_v60, %v7104_v0  ;;  %v3000_v15 = vsel %vm4098_vm11, %v3768_v40, %v7107_v55  ;;  %v2968_v1 = vmax.bf16 %v7111_v61, %v7110_v2  ;;  %v2489_v62 = vmax.bf16 %v7115_v4, %v7112_v37  ;;  %v7123_v61 = vld [vmem:[#allocation31_spill] sm:$0xff] }
 0x1db   :  { %v3108_v26 = vmax.bf16 %v3000_v15, %v2964_v30  ;;  %v3110_v42 = vmax.bf16 %v7116_v53, %v2966_v41  ;;  %v3130_v28 = vmax.bf16 %v3107_v6, %v3106_v63  ;;  %v3145_v40 = vmax.bf16 %v3129_v57, %v3107_v6 }
 0x1dc   :  { %v6292_v5 = vmax.bf16 %v7117_v32, %v2967_v21  ;;  %v6295_v44 = vmax.bf16 %v7118_v49, %v2968_v1  ;;  %v2681_v33 = vmax.bf16 %v7119_v51, %v2489_v62  ;;  %v2777_v31 = vrot.slane %v7120_v20, 5  ;;  %v7125_v51 = vld [vmem:[#allocation35_spill] sm:$0xff]  ;;  %v7126_v20 = vld [vmem:[#allocation34_spill] sm:$0xff] }
 0x1dd   :  { %v3146_v48 = vmax.bf16 %v3130_v28, %v3108_v26  ;;  %v3131_v46 = vmax.bf16 %v3108_v26, %v3107_v6  ;;  %v3132_v0 = vmax.bf16 %v3109_v52, %v3108_v26  ;;  %v7121_v30 = vshll.u32 %v7112_v37, 16 }
 0x1de   :  { %v3161_v41 = vmax.bf16 %v3145_v40, %v3108_v26  ;;  %v3773_v63 = vrot.slane %v7112_v37, 10  ;;  %v3133_v21 = vmax.bf16 %v3110_v42, %v3109_v52  ;;  %v2248_v55 = vshrl.u32 %v7122_v8, 16 }
 0x1df   :  { %v2778_v60 = vrot.slane %v7121_v30, 6  ;;  %v3162_v15 = vmax.bf16 %v3146_v48, %v3109_v52  ;;  %v3147_v57 = vmax.bf16 %v3131_v46, %v3109_v52  ;;  %v3148_v13 = vmax.bf16 %v3132_v0, %v3110_v42 }
 0x1e0   :  { %v6304_v2 = vmax.bf16 %v3161_v41, %v3109_v52  ;;  %v7124_v1 = vrot.slane %v7123_v61, 6  ;;  %v3149_v45 = vmax.bf16 %v3133_v21, %v6292_v5  ;;  %v2250_v12 = vrot.slane %v2248_v55, 4 }
 0x1e1   :  { %v2779_v18 = vor.u32 %v2778_v60, %v2777_v31  ;;  %v6311_v4 = vmax.bf16 %v3162_v15, %v3110_v42  ;;  %v3163_v37 = vmax.bf16 %v3147_v57, %v3110_v42  ;;  %v3164_v62 = vmax.bf16 %v3148_v13, %v6292_v5  ;;  %v7128_v60 = vld [vmem:[#allocation37_spill] sm:$0xff] }
 0x1e2   :  { %v3020_v6 = vsel %vm4098_vm11, %v3773_v63, %v7124_v1  ;;  %3193 = vst.msk [vmem:[%s6811_s2] sm:$0xf] %vm2071_vm12, %v6304_v2  ;;  %v3165_v52 = vmax.bf16 %v3149_v45, %v6295_v44  ;;  %v2251_v53 = vshll.u32 %v7122_v8, 16  ;;  %v3750_v28 = vrot.slane %v7122_v8, 9  ;;  %v7131_v57 = vld [vmem:[#allocation41_spill] sm:$0xff] }
 0x1e3   :  { %v2780_v26 = vrot.slane %v2779_v18, 4  ;;  %v2787_v32 = vrot.slane %v2248_v55, 5  ;;  %3194 = vst.msk [vmem:[%s6811_s2 + $0x4] sm:$0xf] %vm2071_vm12, %v6311_v4  ;;  %v6328_v40 = vmax.bf16 %v3163_v37, %v6292_v5  ;;  %v6331_v49 = vmax.bf16 %v3164_v62, %v6295_v44 }
 0x1e4   :  { %v7127_v31 = vor.u32 %v7125_v51, %v7126_v20  ;;  %v3774_v46 = vrot.slane %v7122_v8, 10  ;;  %v2253_v30 = vrot.slane %v2251_v53, 5  ;;  %v7129_v41 = vrot.slane %v7128_v60, 5 }
 0x1e5   :  { %v2788_v21 = vrot.slane %v2251_v53, 6  ;;  %3195 = vst.msk [vmem:[%s6811_s2 + $0x8] sm:$0xf] %vm2071_vm12, %v6328_v40  ;;  %3196 = vst.msk [vmem:[%s6811_s2 + $0xc] sm:$0xf] %vm2071_vm12, %v6331_v49  ;;  %v3134_v15 = vmax.bf16 %v6292_v5, %v3110_v42  ;;  %v2262_v13 = vshrl.u32 %v7131_v57, 16 }
 0x1e6   :  { %v2786_v48 = vsel %vm4051_vm8, %v2780_v26, %v7127_v31  ;;  %v2592_v63 = vsel %vm3974_vm5, %v3750_v28, %v7129_v41  ;;  %v2265_v18 = vshll.u32 %v7131_v57, 16  ;;  %v2254_v1 = vor.u32 %v2253_v30, %v2250_v12 }
 0x1e7   :  { %v2969_v0 = vmax.bf16 %v2786_v48, %v2681_v33  ;;  %v7130_v33 = vrot.slane %v7128_v60, 6  ;;  %v2789_v45 = vor.u32 %v2788_v21, %v2787_v32  ;;  %v3751_v37 = vrot.slane %v7131_v57, 9  ;;  %v7132_v48 = vld [vmem:[#allocation42_spill] sm:$0xff]  ;;  %v7134_v32 = vld [vmem:[#allocation44_spill] sm:$0xff] }
 0x1e8   :  { %v3150_v62 = vmax.bf16 %v3134_v15, %v6295_v44  ;;  %v2264_v26 = vrot.slane %v2262_v13, 4  ;;  %v2267_v53 = vrot.slane %v2265_v18, 5  ;;  %v2797_v28 = vrot.slane %v2262_v13, 5  ;;  %v7137_v21 = vld [vmem:[#allocation40_spill] sm:$0xff] }
 0x1e9   :  { %v3024_v55 = vsel %vm4098_vm11, %v3774_v46, %v7130_v33  ;;  %v3113_v61 = vmax.bf16 %v3020_v6, %v2969_v0  ;;  %v2255_v20 = vrot.slane %v2254_v1, 4  ;;  %v2790_v31 = vrot.slane %v2789_v45, 4  ;;  %v7135_v0 = vld [vmem:[#allocation45_spill] sm:$0xff]  ;;  %v7138_v33 = vld [vmem:[#allocation39_spill] sm:$0xff] }
 0x1ea   :  { %v7133_v42 = vrot.slane %v7132_v48, 5  ;;  %v2268_v6 = vor.u32 %v2267_v53, %v2264_v26  ;;  %v2798_v12 = vrot.slane %v2265_v18, 6  ;;  %v2805_v30 = vor.u32 %v7135_v0, %v7134_v32  ;;  %v7140_v26 = vld [vmem:[#allocation46_spill] sm:$0xff] }
 0x1eb   :  { %v6362_v51 = vmax.bf16 %v3165_v52, %v3113_v61  ;;  %v3166_v60 = vmax.bf16 %v3150_v62, %v3113_v61  ;;  %v7136_v52 = vld [vmem:[#allocation38_spill] sm:$0xff]  ;;  %v7139_v15 = vor.u32 %v7137_v21, %v7138_v33  ;;  %v3775_v18 = vrot.slane %v7131_v57, 10  ;;  %v7142_v21 = vld [vmem:[#allocation43_spill] sm:$0xff] }
 0x1ec   :  { %v2596_v46 = vsel %vm3974_vm5, %v3751_v37, %v7133_v42  ;;  %v2260_v41 = vsel %vm3918_vm4, %v2255_v20, %v7136_v52  ;;  %v3135_v1 = vmax.bf16 %v6295_v44, %v6292_v5  ;;  %v2269_v37 = vrot.slane %v2268_v6, 4 }
 0x1ed   :  { %3197 = vst.msk [vmem:[%s6811_s2 + $0x10] sm:$0xf] %vm2071_vm12, %v6362_v51  ;;  %v2796_v13 = vsel %vm4051_vm8, %v2790_v31, %v7139_v15  ;;  %v2490_v45 = vmax.bf16 %v2260_v41, %v7122_v8  ;;  %v2799_v62 = vor.u32 %v2798_v12, %v2797_v28  ;;  %v2276_v53 = vshrl.u32 %v7140_v26, 16  ;;  %v7143_v41 = vld [vmem:[#allocation47_spill] sm:$0xff] }
 0x1ee   :  { %v7141_v42 = vrot.slane %v7132_v48, 6  ;;  %v3151_v32 = vmax.bf16 %v3135_v1, %v3113_v61  ;;  %v2279_v0 = vshll.u32 %v7140_v26, 16  ;;  %v3752_v31 = vrot.slane %v7140_v26, 9 }
 0x1ef   :  { %v2682_v52 = vmax.bf16 %v2592_v63, %v2490_v45  ;;  %v2274_v5 = vsel %vm3918_vm4, %v2269_v37, %v7142_v21  ;;  %v2800_v8 = vrot.slane %v2799_v62, 4  ;;  %v2278_v6 = vrot.slane %v2276_v53, 4  ;;  %v7145_v45 = vld [vmem:[#allocation49_spill] sm:$0xff] }
 0x1f0   :  { %v3028_v20 = vsel %vm4098_vm11, %v3775_v18, %v7141_v42  ;;  %v2491_v28 = vmax.bf16 %v2274_v5, %v7131_v57  ;;  %v2281_v12 = vrot.slane %v2279_v0, 5  ;;  %v7144_v48 = vrot.slane %v7143_v41, 5  ;;  %v7146_v42 = vld [vmem:[#allocation50_spill] sm:$0xff] }
 0x1f1   :  { %v2807_v15 = vrot.slane %v2276_v53, 5  ;;  %v2970_v18 = vmax.bf16 %v2796_v13, %v2682_v52  ;;  %v2806_v1 = vsel %vm4051_vm8, %v2800_v8, %v2805_v30  ;;  %v2808_v63 = vrot.slane %v2279_v0, 6  ;;  %v7147_v13 = vld [vmem:[#allocation52_spill] sm:$0xff]  ;;  %v7150_v0 = vld [vmem:[#allocation62_spill] sm:$0xff] }
 0x1f2   :  { %v2600_v33 = vsel %vm3974_vm5, %v3752_v31, %v7144_v48  ;;  %v2815_v34 = vor.u32 %v7146_v42, %v7145_v45  ;;  %v2683_v37 = vmax.bf16 %v2596_v46, %v2491_v28  ;;  %v2282_v62 = vor.u32 %v2281_v12, %v2278_v6  ;;  %v7149_v30 = vld [vmem:[#allocation56_spill] sm:$0xff]  ;;  %v7151_v52 = vld [vmem:[#allocation58_spill] sm:$0xff]  ;;  %v7155_v12 = vld [vmem:[#allocation65_spill] sm:$0xff] }
 0x1f3   :  { %v3776_v21 = vrot.slane %v7140_v26, 10  ;;  %v3136_v57 = vmax.bf16 %v3113_v61, %v6295_v44  ;;  %v3114_v5 = vmax.bf16 %v3024_v55, %v2970_v18  ;;  %v2809_v19 = vor.u32 %v2808_v63, %v2807_v15  ;;  %v7154_v61 = vld [vmem:[#allocation63_spill] sm:$0xff] }
 0x1f4   :  { %v7148_v53 = vsel %vm3918_vm4, %v5373_v14, %v7147_v13  ;;  %v7152_v46 = vsel %vm3918_vm4, %v7150_v0, %v7151_v52  ;;  %v2971_v6 = vmax.bf16 %v2806_v1, %v2683_v37  ;;  %v2283_v28 = vrot.slane %v2282_v62, 4  ;;  %v7156_v14 = vld [vmem:[#allocation66_spill] sm:$0xff]  ;;  %v7158_v1 = vld [vmem:[#allocation48_spill] sm:$0xff]  ;;  %v7159_v37 = vld [vmem:[#allocation53_spill] sm:$0xff] }
 0x1f5   :  { %v2493_v31 = vmax.bf16 %v7148_v53, %v5329_v16  ;;  %v2494_v8 = vmax.bf16 %v7152_v46, %v7149_v30  ;;  %v7153_v44 = vrot.slane %v7143_v41, 6  ;;  %v7157_v48 = vsel %vm3918_vm4, %v7155_v12, %v7156_v14 }
 0x1f6   :  { %v2495_v15 = vmax.bf16 %v7157_v48, %v7154_v61  ;;  %v6430_v18 = vmax.bf16 %v3166_v60, %v3114_v5  ;;  %v3167_v63 = vmax.bf16 %v3151_v32, %v3114_v5  ;;  %v2810_v45 = vrot.slane %v2809_v19, 4 }
 0x1f7   :  { %v3032_v55 = vsel %vm4098_vm11, %v3776_v21, %v7153_v44  ;;  %v3152_v42 = vmax.bf16 %v3136_v57, %v3114_v5  ;;  %v3115_v13 = vmax.bf16 %v3028_v20, %v2971_v6  ;;  %v2288_v41 = vsel %vm3918_vm4, %v2283_v28, %v7158_v1  ;;  %v7160_v21 = vld [vmem:[#allocation59_spill] sm:$0xff]  ;;  %v7171_v1 = vld [vmem:[#allocation76_spill] sm:$0xff] }
 0x1f8   :  { %v2685_v62 = vmax.bf16 %v7159_v37, %v2493_v31  ;;  %v2686_v53 = vmax.bf16 %v7160_v21, %v2494_v8  ;;  %3198 = vst.msk [vmem:[%s6811_s2 + $0x14] sm:$0xf] %vm2071_vm12, %v6430_v18  ;;  %v2492_v60 = vmax.bf16 %v2288_v41, %v7140_v26  ;;  %v2816_v19 = vsel %vm4051_vm8, %v2810_v45, %v2815_v34  ;;  %v7161_v20 = vld [vmem:[#allocation67_spill] sm:$0xff]  ;;  %v7172_v41 = vld [vmem:[#allocation78_spill] sm:$0xff] }
 0x1f9   :  { %v2687_v32 = vmax.bf16 %v7161_v20, %v2495_v15  ;;  %v7162_v57 = vshrl.u32 %v5329_v16, 16  ;;  %v6448_v0 = vmax.bf16 %v3167_v63, %v3115_v13  ;;  %v3168_v31 = vmax.bf16 %v3152_v42, %v3115_v13  ;;  %v7168_v63 = vld [vmem:[#allocation70_spill] sm:$0xff]  ;;  %v7174_v21 = vld [vmem:[#allocation79_spill] sm:$0xff] }
 0x1fa   :  { %v7163_v52 = vshll.u32 %v5329_v16, 16  ;;  %v7164_v8 = vshrl.u32 %v7149_v30, 16  ;;  %v2684_v28 = vmax.bf16 %v2600_v33, %v2492_v60  ;;  %v7165_v26 = vshll.u32 %v7149_v30, 16 }
 0x1fb   :  { %v2817_v5 = vrot.slane %v7162_v57, 5  ;;  %v7166_v34 = vshrl.u32 %v7154_v61, 16  ;;  %v7167_v14 = vshll.u32 %v7154_v61, 16  ;;  %3199 = vst.msk [vmem:[%s6811_s2 + $0x18] sm:$0xf] %vm2071_vm12, %v6448_v0  ;;  %v7169_v45 = vshrl.u32 %v7168_v63, 16 }
 0x1fc   :  { %v2818_v46 = vrot.slane %v7163_v52, 6  ;;  %v2827_v6 = vrot.slane %v7164_v8, 5  ;;  %v2828_v44 = vrot.slane %v7165_v26, 6  ;;  %v7170_v33 = vshll.u32 %v7168_v63, 16 }
 0x1fd   :  { %v2837_v12 = vrot.slane %v7166_v34, 5  ;;  %v2838_v48 = vrot.slane %v7167_v14, 6  ;;  %v2847_v42 = vrot.slane %v7169_v45, 5  ;;  %v7173_v37 = vmax.bf16 %v7171_v1, %v7172_v41  ;;  %v7177_v41 = vld [vmem:[#allocation55_spill] sm:$0xff] }
 0x1fe   :  { %v2819_v15 = vor.u32 %v2818_v46, %v2817_v5  ;;  %v2848_v13 = vrot.slane %v7170_v33, 6  ;;  %v2972_v20 = vmax.bf16 %v2816_v19, %v2684_v28  ;;  %v2829_v57 = vor.u32 %v2828_v44, %v2827_v6  ;;  %v7175_v33 = vld [vmem:[#allocation51_spill] sm:$0xff]  ;;  %v7178_v19 = vld [vmem:[#allocation54_spill] sm:$0xff]  ;;  %v7180_v44 = vld [vmem:[#allocation57_spill] sm:$0xff] }
 0x1ff   :  { %v2977_v60 = vmax.bf16 %v7174_v21, %v7173_v37  ;;  %v2839_v52 = vor.u32 %v2838_v48, %v2837_v12  ;;  %v3777_v8 = vrot.slane %v5329_v16, 10  ;;  %v3778_v5 = vrot.slane %v7149_v30, 10  ;;  %v7187_v21 = vld [vmem:[#allocation69_spill] sm:$0xff] }
 0x200   :  { %v2820_v26 = vrot.slane %v2819_v15, 4  ;;  %v2849_v34 = vor.u32 %v2848_v13, %v2847_v42  ;;  %v3779_v46 = vrot.slane %v7154_v61, 10  ;;  %v3116_v14 = vmax.bf16 %v3032_v55, %v2972_v20  ;;  %v7182_v55 = vld [vmem:[#allocation64_spill] sm:$0xff]  ;;  %v7185_v42 = vld [vmem:[#allocation61_spill] sm:$0xff] }
 0x201   :  { %v2830_v45 = vrot.slane %v2829_v57, 4  ;;  %v2840_v35 = vrot.slane %v2839_v52, 4  ;;  %v7176_v58 = vrot.slane %v7175_v33, 6  ;;  %v7179_v6 = vor.u32 %v7177_v41, %v7178_v19  ;;  %v7188_v20 = vld [vmem:[#allocation68_spill] sm:$0xff]  ;;  %v7194_v41 = vld [vmem:[#allocation75_spill] sm:$0xff] }
 0x202   :  { %v2850_v28 = vrot.slane %v2849_v34, 4  ;;  %v7181_v12 = vrot.slane %v7180_v44, 6  ;;  %v7183_v61 = vrot.slane %v7182_v55, 6  ;;  %v6493_v15 = vmax.bf16 %v3168_v31, %v3116_v14  ;;  %v7191_v34 = vld [vmem:[#allocation73_spill] sm:$0xff]  ;;  %v7197_v44 = vld [vmem:[#allocation80_spill] sm:$0xff]  ;;  %v7201_v55 = vld [vmem:[#allocation71_spill] sm:$0xff] }
 0x203   :  { %v3036_v1 = vsel %vm4098_vm11, %v3777_v8, %v7176_v58  ;;  %v2826_v16 = vsel %vm4051_vm8, %v2820_v26, %v7179_v6  ;;  %v7184_v58 = vld [vmem:[#allocation60_spill] sm:$0xff]  ;;  %v7189_v57 = vor.u32 %v7187_v21, %v7188_v20  ;;  %v7190_v26 = vld [vmem:[#allocation74_spill] sm:$0xff]  ;;  %v3780_v33 = vrot.slane %v7168_v63, 10  ;;  %v7196_v6 = vld [vmem:[#allocation77_spill] sm:$0xff] }
 0x204   :  { %v3040_v30 = vsel %vm4098_vm11, %v3778_v5, %v7181_v12  ;;  %v3044_v48 = vsel %vm4098_vm11, %v3779_v46, %v7183_v61  ;;  %v7186_v13 = vor.u32 %v7184_v58, %v7185_v42  ;;  %v2973_v8 = vmax.bf16 %v2826_v16, %v2685_v62  ;;  %3200 = vst.msk [vmem:[%s6811_s2 + $0x1c] sm:$0xf] %vm2071_vm12, %v6493_v15  ;;  %v7198_v12 = vld [vmem:[#allocation82_spill] sm:$0xff]  ;;  %v7206_v20 = vld [vmem:[#allocation87_spill] sm:$0xff] }
 0x205   :  { %v2846_v52 = vsel %vm4051_vm8, %v2840_v35, %v7189_v57  ;;  %v7192_v5 = vor.u32 %v7190_v26, %v7191_v34  ;;  %v3121_v16 = vmax.bf16 %v7196_v6, %v2977_v60  ;;  %v7202_v63 = vrot.slane %v7201_v55, 6  ;;  %v7209_v34 = vld [vmem:[#allocation90_spill] sm:$0xff] }
 0x206   :  { %v2836_v37 = vsel %vm4051_vm8, %v2830_v45, %v7186_v13  ;;  %v2975_v14 = vmax.bf16 %v2846_v52, %v2687_v32  ;;  %v7193_v45 = vld [vmem:[#allocation72_spill] sm:$0xff]  ;;  %v3117_v19 = vmax.bf16 %v3036_v1, %v2973_v8  ;;  %v7207_v52 = vld [vmem:[#allocation81_spill] sm:$0xff]  ;;  %v7208_v8 = vmax.bf16 %v5943_v25, %v5960_v54 }
 0x207   :  { %v2856_v31 = vsel %vm4051_vm8, %v2850_v28, %v7192_v5  ;;  %v2974_v46 = vmax.bf16 %v2836_v37, %v2686_v53  ;;  %v7195_v35 = vmax.bf16 %v7193_v45, %v7194_v41  ;;  %v7199_v28 = vmax.bf16 %v7197_v44, %v7198_v12  ;;  %v7200_v53 = vld [vmem:[#allocation83_spill] sm:$0xff]  ;;  %v7203_v13 = vld [vmem:[#allocation84_spill] sm:$0xff]  ;;  %v7204_v37 = vld [vmem:[#allocation86_spill] sm:$0xff] }
 0x208   :  { %v3048_v61 = vsel %vm4098_vm11, %v3780_v33, %v7202_v63  ;;  %v3119_v42 = vmax.bf16 %v3044_v48, %v2975_v14  ;;  %v7205_v21 = vmax.bf16 %v7203_v13, %v7204_v37  ;;  %v2980_v26 = vmax.bf16 %v5976_v11, %v7208_v8  ;;  %v7214_v11 = vld [vmem:[#allocation91_spill] sm:$0xff]  ;;  %v7216_v13 = vld [vmem:[#allocation89_spill] sm:$0xff] }
 0x209   :  { %v2976_v62 = vmax.bf16 %v2856_v31, %v7195_v35  ;;  %v2978_v32 = vmax.bf16 %v7200_v53, %v7199_v28  ;;  %v3118_v58 = vmax.bf16 %v3040_v30, %v2974_v46  ;;  %v7210_v30 = vsel %vm3918_vm4, %v5996_v50, %v7209_v34  ;;  %v7211_v46 = vld [vmem:[#allocation85_spill] sm:$0xff]  ;;  %v7213_v35 = vld [vmem:[#allocation88_spill] sm:$0xff] }
 0x20a   :  { %v2979_v57 = vmax.bf16 %v7206_v20, %v7205_v21  ;;  %v2501_v48 = vmax.bf16 %v7210_v30, %v5950_v36  ;;  %v7212_v33 = vshrl.u32 %v5950_v36, 16  ;;  %v6549_v25 = vmax.bf16 %v7213_v35, %v2980_v26 }
 0x20b   :  { %v3120_v1 = vmax.bf16 %v3048_v61, %v2976_v62  ;;  %v3122_v60 = vmax.bf16 %v7207_v52, %v2978_v32  ;;  %v3137_v5 = vmax.bf16 %v3118_v58, %v3117_v19  ;;  %v3138_v31 = vmax.bf16 %v3119_v42, %v3118_v58 }
 0x20c   :  { %v6544_v14 = vmax.bf16 %v7211_v46, %v2979_v57  ;;  %v2897_v45 = vrot.slane %v7212_v33, 5  ;;  %v2693_v62 = vmax.bf16 %v7214_v11, %v2501_v48  ;;  %v7215_v50 = vshll.u32 %v5950_v36, 16 }
 0x20d   :  { %v3139_v41 = vmax.bf16 %v3120_v1, %v3119_v42  ;;  %v3140_v54 = vmax.bf16 %v3121_v16, %v3120_v1  ;;  %v3153_v6 = vmax.bf16 %v3137_v5, %v3119_v42  ;;  %v3154_v44 = vmax.bf16 %v3138_v31, %v3120_v1  ;;  %v7219_v31 = vld [vmem:[#allocation92_spill] sm:$0xff] }
 0x20e   :  { %v2898_v12 = vrot.slane %v7215_v50, 6  ;;  %v3785_v19 = vrot.slane %v5950_v36, 10  ;;  %v3141_v32 = vmax.bf16 %v3122_v60, %v3121_v16  ;;  %v2416_v55 = vshrl.u32 %v6057_v27, 16 }
 0x20f   :  { %v3155_v28 = vmax.bf16 %v3139_v41, %v3121_v16  ;;  %v3156_v53 = vmax.bf16 %v3140_v54, %v3122_v60  ;;  %v3169_v63 = vmax.bf16 %v3153_v6, %v3120_v1  ;;  %v3170_v61 = vmax.bf16 %v3154_v44, %v3121_v16 }
 0x210   :  { %v2899_v58 = vor.u32 %v2898_v12, %v2897_v45  ;;  %v7217_v37 = vrot.slane %v7216_v13, 6  ;;  %v3157_v57 = vmax.bf16 %v3141_v32, %v6544_v14  ;;  %v2418_v52 = vrot.slane %v2416_v55, 4 }
 0x211   :  { %v3171_v42 = vmax.bf16 %v3155_v28, %v3122_v60  ;;  %v3172_v20 = vmax.bf16 %v3156_v53, %v6544_v14  ;;  %v6562_v36 = vmax.bf16 %v3169_v63, %v3121_v16  ;;  %v6564_v8 = vmax.bf16 %v3170_v61, %v3122_v60  ;;  %v7218_v16 = vld [vmem:[#allocation93_spill] sm:$0xff] }
 0x212   :  { %v3068_v21 = vsel %vm4098_vm11, %v3785_v19, %v7217_v37  ;;  %v2900_v26 = vrot.slane %v2899_v58, 4  ;;  %v2419_v1 = vshll.u32 %v6057_v27, 16  ;;  %v3173_v48 = vmax.bf16 %v3157_v57, %v6549_v25 }
 0x213   :  { %v6568_v34 = vmax.bf16 %v3171_v42, %v6544_v14  ;;  %v6571_v30 = vmax.bf16 %v3172_v20, %v6549_v25  ;;  %v3762_v5 = vrot.slane %v6057_v27, 9  ;;  %3201 = vst.msk [vmem:[%s6811_s2 + $0x20] sm:$0xf] %vm2071_vm12, %v6562_v36  ;;  %3202 = vst.msk [vmem:[%s6811_s2 + $0x24] sm:$0xf] %vm2071_vm12, %v6564_v8  ;;  %v7220_v46 = vor.u32 %v7218_v16, %v7219_v31 }
 0x214   :  { %v2421_v45 = vrot.slane %v2419_v1, 5  ;;  %v2907_v41 = vrot.slane %v2416_v55, 5  ;;  %v2908_v35 = vrot.slane %v2419_v1, 6  ;;  %v7221_v11 = vrot.slane %v6090_v47, 5  ;;  %v7225_v1 = vld [vmem:[#allocation96_spill] sm:$0xff] }
 0x215   :  { %v2906_v33 = vsel %vm4051_vm8, %v2900_v26, %v7220_v46  ;;  %3203 = vst.msk [vmem:[%s6811_s2 + $0x28] sm:$0xf] %vm2071_vm12, %v6568_v34  ;;  %3204 = vst.msk [vmem:[%s6811_s2 + $0x2c] sm:$0xf] %vm2071_vm12, %v6571_v30  ;;  %v3786_v44 = vrot.slane %v6057_v27, 10  ;;  %v3142_v50 = vmax.bf16 %v6544_v14, %v3122_v60  ;;  %v2430_v28 = vshrl.u32 %v6115_v17, 16 }
 0x216   :  { %v2981_v54 = vmax.bf16 %v2906_v33, %v2693_v62  ;;  %v2640_v6 = vsel %vm3974_vm5, %v3762_v5, %v7221_v11  ;;  %v2422_v12 = vor.u32 %v2421_v45, %v2418_v52  ;;  %v2909_v19 = vor.u32 %v2908_v35, %v2907_v41  ;;  %v7224_v52 = vld [vmem:[#allocation94_spill] sm:$0xff]  ;;  %v7226_v5 = vld [vmem:[#allocation95_spill] sm:$0xff] }
 0x217   :  { %v2433_v53 = vshll.u32 %v6115_v17, 16  ;;  %v7222_v55 = vrot.slane %v6090_v47, 6  ;;  %v3158_v63 = vmax.bf16 %v3142_v50, %v6549_v25  ;;  %v3763_v61 = vrot.slane %v6115_v17, 9 }
 0x218   :  { %v3125_v32 = vmax.bf16 %v3068_v21, %v2981_v54  ;;  %v2423_v58 = vrot.slane %v2422_v12, 4  ;;  %v2910_v13 = vrot.slane %v2909_v19, 4  ;;  %v2432_v37 = vrot.slane %v2430_v28, 4 }
 0x219   :  { %v3072_v62 = vsel %vm4098_vm11, %v3786_v44, %v7222_v55  ;;  %v2435_v60 = vrot.slane %v2433_v53, 5  ;;  %v7223_v57 = vrot.slane %v6137_v56, 5  ;;  %v2917_v47 = vrot.slane %v2430_v28, 5 }
 0x21a   :  { %v6614_v42 = vmax.bf16 %v3173_v48, %v3125_v32  ;;  %v3174_v20 = vmax.bf16 %v3158_v63, %v3125_v32  ;;  %v2428_v26 = vsel %vm3918_vm4, %v2423_v58, %v7224_v52  ;;  %v7227_v16 = vor.u32 %v7225_v1, %v7226_v5 }
 0x21b   :  { %v2644_v21 = vsel %vm3974_vm5, %v3763_v61, %v7223_v57  ;;  %v2436_v46 = vor.u32 %v2435_v60, %v2432_v37  ;;  %v2918_v48 = vrot.slane %v2433_v53, 6  ;;  %v2502_v33 = vmax.bf16 %v2428_v26, %v6057_v27 }
 0x21c   :  { %v2916_v31 = vsel %vm4051_vm8, %v2910_v13, %v7227_v16  ;;  %3205 = vst.msk [vmem:[%s6811_s2 + $0x30] sm:$0xf] %vm2071_vm12, %v6614_v42  ;;  %v2925_v45 = vor.u32 %v6158_v10, %v6156_v43  ;;  %v3787_v41 = vrot.slane %v6115_v17, 10  ;;  %v3143_v35 = vmax.bf16 %v6549_v25, %v6544_v14 }
 0x21d   :  { %v2437_v54 = vrot.slane %v2436_v46, 4  ;;  %v2919_v11 = vor.u32 %v2918_v48, %v2917_v47  ;;  %v2444_v44 = vshrl.u32 %v6192_v3, 16  ;;  %v2447_v50 = vshll.u32 %v6192_v3, 16 }
 0x21e   :  { %v2694_v12 = vmax.bf16 %v2640_v6, %v2502_v33  ;;  %v7228_v19 = vrot.slane %v6137_v56, 6  ;;  %v3159_v28 = vmax.bf16 %v3143_v35, %v3125_v32  ;;  %v3764_v43 = vrot.slane %v6192_v3, 9 }
 0x21f   :  { %v2442_v10 = vsel %vm3918_vm4, %v2437_v54, %v6154_v24  ;;  %v2920_v14 = vrot.slane %v2919_v11, 4  ;;  %v2446_v53 = vrot.slane %v2444_v44, 4  ;;  %v2449_v55 = vrot.slane %v2447_v50, 5 }
 0x220   :  { %v3076_v27 = vsel %vm4098_vm11, %v3787_v41, %v7228_v19  ;;  %v2982_v63 = vmax.bf16 %v2916_v31, %v2694_v12  ;;  %v2503_v61 = vmax.bf16 %v2442_v10, %v6115_v17  ;;  %v7229_v6 = vrot.slane %v6218_v22, 5 }
 0x221   :  { %v2927_v58 = vrot.slane %v2444_v44, 5  ;;  %v2926_v13 = vsel %vm4051_vm8, %v2920_v14, %v2925_v45  ;;  %v2450_v37 = vor.u32 %v2449_v55, %v2446_v53  ;;  %v2928_v60 = vrot.slane %v2447_v50, 6 }
 0x222   :  { %v2648_v56 = vsel %vm3974_vm5, %v3764_v43, %v7229_v6  ;;  %v2935_v24 = vor.u32 %v6261_v9, %v6259_v23  ;;  %v3126_v57 = vmax.bf16 %v3072_v62, %v2982_v63  ;;  %v2695_v47 = vmax.bf16 %v2644_v21, %v2503_v61 }
 0x223   :  { %v3788_v52 = vrot.slane %v6192_v3, 10  ;;  %v3144_v17 = vmax.bf16 %v3125_v32, %v6549_v25  ;;  %v2451_v26 = vrot.slane %v2450_v37, 4  ;;  %v2929_v1 = vor.u32 %v2928_v60, %v2927_v58 }
 0x224   :  { %v3210_v59 = vshrl.u32 %v6304_v2, 16  ;;  %v3213_v5 = vshll.u32 %v6304_v2, 16  ;;  %v6662_v16 = vmax.bf16 %v3174_v20, %v3126_v57  ;;  %v2983_v31 = vmax.bf16 %v2926_v13, %v2695_v47 }
 0x225   :  { %v3175_v46 = vmax.bf16 %v3159_v28, %v3126_v57  ;;  %v7230_v48 = vrot.slane %v6218_v22, 6  ;;  %v2456_v9 = vsel %vm3918_vm4, %v2451_v26, %v6257_v38  ;;  %v2930_v25 = vrot.slane %v2929_v1, 4 }
 0x226   :  { %v3160_v32 = vmax.bf16 %v3144_v17, %v3126_v57  ;;  %v3212_v62 = vrot.slane %v3210_v59, 4  ;;  %3206 = vst.msk [vmem:[%s6811_s2 + $0x34] sm:$0xf] %vm2071_vm12, %v6662_v16  ;;  %v3127_v20 = vmax.bf16 %v3076_v27, %v2983_v31  ;;  %v2504_v21 = vmax.bf16 %v2456_v9, %v6192_v3 }
 0x227   :  { %v3080_v23 = vsel %vm4098_vm11, %v3788_v52, %v7230_v48  ;;  %v3215_v22 = vrot.slane %v3213_v5, 5  ;;  %v3219_v39 = vshrl.u32 %v6311_v4, 16  ;;  %v2936_v33 = vsel %vm4051_vm8, %v2930_v25, %v2935_v24 }
 0x228   :  { %v3222_v29 = vshll.u32 %v6311_v4, 16  ;;  %v3228_v38 = vshrl.u32 %v6328_v40, 16  ;;  %v3231_v45 = vshll.u32 %v6328_v40, 16  ;;  %v6683_v41 = vmax.bf16 %v3175_v46, %v3127_v20 }
 0x229   :  { %v2696_v35 = vmax.bf16 %v2648_v56, %v2504_v21  ;;  %v3176_v54 = vmax.bf16 %v3160_v32, %v3127_v20  ;;  %v3216_v11 = vor.u32 %v3215_v22, %v3212_v62  ;;  %v3221_v44 = vrot.slane %v3219_v39, 4 }
 0x22a   :  { %v3224_v50 = vrot.slane %v3222_v29, 5  ;;  %v3230_v3 = vrot.slane %v3228_v38, 4  ;;  %v3233_v12 = vrot.slane %v3231_v45, 5  ;;  %3207 = vst.msk [vmem:[%s6811_s2 + $0x38] sm:$0xf] %vm2071_vm12, %v6683_v41  ;;  %v3237_v27 = vshrl.u32 %v6331_v49, 16 }
 0x22b   :  { %v2984_v7 = vmax.bf16 %v2936_v33, %v2696_v35  ;;  %v3217_v19 = vrot.slane %v3216_v11, 4  ;;  %v3240_v28 = vshll.u32 %v6331_v49, 16  ;;  %v3246_v14 = vshrl.u32 %v6362_v51, 16 }
 0x22c   :  { %v3225_v43 = vor.u32 %v3224_v50, %v3221_v44  ;;  %v3234_v10 = vor.u32 %v3233_v12, %v3230_v3  ;;  %v3249_v53 = vshll.u32 %v6362_v51, 16  ;;  %v3239_v63 = vrot.slane %v3237_v27, 4 }
 0x22d   :  { %v3128_v55 = vmax.bf16 %v3080_v23, %v2984_v7  ;;  %v3242_v61 = vrot.slane %v3240_v28, 5  ;;  %v3369_v6 = vmax.bf16 %v3217_v19, %v6304_v2  ;;  %v3248_v13 = vrot.slane %v3246_v14, 4 }
 0x22e   :  { %v3226_v56 = vrot.slane %v3225_v43, 4  ;;  %v3235_v58 = vrot.slane %v3234_v10, 4  ;;  %v3251_v37 = vrot.slane %v3249_v53, 5  ;;  %v3789_v57 = vrot.slane %v6304_v2, 9 }
 0x22f   :  { %v6695_v60 = vmax.bf16 %v3176_v54, %v3128_v55  ;;  %v3243_v24 = vor.u32 %v3242_v61, %v3239_v63  ;;  %v3790_v47 = vrot.slane %v6311_v4, 9  ;;  %v3791_v1 = vrot.slane %v6328_v40, 9 }
 0x230   :  { %v3252_v52 = vor.u32 %v3251_v37, %v3248_v13  ;;  %v3370_v17 = vmax.bf16 %v3226_v56, %v6311_v4  ;;  %v3371_v26 = vmax.bf16 %v3235_v58, %v6328_v40  ;;  %v3792_v46 = vrot.slane %v6331_v49, 9 }
 0x231   :  { %3208 = vst.msk [vmem:[%s6811_s2 + $0x3c] sm:$0xf] %vm2071_vm12, %v6695_v60  ;;  %v3244_v31 = vrot.slane %v3243_v24, 4  ;;  %v3793_v48 = vrot.slane %v6362_v51, 9  ;;  %v3449_v23 = vmax.bf16 %v3789_v57, %v3369_v6  ;;  %v3465_v62 = vrot.slane %v3210_v59, 5 }
 0x232   :  { %v3253_v9 = vrot.slane %v3252_v52, 4  ;;  %v3450_v25 = vmax.bf16 %v3790_v47, %v3370_v17  ;;  %v3451_v32 = vmax.bf16 %v3791_v1, %v3371_v26  ;;  %v3466_v21 = vrot.slane %v3213_v5, 6 }
 0x233   :  { %v3372_v20 = vmax.bf16 %v3244_v31, %v6331_v49  ;;  %v3469_v22 = vrot.slane %v3219_v39, 5  ;;  %v3470_v33 = vrot.slane %v3222_v29, 6  ;;  %v3473_v54 = vrot.slane %v3228_v38, 5 }
 0x234   :  { %v3373_v35 = vmax.bf16 %v3253_v9, %v6362_v51  ;;  %v3474_v11 = vrot.slane %v3231_v45, 6  ;;  %v3477_v44 = vrot.slane %v3237_v27, 5  ;;  %v3467_v3 = vor.u32 %v3466_v21, %v3465_v62 }
 0x235   :  { %v3452_v50 = vmax.bf16 %v3792_v46, %v3372_v20  ;;  %v3471_v12 = vor.u32 %v3470_v33, %v3469_v22  ;;  %v3478_v7 = vrot.slane %v3240_v28, 6  ;;  %v3481_v10 = vrot.slane %v3246_v14, 5 }
 0x236   :  { %v3453_v19 = vmax.bf16 %v3793_v48, %v3373_v35  ;;  %v3475_v43 = vor.u32 %v3474_v11, %v3473_v54  ;;  %v3482_v55 = vrot.slane %v3249_v53, 6  ;;  %v3468_v63 = vrot.slane %v3467_v3, 4 }
 0x237   :  { %v3472_v59 = vrot.slane %v3471_v12, 4  ;;  %v3479_v61 = vor.u32 %v3478_v7, %v3477_v44  ;;  %v3805_v5 = vrot.slane %v6304_v2, 10  ;;  %v3806_v6 = vrot.slane %v6311_v4, 10 }
 0x238   :  { %v3476_v39 = vrot.slane %v3475_v43, 4  ;;  %v3483_v29 = vor.u32 %v3482_v55, %v3481_v10  ;;  %v3807_v38 = vrot.slane %v6328_v40, 10  ;;  %v3545_v27 = vmax.bf16 %v3468_v63, %v3449_v23 }
 0x239   :  { %v3480_v45 = vrot.slane %v3479_v61, 4  ;;  %v3546_v56 = vmax.bf16 %v3472_v59, %v3450_v25  ;;  %v3808_v28 = vrot.slane %v6331_v49, 10  ;;  %v3809_v14 = vrot.slane %v6362_v51, 10 }
 0x23a   :  { %v3484_v58 = vrot.slane %v3483_v29, 4  ;;  %v3547_v13 = vmax.bf16 %v3476_v39, %v3451_v32  ;;  %v3255_v53 = vshrl.u32 %v6430_v18, 16  ;;  %v3609_v24 = vmax.bf16 %v3805_v5, %v3545_v27 }
 0x23b   :  { %v3548_v37 = vmax.bf16 %v3480_v45, %v3452_v50  ;;  %v3610_v2 = vmax.bf16 %v3806_v6, %v3546_v56  ;;  %v3258_v57 = vshll.u32 %v6430_v18, 16  ;;  %v3794_v40 = vrot.slane %v6430_v18, 9 }
 0x23c   :  { %v3549_v47 = vmax.bf16 %v3484_v58, %v3453_v19  ;;  %v3611_v4 = vmax.bf16 %v3807_v38, %v3547_v13  ;;  %v3257_v52 = vrot.slane %v3255_v53, 4  ;;  %v3485_v1 = vrot.slane %v3255_v53, 5 }
 0x23d   :  { %v6719_v17 = vmax.bf16 %v3808_v28, %v3548_v37  ;;  %v3625_v26 = vmax.bf16 %v3610_v2, %v3609_v24  ;;  %v3260_v49 = vrot.slane %v3258_v57, 5  ;;  %v3486_v46 = vrot.slane %v3258_v57, 6 }
 0x23e   :  { %v3613_v31 = vmax.bf16 %v3809_v14, %v3549_v47  ;;  %v3810_v51 = vrot.slane %v6430_v18, 10  ;;  %v3626_v48 = vmax.bf16 %v3611_v4, %v3610_v2  ;;  %v3264_v25 = vshrl.u32 %v6448_v0, 16 }
 0x23f   :  { %v3633_v23 = vmax.bf16 %v3625_v26, %v3611_v4  ;;  %v3261_v9 = vor.u32 %v3260_v49, %v3257_v52  ;;  %v3267_v32 = vshll.u32 %v6448_v0, 16  ;;  %v3487_v62 = vor.u32 %v3486_v46, %v3485_v1 }
 0x240   :  { %v3634_v20 = vmax.bf16 %v3626_v48, %v6719_v17  ;;  %v3795_v21 = vrot.slane %v6448_v0, 9  ;;  %v3811_v22 = vrot.slane %v6448_v0, 10  ;;  %v3266_v54 = vrot.slane %v3264_v25, 4 }
 0x241   :  { %v3641_v33 = vmax.bf16 %v3633_v23, %v6719_v17  ;;  %v3262_v35 = vrot.slane %v3261_v9, 4  ;;  %v3269_v11 = vrot.slane %v3267_v32, 5  ;;  %v3488_v44 = vrot.slane %v3487_v62, 4 }
 0x242   :  { %v3642_v50 = vmax.bf16 %v3634_v20, %v3613_v31  ;;  %v3489_v3 = vrot.slane %v3264_v25, 5  ;;  %v3490_v12 = vrot.slane %v3267_v32, 6  ;;  %v3627_v10 = vmax.bf16 %v6719_v17, %v3611_v4 }
 0x243   :  { %v3649_v7 = vmax.bf16 %v3641_v33, %v3613_v31  ;;  %v3374_v19 = vmax.bf16 %v3262_v35, %v6430_v18  ;;  %v3270_v43 = vor.u32 %v3269_v11, %v3266_v54  ;;  %v3273_v63 = vshrl.u32 %v6493_v15, 16 }
 0x244   :  { %v3491_v55 = vor.u32 %v3490_v12, %v3489_v3  ;;  %v3276_v59 = vshll.u32 %v6493_v15, 16  ;;  %v3796_v61 = vrot.slane %v6493_v15, 9  ;;  %v3635_v29 = vmax.bf16 %v3627_v10, %v3613_v31 }
 0x245   :  { %3657 = vst.msk [vmem:[%s6812_s3] sm:$0x3] %vm2073_vm13, %v3649_v7  ;;  %v3454_v5 = vmax.bf16 %v3794_v40, %v3374_v19  ;;  %v3271_v39 = vrot.slane %v3270_v43, 4  ;;  %v3812_v18 = vrot.slane %v6493_v15, 10  ;;  %v3275_v38 = vrot.slane %v3273_v63, 4 }
 0x246   :  { %v3492_v6 = vrot.slane %v3491_v55, 4  ;;  %v3278_v45 = vrot.slane %v3276_v59, 5  ;;  %v3493_v27 = vrot.slane %v3273_v63, 5  ;;  %v3494_v58 = vrot.slane %v3276_v59, 6 }
 0x247   :  { %v3550_v56 = vmax.bf16 %v3488_v44, %v3454_v5  ;;  %v3375_v28 = vmax.bf16 %v3271_v39, %v6448_v0  ;;  %v3628_v13 = vmax.bf16 %v3613_v31, %v6719_v17  ;;  %v3282_v53 = vshrl.u32 %v6562_v36, 16 }
 0x248   :  { %v3279_v14 = vor.u32 %v3278_v45, %v3275_v38  ;;  %v3285_v37 = vshll.u32 %v6562_v36, 16  ;;  %v3291_v24 = vshrl.u32 %v6564_v8, 16  ;;  %v3495_v47 = vor.u32 %v3494_v58, %v3493_v27 }
 0x249   :  { %v3614_v2 = vmax.bf16 %v3810_v51, %v3550_v56  ;;  %v3455_v57 = vmax.bf16 %v3795_v21, %v3375_v28  ;;  %v3294_v4 = vshll.u32 %v6564_v8, 16  ;;  %v3284_v40 = vrot.slane %v3282_v53, 4 }
 0x24a   :  { %v3280_v52 = vrot.slane %v3279_v14, 4  ;;  %v3287_v26 = vrot.slane %v3285_v37, 5  ;;  %v3293_v49 = vrot.slane %v3291_v24, 4  ;;  %v3496_v17 = vrot.slane %v3495_v47, 4 }
 0x24b   :  { %v3650_v0 = vmax.bf16 %v3642_v50, %v3614_v2  ;;  %v3551_v1 = vmax.bf16 %v3492_v6, %v3455_v57  ;;  %v3643_v46 = vmax.bf16 %v3635_v29, %v3614_v2  ;;  %v3636_v48 = vmax.bf16 %v3628_v13, %v3614_v2 }
 0x24c   :  { %v3376_v31 = vmax.bf16 %v3280_v52, %v6493_v15  ;;  %v3288_v23 = vor.u32 %v3287_v26, %v3284_v40  ;;  %v3296_v9 = vrot.slane %v3294_v4, 5  ;;  %v3300_v25 = vshrl.u32 %v6568_v34, 16 }
 0x24d   :  { %3658 = vst.msk [vmem:[%s6812_s3 + $0x2] sm:$0x3] %vm2073_vm13, %v3650_v0  ;;  %v3615_v51 = vmax.bf16 %v3811_v22, %v3551_v1  ;;  %v3303_v32 = vshll.u32 %v6568_v34, 16  ;;  %v3309_v62 = vshrl.u32 %v6571_v30, 16  ;;  %v3312_v15 = vshll.u32 %v6571_v30, 16 }
 0x24e   :  { %v3456_v20 = vmax.bf16 %v3796_v61, %v3376_v31  ;;  %v3289_v21 = vrot.slane %v3288_v23, 4  ;;  %v3297_v33 = vor.u32 %v3296_v9, %v3293_v49  ;;  %v3302_v11 = vrot.slane %v3300_v25, 4 }
 0x24f   :  { %v3651_v35 = vmax.bf16 %v3643_v46, %v3615_v51  ;;  %v3644_v54 = vmax.bf16 %v3636_v48, %v3615_v51  ;;  %v3305_v44 = vrot.slane %v3303_v32, 5  ;;  %v3311_v12 = vrot.slane %v3309_v62, 4 }
 0x250   :  { %v3552_v50 = vmax.bf16 %v3496_v17, %v3456_v20  ;;  %v3298_v3 = vrot.slane %v3297_v33, 4  ;;  %v3314_v7 = vrot.slane %v3312_v15, 5  ;;  %v3318_v19 = vshrl.u32 %v6614_v42, 16 }
 0x251   :  { %3659 = vst.msk [vmem:[%s6812_s3 + $0x4] sm:$0x3] %vm2073_vm13, %v3651_v35  ;;  %v3306_v22 = vor.u32 %v3305_v44, %v3302_v11  ;;  %v3321_v43 = vshll.u32 %v6614_v42, 16  ;;  %v3377_v10 = vmax.bf16 %v3289_v21, %v6562_v36  ;;  %v3797_v61 = vrot.slane %v6562_v36, 9 }
 0x252   :  { %v3616_v55 = vmax.bf16 %v3812_v18, %v3552_v50  ;;  %v3315_v63 = vor.u32 %v3314_v7, %v3311_v12  ;;  %v3378_v59 = vmax.bf16 %v3298_v3, %v6564_v8  ;;  %v3320_v39 = vrot.slane %v3318_v19, 4 }
 0x253   :  { %v3307_v5 = vrot.slane %v3306_v22, 4  ;;  %v3323_v29 = vrot.slane %v3321_v43, 5  ;;  %v3798_v6 = vrot.slane %v6564_v8, 9  ;;  %v3799_v27 = vrot.slane %v6568_v34, 9 }
 0x254   :  { %v3652_v38 = vmax.bf16 %v3644_v54, %v3616_v55  ;;  %v3316_v45 = vrot.slane %v3315_v63, 4  ;;  %v3800_v56 = vrot.slane %v6571_v30, 9  ;;  %v3801_v18 = vrot.slane %v6614_v42, 9 }
 0x255   :  { %v3324_v28 = vor.u32 %v3323_v29, %v3320_v39  ;;  %v3379_v58 = vmax.bf16 %v3307_v5, %v6568_v34  ;;  %v3457_v13 = vmax.bf16 %v3797_v61, %v3377_v10  ;;  %v3458_v2 = vmax.bf16 %v3798_v6, %v3378_v59 }
 0x256   :  { %3660 = vst.msk [vmem:[%s6812_s3 + $0x6] sm:$0x3] %vm2073_vm13, %v3652_v38  ;;  %v3380_v14 = vmax.bf16 %v3316_v45, %v6571_v30  ;;  %v3497_v57 = vrot.slane %v3282_v53, 5  ;;  %v3498_v47 = vrot.slane %v3285_v37, 6  ;;  %v3501_v26 = vrot.slane %v3291_v24, 5 }
 0x257   :  { %v3325_v52 = vrot.slane %v3324_v28, 4  ;;  %v3459_v40 = vmax.bf16 %v3799_v27, %v3379_v58  ;;  %v3502_v49 = vrot.slane %v3294_v4, 6  ;;  %v3505_v46 = vrot.slane %v3300_v25, 5 }
 0x258   :  { %v3460_v0 = vmax.bf16 %v3800_v56, %v3380_v14  ;;  %v3499_v1 = vor.u32 %v3498_v47, %v3497_v57  ;;  %v3506_v17 = vrot.slane %v3303_v32, 6  ;;  %v3509_v23 = vrot.slane %v3309_v62, 5 }
 0x259   :  { %v3381_v31 = vmax.bf16 %v3325_v52, %v6614_v42  ;;  %v3503_v48 = vor.u32 %v3502_v49, %v3501_v26  ;;  %v3510_v9 = vrot.slane %v3312_v15, 6  ;;  %v3513_v21 = vrot.slane %v3318_v19, 5 }
 0x25a   :  { %v3500_v51 = vrot.slane %v3499_v1, 4  ;;  %v3507_v20 = vor.u32 %v3506_v17, %v3505_v46  ;;  %v3514_v33 = vrot.slane %v3321_v43, 6  ;;  %v3813_v54 = vrot.slane %v6562_v36, 10 }
 0x25b   :  { %v3461_v35 = vmax.bf16 %v3801_v18, %v3381_v31  ;;  %v3504_v53 = vrot.slane %v3503_v48, 4  ;;  %v3511_v37 = vor.u32 %v3510_v9, %v3509_v23  ;;  %v3814_v25 = vrot.slane %v6564_v8, 10 }
 0x25c   :  { %v3508_v24 = vrot.slane %v3507_v20, 4  ;;  %v3515_v4 = vor.u32 %v3514_v33, %v3513_v21  ;;  %v3553_v11 = vmax.bf16 %v3500_v51, %v3457_v13  ;;  %v3815_v50 = vrot.slane %v6568_v34, 10 }
 0x25d   :  { %v3512_v32 = vrot.slane %v3511_v37, 4  ;;  %v3554_v44 = vmax.bf16 %v3504_v53, %v3458_v2  ;;  %v3816_v3 = vrot.slane %v6571_v30, 10  ;;  %v3327_v19 = vshrl.u32 %v6662_v16, 16 }
 0x25e   :  { %v3516_v62 = vrot.slane %v3515_v4, 4  ;;  %v3555_v15 = vmax.bf16 %v3508_v24, %v3459_v40  ;;  %v3617_v12 = vmax.bf16 %v3813_v54, %v3553_v11  ;;  %v3330_v36 = vshll.u32 %v6662_v16, 16 }
 0x25f   :  { %v3556_v7 = vmax.bf16 %v3512_v32, %v3460_v0  ;;  %v3618_v22 = vmax.bf16 %v3814_v25, %v3554_v44  ;;  %v3817_v10 = vrot.slane %v6614_v42, 10  ;;  %v3329_v63 = vrot.slane %v3327_v19, 4 }
 0x260   :  { %v3557_v43 = vmax.bf16 %v3516_v62, %v3461_v35  ;;  %v3619_v55 = vmax.bf16 %v3815_v50, %v3555_v15  ;;  %v3332_v59 = vrot.slane %v3330_v36, 5  ;;  %v3517_v34 = vrot.slane %v3327_v19, 5 }
 0x261   :  { %v3629_v8 = vmax.bf16 %v3618_v22, %v3617_v12  ;;  %v3620_v61 = vmax.bf16 %v3816_v3, %v3556_v7  ;;  %v3518_v5 = vrot.slane %v3330_v36, 6  ;;  %v3336_v6 = vshrl.u32 %v6683_v41, 16 }
 0x262   :  { %v3630_v39 = vmax.bf16 %v3619_v55, %v3618_v22  ;;  %v3333_v30 = vor.u32 %v3332_v59, %v3329_v63  ;;  %v3339_v38 = vshll.u32 %v6683_v41, 16  ;;  %v3621_v45 = vmax.bf16 %v3817_v10, %v3557_v43 }
 0x263   :  { %v3637_v29 = vmax.bf16 %v3629_v8, %v3619_v55  ;;  %v3802_v27 = vrot.slane %v6662_v16, 9  ;;  %v3519_v56 = vor.u32 %v3518_v5, %v3517_v34  ;;  %v3338_v18 = vrot.slane %v3336_v6, 4 }
 0x264   :  { %v3638_v28 = vmax.bf16 %v3630_v39, %v3620_v61  ;;  %v3334_v58 = vrot.slane %v3333_v30, 4  ;;  %v3341_v13 = vrot.slane %v3339_v38, 5  ;;  %v3521_v2 = vrot.slane %v3336_v6, 5 }
 0x265   :  { %v3645_v42 = vmax.bf16 %v3637_v29, %v3620_v61  ;;  %v3520_v14 = vrot.slane %v3519_v56, 4  ;;  %v3522_v57 = vrot.slane %v3339_v38, 6  ;;  %v3631_v26 = vmax.bf16 %v3620_v61, %v3619_v55 }
 0x266   :  { %v3382_v52 = vmax.bf16 %v3334_v58, %v6662_v16  ;;  %v3342_v40 = vor.u32 %v3341_v13, %v3338_v18  ;;  %v3818_v49 = vrot.slane %v6662_v16, 10  ;;  %v3345_v1 = vshrl.u32 %v6695_v60, 16 }
 0x267   :  { %v3653_v47 = vmax.bf16 %v3645_v42, %v3621_v45  ;;  %v3523_v0 = vor.u32 %v3522_v57, %v3521_v2  ;;  %v3348_v46 = vshll.u32 %v6695_v60, 16  ;;  %v3646_v31 = vmax.bf16 %v3638_v28, %v3621_v45 }
 0x268   :  { %v3462_v17 = vmax.bf16 %v3802_v27, %v3382_v52  ;;  %v3343_v48 = vrot.slane %v3342_v40, 4  ;;  %v3803_v23 = vrot.slane %v6683_v41, 9  ;;  %v3639_v9 = vmax.bf16 %v3631_v26, %v3621_v45 }
 0x269   :  { %3661 = vst.msk [vmem:[%s6812_s3 + $0x8] sm:$0x3] %vm2073_vm13, %v3653_v47  ;;  %v3347_v51 = vrot.slane %v3345_v1, 4  ;;  %v3350_v20 = vrot.slane %v3348_v46, 5  ;;  %v3525_v21 = vrot.slane %v3345_v1, 5  ;;  %v3524_v35 = vrot.slane %v3523_v0, 4 }
 0x26a   :  { %v3558_v16 = vmax.bf16 %v3520_v14, %v3462_v17  ;;  %v3383_v33 = vmax.bf16 %v3343_v48, %v6683_v41  ;;  %v3526_v53 = vrot.slane %v3348_v46, 6  ;;  %v3632_v54 = vmax.bf16 %v3621_v45, %v3620_v61 }
 0x26b   :  { %v3351_v37 = vor.u32 %v3350_v20, %v3347_v51  ;;  %v3819_v11 = vrot.slane %v6683_v41, 10  ;;  %v3804_v44 = vrot.slane %v6695_v60, 9  ;;  %v3820_v41 = vrot.slane %v6695_v60, 10 }
 0x26c   :  { %v3622_v24 = vmax.bf16 %v3818_v49, %v3558_v16  ;;  %v3463_v4 = vmax.bf16 %v3803_v23, %v3383_v33  ;;  %v3527_v25 = vor.u32 %v3526_v53, %v3525_v21 }
 0x26d   :  { %v3352_v32 = vrot.slane %v3351_v37, 4 }
 0x26e   :  { %v3654_v50 = vmax.bf16 %v3646_v31, %v3622_v24  ;;  %v3559_v62 = vmax.bf16 %v3524_v35, %v3463_v4  ;;  %v3647_v15 = vmax.bf16 %v3639_v9, %v3622_v24  ;;  %v3528_v12 = vrot.slane %v3527_v25, 4 }
 0x26f   :  { %v3384_v3 = vmax.bf16 %v3352_v32, %v6695_v60  ;;  %v3640_v7 = vmax.bf16 %v3632_v54, %v3622_v24 }
 0x270   :  { %3662 = vst.msk [vmem:[%s6812_s3 + $0xa] sm:$0x3] %vm2073_vm13, %v3654_v50  ;;  %v3623_v22 = vmax.bf16 %v3819_v11, %v3559_v62 }
 0x271   :  { %v3464_v19 = vmax.bf16 %v3804_v44, %v3384_v3 }
 0x272   :  { %v3655_v36 = vmax.bf16 %v3647_v15, %v3623_v22  ;;  %v3648_v43 = vmax.bf16 %v3640_v7, %v3623_v22 }
 0x273   :  { %v3560_v10 = vmax.bf16 %v3528_v12, %v3464_v19 }
 0x274   :  { %3663 = vst.msk [vmem:[%s6812_s3 + $0xc] sm:$0x3] %vm2073_vm13, %v3655_v36 }
 0x275   :  { %v3624_v55 = vmax.bf16 %v3820_v41, %v3560_v10 }
 0x277   :  { %v3656_v8 = vmax.bf16 %v3648_v43, %v3624_v55 }
 0x279   :  { %3664 = vst.msk [vmem:[%s6812_s3 + $0xe] sm:$0x3] %vm2073_vm13, %v3656_v8 }

</bundles_post_ra>
